<compile_context>
chip_gen: v6e
topology: v6e:2x2x1
jax: 0.10.0
libtpu: 0.0.40
codegen_flags: <defaults>
</compile_context>

<pallas_src>
import functools

import jax
import jax.numpy as jnp
from jax.experimental import pallas as pl
from jax.experimental.pallas import tpu as pltpu


_VMEM_LIMIT_BYTES = 40 * 1024 * 1024   # < 64 MiB (v7x physical), > v5e default


def _round_up(x, m):
    return ((x + m - 1) // m) * m


def _choose_tm(M, cap):
    """Row-tile size: multiple of 16 (bf16 sublane packing), aim for >=2 grid
    steps (v7x megacore), capped for VMEM."""
    tm = _round_up(max(-(-M // 2), 8), 16)
    return min(cap, tm)


def _compiler_params(n_axes=1):
    return pltpu.CompilerParams(
        dimension_semantics=("parallel",) * n_axes,
        vmem_limit_bytes=_VMEM_LIMIT_BYTES)


# ----------------------------------------------------------------------------
# Kernel 1: fused conv (4-phase im2col matmul) + bias + ReLU + 2x2 max-pool,
#           optionally followed by a per-channel affine (eval-mode BN1).
#           bf16 operands, f32 accumulation, bf16 output.  Single K step.
# ----------------------------------------------------------------------------
def _conv_pool_kernel(a0_ref, a1_ref, a2_ref, a3_ref, w_ref, b_ref, o_ref):
    w = w_ref[...]
    m = jnp.dot(a0_ref[...], w, preferred_element_type=jnp.float32)
    m = jnp.maximum(m, jnp.dot(a1_ref[...], w, preferred_element_type=jnp.float32))
    m = jnp.maximum(m, jnp.dot(a2_ref[...], w, preferred_element_type=jnp.float32))
    m = jnp.maximum(m, jnp.dot(a3_ref[...], w, preferred_element_type=jnp.float32))
    # relu(max(conv) + b) == maxpool(relu(conv + b))  (monotonicity)
    o_ref[...] = jnp.maximum(m + b_ref[...], 0.0).astype(o_ref.dtype)


def _conv_pool_affine_kernel(a0_ref, a1_ref, a2_ref, a3_ref, w_ref, b_ref,
                             s_ref, t_ref, o_ref):
    w = w_ref[...]
    m = jnp.dot(a0_ref[...], w, preferred_element_type=jnp.float32)
    m = jnp.maximum(m, jnp.dot(a1_ref[...], w, preferred_element_type=jnp.float32))
    m = jnp.maximum(m, jnp.dot(a2_ref[...], w, preferred_element_type=jnp.float32))
    m = jnp.maximum(m, jnp.dot(a3_ref[...], w, preferred_element_type=jnp.float32))
    out = jnp.maximum(m + b_ref[...], 0.0)
    o_ref[...] = (out * s_ref[...] + t_ref[...]).astype(o_ref.dtype)


def conv_relu_pool(phases, w_p, bias_p, scale=None, shift=None, *, tm_cap):
    """y = maxpool2x2(relu(conv(x)+b)) [optionally *scale+shift], as a fused
    4-phase im2col matmul.  phases: 4 x (M,K) bf16 with M = N*Hp*Wp pooled
    pixels, rows ordered (n, ph, pw).  Returns (M, C) bf16 in that row order
    (i.e. the NHWC pooled activation, flattened)."""
    M, K = phases[0].shape
    Kp, C = w_p.shape                          # weight pre-padded in prepare_params
    if K != Kp:                                # conv1: K 25 -> 32
        phases = [jnp.pad(a, ((0, 0), (0, Kp - K))) for a in phases]
    tm = _choose_tm(M, tm_cap)
    Mp = _round_up(M, tm)
    if Mp != M:
        phases = [jnp.pad(a, ((0, Mp - M), (0, 0))) for a in phases]

    a_spec = pl.BlockSpec((tm, Kp), lambda i: (i, 0))
    w_spec = pl.BlockSpec((Kp, C), lambda i: (0, 0))
    v_spec = pl.BlockSpec((1, C), lambda i: (0, 0))
    if scale is None:
        kernel = _conv_pool_kernel
        args = list(phases) + [w_p, bias_p]
        in_specs = [a_spec] * 4 + [w_spec, v_spec]
    else:
        kernel = _conv_pool_affine_kernel
        args = list(phases) + [w_p, bias_p, scale, shift]
        in_specs = [a_spec] * 4 + [w_spec, v_spec, v_spec, v_spec]

    out = pl.pallas_call(
        kernel,
        out_shape=jax.ShapeDtypeStruct((Mp, C), jnp.bfloat16),
        grid=(Mp // tm,),
        in_specs=in_specs,
        out_specs=pl.BlockSpec((tm, C), lambda i: (i, 0)),
        compiler_params=_compiler_params(),
    )(*args)
    return out[:M]


# ----------------------------------------------------------------------------
# Kernel 2: fused head -- linear_1 + bias + ReLU + linear_2 + bias + masked
#           log_softmax.  Single K step, bf16 operands, f32 accumulation.
# ----------------------------------------------------------------------------
def _head_kernel(a_ref, w1_ref, b1_ref, w2_ref, b2_ref, logits_ref, probas_ref,
                 *, num_classes):
    h = jnp.dot(a_ref[...], w1_ref[...], preferred_element_type=jnp.float32)
    h = jnp.maximum(h + b1_ref[...], 0.0)
    logits = jnp.dot(h.astype(jnp.bfloat16), w2_ref[...],
                     preferred_element_type=jnp.float32) + b2_ref[...]
    col = jax.lax.broadcasted_iota(jnp.int32, logits.shape, 1)
    masked = jnp.where(col < num_classes, logits, -jnp.inf)
    m = jnp.max(masked, axis=-1, keepdims=True)
    ex = jnp.exp(masked - m)                    # padded cols: exp(-inf) = 0
    lse = m + jnp.log(jnp.sum(ex, axis=-1, keepdims=True))
    logits_ref[...] = logits
    probas_ref[...] = logits - lse


def head_linear_logsoftmax(feat, w1_p, b1_p, w2_p, b2_p, num_classes, *, tm_cap=256):
    M, K = feat.shape
    N1 = w1_p.shape[1]
    N2 = w2_p.shape[1]
    tm = _choose_tm(M, tm_cap)
    Mp = _round_up(M, tm)
    a_p = jnp.pad(feat, ((0, Mp - M), (0, 0)))

    logits, probas = pl.pallas_call(
        functools.partial(_head_kernel, num_classes=num_classes),
        out_shape=(jax.ShapeDtypeStruct((Mp, N2), jnp.float32),
                   jax.ShapeDtypeStruct((Mp, N2), jnp.float32)),
        grid=(Mp // tm,),
        in_specs=[pl.BlockSpec((tm, K), lambda i: (i, 0)),
                  pl.BlockSpec((K, N1), lambda i: (0, 0)),
                  pl.BlockSpec((1, N1), lambda i: (0, 0)),
                  pl.BlockSpec((N1, N2), lambda i: (0, 0)),
                  pl.BlockSpec((1, N2), lambda i: (0, 0))],
        out_specs=(pl.BlockSpec((tm, N2), lambda i: (i, 0)),
                   pl.BlockSpec((tm, N2), lambda i: (i, 0))),
        compiler_params=_compiler_params(),
    )(a_p, w1_p, b1_p, w2_p, b2_p)
    return logits[:M, :num_classes], probas[:M, :num_classes]


# ----------------------------------------------------------------------------
# Wrapper-side glue: phase im2col, BN folding, parameter prep, forward pass
# ----------------------------------------------------------------------------
def phase_im2col(x_nhwc, ksize, pad):
    """Four im2col matrices, one per 2x2-pool phase.  Rows are ordered
    (n, ph, pw) over the *pooled* output grid; columns are (dh, dw, cin),
    matching the conv weight reshape.  Total gathered bytes equal a plain
    im2col; this replaces both the old im2col and the pool's strided slices."""
    N, H, W, C = x_nhwc.shape
    xp = jnp.pad(x_nhwc, ((0, 0), (pad, pad), (pad, pad), (0, 0)))
    Ho = H + 2 * pad - ksize + 1
    Wo = W + 2 * pad - ksize + 1
    Hp, Wp = Ho // 2, Wo // 2
    phases = []
    for ph in (0, 1):
        for pw in (0, 1):
            taps = [xp[:, ph + dh: ph + dh + 2 * Hp: 2,
                        pw + dw: pw + dw + 2 * Wp: 2, :]
                    for dh in range(ksize) for dw in range(ksize)]
            cols = jnp.concatenate(taps, axis=-1)        # (N, Hp, Wp, k*k*C)
            phases.append(cols.reshape(N * Hp * Wp, ksize * ksize * C))
    return phases, Hp, Wp


def bn_affine(gamma, beta, mean, var, eps=1e-5):
    scale = gamma * jax.lax.rsqrt(var + eps)
    shift = beta - mean * scale
    return scale, shift


def prepare_params(params, num_classes=10):
    """One-time parameter prep (call once, OUTSIDE the per-step jit):
      * conv weights -> im2col layout, K padded, bf16,
      * eval-mode BN1 -> per-channel scale/shift fused in the conv1 kernel,
      * eval-mode BN2 folded exactly into linear_1 (torch's CHW flatten order),
        then linear_1's rows permuted CHW->HWC so the forward needs no
        per-step transpose,
      * linear weights padded to MXU-friendly shapes, bf16."""
    p = {}
    # conv1: (5,5,1,32) -> (25,32), pad K 25->32
    w = params["conv1_w"].reshape(5 * 5 * 1, 32).astype(jnp.float32)
    p["conv1_w"] = jnp.pad(w, ((0, 7), (0, 0))).astype(jnp.bfloat16)
    p["conv1_b"] = params["conv1_b"].astype(jnp.float32).reshape(1, 32)
    s1, t1 = bn_affine(params["bn1_gamma"], params["bn1_beta"],
                       params["bn1_mean"], params["bn1_var"])
    p["bn1_scale"] = s1.astype(jnp.float32).reshape(1, 32)
    p["bn1_shift"] = t1.astype(jnp.float32).reshape(1, 32)

    # conv2: (5,5,32,64) -> (800,64)
    p["conv2_w"] = params["conv2_w"].reshape(5 * 5 * 32, 64).astype(jnp.bfloat16)
    p["conv2_b"] = params["conv2_b"].astype(jnp.float32).reshape(1, 64)

    # BN2 folded into linear_1 (torch flatten is CHW: feature f = c*36 + hw)
    s2, t2 = bn_affine(params["bn2_gamma"], params["bn2_beta"],
                       params["bn2_mean"], params["bn2_var"])
    s2f = jnp.repeat(s2, 36)
    t2f = jnp.repeat(t2, 36)
    w1 = params["lin1_w"].astype(jnp.float32)              # (2304,1000), CHW rows
    b1 = params["lin1_b"].astype(jnp.float32) + t2f @ w1
    w1 = w1 * s2f[:, None]
    # permute rows CHW -> HWC so the kernel consumes the NHWC pooled activation
    # flattened as-is (row hw*64 + c  <-  row c*36 + hw)
    w1 = w1.reshape(64, 36, 1000).transpose(1, 0, 2).reshape(2304, 1000)
    n1p = _round_up(1000, 128)                              # 1024
    p["lin1_w"] = jnp.pad(w1, ((0, 0), (0, n1p - 1000))).astype(jnp.bfloat16)
    p["lin1_b"] = jnp.pad(b1, (0, n1p - 1000)).reshape(1, n1p)

    # linear_2: pad K 1000->1024, N num_classes->128
    n2p = _round_up(max(num_classes, 128), 128)
    w2 = params["lin2_w"].astype(jnp.float32)
    p["lin2_w"] = jnp.pad(w2, ((0, n1p - 1000),
                               (0, n2p - num_classes))).astype(jnp.bfloat16)
    p["lin2_b"] = jnp.pad(params["lin2_b"].astype(jnp.float32),
                          (0, n2p - num_classes)).reshape(1, n2p)
    return p


def cnn_forward(x_nchw, p, num_classes=10):
    x = jnp.transpose(x_nchw, (0, 2, 3, 1)).astype(jnp.bfloat16)     # NHWC bf16
    N = x.shape[0]

    # layer1: Conv2d(1->32,k5,p2)+ReLU+MaxPool2x2, then BN1 affine (all fused)
    phases, Hp, Wp = phase_im2col(x, 5, 2)                # 4 x (N*196, 25)
    y = conv_relu_pool(phases, p["conv1_w"], p["conv1_b"],
                       p["bn1_scale"], p["bn1_shift"], tm_cap=2048)
    y = y.reshape(N, Hp, Wp, 32)                          # (N,14,14,32) bf16

    # layer2: Conv2d(32->64,k5,p1)+ReLU+MaxPool2x2 (BN2 folded into linear_1)
    phases, Hp, Wp = phase_im2col(y, 5, 1)                # 4 x (N*36, 800)
    y = conv_relu_pool(phases, p["conv2_w"], p["conv2_b"], tm_cap=512)

    # rows are (n, ph, pw), cols are c -> (N, 2304) in HWC order; linear_1's
    # rows were permuted CHW->HWC in prepare_params, so no transpose is needed.
    feat = y.reshape(N, Hp * Wp * 64)                     # (N, 2304) bf16

    return head_linear_logsoftmax(feat, p["lin1_w"], p["lin1_b"],
                                  p["lin2_w"], p["lin2_b"], num_classes)


# ----------------------------------------------------------------------------
# Pure-JAX f32 reference (mirrors the torch forward) + parameter init
# ----------------------------------------------------------------------------
def cnn_reference(x_nchw, params, eps=1e-5):
    hp = jax.lax.Precision.HIGHEST
    x = jnp.transpose(x_nchw, (0, 2, 3, 1)).astype(jnp.float32)

    def conv(x, w, b, pad):
        y = jax.lax.conv_general_dilated(
            x, w, window_strides=(1, 1), padding=[(pad, pad), (pad, pad)],
            dimension_numbers=("NHWC", "HWIO", "NHWC"), precision=hp)
        return y + b

    def pool(x):
        return jax.lax.reduce_window(x, -jnp.inf, jax.lax.max,
                                     (1, 2, 2, 1), (1, 2, 2, 1), "VALID")

    def bn(x, g, b, m, v):
        return (x - m) * (g * jax.lax.rsqrt(v + eps)) + b

    y = pool(jax.nn.relu(conv(x, params["conv1_w"], params["conv1_b"], 2)))
    y = bn(y, params["bn1_gamma"], params["bn1_beta"],
           params["bn1_mean"], params["bn1_var"])
    y = pool(jax.nn.relu(conv(y, params["conv2_w"], params["conv2_b"], 1)))
    y = bn(y, params["bn2_gamma"], params["bn2_beta"],
           params["bn2_mean"], params["bn2_var"])
    feat = jnp.transpose(y, (0, 3, 1, 2)).reshape(x.shape[0], -1)   # CHW flatten
    h = jax.nn.relu(jnp.dot(feat, params["lin1_w"], precision=hp)
                    + params["lin1_b"])
    logits = jnp.dot(h, params["lin2_w"], precision=hp) + params["lin2_b"]
    return logits, jax.nn.log_softmax(logits, axis=-1)


def init_params(key, num_classes=10):
    ks = jax.random.split(key, 10)
    p = {}
    # conv weights stored as (kh, kw, cin, cout) == torch (cout,cin,kh,kw)
    # permuted to the im2col column ordering.
    p["conv1_w"] = 0.10 * jax.random.normal(ks[0], (5, 5, 1, 32), jnp.float32)
    p["conv1_b"] = 0.10 * jax.random.normal(ks[1], (32,), jnp.float32)
    p["conv2_w"] = 0.05 * jax.random.normal(ks[2], (5, 5, 32, 64), jnp.float32)
    p["conv2_b"] = 0.10 * jax.random.normal(ks[3], (64,), jnp.float32)
    # BatchNorm (eval mode) parameters + running stats
    p["bn1_gamma"] = jnp.ones((32,), jnp.float32)
    p["bn1_beta"] = jnp.zeros((32,), jnp.float32)
    p["bn1_mean"] = 0.05 * jax.random.normal(ks[4], (32,), jnp.float32)
    p["bn1_var"] = 1.0 + 0.1 * jax.random.uniform(ks[5], (32,), jnp.float32)
    p["bn2_gamma"] = jnp.ones((64,), jnp.float32)
    p["bn2_beta"] = jnp.zeros((64,), jnp.float32)
    p["bn2_mean"] = 0.05 * jax.random.normal(ks[6], (64,), jnp.float32)
    p["bn2_var"] = 1.0 + 0.1 * jax.random.uniform(ks[7], (64,), jnp.float32)
    # linear weights stored as (in, out) == torch weight.T
    p["lin1_w"] = 0.02 * jax.random.normal(ks[8], (2304, 1000), jnp.float32)
    p["lin1_b"] = jnp.zeros((1000,), jnp.float32)
    p["lin2_w"] = 0.05 * jax.random.normal(ks[9], (1000, num_classes), jnp.float32)
    p["lin2_b"] = jnp.zeros((num_classes,), jnp.float32)
    return p


if __name__ == "__main__":
    key = jax.random.PRNGKey(0)
    k_x, k_p = jax.random.split(key)
    # spatial must be 28x28 so that 64*6*6 == 2304 feeds linear_1 (as in torch)
    x = jax.random.normal(k_x, (2, 1, 28, 28), jnp.float32)
    params = init_params(k_p)
    prep = prepare_params(params)     # one-time pad/cast/BN-fold (hoisted)

    fwd = jax.jit(cnn_forward)
    logits, probas = jax.block_until_ready(fwd(x, prep))

    assert logits.shape == (2, 10) and probas.shape == (2, 10)
    assert bool(jnp.all(jnp.isfinite(logits))) and bool(jnp.all(jnp.isfinite(probas)))
    # log_softmax rows must exponentiate-and-sum to 1
    assert bool(jnp.allclose(jnp.sum(jnp.exp(probas), axis=1), 1.0, atol=1e-4))

    # pure-JAX float32 reference (tolerance reflects bf16 operands, f32 accum)
    ref_logits, ref_probas = cnn_reference(x, params)
    assert float(jnp.max(jnp.abs(logits - ref_logits))) < 0.3
    assert float(jnp.max(jnp.abs(probas - ref_probas))) < 0.3

    print("KERNEL_OK")
</pallas_src>

<mosaic_0001>
module attributes {stable_mosaic.version = 11 : i64} {
  func.func @_conv_pool_affine_kernel(%arg0: i32, %arg1: memref<208x32xbf16, #tpu.memory_space<vmem>>, %arg2: memref<208x32xbf16, #tpu.memory_space<vmem>>, %arg3: memref<208x32xbf16, #tpu.memory_space<vmem>>, %arg4: memref<208x32xbf16, #tpu.memory_space<vmem>>, %arg5: memref<32x32xbf16, #tpu.memory_space<vmem>>, %arg6: memref<1x32xf32, #tpu.memory_space<vmem>>, %arg7: memref<1x32xf32, #tpu.memory_space<vmem>>, %arg8: memref<1x32xf32, #tpu.memory_space<vmem>>, %arg9: memref<208x32xbf16, #tpu.memory_space<vmem>>) attributes {dimension_semantics = [#tpu.dimension_semantics<parallel>], iteration_bounds = array<i64: 2>, scalar_prefetch = 0 : i64, scratch_operands = 0 : i64, tpu.core_type = #tpu.core_type<tc>, window_params = [{transform_indices = @transform_0, window_bounds = array<i64: 208, 32>}, {transform_indices = @transform_1, window_bounds = array<i64: 208, 32>}, {transform_indices = @transform_2, window_bounds = array<i64: 208, 32>}, {transform_indices = @transform_3, window_bounds = array<i64: 208, 32>}, {pipeline_mode = #tpu.pipeline_mode<synchronous>, transform_indices = @transform_4, window_bounds = array<i64: 32, 32>}, {pipeline_mode = #tpu.pipeline_mode<synchronous>, transform_indices = @transform_5, window_bounds = array<i64: 1, 32>}, {pipeline_mode = #tpu.pipeline_mode<synchronous>, transform_indices = @transform_6, window_bounds = array<i64: 1, 32>}, {pipeline_mode = #tpu.pipeline_mode<synchronous>, transform_indices = @transform_7, window_bounds = array<i64: 1, 32>}, {transform_indices = @transform_8, window_bounds = array<i64: 208, 32>}]} {
    %c0 = arith.constant 0 : index
    %c0_0 = arith.constant 0 : index
    %0 = vector.load %arg5[%c0, %c0_0] : memref<32x32xbf16, #tpu.memory_space<vmem>>, vector<32x32xbf16>
    %c0_1 = arith.constant 0 : index
    %c0_2 = arith.constant 0 : index
    %1 = vector.load %arg1[%c0_1, %c0_2] : memref<208x32xbf16, #tpu.memory_space<vmem>>, vector<208x32xbf16>
    %cst = arith.constant dense<0.000000e+00> : vector<208x32xf32>
    %2 = tpu.matmul %1, %0, %cst {dimension_numbers = #tpu.dot_dimension_numbers<[1], [0], [0], [1], [0, 0, 1, 1], [], []>} : vector<208x32xbf16>, vector<32x32xbf16>, vector<208x32xf32> -> vector<208x32xf32>
    %c0_3 = arith.constant 0 : index
    %c0_4 = arith.constant 0 : index
    %3 = vector.load %arg2[%c0_3, %c0_4] : memref<208x32xbf16, #tpu.memory_space<vmem>>, vector<208x32xbf16>
    %cst_5 = arith.constant dense<0.000000e+00> : vector<208x32xf32>
    %4 = tpu.matmul %3, %0, %cst_5 {dimension_numbers = #tpu.dot_dimension_numbers<[1], [0], [0], [1], [0, 0, 1, 1], [], []>} : vector<208x32xbf16>, vector<32x32xbf16>, vector<208x32xf32> -> vector<208x32xf32>
    %5 = arith.maximumf %2, %4 : vector<208x32xf32>
    %c0_6 = arith.constant 0 : index
    %c0_7 = arith.constant 0 : index
    %6 = vector.load %arg3[%c0_6, %c0_7] : memref<208x32xbf16, #tpu.memory_space<vmem>>, vector<208x32xbf16>
    %cst_8 = arith.constant dense<0.000000e+00> : vector<208x32xf32>
    %7 = tpu.matmul %6, %0, %cst_8 {dimension_numbers = #tpu.dot_dimension_numbers<[1], [0], [0], [1], [0, 0, 1, 1], [], []>} : vector<208x32xbf16>, vector<32x32xbf16>, vector<208x32xf32> -> vector<208x32xf32>
    %8 = arith.maximumf %5, %7 : vector<208x32xf32>
    %c0_9 = arith.constant 0 : index
    %c0_10 = arith.constant 0 : index
    %9 = vector.load %arg4[%c0_9, %c0_10] : memref<208x32xbf16, #tpu.memory_space<vmem>>, vector<208x32xbf16>
    %cst_11 = arith.constant dense<0.000000e+00> : vector<208x32xf32>
    %10 = tpu.matmul %9, %0, %cst_11 {dimension_numbers = #tpu.dot_dimension_numbers<[1], [0], [0], [1], [0, 0, 1, 1], [], []>} : vector<208x32xbf16>, vector<32x32xbf16>, vector<208x32xf32> -> vector<208x32xf32>
    %11 = arith.maximumf %8, %10 : vector<208x32xf32>
    %c0_12 = arith.constant 0 : index
    %c0_13 = arith.constant 0 : index
    %12 = vector.load %arg6[%c0_12, %c0_13] : memref<1x32xf32, #tpu.memory_space<vmem>>, vector<1x32xf32>
    %13 = vector.broadcast %12 : vector<1x32xf32> to vector<208x32xf32>
    %14 = arith.addf %11, %13 : vector<208x32xf32>
    %cst_14 = arith.constant 0.000000e+00 : f32
    %15 = vector.broadcast %cst_14 : f32 to vector<208x32xf32>
    %16 = arith.maximumf %14, %15 : vector<208x32xf32>
    %c0_15 = arith.constant 0 : index
    %c0_16 = arith.constant 0 : index
    %17 = vector.load %arg7[%c0_15, %c0_16] : memref<1x32xf32, #tpu.memory_space<vmem>>, vector<1x32xf32>
    %18 = vector.broadcast %17 : vector<1x32xf32> to vector<208x32xf32>
    %19 = arith.mulf %16, %18 : vector<208x32xf32>
    %c0_17 = arith.constant 0 : index
    %c0_18 = arith.constant 0 : index
    %20 = vector.load %arg8[%c0_17, %c0_18] : memref<1x32xf32, #tpu.memory_space<vmem>>, vector<1x32xf32>
    %21 = vector.broadcast %20 : vector<1x32xf32> to vector<208x32xf32>
    %22 = arith.addf %19, %21 : vector<208x32xf32>
    %23 = arith.truncf %22 : vector<208x32xf32> to vector<208x32xbf16>
    %c0_19 = arith.constant 0 : index
    %c0_20 = arith.constant 0 : index
    %24 = vector.load %arg9[%c0_19, %c0_20] : memref<208x32xbf16, #tpu.memory_space<vmem>>, vector<208x32xbf16>
    tpu.vector_store %arg9[%c0_19, %c0_20], %23 {strides = array<i32>} : memref<208x32xbf16, #tpu.memory_space<vmem>>, vector<208x32xbf16>,
    return
  }
  func.func @transform_0(%arg0: i32) -> (i32, i32) {
    %c0_i32 = arith.constant 0 : i32
    %c0_i32_0 = arith.constant 0 : i32
    return %arg0, %c0_i32 : i32, i32
  }
  func.func @transform_1(%arg0: i32) -> (i32, i32) {
    %c0_i32 = arith.constant 0 : i32
    %c0_i32_0 = arith.constant 0 : i32
    return %arg0, %c0_i32 : i32, i32
  }
  func.func @transform_2(%arg0: i32) -> (i32, i32) {
    %c0_i32 = arith.constant 0 : i32
    %c0_i32_0 = arith.constant 0 : i32
    return %arg0, %c0_i32 : i32, i32
  }
  func.func @transform_3(%arg0: i32) -> (i32, i32) {
    %c0_i32 = arith.constant 0 : i32
    %c0_i32_0 = arith.constant 0 : i32
    return %arg0, %c0_i32 : i32, i32
  }
  func.func @transform_4(%arg0: i32) -> (i32, i32) {
    %c0_i32 = arith.constant 0 : i32
    %c0_i32_0 = arith.constant 0 : i32
    %c0_i32_1 = arith.constant 0 : i32
    return %c0_i32, %c0_i32_0 : i32, i32
  }
  func.func @transform_5(%arg0: i32) -> (i32, i32) {
    %c0_i32 = arith.constant 0 : i32
    %c0_i32_0 = arith.constant 0 : i32
    %c0_i32_1 = arith.constant 0 : i32
    return %c0_i32, %c0_i32_0 : i32, i32
  }
  func.func @transform_6(%arg0: i32) -> (i32, i32) {
    %c0_i32 = arith.constant 0 : i32
    %c0_i32_0 = arith.constant 0 : i32
    %c0_i32_1 = arith.constant 0 : i32
    return %c0_i32, %c0_i32_0 : i32, i32
  }
  func.func @transform_7(%arg0: i32) -> (i32, i32) {
    %c0_i32 = arith.constant 0 : i32
    %c0_i32_0 = arith.constant 0 : i32
    %c0_i32_1 = arith.constant 0 : i32
    return %c0_i32, %c0_i32_0 : i32, i32
  }
  func.func @transform_8(%arg0: i32) -> (i32, i32) {
    %c0_i32 = arith.constant 0 : i32
    %c0_i32_0 = arith.constant 0 : i32
    return %arg0, %c0_i32 : i32, i32
  }
}

module attributes {stable_mosaic.version = 11 : i64} {
  func.func @_conv_pool_kernel(%arg0: i32, %arg1: memref<48x800xbf16, #tpu.memory_space<vmem>>, %arg2: memref<48x800xbf16, #tpu.memory_space<vmem>>, %arg3: memref<48x800xbf16, #tpu.memory_space<vmem>>, %arg4: memref<48x800xbf16, #tpu.memory_space<vmem>>, %arg5: memref<800x64xbf16, #tpu.memory_space<vmem>>, %arg6: memref<1x64xf32, #tpu.memory_space<vmem>>, %arg7: memref<48x64xbf16, #tpu.memory_space<vmem>>) attributes {dimension_semantics = [#tpu.dimension_semantics<parallel>], iteration_bounds = array<i64: 2>, scalar_prefetch = 0 : i64, scratch_operands = 0 : i64, tpu.core_type = #tpu.core_type<tc>, window_params = [{transform_indices = @transform_0, window_bounds = array<i64: 48, 800>}, {transform_indices = @transform_1, window_bounds = array<i64: 48, 800>}, {transform_indices = @transform_2, window_bounds = array<i64: 48, 800>}, {transform_indices = @transform_3, window_bounds = array<i64: 48, 800>}, {pipeline_mode = #tpu.pipeline_mode<synchronous>, transform_indices = @transform_4, window_bounds = array<i64: 800, 64>}, {pipeline_mode = #tpu.pipeline_mode<synchronous>, transform_indices = @transform_5, window_bounds = array<i64: 1, 64>}, {transform_indices = @transform_6, window_bounds = array<i64: 48, 64>}]} {
    %c0 = arith.constant 0 : index
    %c0_0 = arith.constant 0 : index
    %0 = vector.load %arg5[%c0, %c0_0] : memref<800x64xbf16, #tpu.memory_space<vmem>>, vector<800x64xbf16>
    %c0_1 = arith.constant 0 : index
    %c0_2 = arith.constant 0 : index
    %1 = vector.load %arg1[%c0_1, %c0_2] : memref<48x800xbf16, #tpu.memory_space<vmem>>, vector<48x800xbf16>
    %cst = arith.constant dense<0.000000e+00> : vector<48x64xf32>
    %2 = tpu.matmul %1, %0, %cst {dimension_numbers = #tpu.dot_dimension_numbers<[1], [0], [0], [1], [0, 0, 1, 1], [], []>} : vector<48x800xbf16>, vector<800x64xbf16>, vector<48x64xf32> -> vector<48x64xf32>
    %c0_3 = arith.constant 0 : index
    %c0_4 = arith.constant 0 : index
    %3 = vector.load %arg2[%c0_3, %c0_4] : memref<48x800xbf16, #tpu.memory_space<vmem>>, vector<48x800xbf16>
    %cst_5 = arith.constant dense<0.000000e+00> : vector<48x64xf32>
    %4 = tpu.matmul %3, %0, %cst_5 {dimension_numbers = #tpu.dot_dimension_numbers<[1], [0], [0], [1], [0, 0, 1, 1], [], []>} : vector<48x800xbf16>, vector<800x64xbf16>, vector<48x64xf32> -> vector<48x64xf32>
    %5 = arith.maximumf %2, %4 : vector<48x64xf32>
    %c0_6 = arith.constant 0 : index
    %c0_7 = arith.constant 0 : index
    %6 = vector.load %arg3[%c0_6, %c0_7] : memref<48x800xbf16, #tpu.memory_space<vmem>>, vector<48x800xbf16>
    %cst_8 = arith.constant dense<0.000000e+00> : vector<48x64xf32>
    %7 = tpu.matmul %6, %0, %cst_8 {dimension_numbers = #tpu.dot_dimension_numbers<[1], [0], [0], [1], [0, 0, 1, 1], [], []>} : vector<48x800xbf16>, vector<800x64xbf16>, vector<48x64xf32> -> vector<48x64xf32>
    %8 = arith.maximumf %5, %7 : vector<48x64xf32>
    %c0_9 = arith.constant 0 : index
    %c0_10 = arith.constant 0 : index
    %9 = vector.load %arg4[%c0_9, %c0_10] : memref<48x800xbf16, #tpu.memory_space<vmem>>, vector<48x800xbf16>
    %cst_11 = arith.constant dense<0.000000e+00> : vector<48x64xf32>
    %10 = tpu.matmul %9, %0, %cst_11 {dimension_numbers = #tpu.dot_dimension_numbers<[1], [0], [0], [1], [0, 0, 1, 1], [], []>} : vector<48x800xbf16>, vector<800x64xbf16>, vector<48x64xf32> -> vector<48x64xf32>
    %11 = arith.maximumf %8, %10 : vector<48x64xf32>
    %c0_12 = arith.constant 0 : index
    %c0_13 = arith.constant 0 : index
    %12 = vector.load %arg6[%c0_12, %c0_13] : memref<1x64xf32, #tpu.memory_space<vmem>>, vector<1x64xf32>
    %13 = vector.broadcast %12 : vector<1x64xf32> to vector<48x64xf32>
    %14 = arith.addf %11, %13 : vector<48x64xf32>
    %cst_14 = arith.constant 0.000000e+00 : f32
    %15 = vector.broadcast %cst_14 : f32 to vector<48x64xf32>
    %16 = arith.maximumf %14, %15 : vector<48x64xf32>
    %17 = arith.truncf %16 : vector<48x64xf32> to vector<48x64xbf16>
    %c0_15 = arith.constant 0 : index
    %c0_16 = arith.constant 0 : index
    %18 = vector.load %arg7[%c0_15, %c0_16] : memref<48x64xbf16, #tpu.memory_space<vmem>>, vector<48x64xbf16>
    tpu.vector_store %arg7[%c0_15, %c0_16], %17 {strides = array<i32>} : memref<48x64xbf16, #tpu.memory_space<vmem>>, vector<48x64xbf16>,
    return
  }
  func.func @transform_0(%arg0: i32) -> (i32, i32) {
    %c0_i32 = arith.constant 0 : i32
    %c0_i32_0 = arith.constant 0 : i32
    return %arg0, %c0_i32 : i32, i32
  }
  func.func @transform_1(%arg0: i32) -> (i32, i32) {
    %c0_i32 = arith.constant 0 : i32
    %c0_i32_0 = arith.constant 0 : i32
    return %arg0, %c0_i32 : i32, i32
  }
  func.func @transform_2(%arg0: i32) -> (i32, i32) {
    %c0_i32 = arith.constant 0 : i32
    %c0_i32_0 = arith.constant 0 : i32
    return %arg0, %c0_i32 : i32, i32
  }
  func.func @transform_3(%arg0: i32) -> (i32, i32) {
    %c0_i32 = arith.constant 0 : i32
    %c0_i32_0 = arith.constant 0 : i32
    return %arg0, %c0_i32 : i32, i32
  }
  func.func @transform_4(%arg0: i32) -> (i32, i32) {
    %c0_i32 = arith.constant 0 : i32
    %c0_i32_0 = arith.constant 0 : i32
    %c0_i32_1 = arith.constant 0 : i32
    return %c0_i32, %c0_i32_0 : i32, i32
  }
  func.func @transform_5(%arg0: i32) -> (i32, i32) {
    %c0_i32 = arith.constant 0 : i32
    %c0_i32_0 = arith.constant 0 : i32
    %c0_i32_1 = arith.constant 0 : i32
    return %c0_i32, %c0_i32_0 : i32, i32
  }
  func.func @transform_6(%arg0: i32) -> (i32, i32) {
    %c0_i32 = arith.constant 0 : i32
    %c0_i32_0 = arith.constant 0 : i32
    return %arg0, %c0_i32 : i32, i32
  }
}

module attributes {stable_mosaic.version = 11 : i64} {
  func.func @_head_kernel(%arg0: i32, %arg1: memref<16x2304xbf16, #tpu.memory_space<vmem>>, %arg2: memref<2304x1024xbf16, #tpu.memory_space<vmem>>, %arg3: memref<1x1024xf32, #tpu.memory_space<vmem>>, %arg4: memref<1024x128xbf16, #tpu.memory_space<vmem>>, %arg5: memref<1x128xf32, #tpu.memory_space<vmem>>, %arg6: memref<16x128xf32, #tpu.memory_space<vmem>>, %arg7: memref<16x128xf32, #tpu.memory_space<vmem>>) attributes {dimension_semantics = [#tpu.dimension_semantics<parallel>], iteration_bounds = array<i64: 1>, scalar_prefetch = 0 : i64, scratch_operands = 0 : i64, tpu.core_type = #tpu.core_type<tc>, window_params = [{transform_indices = @transform_0, window_bounds = array<i64: 16, 2304>}, {pipeline_mode = #tpu.pipeline_mode<synchronous>, transform_indices = @transform_1, window_bounds = array<i64: 2304, 1024>}, {pipeline_mode = #tpu.pipeline_mode<synchronous>, transform_indices = @transform_2, window_bounds = array<i64: 1, 1024>}, {pipeline_mode = #tpu.pipeline_mode<synchronous>, transform_indices = @transform_3, window_bounds = array<i64: 1024, 128>}, {pipeline_mode = #tpu.pipeline_mode<synchronous>, transform_indices = @transform_4, window_bounds = array<i64: 1, 128>}, {transform_indices = @transform_5, window_bounds = array<i64: 16, 128>}, {transform_indices = @transform_6, window_bounds = array<i64: 16, 128>}]} {
    %c0 = arith.constant 0 : index
    %c0_0 = arith.constant 0 : index
    %0 = vector.load %arg1[%c0, %c0_0] : memref<16x2304xbf16, #tpu.memory_space<vmem>>, vector<16x2304xbf16>
    %c0_1 = arith.constant 0 : index
    %c0_2 = arith.constant 0 : index
    %1 = vector.load %arg2[%c0_1, %c0_2] : memref<2304x1024xbf16, #tpu.memory_space<vmem>>, vector<2304x1024xbf16>
    %cst = arith.constant dense<0.000000e+00> : vector<16x1024xf32>
    %2 = tpu.matmul %0, %1, %cst {dimension_numbers = #tpu.dot_dimension_numbers<[1], [0], [0], [1], [0, 0, 1, 1], [], []>} : vector<16x2304xbf16>, vector<2304x1024xbf16>, vector<16x1024xf32> -> vector<16x1024xf32>
    %c0_3 = arith.constant 0 : index
    %c0_4 = arith.constant 0 : index
    %3 = vector.load %arg3[%c0_3, %c0_4] : memref<1x1024xf32, #tpu.memory_space<vmem>>, vector<1x1024xf32>
    %4 = vector.broadcast %3 : vector<1x1024xf32> to vector<16x1024xf32>
    %5 = arith.addf %2, %4 : vector<16x1024xf32>
    %cst_5 = arith.constant 0.000000e+00 : f32
    %6 = vector.broadcast %cst_5 : f32 to vector<16x1024xf32>
    %7 = arith.maximumf %5, %6 : vector<16x1024xf32>
    %8 = arith.truncf %7 : vector<16x1024xf32> to vector<16x1024xbf16>
    %c0_6 = arith.constant 0 : index
    %c0_7 = arith.constant 0 : index
    %9 = vector.load %arg4[%c0_6, %c0_7] : memref<1024x128xbf16, #tpu.memory_space<vmem>>, vector<1024x128xbf16>
    %cst_8 = arith.constant dense<0.000000e+00> : vector<16x128xf32>
    %10 = tpu.matmul %8, %9, %cst_8 {dimension_numbers = #tpu.dot_dimension_numbers<[1], [0], [0], [1], [0, 0, 1, 1], [], []>} : vector<16x1024xbf16>, vector<1024x128xbf16>, vector<16x128xf32> -> vector<16x128xf32>
    %c0_9 = arith.constant 0 : index
    %c0_10 = arith.constant 0 : index
    %11 = vector.load %arg5[%c0_9, %c0_10] : memref<1x128xf32, #tpu.memory_space<vmem>>, vector<1x128xf32>
    %12 = vector.broadcast %11 : vector<1x128xf32> to vector<16x128xf32>
    %13 = arith.addf %10, %12 : vector<16x128xf32>
    %14 = tpu.iota {dimensions = array<i32: 1>} : vector<16x128xi32>
    %c10_i32 = arith.constant 10 : i32
    %15 = vector.broadcast %c10_i32 : i32 to vector<16x128xi32>
    %16 = arith.cmpi slt, %14, %15 : vector<16x128xi32>
    %cst_11 = arith.constant 0xFF800000 : f32
    %17 = vector.broadcast %cst_11 : f32 to vector<16x128xf32>
    %18 = arith.select %16, %13, %17 : vector<16x128xi1>, vector<16x128xf32>
    %cst_12 = arith.constant dense<0xFF800000> : vector<16xf32>
    %19 = vector.multi_reduction <maximumf>, %18, %cst_12 [1] : vector<16x128xf32> to vector<16xf32>
    %20 = vector.shape_cast %19 : vector<16xf32> to vector<16x1xf32>
    %21 = vector.broadcast %20 : vector<16x1xf32> to vector<16x128xf32>
    %22 = arith.subf %18, %21 : vector<16x128xf32>
    %23 = math.exp %22 : vector<16x128xf32>
    %cst_13 = arith.constant dense<0.000000e+00> : vector<16xf32>
    %24 = vector.multi_reduction <add>, %23, %cst_13 [1] : vector<16x128xf32> to vector<16xf32>
    %25 = vector.shape_cast %24 : vector<16xf32> to vector<16x1xf32>
    %26 = math.log %25 : vector<16x1xf32>
    %27 = arith.addf %20, %26 : vector<16x1xf32>
    %c0_14 = arith.constant 0 : index
    %c0_15 = arith.constant 0 : index
    %28 = vector.load %arg6[%c0_14, %c0_15] : memref<16x128xf32, #tpu.memory_space<vmem>>, vector<16x128xf32>
    tpu.vector_store %arg6[%c0_14, %c0_15], %13 {strides = array<i32>} : memref<16x128xf32, #tpu.memory_space<vmem>>, vector<16x128xf32>,
    %29 = vector.broadcast %27 : vector<16x1xf32> to vector<16x128xf32>
    %30 = arith.subf %13, %29 : vector<16x128xf32>
    %c0_16 = arith.constant 0 : index
    %c0_17 = arith.constant 0 : index
    %31 = vector.load %arg7[%c0_16, %c0_17] : memref<16x128xf32, #tpu.memory_space<vmem>>, vector<16x128xf32>
    tpu.vector_store %arg7[%c0_16, %c0_17], %30 {strides = array<i32>} : memref<16x128xf32, #tpu.memory_space<vmem>>, vector<16x128xf32>,
    return
  }
  func.func @transform_0(%arg0: i32) -> (i32, i32) {
    %c0_i32 = arith.constant 0 : i32
    %c0_i32_0 = arith.constant 0 : i32
    return %arg0, %c0_i32 : i32, i32
  }
  func.func @transform_1(%arg0: i32) -> (i32, i32) {
    %c0_i32 = arith.constant 0 : i32
    %c0_i32_0 = arith.constant 0 : i32
    %c0_i32_1 = arith.constant 0 : i32
    return %c0_i32, %c0_i32_0 : i32, i32
  }
  func.func @transform_2(%arg0: i32) -> (i32, i32) {
    %c0_i32 = arith.constant 0 : i32
    %c0_i32_0 = arith.constant 0 : i32
    %c0_i32_1 = arith.constant 0 : i32
    return %c0_i32, %c0_i32_0 : i32, i32
  }
  func.func @transform_3(%arg0: i32) -> (i32, i32) {
    %c0_i32 = arith.constant 0 : i32
    %c0_i32_0 = arith.constant 0 : i32
    %c0_i32_1 = arith.constant 0 : i32
    return %c0_i32, %c0_i32_0 : i32, i32
  }
  func.func @transform_4(%arg0: i32) -> (i32, i32) {
    %c0_i32 = arith.constant 0 : i32
    %c0_i32_0 = arith.constant 0 : i32
    %c0_i32_1 = arith.constant 0 : i32
    return %c0_i32, %c0_i32_0 : i32, i32
  }
  func.func @transform_5(%arg0: i32) -> (i32, i32) {
    %c0_i32 = arith.constant 0 : i32
    %c0_i32_0 = arith.constant 0 : i32
    return %arg0, %c0_i32 : i32, i32
  }
  func.func @transform_6(%arg0: i32) -> (i32, i32) {
    %c0_i32 = arith.constant 0 : i32
    %c0_i32_0 = arith.constant 0 : i32
    return %arg0, %c0_i32 : i32, i32
  }
}

</mosaic_0001>

<bundles_post_ra>
// kernel: cnn_forward.3
= control target key start
LH: loop header
LB: loop body
LE: loop exit
PB: predicated region body
PF: predicated region fallthrough
CT: control target
= control target key end

     0   :  { %13 = vsyncpa [#allocation3], 0  ;;  %s3445_s0 = inlined_call_operand.vmem [shape: bf16[416,32], index: 0, kind: input, shape index: {}]   ;;  %s3446_s1 = inlined_call_operand.vmem [shape: bf16[416,32], index: 1, kind: input, shape index: {}]   ;;  %s3447_s2 = inlined_call_operand.vmem [shape: bf16[416,32], index: 2, kind: input, shape index: {}]   ;;  %s3448_s3 = inlined_call_operand.vmem [shape: bf16[416,32], index: 3, kind: input, shape index: {}]   ;;  %s3449_s4 = inlined_call_operand.hbm [shape: bf16[32,32], index: 4, kind: input, shape index: {}]   ;;  %s3450_s5 = inlined_call_operand.hbm [shape: f32[1,32], index: 5, kind: input, shape index: {}]   ;;  %s3451_s6 = inlined_call_operand.hbm [shape: f32[1,32], index: 6, kind: input, shape index: {}]   ;;  %s3452_s7 = inlined_call_operand.hbm [shape: f32[1,32], index: 7, kind: input, shape index: {}]   ;;  %s3453_s8 = inlined_call_operand.vmem [shape: bf16[416,32], index: 8, kind: output, shape index: {}]  }
   0x1   :  { %14 = vsyncpa [#allocation5], 0 }
   0x2   :  { %15 = vsyncpa [#allocation8], 0  ;;  %s2730_s27 = smov 0  }
   0x3 LB: > { %s2677_s28 = smov [#allocation4]   ;;  %s1981_s30 = sadd.s32 4294967295, %s2675_s27   ;;  %s2675_s27 = sphi %s2730_s27, %s21_s27  }
   0x4   : > { %s266_s29 = sshll.u32 %s2677_s28, 4  ;;  %p1983_p0 = scmp.ge.s32.totalorder %s2675_s27, 1  ;;  %s267_s29 = int_to_ptr.vmem [resolvable:$true] %s266_s29 }
   0x5   : > { %p240_p1 = scmp.lt.s32.totalorder %s2675_s27, 3  ;;  %p2740_p2 = scmp.eq.s32.totalorder %s1981_s30, 0 }
   0x6   : > { %s2678_s11 = smov [#allocation2]   ;;  %s2679_s14 = smov [#allocation6]  }
   0x7   : > { %p2744_p3 = pnand %p1983_p0, %p240_p1  ;;  %s252_s12 = sshll.u32 %s2678_s11, 4  ;;  %s2750_s12 = int_to_ptr.vmem [resolvable:$true] %s252_s12 }
   0x8   : > { %s277_s15 = sshll.u32 %s2679_s14, 4  ;;  %s2680_s16 = smov [#allocation7]   ;;  %s2758_s15 = int_to_ptr.vmem [resolvable:$true] %s277_s15 }
   0x9   : > { %p2462_p4 = pneg %p2744_p3  ;;  %s2760_s17 = sshll.u32 %s2680_s16, 4  ;;  %s289_s17 = int_to_ptr.vmem [resolvable:$true] %s2760_s17 }
   0xa   : > { %s2564_s18 = scalar_lea.vmem %s267_s29, 16  ;;  %s2571_s19 = scalar_lea.vmem %s267_s29, 32 }
   0xb   : > { %p2754_p5 = pnand %p2740_p2, %p2462_p4  ;;  %p2565_p7 = scmp.ne.s32.totalorder %s267_s29, %s2564_s18 }
   0xc   : > { %p2572_p10 = scmp.lt.s32.totalorder %s267_s29, %s267_s29  ;;  %p2573_p11 = scmp.lt.s32.totalorder %s2571_s19, %s2564_s18 }
   0xd   : > { %p2555_p6 = pneg %p2754_p5 }
   0xe   : > { %p2574_p12 = por %p2573_p11, %p2572_p10 }
   0xf   : > { %p2567_p8 = pnand %p2565_p7, %p2555_p6 }
  0x11   : > { %p2568_p9 = pneg %p2567_p8 }
  0x13   : > { %p2575_p13 = pnand %p2574_p12, %p2568_p9 }
  0x15   : > { %2578 = shalt.err (!%p2575_p13)
}
  0x16   : > { %2468 = dma.hbm_to_vmem [thread:$0]  (!%p2754_p5), %s3450_s5, 16, %s267_s29, [#allocation5]  }
  0x17   : > { %s2590_s22 = scalar_lea.vmem %s2750_s12, 256  ;;  %p2598_p7 = scmp.lt.s32.totalorder %s2750_s12, %s2750_s12 }
  0x18   : > { %p2591_p0 = scmp.ne.s32.totalorder %s2750_s12, %s2590_s22  ;;  %p2599_p8 = scmp.lt.s32.totalorder %s2590_s22, %s2590_s22 }
  0x1a   : > { %p2593_p1 = pnand %p2591_p0, %p2555_p6  ;;  %p2600_p9 = por %p2599_p8, %p2598_p7 }
  0x1c   : > { %p2594_p4 = pneg %p2593_p1 }
  0x1e   : > { %p2601_p10 = pnand %p2600_p9, %p2594_p4 }
  0x20   : > { %2604 = shalt.err (!%p2601_p10)
}
  0x21   : > { %s2681_s23 = smov 64   ;;  %s2682_s24 = smov 4  }
  0x22   : > { %2465 = dma.hbm_to_vmem [thread:$0]  (!%p2754_p5), %s3449_s4, 256, %s2750_s12, [#allocation3], %s2681_s23, %s2681_s23, %s2682_s24  }
  0x23   : > { %s2616_s28 = scalar_lea.vmem %s2758_s15, 16  ;;  %s2623_s29 = scalar_lea.vmem %s2758_s15, 32 }
  0x24   : > { %p2617_p11 = scmp.ne.s32.totalorder %s2758_s15, %s2616_s28  ;;  %p2624_p0 = scmp.lt.s32.totalorder %s2758_s15, %s2758_s15 }
  0x25   : > { %p2625_p1 = scmp.lt.s32.totalorder %s2623_s29, %s2616_s28 }
  0x26   : > { %p2619_p12 = pnand %p2617_p11, %p2555_p6 }
  0x27   : > { %p2626_p4 = por %p2625_p1, %p2624_p0 }
  0x28   : > { %p2620_p13 = pneg %p2619_p12 }
  0x2a   : > { %p2627_p7 = pnand %p2626_p4, %p2620_p13 }
  0x2c   : > { %2630 = shalt.err (!%p2627_p7)
}
  0x2d   : > { %2471 = dma.hbm_to_vmem [thread:$0]  (!%p2754_p5), %s3451_s6, 16, %s2758_s15, [#allocation5]  }
  0x2e   : > { %s2642_s12 = scalar_lea.vmem %s289_s17, 16  ;;  %s2649_s16 = scalar_lea.vmem %s289_s17, 32 }
  0x2f   : > { %p2643_p8 = scmp.ne.s32.totalorder %s289_s17, %s2642_s12  ;;  %p2650_p11 = scmp.lt.s32.totalorder %s289_s17, %s289_s17 }
  0x30   : > { %p2651_p12 = scmp.lt.s32.totalorder %s2649_s16, %s2642_s12 }
  0x31   : > { %p2645_p9 = pnand %p2643_p8, %p2555_p6 }
  0x32   : > { %p2652_p13 = por %p2651_p12, %p2650_p11 }
  0x33   : > { %p2646_p10 = pneg %p2645_p9 }
  0x35   : > { %p2653_p0 = pnand %p2652_p13, %p2646_p10 }
  0x37   : > { %2656 = shalt.err (!%p2653_p0)
}
  0x38   : > { %2474 = dma.hbm_to_vmem [thread:$0]  (!%p2754_p5), %s3452_s7, 16, %s289_s17, [#allocation8]  }
  0x39   : > { %337 = sbr.rel (%p2744_p3) target bundleno = 489 (0x1e9), region = 52 }
  0x3e   : > { %2662 = dma.done.wait (%p2740_p2), [#allocation3], 256  }
  0x3f   : > { %2664 = vsyncadd (%p2740_p2), [#allocation3], 4294967040 }
  0x40   : > { %2666 = dma.done.wait (%p2740_p2), [#allocation5], 32  }
  0x41   : > { %2668 = vsyncadd (%p2740_p2), [#allocation5], 4294967264 }
  0x42   : > { %2670 = dma.done.wait (%p2740_p2), [#allocation8], 16  }
  0x43   : > { %2672 = vsyncadd (%p2740_p2), [#allocation8], 4294967280  ;;  %s398_s10 = smul.u32 26, %s1981_s30  ;;  %v2683_v0 = vmov 0.0   ;;  %vm2684_vm0 = vmmov 0   ;;  %v2499_v1 = vld [vmem:[#allocation2 + $0x8] sm:$0xff]  }
  0x44   : > { %2222 = vmatprep.subr.bf16.mxu0 %v2683_v0  ;;  %2278 = vmatprep.subr.bf16.mxu1 %v2683_v0  ;;  %v2500_v2 = vld [vmem:[#allocation2] sm:$0xff]   ;;  %vm536_vm1 = vcmask 261120   ;;  %vm1821_vm2 = vcmask 257024  }
  0x45   : > { %2226 = vmatprep.mubr.msk.bf16.mxu0 %vm2684_vm0, %v2683_v0  ;;  %2282 = vmatprep.mubr.msk.bf16.mxu1 %vm2684_vm0, %v2683_v0  ;;  %p399_p3 = scmp.lt.s32.totalorder %s398_s10, 51 }
  0x46   : > { %2223 = vmatpush3.bf16.msra.mxu0 %v2499_v1  ;;  %2279 = vmatpush3.bf16.msra.mxu1 %v2499_v1 }
  0x47   : > { %s3495_s10 = smov (!%p399_p3, %s398_s10), 51  ;;  %2224 = vmatprep.subr.bf16.mxu0 %v2683_v0  ;;  %2280 = vmatprep.subr.bf16.mxu1 %v2683_v0 }
  0x48   : > { %s2830_s13 = sshll.u32 %s3495_s10, 2 }
  0x49   : > { %s2836_s15 = scalar_lea.vmem %s3445_s0, %s2830_s13  ;;  %s2842_s21 = scalar_lea.vmem %s3446_s1, %s2830_s13 }
  0x4a   : > { %v2501_v3 = vld [vmem:[%s2836_s15] sm:$0xff]   ;;  %2225 = vmatpush3.bf16.msra.mxu0 %v2500_v2  ;;  %2281 = vmatpush3.bf16.msra.mxu1 %v2500_v2  ;;  %v2503_v5 = vld [vmem:[%s2836_s15 + $0x8] sm:$0xff]   ;;  %v2505_v7 = vld [vmem:[%s2836_s15 + $0x10] sm:$0xff]   ;;  %s2878_s24 = scalar_lea.vmem %s3447_s2, %s2830_s13  ;;  %s2885_s28 = scalar_lea.vmem %s3448_s3, %s2830_s13 }
  0x4b   : > { %v2502_v4 = vld [vmem:[%s2842_s21] sm:$0xff]   ;;  %2334 = vmatprep.subr.bf16.mxu0 %v2683_v0  ;;  %2390 = vmatprep.subr.bf16.mxu1 %v2683_v0  ;;  %v2504_v6 = vld [vmem:[%s2842_s21 + $0x8] sm:$0xff]   ;;  %v2506_v8 = vld [vmem:[%s2842_s21 + $0x10] sm:$0xff]   ;;  %s3245_s14 = scalar_lea.vmem %s3453_s8, %s2830_s13 }
  0x4c   : > { %v2507_v9 = vld [vmem:[%s2836_s15 + $0x18] sm:$0xff]   ;;  %v2509_v11 = vld [vmem:[%s2836_s15 + $0x20] sm:$0xff]   ;;  %v2511_v13 = vld [vmem:[%s2836_s15 + $0x28] sm:$0xff]  }
  0x4d   : > { %2227 = vmatmul.mubr.msk.bf16.vlgmr.msra.gmra.mxu0 %vm536_vm1, %v2501_v3  ;;  %2283 = vmatmul.mubr.msk.bf16.vlgmr.msra.gmra.mxu1 %vm536_vm1, %v2502_v4  ;;  %v2508_v10 = vld [vmem:[%s2842_s21 + $0x18] sm:$0xff]   ;;  %v2510_v12 = vld [vmem:[%s2842_s21 + $0x20] sm:$0xff]   ;;  %v2512_v14 = vld [vmem:[%s2842_s21 + $0x28] sm:$0xff]  }
  0x4e   : > { %2335 = vmatpush3.bf16.msra.mxu0 %v2499_v1  ;;  %2391 = vmatpush3.bf16.msra.mxu1 %v2499_v1  ;;  %v2513_v15 = vld [vmem:[%s2836_s15 + $0x30] sm:$0xff]   ;;  %v2515_v17 = vld [vmem:[%s2836_s15 + $0x38] sm:$0xff]   ;;  %v2517_v19 = vld [vmem:[%s2836_s15 + $0x40] sm:$0xff]  }
  0x4f   : > { %2230 = vmatprep.mubr.msk.bf16.mxu0 %vm2684_vm0, %v2683_v0  ;;  %2286 = vmatprep.mubr.msk.bf16.mxu1 %vm2684_vm0, %v2683_v0  ;;  %v2514_v16 = vld [vmem:[%s2842_s21 + $0x30] sm:$0xff]   ;;  %v2516_v18 = vld [vmem:[%s2842_s21 + $0x38] sm:$0xff]   ;;  %v2518_v20 = vld [vmem:[%s2842_s21 + $0x40] sm:$0xff]  }
  0x50   : > { %2336 = vmatprep.subr.bf16.mxu0 %v2683_v0  ;;  %2392 = vmatprep.subr.bf16.mxu1 %v2683_v0  ;;  %v2519_v21 = vld [vmem:[%s2836_s15 + $0x48] sm:$0xff]   ;;  %v2521_v23 = vld [vmem:[%s2836_s15 + $0x50] sm:$0xff]   ;;  %v2523_v25 = vld [vmem:[%s2836_s15 + $0x58] sm:$0xff]  }
  0x51   : > { %v2520_v22 = vld [vmem:[%s2842_s21 + $0x48] sm:$0xff]   ;;  %v2522_v24 = vld [vmem:[%s2842_s21 + $0x50] sm:$0xff]   ;;  %v2524_v26 = vld [vmem:[%s2842_s21 + $0x58] sm:$0xff]  }
  0x52   : > { %2337 = vmatpush3.bf16.msra.mxu0 %v2500_v2  ;;  %2393 = vmatpush3.bf16.msra.mxu1 %v2500_v2  ;;  %v2525_v27 = vld [vmem:[%s2836_s15 + $0x60] sm:$0xff]   ;;  %v2529_v31 = vld [vmem:[%s2878_s24 + $0x8] sm:$0xff]   ;;  %v2531_v33 = vld [vmem:[%s2878_s24 + $0x10] sm:$0xff]  }
  0x53   : > { %v2526_v28 = vld [vmem:[%s2842_s21 + $0x60] sm:$0xff]   ;;  %v2530_v32 = vld [vmem:[%s2885_s28 + $0x8] sm:$0xff]   ;;  %v2532_v34 = vld [vmem:[%s2885_s28 + $0x10] sm:$0xff]  }
  0x54   : > { %v2527_v29 = vld [vmem:[%s2878_s24] sm:$0xff]   ;;  %v2533_v35 = vld [vmem:[%s2878_s24 + $0x18] sm:$0xff]   ;;  %v2537_v39 = vld [vmem:[%s2878_s24 + $0x28] sm:$0xff]  }
  0x55   : > { %2231 = vmatmul.mubr.msk.bf16.gmra.mxu0 %vm536_vm1, %v2503_v5  ;;  %2287 = vmatmul.mubr.msk.bf16.gmra.mxu1 %vm536_vm1, %v2504_v6  ;;  %v2528_v30 = vld [vmem:[%s2885_s28] sm:$0xff]   ;;  %v2534_v36 = vld [vmem:[%s2885_s28 + $0x18] sm:$0xff]   ;;  %v2538_v40 = vld [vmem:[%s2885_s28 + $0x28] sm:$0xff]  }
  0x56   : > { %2234 = vmatprep.mubr.msk.bf16.mxu0 %vm2684_vm0, %v2683_v0  ;;  %2290 = vmatprep.mubr.msk.bf16.mxu1 %vm2684_vm0, %v2683_v0  ;;  %v2535_v37 = vld [vmem:[%s2878_s24 + $0x20] sm:$0xff]   ;;  %v2539_v41 = vld [vmem:[%s2878_s24 + $0x30] sm:$0xff]   ;;  %v2541_v43 = vld [vmem:[%s2878_s24 + $0x38] sm:$0xff]  }
  0x57   : > { %v2536_v38 = vld [vmem:[%s2885_s28 + $0x20] sm:$0xff]   ;;  %v2540_v42 = vld [vmem:[%s2885_s28 + $0x30] sm:$0xff]   ;;  %v2542_v44 = vld [vmem:[%s2885_s28 + $0x38] sm:$0xff]  }
  0x58   : > { %v2543_v45 = vld [vmem:[%s2878_s24 + $0x40] sm:$0xff]   ;;  %v2545_v47 = vld [vmem:[%s2878_s24 + $0x48] sm:$0xff]   ;;  %v2547_v49 = vld [vmem:[%s2878_s24 + $0x50] sm:$0xff]  }
  0x59   : > { %v2544_v46 = vld [vmem:[%s2885_s28 + $0x40] sm:$0xff]   ;;  %v2546_v48 = vld [vmem:[%s2885_s28 + $0x48] sm:$0xff]   ;;  %v2548_v50 = vld [vmem:[%s2885_s28 + $0x50] sm:$0xff]  }
  0x5a   : > { %v2549_v51 = vld [vmem:[%s2878_s24 + $0x58] sm:$0xff]   ;;  %v2551_v60 = vld [vmem:[%s2878_s24 + $0x60] sm:$0xff]  }
  0x5b   : > { %v2550_v52 = vld [vmem:[%s2885_s28 + $0x58] sm:$0xff]   ;;  %v2552_v61 = vld [vmem:[%s2885_s28 + $0x60] sm:$0xff]  }
  0x5d   : > { %2235 = vmatmul.mubr.msk.bf16.gmra.mxu0 %vm536_vm1, %v2505_v7  ;;  %2291 = vmatmul.mubr.msk.bf16.gmra.mxu1 %vm536_vm1, %v2506_v8 }
  0x5e   : > { %2238 = vmatprep.mubr.msk.bf16.mxu0 %vm2684_vm0, %v2683_v0  ;;  %2294 = vmatprep.mubr.msk.bf16.mxu1 %vm2684_vm0, %v2683_v0 }
  0x65   : > { %2239 = vmatmul.mubr.msk.bf16.gmra.mxu0 %vm536_vm1, %v2507_v9  ;;  %2295 = vmatmul.mubr.msk.bf16.gmra.mxu1 %vm536_vm1, %v2508_v10 }
  0x66   : > { %2242 = vmatprep.mubr.msk.bf16.mxu0 %vm2684_vm0, %v2683_v0  ;;  %2298 = vmatprep.mubr.msk.bf16.mxu1 %vm2684_vm0, %v2683_v0 }
  0x6d   : > { %2243 = vmatmul.mubr.msk.bf16.gmra.mxu0 %vm536_vm1, %v2509_v11  ;;  %2299 = vmatmul.mubr.msk.bf16.gmra.mxu1 %vm536_vm1, %v2510_v12 }
  0x6e   : > { %2246 = vmatprep.mubr.msk.bf16.mxu0 %vm2684_vm0, %v2683_v0  ;;  %2302 = vmatprep.mubr.msk.bf16.mxu1 %vm2684_vm0, %v2683_v0 }
  0x75   : > { %2247 = vmatmul.mubr.msk.bf16.gmra.mxu0 %vm536_vm1, %v2511_v13  ;;  %2303 = vmatmul.mubr.msk.bf16.gmra.mxu1 %vm536_vm1, %v2512_v14 }
  0x76   : > { %2250 = vmatprep.mubr.msk.bf16.mxu0 %vm2684_vm0, %v2683_v0  ;;  %2306 = vmatprep.mubr.msk.bf16.mxu1 %vm2684_vm0, %v2683_v0 }
  0x7d   : > { %2251 = vmatmul.mubr.msk.bf16.gmra.mxu0 %vm536_vm1, %v2513_v15  ;;  %2307 = vmatmul.mubr.msk.bf16.gmra.mxu1 %vm536_vm1, %v2514_v16 }
  0x7e   : > { %2254 = vmatprep.mubr.msk.bf16.mxu0 %vm2684_vm0, %v2683_v0  ;;  %2310 = vmatprep.mubr.msk.bf16.mxu1 %vm2684_vm0, %v2683_v0 }
  0x85   : > { %2255 = vmatmul.mubr.msk.bf16.gmra.mxu0 %vm536_vm1, %v2515_v17  ;;  %2311 = vmatmul.mubr.msk.bf16.gmra.mxu1 %vm536_vm1, %v2516_v18 }
  0x86   : > { %2258 = vmatprep.mubr.msk.bf16.mxu0 %vm2684_vm0, %v2683_v0  ;;  %2314 = vmatprep.mubr.msk.bf16.mxu1 %vm2684_vm0, %v2683_v0 }
  0x8d   : > { %2259 = vmatmul.mubr.msk.bf16.gmra.mxu0 %vm536_vm1, %v2517_v19  ;;  %2315 = vmatmul.mubr.msk.bf16.gmra.mxu1 %vm536_vm1, %v2518_v20 }
  0x8e   : > { %2262 = vmatprep.mubr.msk.bf16.mxu0 %vm2684_vm0, %v2683_v0  ;;  %2318 = vmatprep.mubr.msk.bf16.mxu1 %vm2684_vm0, %v2683_v0 }
  0x95   : > { %2263 = vmatmul.mubr.msk.bf16.gmra.mxu0 %vm536_vm1, %v2519_v21  ;;  %2319 = vmatmul.mubr.msk.bf16.gmra.mxu1 %vm536_vm1, %v2520_v22 }
  0x96   : > { %2266 = vmatprep.mubr.msk.bf16.mxu0 %vm2684_vm0, %v2683_v0  ;;  %2322 = vmatprep.mubr.msk.bf16.mxu1 %vm2684_vm0, %v2683_v0 }
  0x9d   : > { %2267 = vmatmul.mubr.msk.bf16.gmra.mxu0 %vm536_vm1, %v2521_v23  ;;  %2323 = vmatmul.mubr.msk.bf16.gmra.mxu1 %vm536_vm1, %v2522_v24 }
  0x9e   : > { %2270 = vmatprep.mubr.msk.bf16.mxu0 %vm2684_vm0, %v2683_v0  ;;  %2326 = vmatprep.mubr.msk.bf16.mxu1 %vm2684_vm0, %v2683_v0 }
  0xa5   : > { %2271 = vmatmul.mubr.msk.bf16.gmra.mxu0 %vm536_vm1, %v2523_v25  ;;  %2327 = vmatmul.mubr.msk.bf16.gmra.mxu1 %vm536_vm1, %v2524_v26 }
  0xa6   : > { %2274 = vmatprep.mubr.msk.bf16.mxu0 %vm2684_vm0, %v2683_v0  ;;  %2330 = vmatprep.mubr.msk.bf16.mxu1 %vm2684_vm0, %v2683_v0 }
  0xad   : > { %2275 = vmatmul.mubr.msk.bf16.gmra.mxu0 %vm536_vm1, %v2525_v27  ;;  %2331 = vmatmul.mubr.msk.bf16.gmra.mxu1 %vm536_vm1, %v2526_v28 }
  0xae   : > { %2338 = vmatprep.mubr.msk.bf16.mxu0 %vm2684_vm0, %v2683_v0  ;;  %2394 = vmatprep.mubr.msk.bf16.mxu1 %vm2684_vm0, %v2683_v0 }
  0xb5   : > { %2339 = vmatmul.mubr.msk.bf16.vlgmr.msra.gmra.mxu0 %vm536_vm1, %v2527_v29  ;;  %2395 = vmatmul.mubr.msk.bf16.vlgmr.msra.gmra.mxu1 %vm536_vm1, %v2528_v30 }
  0xb6   : > { %2342 = vmatprep.mubr.msk.bf16.mxu0 %vm2684_vm0, %v2683_v0  ;;  %2398 = vmatprep.mubr.msk.bf16.mxu1 %vm2684_vm0, %v2683_v0 }
  0xbd   : > { %2343 = vmatmul.mubr.msk.bf16.gmra.mxu0 %vm536_vm1, %v2529_v31  ;;  %2399 = vmatmul.mubr.msk.bf16.gmra.mxu1 %vm536_vm1, %v2530_v32 }
  0xbe   : > { %2346 = vmatprep.mubr.msk.bf16.mxu0 %vm2684_vm0, %v2683_v0  ;;  %2402 = vmatprep.mubr.msk.bf16.mxu1 %vm2684_vm0, %v2683_v0 }
  0xc5   : > { %2347 = vmatmul.mubr.msk.bf16.gmra.mxu0 %vm536_vm1, %v2531_v33  ;;  %2403 = vmatmul.mubr.msk.bf16.gmra.mxu1 %vm536_vm1, %v2532_v34 }
  0xc6   : > { %2350 = vmatprep.mubr.msk.bf16.mxu0 %vm2684_vm0, %v2683_v0  ;;  %2406 = vmatprep.mubr.msk.bf16.mxu1 %vm2684_vm0, %v2683_v0 }
  0xcd   : > { %2351 = vmatmul.mubr.msk.bf16.gmra.mxu0 %vm536_vm1, %v2533_v35  ;;  %2407 = vmatmul.mubr.msk.bf16.gmra.mxu1 %vm536_vm1, %v2534_v36 }
  0xce   : > { %2354 = vmatprep.mubr.msk.bf16.mxu0 %vm2684_vm0, %v2683_v0  ;;  %2410 = vmatprep.mubr.msk.bf16.mxu1 %vm2684_vm0, %v2683_v0 }
  0xd5   : > { %2355 = vmatmul.mubr.msk.bf16.gmra.mxu0 %vm536_vm1, %v2535_v37  ;;  %2411 = vmatmul.mubr.msk.bf16.gmra.mxu1 %vm536_vm1, %v2536_v38 }
  0xd6   : > { %2358 = vmatprep.mubr.msk.bf16.mxu0 %vm2684_vm0, %v2683_v0  ;;  %2414 = vmatprep.mubr.msk.bf16.mxu1 %vm2684_vm0, %v2683_v0 }
  0xdd   : > { %2359 = vmatmul.mubr.msk.bf16.gmra.mxu0 %vm536_vm1, %v2537_v39  ;;  %2415 = vmatmul.mubr.msk.bf16.gmra.mxu1 %vm536_vm1, %v2538_v40 }
  0xde   : > { %2362 = vmatprep.mubr.msk.bf16.mxu0 %vm2684_vm0, %v2683_v0  ;;  %2418 = vmatprep.mubr.msk.bf16.mxu1 %vm2684_vm0, %v2683_v0 }
  0xe5   : > { %2363 = vmatmul.mubr.msk.bf16.gmra.mxu0 %vm536_vm1, %v2539_v41  ;;  %2419 = vmatmul.mubr.msk.bf16.gmra.mxu1 %vm536_vm1, %v2540_v42 }
  0xe6   : > { %2366 = vmatprep.mubr.msk.bf16.mxu0 %vm2684_vm0, %v2683_v0  ;;  %2422 = vmatprep.mubr.msk.bf16.mxu1 %vm2684_vm0, %v2683_v0 }
  0xed   : > { %2367 = vmatmul.mubr.msk.bf16.gmra.mxu0 %vm536_vm1, %v2541_v43  ;;  %2423 = vmatmul.mubr.msk.bf16.gmra.mxu1 %vm536_vm1, %v2542_v44 }
  0xee   : > { %2370 = vmatprep.mubr.msk.bf16.mxu0 %vm2684_vm0, %v2683_v0  ;;  %2426 = vmatprep.mubr.msk.bf16.mxu1 %vm2684_vm0, %v2683_v0 }
  0xf5   : > { %2371 = vmatmul.mubr.msk.bf16.gmra.mxu0 %vm536_vm1, %v2543_v45  ;;  %2427 = vmatmul.mubr.msk.bf16.gmra.mxu1 %vm536_vm1, %v2544_v46 }
  0xf6   : > { %2374 = vmatprep.mubr.msk.bf16.mxu0 %vm2684_vm0, %v2683_v0  ;;  %2430 = vmatprep.mubr.msk.bf16.mxu1 %vm2684_vm0, %v2683_v0 }
  0xfd   : > { %2375 = vmatmul.mubr.msk.bf16.gmra.mxu0 %vm536_vm1, %v2545_v47  ;;  %2431 = vmatmul.mubr.msk.bf16.gmra.mxu1 %vm536_vm1, %v2546_v48 }
  0xfe   : > { %2378 = vmatprep.mubr.msk.bf16.mxu0 %vm2684_vm0, %v2683_v0  ;;  %2434 = vmatprep.mubr.msk.bf16.mxu1 %vm2684_vm0, %v2683_v0 }
 0x105   : > { %2379 = vmatmul.mubr.msk.bf16.gmra.mxu0 %vm536_vm1, %v2547_v49  ;;  %2435 = vmatmul.mubr.msk.bf16.gmra.mxu1 %vm536_vm1, %v2548_v50 }
 0x106   : > { %2382 = vmatprep.mubr.msk.bf16.mxu0 %vm2684_vm0, %v2683_v0  ;;  %2438 = vmatprep.mubr.msk.bf16.mxu1 %vm2684_vm0, %v2683_v0 }
 0x10d   : > { %v3056_v53 = vpop.f32.mrf.mxu0  ;;  %v3058_v54 = vpop.f32.mrf.mxu1  ;;  %2383 = vmatmul.mubr.msk.bf16.gmra.mxu0 %vm536_vm1, %v2549_v51  ;;  %2439 = vmatmul.mubr.msk.bf16.gmra.mxu1 %vm536_vm1, %v2550_v52 }
 0x10e   : > { %v980_v55 = vmax.f32 %v3056_v53, %v3058_v54  ;;  %2386 = vmatprep.mubr.msk.bf16.mxu0 %vm2684_vm0, %v2683_v0  ;;  %2442 = vmatprep.mubr.msk.bf16.mxu1 %vm2684_vm0, %v2683_v0  ;;  %v3225_v0 = vld [vmem:[#allocation4] ss:$0 sm:$0xff] }
 0x10f   : > { %v2228_v56 = vpop.f32.mrf.mxu0  ;;  %v2284_v57 = vpop.f32.mrf.mxu1 }
 0x111   : > { %v3068_v58 = vpop.f32.mrf.mxu0  ;;  %v3070_v59 = vpop.f32.mrf.mxu1 }
 0x112   : > { %v3465_v18 = vmax.f32 %v3068_v58, %v3070_v59 }
 0x113   : > { %v2229_v63 = vpop.f32.mrf.mxu0  ;;  %v2285_v1 = vpop.f32.mrf.mxu1 }
 0x115   : > { %v3076_v2 = vpop.f32.mrf.mxu0  ;;  %v3078_v3 = vpop.f32.mrf.mxu1  ;;  %2387 = vmatmul.mubr.msk.bf16.gmra.mxu0 %vm536_vm1, %v2551_v60  ;;  %2443 = vmatmul.mubr.msk.bf16.gmra.mxu1 %vm536_vm1, %v2552_v61 }
 0x117   : > { %v2232_v4 = vpop.f32.mrf.mxu0  ;;  %v2288_v5 = vpop.f32.mrf.mxu1 }
 0x119   : > { %v3084_v6 = vpop.f32.mrf.mxu0  ;;  %v3086_v7 = vpop.f32.mrf.mxu1 }
 0x11b   : > { %v2233_v9 = vpop.f32.mrf.mxu0  ;;  %v2289_v10 = vpop.f32.mrf.mxu1 }
 0x11d   : > { %v3090_v11 = vpop.f32.mrf.mxu0  ;;  %v3092_v12 = vpop.f32.mrf.mxu1 }
 0x11f   : > { %v2236_v14 = vpop.f32.mrf.mxu0  ;;  %v2292_v15 = vpop.f32.mrf.mxu1 }
 0x121   : > { %v3096_v16 = vpop.f32.mrf.mxu0  ;;  %v3098_v17 = vpop.f32.mrf.mxu1 }
 0x123   : > { %v2237_v19 = vpop.f32.mrf.mxu0  ;;  %v2293_v20 = vpop.f32.mrf.mxu1 }
 0x125   : > { %v3102_v21 = vpop.f32.mrf.mxu0  ;;  %v3104_v22 = vpop.f32.mrf.mxu1 }
 0x127   : > { %v2240_v24 = vpop.f32.mrf.mxu0  ;;  %v2296_v25 = vpop.f32.mrf.mxu1 }
 0x129   : > { %v3108_v26 = vpop.f32.mrf.mxu0  ;;  %v3110_v27 = vpop.f32.mrf.mxu1 }
 0x12b   : > { %v2241_v29 = vpop.f32.mrf.mxu0  ;;  %v2297_v30 = vpop.f32.mrf.mxu1 }
 0x12d   : > { %v3114_v31 = vpop.f32.mrf.mxu0  ;;  %v3116_v32 = vpop.f32.mrf.mxu1 }
 0x12f   : > { %v2244_v34 = vpop.f32.mrf.mxu0  ;;  %v2300_v35 = vpop.f32.mrf.mxu1 }
 0x131   : > { %v3120_v36 = vpop.f32.mrf.mxu0  ;;  %v3122_v37 = vpop.f32.mrf.mxu1 }
 0x133   : > { %v2245_v39 = vpop.f32.mrf.mxu0  ;;  %v2301_v40 = vpop.f32.mrf.mxu1 }
 0x135   : > { %v3126_v41 = vpop.f32.mrf.mxu0  ;;  %v3128_v42 = vpop.f32.mrf.mxu1 }
 0x137   : > { %v2248_v44 = vpop.f32.mrf.mxu0  ;;  %v2304_v45 = vpop.f32.mrf.mxu1 }
 0x139   : > { %v3132_v46 = vpop.f32.mrf.mxu0  ;;  %v3134_v47 = vpop.f32.mrf.mxu1 }
 0x13b   : > { %v2249_v49 = vpop.f32.mrf.mxu0  ;;  %v2305_v50 = vpop.f32.mrf.mxu1 }
 0x13d   : > { %v3138_v51 = vpop.f32.mrf.mxu0  ;;  %v3140_v52 = vpop.f32.mrf.mxu1 }
 0x13f   : > { %v2252_v57 = vpop.f32.mrf.mxu0  ;;  %v2308_v60 = vpop.f32.mrf.mxu1 }
 0x141   : > { %v3144_v61 = vpop.f32.mrf.mxu0  ;;  %v3146_v63 = vpop.f32.mrf.mxu1 }
 0x143   : > { %v2253_v4 = vpop.f32.mrf.mxu0  ;;  %v2309_v5 = vpop.f32.mrf.mxu1 }
 0x145   : > { %v3150_v9 = vpop.f32.mrf.mxu0  ;;  %v3152_v10 = vpop.f32.mrf.mxu1 }
 0x147   : > { %v2256_v15 = vpop.f32.mrf.mxu0  ;;  %v2312_v19 = vpop.f32.mrf.mxu1 }
 0x149   : > { %v3156_v20 = vpop.f32.mrf.mxu0  ;;  %v3158_v24 = vpop.f32.mrf.mxu1 }
 0x14b   : > { %v2257_v29 = vpop.f32.mrf.mxu0  ;;  %v2313_v30 = vpop.f32.mrf.mxu1 }
 0x14d   : > { %v3162_v34 = vpop.f32.mrf.mxu0  ;;  %v3164_v35 = vpop.f32.mrf.mxu1 }
 0x14f   : > { %v2260_v40 = vpop.f32.mrf.mxu0  ;;  %v2316_v44 = vpop.f32.mrf.mxu1 }
 0x151   : > { %v3168_v45 = vpop.f32.mrf.mxu0  ;;  %v3170_v49 = vpop.f32.mrf.mxu1 }
 0x153   : > { %v2261_v57 = vpop.f32.mrf.mxu0  ;;  %v2317_v60 = vpop.f32.mrf.mxu1 }
 0x155   : > { %v3174_v4 = vpop.f32.mrf.mxu0  ;;  %v3176_v5 = vpop.f32.mrf.mxu1 }
 0x157   : > { %v2264_v19 = vpop.f32.mrf.mxu0  ;;  %v2320_v29 = vpop.f32.mrf.mxu1 }
 0x159   : > { %v3180_v30 = vpop.f32.mrf.mxu0  ;;  %v3182_v40 = vpop.f32.mrf.mxu1 }
 0x15b   : > { %v2265_v39 = vpop.f32.mrf.mxu0  ;;  %v2321_v50 = vpop.f32.mrf.mxu1 }
 0x15d   : > { %v3186_v57 = vpop.f32.mrf.mxu0  ;;  %v3188_v60 = vpop.f32.mrf.mxu1 }
 0x15f   : > { %v2268_v14 = vpop.f32.mrf.mxu0  ;;  %v2324_v15 = vpop.f32.mrf.mxu1 }
 0x161   : > { %v3192_v19 = vpop.f32.mrf.mxu0  ;;  %v3194_v29 = vpop.f32.mrf.mxu1 }
 0x163   : > { %v2269_v56 = vpop.f32.mrf.mxu0  ;;  %v2325_v44 = vpop.f32.mrf.mxu1 }
 0x165   : > { %v3198_v39 = vpop.f32.mrf.mxu0  ;;  %v3200_v50 = vpop.f32.mrf.mxu1 }
 0x167   : > { %v2272_v43 = vpop.f32.mrf.mxu0  ;;  %v2328_v25 = vpop.f32.mrf.mxu1 }
 0x169   : > { %v3204_v14 = vpop.f32.mrf.mxu0  ;;  %v3206_v15 = vpop.f32.mrf.mxu1 }
 0x16b   : > { %v2273_v33 = vpop.f32.mrf.mxu0  ;;  %v2329_v1 = vpop.f32.mrf.mxu1 }
 0x16d   : > { %v3210_v56 = vpop.f32.mrf.mxu0  ;;  %v3212_v44 = vpop.f32.mrf.mxu1 }
 0x16e   : > { %3461 = vst [vmem:[#allocation12_spill] sm:$0xff] %v3210_v56  ;;  %3462 = vst [vmem:[#allocation13_spill] sm:$0xff] %v3212_v44 }
 0x16f   : > { %v2276_v23 = vpop.f32.mrf.mxu0  ;;  %v2332_v48 = vpop.f32.mrf.mxu1 }
 0x171   : > { %v3216_v43 = vpop.f32.mrf.mxu0  ;;  %v3218_v25 = vpop.f32.mrf.mxu1 }
 0x172   : > { %3463 = vst [vmem:[#allocation14_spill] sm:$0xff] %v3216_v43  ;;  %3464 = vst [vmem:[#allocation15_spill] sm:$0xff] %v3218_v25 }
 0x173   : > { %v2277_v13 = vpop.f32.mrf.mxu0  ;;  %v2333_v38 = vpop.f32.mrf.mxu1 }
 0x174   : > { %v3231_v38 = vld [vmem:[#allocation6] ss:$0 sm:$0xff] }
 0x175   : > { %v1170_v33 = vpop.f32.mrf.mxu0  ;;  %v1463_v1 = vpop.f32.mrf.mxu1 }
 0x176   : > { %v1273_v8 = vmax.f32 %v980_v55, %v1170_v33  ;;  %v3233_v55 = vld [vmem:[#allocation7] ss:$0 sm:$0xff] }
 0x177   : > { %v2340_v28 = vpop.f32.mrf.mxu0  ;;  %v2396_v23 = vpop.f32.mrf.mxu1 }
 0x178   : > { %v1566_v48 = vmax.f32 %v1273_v8, %v1463_v1  ;;  %v3466_v23 = vmax.f32 %v3076_v2, %v3078_v3  ;;  %v3467_v3 = vmax.f32 %v3084_v6, %v3086_v7  ;;  %v3468_v6 = vmax.f32 %v3090_v11, %v3092_v12 }
 0x179   : > { %v1173_v62 = vpop.f32.mrf.mxu0  ;;  %v1466_v44 = vpop.f32.mrf.mxu1  ;;  %v3469_v11 = vmax.f32 %v3096_v16, %v3098_v17  ;;  %v3470_v16 = vmax.f32 %v3102_v21, %v3104_v22  ;;  %v3471_v21 = vmax.f32 %v3108_v26, %v3110_v27  ;;  %v3472_v26 = vmax.f32 %v3114_v31, %v3116_v32 }
 0x17a   : > { %v1599_v56 = vadd.f32 %v3225_v0, %v1566_v48  ;;  %v1274_v13 = vmax.f32 %v3465_v18, %v1173_v62  ;;  %v3473_v31 = vmax.f32 %v3120_v36, %v3122_v37  ;;  %v3474_v36 = vmax.f32 %v3126_v41, %v3128_v42 }
 0x17b   : > { %v2341_v25 = vpop.f32.mrf.mxu0  ;;  %v2397_v43 = vpop.f32.mrf.mxu1  ;;  %v3475_v41 = vmax.f32 %v3132_v46, %v3134_v47  ;;  %v3476_v46 = vmax.f32 %v3138_v51, %v3140_v52  ;;  %v3477_v51 = vmax.f32 %v3144_v61, %v3146_v63  ;;  %v3478_v61 = vmax.f32 %v3150_v9, %v3152_v10 }
 0x17c   : > { %v1625_v53 = vmax.f32 %v1599_v56, 0.0  ;;  %v1567_v54 = vmax.f32 %v1274_v13, %v1466_v44  ;;  %v3479_v9 = vmax.f32 %v3156_v20, %v3158_v24  ;;  %v3480_v20 = vmax.f32 %v3162_v34, %v3164_v35 }
 0x17d   : > { %v1178_v28 = vpop.f32.mrf.mxu0  ;;  %v1471_v33 = vpop.f32.mrf.mxu1  ;;  %v3481_v34 = vmax.f32 %v3168_v45, %v3170_v49  ;;  %v3482_v45 = vmax.f32 %v3174_v4, %v3176_v5  ;;  %v3483_v4 = vmax.f32 %v3180_v30, %v3182_v40  ;;  %v3484_v30 = vmax.f32 %v3186_v57, %v3188_v60 }
 0x17e   : > { %v1658_v8 = vmul.f32 %v3231_v38, %v1625_v53  ;;  %v1600_v1 = vadd.f32 %v3225_v0, %v1567_v54  ;;  %v1275_v58 = vmax.f32 %v3466_v23, %v1178_v28  ;;  %v3485_v57 = vmax.f32 %v3192_v19, %v3194_v29 }
 0x17f   : > { %v2344_v59 = vpop.f32.mrf.mxu0  ;;  %v2400_v62 = vpop.f32.mrf.mxu1  ;;  %v3486_v19 = vmax.f32 %v3198_v39, %v3200_v50  ;;  %v3487_v39 = vmax.f32 %v3204_v14, %v3206_v15 }
 0x180   : > { %v1691_v18 = vadd.f32 %v3233_v55, %v1658_v8  ;;  %v1626_v25 = vmax.f32 %v1600_v1, 0.0  ;;  %v1568_v43 = vmax.f32 %v1275_v58, %v1471_v33 }
 0x181   : > { %v1181_v56 = vpop.f32.mrf.mxu0  ;;  %v1474_v44 = vpop.f32.mrf.mxu1 }
 0x182   : > { %v2136_v48 = vpack.c.bf16 %v1691_v18, %v1691_v18  ;;  %v1659_v13 = vmul.f32 %v3231_v38, %v1626_v25  ;;  %v1601_v2 = vadd.f32 %v3225_v0, %v1568_v43  ;;  %v1276_v53 = vmax.f32 %v3467_v3, %v1181_v56 }
 0x183   : > { %v2345_v54 = vpop.f32.mrf.mxu0  ;;  %v2401_v28 = vpop.f32.mrf.mxu1 }
 0x184   : > { %1822 = vst.msk [vmem:[%s3245_s14] sm:$0xf] %vm1821_vm2, %v2136_v48  ;;  %v1692_v33 = vadd.f32 %v3233_v55, %v1659_v13  ;;  %v1627_v8 = vmax.f32 %v1601_v2, 0.0  ;;  %v1569_v1 = vmax.f32 %v1276_v53, %v1474_v44 }
 0x185   : > { %v1186_v23 = vpop.f32.mrf.mxu0  ;;  %v1479_v58 = vpop.f32.mrf.mxu1 }
 0x186   : > { %v2137_v59 = vpack.c.bf16 %v1692_v33, %v1692_v33  ;;  %v1660_v62 = vmul.f32 %v3231_v38, %v1627_v8  ;;  %v1602_v18 = vadd.f32 %v3225_v0, %v1569_v1  ;;  %v1277_v7 = vmax.f32 %v3468_v6, %v1186_v23 }
 0x187   : > { %v2348_v25 = vpop.f32.mrf.mxu0  ;;  %v2404_v43 = vpop.f32.mrf.mxu1 }
 0x188   : > { %1823 = vst.msk [vmem:[%s3245_s14 + $0x4] sm:$0xf] %vm1821_vm2, %v2137_v59  ;;  %v1693_v56 = vadd.f32 %v3233_v55, %v1660_v62  ;;  %v1628_v48 = vmax.f32 %v1602_v18, 0.0  ;;  %v1570_v44 = vmax.f32 %v1277_v7, %v1479_v58 }
 0x189   : > { %v1189_v13 = vpop.f32.mrf.mxu0  ;;  %v1482_v2 = vpop.f32.mrf.mxu1 }
 0x18a   : > { %v2138_v3 = vpack.c.bf16 %v1693_v56, %v1693_v56  ;;  %v1661_v53 = vmul.f32 %v3231_v38, %v1628_v48  ;;  %v1603_v54 = vadd.f32 %v3225_v0, %v1570_v44  ;;  %v1278_v12 = vmax.f32 %v3469_v11, %v1189_v13 }
 0x18b   : > { %v2349_v28 = vpop.f32.mrf.mxu0  ;;  %v2405_v33 = vpop.f32.mrf.mxu1 }
 0x18c   : > { %1824 = vst.msk [vmem:[%s3245_s14 + $0x8] sm:$0xf] %vm1821_vm2, %v2138_v3  ;;  %v1694_v8 = vadd.f32 %v3233_v55, %v1661_v53  ;;  %v1629_v1 = vmax.f32 %v1603_v54, 0.0  ;;  %v1571_v23 = vmax.f32 %v1278_v12, %v1482_v2 }
 0x18d   : > { %v1194_v58 = vpop.f32.mrf.mxu0  ;;  %v1487_v59 = vpop.f32.mrf.mxu1 }
 0x18e   : > { %v2139_v62 = vpack.c.bf16 %v1694_v8, %v1694_v8  ;;  %v1662_v18 = vmul.f32 %v3231_v38, %v1629_v1  ;;  %v1604_v6 = vadd.f32 %v3225_v0, %v1571_v23  ;;  %v1279_v17 = vmax.f32 %v3470_v16, %v1194_v58 }
 0x18f   : > { %v2352_v7 = vpop.f32.mrf.mxu0  ;;  %v2408_v25 = vpop.f32.mrf.mxu1 }
 0x190   : > { %1825 = vst.msk [vmem:[%s3245_s14 + $0xc] sm:$0xf] %vm1821_vm2, %v2139_v62  ;;  %v1695_v43 = vadd.f32 %v3233_v55, %v1662_v18  ;;  %v1630_v56 = vmax.f32 %v1604_v6, 0.0  ;;  %v1572_v48 = vmax.f32 %v1279_v17, %v1487_v59 }
 0x191   : > { %v1197_v44 = vpop.f32.mrf.mxu0  ;;  %v1490_v13 = vpop.f32.mrf.mxu1 }
 0x192   : > { %v2140_v2 = vpack.c.bf16 %v1695_v43, %v1695_v43  ;;  %v1663_v3 = vmul.f32 %v3231_v38, %v1630_v56  ;;  %v1605_v53 = vadd.f32 %v3225_v0, %v1572_v48  ;;  %v1280_v22 = vmax.f32 %v3471_v21, %v1197_v44 }
 0x193   : > { %v2353_v54 = vpop.f32.mrf.mxu0  ;;  %v2409_v11 = vpop.f32.mrf.mxu1 }
 0x194   : > { %1826 = vst.msk [vmem:[%s3245_s14 + $0x10] sm:$0xf] %vm1821_vm2, %v2140_v2  ;;  %v1696_v12 = vadd.f32 %v3233_v55, %v1663_v3  ;;  %v1631_v28 = vmax.f32 %v1605_v53, 0.0  ;;  %v1573_v33 = vmax.f32 %v1280_v22, %v1490_v13 }
 0x195   : > { %v1202_v8 = vpop.f32.mrf.mxu0  ;;  %v1495_v1 = vpop.f32.mrf.mxu1 }
 0x196   : > { %v2141_v23 = vpack.c.bf16 %v1696_v12, %v1696_v12  ;;  %v1664_v58 = vmul.f32 %v3231_v38, %v1631_v28  ;;  %v1606_v59 = vadd.f32 %v3225_v0, %v1573_v33  ;;  %v1281_v27 = vmax.f32 %v3472_v26, %v1202_v8 }
 0x197   : > { %v2356_v62 = vpop.f32.mrf.mxu0  ;;  %v2412_v18 = vpop.f32.mrf.mxu1 }
 0x198   : > { %1827 = vst.msk [vmem:[%s3245_s14 + $0x14] sm:$0xf] %vm1821_vm2, %v2141_v23  ;;  %v1697_v6 = vadd.f32 %v3233_v55, %v1664_v58  ;;  %v1632_v16 = vmax.f32 %v1606_v59, 0.0  ;;  %v1574_v17 = vmax.f32 %v1281_v27, %v1495_v1 }
 0x199   : > { %v1205_v7 = vpop.f32.mrf.mxu0  ;;  %v1498_v25 = vpop.f32.mrf.mxu1 }
 0x19a   : > { %v2142_v43 = vpack.c.bf16 %v1697_v6, %v1697_v6  ;;  %v1665_v56 = vmul.f32 %v3231_v38, %v1632_v16  ;;  %v1607_v48 = vadd.f32 %v3225_v0, %v1574_v17  ;;  %v1282_v32 = vmax.f32 %v3473_v31, %v1205_v7 }
 0x19b   : > { %v2357_v44 = vpop.f32.mrf.mxu0  ;;  %v2413_v13 = vpop.f32.mrf.mxu1 }
 0x19c   : > { %1828 = vst.msk [vmem:[%s3245_s14 + $0x18] sm:$0xf] %vm1821_vm2, %v2142_v43  ;;  %v1698_v2 = vadd.f32 %v3233_v55, %v1665_v56  ;;  %v1633_v3 = vmax.f32 %v1607_v48, 0.0  ;;  %v1575_v53 = vmax.f32 %v1282_v32, %v1498_v25 }
 0x19d   : > { %v1210_v21 = vpop.f32.mrf.mxu0  ;;  %v1503_v22 = vpop.f32.mrf.mxu1 }
 0x19e   : > { %v2143_v54 = vpack.c.bf16 %v1698_v2, %v1698_v2  ;;  %v1666_v11 = vmul.f32 %v3231_v38, %v1633_v3  ;;  %v1608_v12 = vadd.f32 %v3225_v0, %v1575_v53  ;;  %v1283_v37 = vmax.f32 %v3474_v36, %v1210_v21 }
 0x19f   : > { %v2360_v28 = vpop.f32.mrf.mxu0  ;;  %v2416_v33 = vpop.f32.mrf.mxu1 }
 0x1a0   : > { %1829 = vst.msk [vmem:[%s3245_s14 + $0x1c] sm:$0xf] %vm1821_vm2, %v2143_v54  ;;  %v1699_v8 = vadd.f32 %v3233_v55, %v1666_v11  ;;  %v1634_v1 = vmax.f32 %v1608_v12, 0.0  ;;  %v1576_v23 = vmax.f32 %v1283_v37, %v1503_v22 }
 0x1a1   : > { %v1213_v58 = vpop.f32.mrf.mxu0  ;;  %v1506_v59 = vpop.f32.mrf.mxu1 }
 0x1a2   : > { %v2144_v26 = vpack.c.bf16 %v1699_v8, %v1699_v8  ;;  %v1667_v27 = vmul.f32 %v3231_v38, %v1634_v1  ;;  %v1609_v62 = vadd.f32 %v3225_v0, %v1576_v23  ;;  %v1284_v42 = vmax.f32 %v3475_v41, %v1213_v58 }
 0x1a3   : > { %v2361_v18 = vpop.f32.mrf.mxu0  ;;  %v2417_v6 = vpop.f32.mrf.mxu1 }
 0x1a4   : > { %1830 = vst.msk [vmem:[%s3245_s14 + $0x20] sm:$0xf] %vm1821_vm2, %v2144_v26  ;;  %v1700_v16 = vadd.f32 %v3233_v55, %v1667_v27  ;;  %v1635_v17 = vmax.f32 %v1609_v62, 0.0  ;;  %v1577_v7 = vmax.f32 %v1284_v42, %v1506_v59 }
 0x1a5   : > { %v1218_v25 = vpop.f32.mrf.mxu0  ;;  %v1511_v43 = vpop.f32.mrf.mxu1 }
 0x1a6   : > { %v2145_v56 = vpack.c.bf16 %v1700_v16, %v1700_v16  ;;  %v1668_v48 = vmul.f32 %v3231_v38, %v1635_v17  ;;  %v1610_v31 = vadd.f32 %v3225_v0, %v1577_v7  ;;  %v1285_v47 = vmax.f32 %v3476_v46, %v1218_v25 }
 0x1a7   : > { %v2364_v32 = vpop.f32.mrf.mxu0  ;;  %v2420_v44 = vpop.f32.mrf.mxu1 }
 0x1a8   : > { %1831 = vst.msk [vmem:[%s3245_s14 + $0x24] sm:$0xf] %vm1821_vm2, %v2145_v56  ;;  %v1701_v13 = vadd.f32 %v3233_v55, %v1668_v48  ;;  %v1636_v2 = vmax.f32 %v1610_v31, 0.0  ;;  %v1578_v3 = vmax.f32 %v1285_v47, %v1511_v43 }
 0x1a9   : > { %v1221_v53 = vpop.f32.mrf.mxu0  ;;  %v1514_v21 = vpop.f32.mrf.mxu1 }
 0x1aa   : > { %v2146_v22 = vpack.c.bf16 %v1701_v13, %v1701_v13  ;;  %v1669_v54 = vmul.f32 %v3231_v38, %v1636_v2  ;;  %v1611_v11 = vadd.f32 %v3225_v0, %v1578_v3  ;;  %v1286_v52 = vmax.f32 %v3477_v51, %v1221_v53 }
 0x1ab   : > { %v2365_v12 = vpop.f32.mrf.mxu0  ;;  %v2421_v36 = vpop.f32.mrf.mxu1 }
 0x1ac   : > { %1832 = vst.msk [vmem:[%s3245_s14 + $0x28] sm:$0xf] %vm1821_vm2, %v2146_v22  ;;  %v1702_v37 = vadd.f32 %v3233_v55, %v1669_v54  ;;  %v1637_v28 = vmax.f32 %v1611_v11, 0.0  ;;  %v1579_v33 = vmax.f32 %v1286_v52, %v1514_v21 }
 0x1ad   : > { %v1226_v8 = vpop.f32.mrf.mxu0  ;;  %v1519_v1 = vpop.f32.mrf.mxu1 }
 0x1ae   : > { %v2147_v23 = vpack.c.bf16 %v1702_v37, %v1702_v37  ;;  %v1670_v58 = vmul.f32 %v3231_v38, %v1637_v28  ;;  %v1612_v59 = vadd.f32 %v3225_v0, %v1579_v33  ;;  %v1287_v63 = vmax.f32 %v3478_v61, %v1226_v8 }
 0x1af   : > { %v2368_v26 = vpop.f32.mrf.mxu0  ;;  %v2424_v27 = vpop.f32.mrf.mxu1 }
 0x1b0   : > { %1833 = vst.msk [vmem:[%s3245_s14 + $0x2c] sm:$0xf] %vm1821_vm2, %v2147_v23  ;;  %v1703_v62 = vadd.f32 %v3233_v55, %v1670_v58  ;;  %v1638_v41 = vmax.f32 %v1612_v59, 0.0  ;;  %v1580_v42 = vmax.f32 %v1287_v63, %v1519_v1 }
 0x1b1   : > { %v1229_v18 = vpop.f32.mrf.mxu0  ;;  %v1522_v6 = vpop.f32.mrf.mxu1 }
 0x1b2   : > { %v2148_v16 = vpack.c.bf16 %v1703_v62, %v1703_v62  ;;  %v1671_v17 = vmul.f32 %v3231_v38, %v1638_v41  ;;  %v1613_v7 = vadd.f32 %v3225_v0, %v1580_v42  ;;  %v1288_v10 = vmax.f32 %v3479_v9, %v1229_v18 }
 0x1b3   : > { %v2369_v25 = vpop.f32.mrf.mxu0  ;;  %v2425_v43 = vpop.f32.mrf.mxu1 }
 0x1b4   : > { %1834 = vst.msk [vmem:[%s3245_s14 + $0x30] sm:$0xf] %vm1821_vm2, %v2148_v16  ;;  %v1704_v56 = vadd.f32 %v3233_v55, %v1671_v17  ;;  %v1639_v48 = vmax.f32 %v1613_v7, 0.0  ;;  %v1581_v31 = vmax.f32 %v1288_v10, %v1522_v6 }
 0x1b5   : > { %v1234_v46 = vpop.f32.mrf.mxu0  ;;  %v1527_v47 = vpop.f32.mrf.mxu1 }
 0x1b6   : > { %v2149_v32 = vpack.c.bf16 %v1704_v56, %v1704_v56  ;;  %v1672_v44 = vmul.f32 %v3231_v38, %v1639_v48  ;;  %v1614_v13 = vadd.f32 %v3225_v0, %v1581_v31  ;;  %v1289_v24 = vmax.f32 %v3480_v20, %v1234_v46 }
 0x1b7   : > { %v2372_v2 = vpop.f32.mrf.mxu0  ;;  %v2428_v3 = vpop.f32.mrf.mxu1 }
 0x1b8   : > { %1835 = vst.msk [vmem:[%s3245_s14 + $0x34] sm:$0xf] %vm1821_vm2, %v2149_v32  ;;  %v1705_v53 = vadd.f32 %v3233_v55, %v1672_v44  ;;  %v1640_v21 = vmax.f32 %v1614_v13, 0.0  ;;  %v1582_v22 = vmax.f32 %v1289_v24, %v1527_v47 }
 0x1b9   : > { %v1237_v54 = vpop.f32.mrf.mxu0  ;;  %v1530_v11 = vpop.f32.mrf.mxu1 }
 0x1ba   : > { %v2150_v51 = vpack.c.bf16 %v1705_v53, %v1705_v53  ;;  %v1673_v52 = vmul.f32 %v3231_v38, %v1640_v21  ;;  %v1615_v12 = vadd.f32 %v3225_v0, %v1582_v22  ;;  %v1290_v35 = vmax.f32 %v3481_v34, %v1237_v54 }
 0x1bb   : > { %v2373_v36 = vpop.f32.mrf.mxu0  ;;  %v2429_v37 = vpop.f32.mrf.mxu1 }
 0x1bc   : > { %1836 = vst.msk [vmem:[%s3245_s14 + $0x38] sm:$0xf] %vm1821_vm2, %v2150_v51  ;;  %v1706_v28 = vadd.f32 %v3233_v55, %v1673_v52  ;;  %v1641_v33 = vmax.f32 %v1615_v12, 0.0  ;;  %v1583_v8 = vmax.f32 %v1290_v35, %v1530_v11 }
 0x1bd   : > { %v1242_v1 = vpop.f32.mrf.mxu0  ;;  %v1535_v23 = vpop.f32.mrf.mxu1 }
 0x1be   : > { %v2151_v58 = vpack.c.bf16 %v1706_v28, %v1706_v28  ;;  %v1674_v59 = vmul.f32 %v3231_v38, %v1641_v33  ;;  %v1616_v61 = vadd.f32 %v3225_v0, %v1583_v8  ;;  %v1291_v49 = vmax.f32 %v3482_v45, %v1242_v1 }
 0x1bf   : > { %v2376_v63 = vpop.f32.mrf.mxu0  ;;  %v2432_v26 = vpop.f32.mrf.mxu1 }
 0x1c0   : > { %1837 = vst.msk [vmem:[%s3245_s14 + $0x3c] sm:$0xf] %vm1821_vm2, %v2151_v58  ;;  %v1707_v27 = vadd.f32 %v3233_v55, %v1674_v59  ;;  %v1642_v62 = vmax.f32 %v1616_v61, 0.0  ;;  %v1584_v41 = vmax.f32 %v1291_v49, %v1535_v23 }
 0x1c1   : > { %v1245_v42 = vpop.f32.mrf.mxu0  ;;  %v1538_v18 = vpop.f32.mrf.mxu1 }
 0x1c2   : > { %v2152_v6 = vpack.c.bf16 %v1707_v27, %v1707_v27  ;;  %v1675_v16 = vmul.f32 %v3231_v38, %v1642_v62  ;;  %v1617_v17 = vadd.f32 %v3225_v0, %v1584_v41  ;;  %v1292_v5 = vmax.f32 %v3483_v4, %v1245_v42 }
 0x1c3   : > { %v2377_v7 = vpop.f32.mrf.mxu0  ;;  %v2433_v9 = vpop.f32.mrf.mxu1 }
 0x1c4   : > { %1838 = vst.msk [vmem:[%s3245_s14 + $0x40] sm:$0xf] %vm1821_vm2, %v2152_v6  ;;  %v1708_v10 = vadd.f32 %v3233_v55, %v1675_v16  ;;  %v1643_v25 = vmax.f32 %v1617_v17, 0.0  ;;  %v1585_v43 = vmax.f32 %v1292_v5, %v1538_v18  ;;  %v3488_v5 = vld [vmem:[#allocation12_spill] sm:$0xff]  ;;  %v3489_v7 = vld [vmem:[#allocation13_spill] sm:$0xff] }
 0x1c5   : > { %v1250_v56 = vpop.f32.mrf.mxu0  ;;  %v1543_v48 = vpop.f32.mrf.mxu1  ;;  %v3490_v14 = vmax.f32 %v3488_v5, %v3489_v7 }
 0x1c6   : > { %v2153_v31 = vpack.c.bf16 %v1708_v10, %v1708_v10  ;;  %v1676_v46 = vmul.f32 %v3231_v38, %v1643_v25  ;;  %v1618_v47 = vadd.f32 %v3225_v0, %v1585_v43  ;;  %v1293_v40 = vmax.f32 %v3484_v30, %v1250_v56 }
 0x1c7   : > { %v2380_v32 = vpop.f32.mrf.mxu0  ;;  %v2436_v44 = vpop.f32.mrf.mxu1 }
 0x1c8   : > { %1839 = vst.msk [vmem:[%s3245_s14 + $0x44] sm:$0xf] %vm1821_vm2, %v2153_v31  ;;  %v1709_v13 = vadd.f32 %v3233_v55, %v1676_v46  ;;  %v1644_v20 = vmax.f32 %v1618_v47, 0.0  ;;  %v1586_v24 = vmax.f32 %v1293_v40, %v1543_v48  ;;  %v3491_v40 = vld [vmem:[#allocation14_spill] sm:$0xff]  ;;  %v3492_v32 = vld [vmem:[#allocation15_spill] sm:$0xff] }
 0x1c9   : > { %v1253_v2 = vpop.f32.mrf.mxu0  ;;  %v1546_v3 = vpop.f32.mrf.mxu1  ;;  %v3493_v44 = vmax.f32 %v3491_v40, %v3492_v32 }
 0x1ca   : > { %v2154_v53 = vpack.c.bf16 %v1709_v13, %v1709_v13  ;;  %v1677_v21 = vmul.f32 %v3231_v38, %v1644_v20  ;;  %v1619_v22 = vadd.f32 %v3225_v0, %v1586_v24  ;;  %v1294_v60 = vmax.f32 %v3485_v57, %v1253_v2 }
 0x1cb   : > { %v2381_v54 = vpop.f32.mrf.mxu0  ;;  %v2437_v11 = vpop.f32.mrf.mxu1 }
 0x1cc   : > { %1840 = vst.msk [vmem:[%s3245_s14 + $0x48] sm:$0xf] %vm1821_vm2, %v2154_v53  ;;  %v1710_v51 = vadd.f32 %v3233_v55, %v1677_v21  ;;  %v1645_v52 = vmax.f32 %v1619_v22, 0.0  ;;  %v1587_v12 = vmax.f32 %v1294_v60, %v1546_v3 }
 0x1cd   : > { %v1258_v34 = vpop.f32.mrf.mxu0  ;;  %v1551_v35 = vpop.f32.mrf.mxu1 }
 0x1ce   : > { %v2155_v36 = vpack.c.bf16 %v1710_v51, %v1710_v51  ;;  %v1678_v37 = vmul.f32 %v3231_v38, %v1645_v52  ;;  %v1620_v28 = vadd.f32 %v3225_v0, %v1587_v12  ;;  %v1295_v29 = vmax.f32 %v3486_v19, %v1258_v34 }
 0x1cf   : > { %v2384_v33 = vpop.f32.mrf.mxu0  ;;  %v2440_v8 = vpop.f32.mrf.mxu1 }
 0x1d0   : > { %1841 = vst.msk [vmem:[%s3245_s14 + $0x4c] sm:$0xf] %vm1821_vm2, %v2155_v36  ;;  %v1711_v1 = vadd.f32 %v3233_v55, %v1678_v37  ;;  %v1646_v23 = vmax.f32 %v1620_v28, 0.0  ;;  %v1588_v58 = vmax.f32 %v1295_v29, %v1551_v35 }
 0x1d1   : > { %v1261_v59 = vpop.f32.mrf.mxu0  ;;  %v1554_v61 = vpop.f32.mrf.mxu1 }
 0x1d2   : > { %v2156_v45 = vpack.c.bf16 %v1711_v1, %v1711_v1  ;;  %v1679_v49 = vmul.f32 %v3231_v38, %v1646_v23  ;;  %v1621_v63 = vadd.f32 %v3225_v0, %v1588_v58  ;;  %v1296_v50 = vmax.f32 %v3487_v39, %v1261_v59 }
 0x1d3   : > { %v2385_v26 = vpop.f32.mrf.mxu0  ;;  %v2441_v27 = vpop.f32.mrf.mxu1 }
 0x1d4   : > { %1842 = vst.msk [vmem:[%s3245_s14 + $0x50] sm:$0xf] %vm1821_vm2, %v2156_v45  ;;  %v1712_v62 = vadd.f32 %v3233_v55, %v1679_v49  ;;  %v1647_v41 = vmax.f32 %v1621_v63, 0.0  ;;  %v1589_v42 = vmax.f32 %v1296_v50, %v1554_v61 }
 0x1d5   : > { %v1266_v18 = vpop.f32.mrf.mxu0  ;;  %v1559_v6 = vpop.f32.mrf.mxu1 }
 0x1d6   : > { %v2157_v16 = vpack.c.bf16 %v1712_v62, %v1712_v62  ;;  %v1680_v17 = vmul.f32 %v3231_v38, %v1647_v41  ;;  %v1622_v4 = vadd.f32 %v3225_v0, %v1589_v42  ;;  %v1297_v15 = vmax.f32 %v3490_v14, %v1266_v18 }
 0x1d7   : > { %v2388_v9 = vpop.f32.mrf.mxu0  ;;  %v2444_v10 = vpop.f32.mrf.mxu1 }
 0x1d8   : > { %1843 = vst.msk [vmem:[%s3245_s14 + $0x54] sm:$0xf] %vm1821_vm2, %v2157_v16  ;;  %v1713_v25 = vadd.f32 %v3233_v55, %v1680_v17  ;;  %v1648_v43 = vmax.f32 %v1622_v4, 0.0  ;;  %v1590_v56 = vmax.f32 %v1297_v15, %v1559_v6 }
 0x1d9   : > { %v1269_v48 = vpop.f32.mrf.mxu0  ;;  %v1562_v31 = vpop.f32.mrf.mxu1 }
 0x1da   : > { %v2158_v46 = vpack.c.bf16 %v1713_v25, %v1713_v25  ;;  %v1681_v47 = vmul.f32 %v3231_v38, %v1648_v43  ;;  %v1623_v30 = vadd.f32 %v3225_v0, %v1590_v56  ;;  %v1298_v13 = vmax.f32 %v3493_v44, %v1269_v48 }
 0x1db   : > { %v2389_v20 = vpop.f32.mrf.mxu0  ;;  %v2445_v24 = vpop.f32.mrf.mxu1 }
 0x1dc   : > { %1844 = vst.msk [vmem:[%s3245_s14 + $0x58] sm:$0xf] %vm1821_vm2, %v2158_v46  ;;  %v1714_v2 = vadd.f32 %v3233_v55, %v1681_v47  ;;  %v1649_v3 = vmax.f32 %v1623_v30, 0.0  ;;  %v1591_v53 = vmax.f32 %v1298_v13, %v1562_v31 }
 0x1de   : > { %v2159_v21 = vpack.c.bf16 %v1714_v2, %v1714_v2  ;;  %v1682_v22 = vmul.f32 %v3231_v38, %v1649_v3  ;;  %v1624_v57 = vadd.f32 %v3225_v0, %v1591_v53 }
 0x1e0   : > { %1845 = vst.msk [vmem:[%s3245_s14 + $0x5c] sm:$0xf] %vm1821_vm2, %v2159_v21  ;;  %v1715_v60 = vadd.f32 %v3233_v55, %v1682_v22  ;;  %v1650_v54 = vmax.f32 %v1624_v57, 0.0 }
 0x1e2   : > { %v2160_v11 = vpack.c.bf16 %v1715_v60, %v1715_v60  ;;  %v1683_v51 = vmul.f32 %v3231_v38, %v1650_v54 }
 0x1e4   : > { %1846 = vst.msk [vmem:[%s3245_s14 + $0x60] sm:$0xf] %vm1821_vm2, %v2160_v11  ;;  %v1716_v52 = vadd.f32 %v3233_v55, %v1683_v51 }
 0x1e6   : > { %v2161_v12 = vpack.c.bf16 %v1716_v52, %v1716_v52 }
 0x1e8   : > { %1847 = vst.msk [vmem:[%s3245_s14 + $0x64] sm:$0xf] %vm1821_vm2, %v2161_v12 }
 0x1e9 PF: > { %s21_s27 = sadd.s32 1, %s2675_s27  }
 0x1ea   : > { %p18_p2 = scmp.ge.s32.totalorder %s21_s27, 4  }
 0x1ec   :  { %20 = sbr.rel (!%p18_p2) target bundleno = 3 (0x3), region = 108 }
 0x1f1   :  { %1870 = vsyncpa [#allocation3], 1 }
 0x1f2   :  { %1872 = vsyncpa [#allocation3 + $0x1], 1 }
 0x1f3   :  { %1873 = vsyncpa [#allocation5], 1 }
 0x1f4   :  { %1874 = vsyncpa [#allocation8], 1 }

// kernel: cnn_forward.4
= control target key start
LH: loop header
LB: loop body
LE: loop exit
PB: predicated region body
PF: predicated region fallthrough
CT: control target
= control target key end

     0   :  { %s3257_s21 = smov 0   ;;  %s4008_s0 = inlined_call_operand.vmem [shape: bf16[96,800], index: 0, kind: input, shape index: {}]   ;;  %s4009_s1 = inlined_call_operand.vmem [shape: bf16[96,800], index: 1, kind: input, shape index: {}]   ;;  %s4010_s2 = inlined_call_operand.vmem [shape: bf16[96,800], index: 2, kind: input, shape index: {}]   ;;  %s4011_s3 = inlined_call_operand.vmem [shape: bf16[96,800], index: 3, kind: input, shape index: {}]   ;;  %s4012_s4 = inlined_call_operand.vmem [shape: bf16[800,64], index: 4, kind: input, shape index: {}]   ;;  %s4013_s5 = inlined_call_operand.vmem [shape: f32[1,64], index: 5, kind: input, shape index: {}]   ;;  %s4014_s6 = inlined_call_operand.vmem [shape: bf16[96,64], index: 6, kind: output, shape index: {}]  }
   0x1 LB: > { %s2359_s22 = sadd.s32 4294967295, %s3218_s21   ;;  %p2363_p0 = scmp.ge.s32.totalorder %s3218_s21, 1  ;;  %s3218_s21 = sphi %s3257_s21, %s16_s21  }
   0x2   : > { %p250_p1 = scmp.lt.s32.totalorder %s3218_s21, 3 }
   0x4   : > { %p251_p2 = pnand %p2363_p0, %p250_p1 }
   0x5   : > { %s299_s29 = smul.u32 (!%p251_p2), 6, %s2359_s22 }
   0x6   : > { %254 = sbr.rel (%p251_p2) target bundleno = 484 (0x1e4), region = 44 }
   0x7   : > { %p300_p3 = scmp.lt.s32.totalorder (!%p251_p2), %s299_s29, 11 }
   0xb   : > { %v3268_v0 = vld [vmem:[%s4012_s4 + $0x78] sm:$0xff]   ;;  %v3291_v4 = vld [vmem:[%s4012_s4 + $0x70] sm:$0xff]   ;;  %v3315_v8 = vld [vmem:[%s4012_s4 + $0x68] sm:$0xff]   ;;  %s4016_s29 = smov (!%p300_p3, %s299_s29), 11  ;;  %v3220_v36 = vmov 0.0   ;;  %vm3221_vm0 = vmmov 0  }
   0xc   : > { %v3273_v1 = vld [vmem:[%s4012_s4 + $0xf8] sm:$0xff]   ;;  %2530 = vmatprep.subr.bf16.mxu0 %v3268_v0  ;;  %v3297_v5 = vld [vmem:[%s4012_s4 + $0xf0] sm:$0xff]   ;;  %v3321_v9 = vld [vmem:[%s4012_s4 + $0xe8] sm:$0xff]   ;;  %s3424_s8 = smul.u32 28, %s4016_s29  ;;  %vm863_vm1 = vcmask 261120   ;;  %s2368_s27 = sshll.u32 %s4016_s29, 2 }
   0xd   : > { %v3279_v2 = vld [vmem:[%s4012_s4 + $0x38] sm:$0xff]   ;;  %2564 = vmatprep.subr.bf16.mxu1 %v3273_v1  ;;  %v3303_v6 = vld [vmem:[%s4012_s4 + $0x30] sm:$0xff]   ;;  %v3327_v10 = vld [vmem:[%s4012_s4 + $0x28] sm:$0xff]   ;;  %s3980_s30 = scalar_lea.vmem %s4014_s6, %s2368_s27  ;;  %vm2260_vm2 = vcmask 519168  }
   0xe   : > { %v3285_v3 = vld [vmem:[%s4012_s4 + $0xb8] sm:$0xff]   ;;  %2531 = vmatpush3.bf16.msra.mxu0 %v3279_v2  ;;  %v3309_v7 = vld [vmem:[%s4012_s4 + $0xb0] sm:$0xff]   ;;  %v3333_v11 = vld [vmem:[%s4012_s4 + $0xa8] sm:$0xff]   ;;  %s3454_s18 = scalar_lea.vmem %s4008_s0, %s3424_s8  ;;  %s3606_s23 = scalar_lea.vmem %s4009_s1, %s3424_s8 }
   0xf   : > { %2565 = vmatpush3.bf16.msra.mxu1 %v3285_v3  ;;  %2532 = vmatprep.subr.bf16.mxu0 %v3291_v4  ;;  %v3339_v12 = vld [vmem:[%s4012_s4 + $0x60] sm:$0xff]   ;;  %v3365_v16 = vld [vmem:[%s4012_s4 + $0x58] sm:$0xff]   ;;  %v3389_v20 = vld [vmem:[%s4012_s4 + $0x50] sm:$0xff]   ;;  %s3638_s26 = scalar_lea.vmem %s4010_s2, %s3424_s8  ;;  %s3662_s28 = scalar_lea.vmem %s4011_s3, %s3424_s8 }
  0x10   : > { %2566 = vmatprep.subr.bf16.mxu1 %v3297_v5  ;;  %v3345_v13 = vld [vmem:[%s4012_s4 + $0xe0] sm:$0xff]   ;;  %v3371_v17 = vld [vmem:[%s4012_s4 + $0xd8] sm:$0xff]   ;;  %v3395_v21 = vld [vmem:[%s4012_s4 + $0xd0] sm:$0xff]  }
  0x11   : > { %v3353_v14 = vld [vmem:[%s4012_s4 + $0x20] sm:$0xff]   ;;  %v3377_v18 = vld [vmem:[%s4012_s4 + $0x18] sm:$0xff]   ;;  %v3403_v22 = vld [vmem:[%s4012_s4 + $0x10] sm:$0xff]  }
  0x12   : > { %2533 = vmatpush3.bf16.msra.mxu0 %v3303_v6  ;;  %v3359_v15 = vld [vmem:[%s4012_s4 + $0xa0] sm:$0xff]   ;;  %v3383_v19 = vld [vmem:[%s4012_s4 + $0x98] sm:$0xff]   ;;  %v3409_v23 = vld [vmem:[%s4012_s4 + $0x90] sm:$0xff]  }
  0x13   : > { %2567 = vmatpush3.bf16.msra.mxu1 %v3309_v7  ;;  %2534 = vmatprep.subr.bf16.mxu0 %v3315_v8  ;;  %v3415_v24 = vld [vmem:[%s4012_s4 + $0x48] sm:$0xff]   ;;  %v3442_v28 = vld [vmem:[%s4012_s4 + $0x40] sm:$0xff]   ;;  %v3478_v37 = vld [vmem:[%s4012_s4 + $0x178] sm:$0xff]  }
  0x14   : > { %2568 = vmatprep.subr.bf16.mxu1 %v3321_v9  ;;  %v3421_v25 = vld [vmem:[%s4012_s4 + $0xc8] sm:$0xff]   ;;  %v3448_v29 = vld [vmem:[%s4012_s4 + $0xc0] sm:$0xff]   ;;  %v3483_v38 = vld [vmem:[%s4012_s4 + $0x138] sm:$0xff]  }
  0x15   : > { %v3430_v26 = vld [vmem:[%s4012_s4 + $0x8] sm:$0xff]   ;;  %v3460_v30 = vld [vmem:[%s4012_s4] sm:$0xff]   ;;  %v3495_v40 = vld [vmem:[%s4012_s4 + $0x170] sm:$0xff]  }
  0x16   : > { %2535 = vmatpush3.bf16.msra.mxu0 %v3327_v10  ;;  %v3436_v27 = vld [vmem:[%s4012_s4 + $0x88] sm:$0xff]   ;;  %v3466_v31 = vld [vmem:[%s4012_s4 + $0x80] sm:$0xff]   ;;  %v3501_v41 = vld [vmem:[%s4012_s4 + $0x130] sm:$0xff]  }
  0x17   : > { %2569 = vmatpush3.bf16.msra.mxu1 %v3333_v11  ;;  %2536 = vmatprep.subr.bf16.mxu0 %v3339_v12  ;;  %v3065_v32 = vld [vmem:[%s3454_s18] ss:$28 sps:$4 sm:$0xff]   ;;  %v3068_v34 = vld [vmem:[%s3454_s18 + $0x8] ss:$28 sps:$4 sm:$0xff]   ;;  %v3080_v44 = vld [vmem:[%s3454_s18 + $0x38] ss:$28 sps:$4 sm:$0xff]  }
  0x18   : > { %2570 = vmatprep.subr.bf16.mxu1 %v3345_v13  ;;  %v3067_v33 = vld [vmem:[%s3454_s18 + $0x4] ss:$28 sps:$4 sm:$0xff]   ;;  %v3070_v35 = vld [vmem:[%s3454_s18 + $0xc] ss:$28 sps:$4 sm:$0xff]   ;;  %v3076_v42 = vld [vmem:[%s3454_s18 + $0x3c] ss:$28 sps:$4 sm:$0xff]  }
  0x19   : > { %905 = vmatprep.mubr.bf16.mxu0 %v3067_v33  ;;  %962 = vmatprep.mubr.bf16.mxu1 %v3070_v35  ;;  %v3489_v39 = vld [vmem:[%s4012_s4 + $0x188] sm:$0xff]   ;;  %v3078_v43 = vld [vmem:[%s3454_s18 + $0x44] ss:$28 sps:$4 sm:$0xff]   ;;  %v3087_v51 = vld [vmem:[%s3454_s18 + $0x74] ss:$28 sps:$4 sm:$0xff]  }
  0x1a   : > { %2537 = vmatpush3.bf16.msra.mxu0 %v3353_v14  ;;  %v3081_v45 = vld [vmem:[%s3454_s18 + $0x40] ss:$28 sps:$4 sm:$0xff]   ;;  %v3513_v46 = vld [vmem:[%s4012_s4 + $0x168] sm:$0xff]   ;;  %v3092_v54 = vld [vmem:[%s3454_s18 + $0x78] ss:$28 sps:$4 sm:$0xff]  }
  0x1b   : > { %2571 = vmatpush3.bf16.msra.mxu1 %v3359_v15  ;;  %2538 = vmatprep.subr.bf16.mxu0 %v3365_v16  ;;  %v3518_v47 = vld [vmem:[%s4012_s4 + $0x128] sm:$0xff]   ;;  %v3524_v48 = vld [vmem:[%s4012_s4 + $0x160] sm:$0xff]   ;;  %v3089_v52 = vld [vmem:[%s3454_s18 + $0x7c] ss:$28 sps:$4 sm:$0xff]  }
  0x1c   : > { %2572 = vmatprep.subr.bf16.mxu1 %v3371_v17  ;;  %v3530_v49 = vld [vmem:[%s4012_s4 + $0x120] sm:$0xff]   ;;  %v3091_v53 = vld [vmem:[%s3454_s18 + $0x70] ss:$28 sps:$4 sm:$0xff]   ;;  %v3547_v55 = vld [vmem:[%s4012_s4 + $0x158] sm:$0xff]  }
  0x1d   : > { %v3536_v50 = vld [vmem:[%s4012_s4 + $0x180] sm:$0xff]   ;;  %v3552_v56 = vld [vmem:[%s4012_s4 + $0x118] sm:$0xff]   ;;  %v3559_v57 = vld [vmem:[%s4012_s4 + $0x150] sm:$0xff]  }
  0x1e   : > { %2539 = vmatpush3.bf16.msra.mxu0 %v3377_v18  ;;  %v3565_v58 = vld [vmem:[%s4012_s4 + $0x110] sm:$0xff]   ;;  %v3573_v59 = vld [vmem:[%s4012_s4 + $0x148] sm:$0xff]   ;;  %v3586_v62 = vld [vmem:[%s4012_s4 + $0x140] sm:$0xff]  }
  0x1f   : > { %2573 = vmatpush3.bf16.msra.mxu1 %v3383_v19  ;;  %2540 = vmatprep.subr.bf16.mxu0 %v3389_v20  ;;  %v3098_v60 = vld [vmem:[%s3454_s18 + $0x18] ss:$28 sps:$4 sm:$0xff]   ;;  %v3580_v61 = vld [vmem:[%s4012_s4 + $0x108] sm:$0xff]  }
  0x20   : > { %2574 = vmatprep.subr.bf16.mxu1 %v3395_v21  ;;  %v3104_v63 = vld [vmem:[%s3454_s18 + $0x14] ss:$28 sps:$4 sm:$0xff]   ;;  %v3106_v35 = vld [vmem:[%s3454_s18 + $0x4c] ss:$28 sps:$4 sm:$0xff]  }
  0x21   : > { %v3102_v33 = vld [vmem:[%s3454_s18 + $0x10] ss:$28 sps:$4 sm:$0xff]  }
  0x22   : > { %2541 = vmatpush3.bf16.msra.mxu0 %v3403_v22 }
  0x23   : > { %2575 = vmatpush3.bf16.msra.mxu1 %v3409_v23  ;;  %2542 = vmatprep.subr.bf16.mxu0 %v3415_v24 }
  0x24   : > { %2576 = vmatprep.subr.bf16.mxu1 %v3421_v25 }
  0x26   : > { %2543 = vmatpush3.bf16.msra.mxu0 %v3430_v26 }
  0x27   : > { %2577 = vmatpush3.bf16.msra.mxu1 %v3436_v27  ;;  %2544 = vmatprep.subr.bf16.mxu0 %v3442_v28 }
  0x28   : > { %2578 = vmatprep.subr.bf16.mxu1 %v3448_v29 }
  0x2a   : > { %2545 = vmatpush3.bf16.msra.mxu0 %v3460_v30 }
  0x2b   : > { %2579 = vmatpush3.bf16.msra.mxu1 %v3466_v31  ;;  %2598 = vmatprep.subr.bf16.mxu0 %v3478_v37 }
  0x2c   : > { %2958 = vmatprep.subr.bf16.mxu1 %v3220_v36 }
  0x2d   : > { %906 = vmatmul.mubr.bf16.vlgmr.msra.gmra.mxu0 %v3065_v32  ;;  %v3595_v32 = vld [vmem:[%s4012_s4 + $0x100] sm:$0xff]  }
  0x2e   : > { %963 = vmatmul.mubr.bf16.vlgmr.msra.gmra.mxu1 %v3068_v34  ;;  %2599 = vmatpush3.bf16.msra.mxu0 %v3483_v38  ;;  %v3105_v34 = vld [vmem:[%s3454_s18 + $0x50] ss:$28 sps:$4 sm:$0xff]  }
  0x2f   : > { %2959 = vmatpush3.bf16.msra.mxu1 %v3489_v39  ;;  %2600 = vmatprep.subr.bf16.mxu0 %v3495_v40 }
  0x30   : > { %2960 = vmatprep.subr.bf16.mxu1 %v3220_v36  ;;  %913 = vmatprep.mubr.bf16.mxu0 %v3076_v42  ;;  %v3108_v42 = vld [vmem:[%s3454_s18 + $0x48] ss:$28 sps:$4 sm:$0xff]  }
  0x31   : > { %970 = vmatprep.mubr.bf16.mxu1 %v3078_v43  ;;  %v3109_v43 = vld [vmem:[%s3454_s18 + $0x88] ss:$28 sps:$4 sm:$0xff]  }
  0x32   : > { %2601 = vmatpush3.bf16.msra.mxu0 %v3501_v41 }
  0x33   : > { %2602 = vmatprep.subr.bf16.mxu0 %v3513_v46  ;;  %2961 = vmatpush3.bf16.msra.mxu1 %v3536_v50 }
  0x34   : > { %2637 = vmatprep.subr.bf16.mxu1 %v3268_v0 }
  0x35   : > { %914 = vmatmul.mubr.bf16.gmra.mxu0 %v3080_v44  ;;  %v3110_v44 = vld [vmem:[%s3454_s18 + $0x84] ss:$28 sps:$4 sm:$0xff]  }
  0x36   : > { %971 = vmatmul.mubr.bf16.gmra.mxu1 %v3081_v45  ;;  %2603 = vmatpush3.bf16.msra.mxu0 %v3518_v47  ;;  %v3115_v45 = vld [vmem:[%s3606_s23 + $0x4] ss:$28 sps:$4 sm:$0xff]  }
  0x37   : > { %2604 = vmatprep.subr.bf16.mxu0 %v3524_v48  ;;  %921 = vmatprep.mubr.bf16.mxu0 %v3087_v51  ;;  %v3112_v51 = vld [vmem:[%s3454_s18 + $0x80] ss:$28 sps:$4 sm:$0xff]  }
  0x38   : > { %978 = vmatprep.mubr.bf16.mxu1 %v3089_v52  ;;  %v3118_v52 = vld [vmem:[%s3606_s23 + $0xc] ss:$28 sps:$4 sm:$0xff]  }
  0x3a   : > { %2605 = vmatpush3.bf16.msra.mxu0 %v3530_v49 }
  0x3b   : > { %2606 = vmatprep.subr.bf16.mxu0 %v3547_v55 }
  0x3d   : > { %922 = vmatmul.mubr.bf16.gmra.mxu0 %v3091_v53  ;;  %v3113_v53 = vld [vmem:[%s3606_s23] ss:$28 sps:$4 sm:$0xff]  }
  0x3e   : > { %979 = vmatmul.mubr.bf16.gmra.mxu1 %v3092_v54  ;;  %2607 = vmatpush3.bf16.msra.mxu0 %v3552_v56  ;;  %v3119_v54 = vld [vmem:[%s3606_s23 + $0x3c] ss:$28 sps:$4 sm:$0xff]  }
  0x3f   : > { %2962 = vmatprep.mubr.msk.bf16.mxu1 %vm3221_vm0, %v3220_v36  ;;  %2608 = vmatprep.subr.bf16.mxu0 %v3559_v57 }
  0x40   : > { %1019 = vmatprep.mubr.bf16.mxu0 %v3104_v63  ;;  %v3121_v63 = vld [vmem:[%s3606_s23 + $0x38] ss:$28 sps:$4 sm:$0xff]  }
  0x42   : > { %2609 = vmatpush3.bf16.msra.mxu0 %v3565_v58 }
  0x43   : > { %2610 = vmatprep.subr.bf16.mxu0 %v3573_v59 }
  0x46   : > { %2963 = vmatmul.mubr.msk.bf16.vlgmr.msra.gmra.mxu1 %vm863_vm1, %v3098_v60  ;;  %2611 = vmatpush3.bf16.msra.mxu0 %v3580_v61  ;;  %v3116_v60 = vld [vmem:[%s3606_s23 + $0x8] ss:$28 sps:$4 sm:$0xff]  }
  0x47   : > { %2638 = vmatpush3.bf16.msra.mxu1 %v3279_v2  ;;  %2612 = vmatprep.subr.bf16.mxu0 %v3586_v62 }
  0x48   : > { %2639 = vmatprep.subr.bf16.mxu1 %v3291_v4  ;;  %2966 = vmatprep.mubr.msk.bf16.mxu1 %vm3221_vm0, %v3220_v36 }
  0x4a   : > { %2613 = vmatpush3.bf16.msra.mxu0 %v3595_v32 }
  0x4b   : > { %2640 = vmatpush3.bf16.msra.mxu1 %v3303_v6  ;;  %2671 = vmatprep.subr.bf16.mxu0 %v3273_v1 }
  0x4c   : > { %2641 = vmatprep.subr.bf16.mxu1 %v3315_v8 }
  0x4d   : > { %1020 = vmatmul.mubr.bf16.vlgmr.msra.gmra.mxu0 %v3102_v33  ;;  %v3122_v33 = vld [vmem:[%s3606_s23 + $0x44] ss:$28 sps:$4 sm:$0xff]  }
  0x4e   : > { %2967 = vmatmul.mubr.msk.bf16.gmra.mxu1 %vm863_vm1, %v3105_v34  ;;  %2672 = vmatpush3.bf16.msra.mxu0 %v3285_v3  ;;  %v3125_v34 = vld [vmem:[%s3606_s23 + $0x74] ss:$28 sps:$4 sm:$0xff]  }
  0x4f   : > { %2642 = vmatpush3.bf16.msra.mxu1 %v3327_v10  ;;  %2673 = vmatprep.subr.bf16.mxu0 %v3297_v5 }
  0x50   : > { %2643 = vmatprep.subr.bf16.mxu1 %v3339_v12  ;;  %1027 = vmatprep.mubr.bf16.mxu0 %v3106_v35  ;;  %v3124_v35 = vld [vmem:[%s3606_s23 + $0x40] ss:$28 sps:$4 sm:$0xff]  }
  0x51   : > { %2970 = vmatprep.mubr.msk.bf16.mxu1 %vm3221_vm0, %v3220_v36 }
  0x52   : > { %2674 = vmatpush3.bf16.msra.mxu0 %v3309_v7 }
  0x53   : > { %2644 = vmatpush3.bf16.msra.mxu1 %v3353_v14  ;;  %2675 = vmatprep.subr.bf16.mxu0 %v3321_v9 }
  0x54   : > { %2645 = vmatprep.subr.bf16.mxu1 %v3365_v16 }
  0x55   : > { %1028 = vmatmul.mubr.bf16.gmra.mxu0 %v3108_v42  ;;  %v3127_v42 = vld [vmem:[%s3606_s23 + $0x70] ss:$28 sps:$4 sm:$0xff]  }
  0x56   : > { %2971 = vmatmul.mubr.msk.bf16.gmra.mxu1 %vm863_vm1, %v3109_v43  ;;  %2676 = vmatpush3.bf16.msra.mxu0 %v3333_v11  ;;  %v3128_v43 = vld [vmem:[%s3606_s23 + $0x7c] ss:$28 sps:$4 sm:$0xff]  }
  0x57   : > { %2646 = vmatpush3.bf16.msra.mxu1 %v3377_v18  ;;  %2677 = vmatprep.subr.bf16.mxu0 %v3345_v13 }
  0x58   : > { %2647 = vmatprep.subr.bf16.mxu1 %v3389_v20  ;;  %1035 = vmatprep.mubr.bf16.mxu0 %v3110_v44  ;;  %v3133_v44 = vld [vmem:[%s3606_s23 + $0x14] ss:$28 sps:$4 sm:$0xff]  }
  0x59   : > { %1271 = vmatprep.mubr.bf16.mxu1 %v3115_v45  ;;  %v3130_v45 = vld [vmem:[%s3606_s23 + $0x78] ss:$28 sps:$4 sm:$0xff]  }
  0x5a   : > { %2678 = vmatpush3.bf16.msra.mxu0 %v3359_v15 }
  0x5b   : > { %2648 = vmatpush3.bf16.msra.mxu1 %v3403_v22  ;;  %2679 = vmatprep.subr.bf16.mxu0 %v3371_v17 }
  0x5c   : > { %2649 = vmatprep.subr.bf16.mxu1 %v3415_v24 }
  0x5d   : > { %1036 = vmatmul.mubr.bf16.gmra.mxu0 %v3112_v51  ;;  %v3131_v51 = vld [vmem:[%s3606_s23 + $0x10] ss:$28 sps:$4 sm:$0xff]  }
  0x5e   : > { %2680 = vmatpush3.bf16.msra.mxu0 %v3383_v19  ;;  %1328 = vmatprep.mubr.bf16.mxu0 %v3118_v52  ;;  %v3134_v52 = vld [vmem:[%s3606_s23 + $0x18] ss:$28 sps:$4 sm:$0xff]  }
  0x5f   : > { %2650 = vmatpush3.bf16.msra.mxu1 %v3430_v26  ;;  %2681 = vmatprep.subr.bf16.mxu0 %v3395_v21 }
  0x60   : > { %2651 = vmatprep.subr.bf16.mxu1 %v3442_v28 }
  0x62   : > { %2682 = vmatpush3.bf16.msra.mxu0 %v3409_v23 }
  0x63   : > { %2652 = vmatpush3.bf16.msra.mxu1 %v3460_v30  ;;  %2683 = vmatprep.subr.bf16.mxu0 %v3421_v25 }
  0x64   : > { %2705 = vmatprep.subr.bf16.mxu1 %v3478_v37 }
  0x66   : > { %1272 = vmatmul.mubr.bf16.vlgmr.msra.gmra.mxu1 %v3113_v53  ;;  %2684 = vmatpush3.bf16.msra.mxu0 %v3436_v27  ;;  %v3135_v53 = vld [vmem:[%s3606_s23 + $0x4c] ss:$28 sps:$4 sm:$0xff]  }
  0x67   : > { %2706 = vmatpush3.bf16.msra.mxu1 %v3483_v38  ;;  %2685 = vmatprep.subr.bf16.mxu0 %v3448_v29 }
  0x68   : > { %2707 = vmatprep.subr.bf16.mxu1 %v3495_v40  ;;  %1279 = vmatprep.mubr.bf16.mxu1 %v3119_v54  ;;  %v3137_v54 = vld [vmem:[%s3606_s23 + $0x48] ss:$28 sps:$4 sm:$0xff]  }
  0x6a   : > { %2686 = vmatpush3.bf16.msra.mxu0 %v3466_v31 }
  0x6b   : > { %2708 = vmatpush3.bf16.msra.mxu1 %v3501_v41  ;;  %2974 = vmatprep.subr.bf16.mxu0 %v3220_v36 }
  0x6c   : > { %2709 = vmatprep.subr.bf16.mxu1 %v3513_v46 }
  0x6d   : > { %1329 = vmatmul.mubr.bf16.vlgmr.msra.gmra.mxu0 %v3116_v60  ;;  %v3151_v60 = vld [vmem:[%s3638_s26 + $0x44] ss:$28 sps:$4 sm:$0xff]  }
  0x6e   : > { %1280 = vmatmul.mubr.bf16.gmra.mxu1 %v3121_v63  ;;  %2975 = vmatpush3.bf16.msra.mxu0 %v3489_v39  ;;  %v3153_v63 = vld [vmem:[%s3638_s26 + $0x38] ss:$28 sps:$4 sm:$0xff]  }
  0x6f   : > { %2710 = vmatpush3.bf16.msra.mxu1 %v3518_v47  ;;  %1336 = vmatprep.mubr.bf16.mxu0 %v3122_v33  ;;  %v3154_v33 = vld [vmem:[%s3638_s26 + $0x40] ss:$28 sps:$4 sm:$0xff]  }
  0x70   : > { %2711 = vmatprep.subr.bf16.mxu1 %v3524_v48  ;;  %1287 = vmatprep.mubr.bf16.mxu1 %v3125_v34  ;;  %v3155_v34 = vld [vmem:[%s3638_s26 + $0x74] ss:$28 sps:$4 sm:$0xff]  }
  0x71   : > { %2976 = vmatprep.subr.bf16.mxu0 %v3220_v36 }
  0x72   : > { %2977 = vmatpush3.bf16.msra.mxu0 %v3536_v50 }
  0x73   : > { %2712 = vmatpush3.bf16.msra.mxu1 %v3530_v49  ;;  %2744 = vmatprep.subr.bf16.mxu0 %v3268_v0 }
  0x74   : > { %2713 = vmatprep.subr.bf16.mxu1 %v3547_v55 }
  0x75   : > { %1337 = vmatmul.mubr.bf16.gmra.mxu0 %v3124_v35  ;;  %v3157_v35 = vld [vmem:[%s3638_s26 + $0x7c] ss:$28 sps:$4 sm:$0xff]  }
  0x76   : > { %1288 = vmatmul.mubr.bf16.gmra.mxu1 %v3127_v42  ;;  %1344 = vmatprep.mubr.bf16.mxu0 %v3128_v43  ;;  %v3159_v42 = vld [vmem:[%s3638_s26 + $0x70] ss:$28 sps:$4 sm:$0xff]   ;;  %v3160_v43 = vld [vmem:[%s3638_s26 + $0x78] ss:$28 sps:$4 sm:$0xff]  }
  0x77   : > { %2714 = vmatpush3.bf16.msra.mxu1 %v3552_v56  ;;  %1385 = vmatprep.mubr.bf16.mxu1 %v3133_v44  ;;  %v3164_v44 = vld [vmem:[%s3638_s26 + $0x14] ss:$28 sps:$4 sm:$0xff]  }
  0x78   : > { %2715 = vmatprep.subr.bf16.mxu1 %v3559_v57 }
  0x7b   : > { %2716 = vmatpush3.bf16.msra.mxu1 %v3565_v58 }
  0x7c   : > { %2717 = vmatprep.subr.bf16.mxu1 %v3573_v59 }
  0x7d   : > { %1345 = vmatmul.mubr.bf16.gmra.mxu0 %v3130_v45  ;;  %v3203_v45 = vld [vmem:[%s4012_s4 + $0x38] sm:$0xff]  }
  0x7e   : > { %2978 = vmatprep.mubr.msk.bf16.mxu0 %vm3221_vm0, %v3220_v36 }
  0x7f   : > { %2718 = vmatpush3.bf16.msra.mxu1 %v3580_v61 }
  0x80   : > { %2719 = vmatprep.subr.bf16.mxu1 %v3586_v62 }
  0x83   : > { %2720 = vmatpush3.bf16.msra.mxu1 %v3595_v32 }
  0x84   : > { %2778 = vmatprep.subr.bf16.mxu1 %v3273_v1  ;;  %v3138_v1 = vld [vmem:[%s3606_s23 + $0x50] ss:$28 sps:$4 sm:$0xff]  }
  0x85   : > { %2979 = vmatmul.mubr.msk.bf16.vlgmr.msra.gmra.mxu0 %vm863_vm1, %v3134_v52  ;;  %v3162_v52 = vld [vmem:[%s3638_s26 + $0x10] ss:$28 sps:$4 sm:$0xff]  }
  0x86   : > { %1386 = vmatmul.mubr.bf16.vlgmr.msra.gmra.mxu1 %v3131_v51  ;;  %2745 = vmatpush3.bf16.msra.mxu0 %v3279_v2  ;;  %v3139_v2 = vld [vmem:[%s3606_s23 + $0x84] ss:$28 sps:$4 sm:$0xff]   ;;  %v3204_v51 = vld [vmem:[%s4012_s4 + $0x70] sm:$0xff]  }
  0x87   : > { %2779 = vmatpush3.bf16.msra.mxu1 %v3285_v3  ;;  %2746 = vmatprep.subr.bf16.mxu0 %v3291_v4  ;;  %v3141_v3 = vld [vmem:[%s3606_s23 + $0x80] ss:$28 sps:$4 sm:$0xff]   ;;  %v3142_v4 = vld [vmem:[%s3606_s23 + $0x88] ss:$28 sps:$4 sm:$0xff]  }
  0x88   : > { %2780 = vmatprep.subr.bf16.mxu1 %v3297_v5  ;;  %1393 = vmatprep.mubr.bf16.mxu1 %v3135_v53  ;;  %v3145_v5 = vld [vmem:[%s3638_s26 + $0x4] ss:$28 sps:$4 sm:$0xff]   ;;  %v3165_v53 = vld [vmem:[%s3638_s26 + $0x50] ss:$28 sps:$4 sm:$0xff]  }
  0x89   : > { %2982 = vmatprep.mubr.msk.bf16.mxu0 %vm3221_vm0, %v3220_v36 }
  0x8a   : > { %2747 = vmatpush3.bf16.msra.mxu0 %v3303_v6  ;;  %v3148_v6 = vld [vmem:[%s3638_s26 + $0xc] ss:$28 sps:$4 sm:$0xff]  }
  0x8b   : > { %2781 = vmatpush3.bf16.msra.mxu1 %v3309_v7  ;;  %2748 = vmatprep.subr.bf16.mxu0 %v3315_v8  ;;  %v3143_v7 = vld [vmem:[%s3638_s26] ss:$28 sps:$4 sm:$0xff]  }
  0x8c   : > { %2782 = vmatprep.subr.bf16.mxu1 %v3321_v9  ;;  %v3146_v9 = vld [vmem:[%s3638_s26 + $0x8] ss:$28 sps:$4 sm:$0xff]  }
  0x8d   : > { %2983 = vmatmul.mubr.msk.bf16.gmra.mxu0 %vm863_vm1, %v3138_v1  ;;  %v3206_v1 = vld [vmem:[%s4012_s4 + $0xf8] sm:$0xff]  }
  0x8e   : > { %1394 = vmatmul.mubr.bf16.gmra.mxu1 %v3137_v54  ;;  %2749 = vmatpush3.bf16.msra.mxu0 %v3327_v10  ;;  %v3205_v54 = vld [vmem:[%s4012_s4 + $0x30] sm:$0xff]  }
  0x8f   : > { %2783 = vmatpush3.bf16.msra.mxu1 %v3333_v11  ;;  %2750 = vmatprep.subr.bf16.mxu0 %v3339_v12  ;;  %v3149_v11 = vld [vmem:[%s3638_s26 + $0x3c] ss:$28 sps:$4 sm:$0xff]  }
  0x90   : > { %2784 = vmatprep.subr.bf16.mxu1 %v3345_v13  ;;  %1401 = vmatprep.mubr.bf16.mxu1 %v3139_v2  ;;  %v3166_v2 = vld [vmem:[%s3638_s26 + $0x4c] ss:$28 sps:$4 sm:$0xff]  }
  0x91   : > { %2986 = vmatprep.mubr.msk.bf16.mxu0 %vm3221_vm0, %v3220_v36 }
  0x92   : > { %2751 = vmatpush3.bf16.msra.mxu0 %v3353_v14 }
  0x93   : > { %2785 = vmatpush3.bf16.msra.mxu1 %v3359_v15  ;;  %2752 = vmatprep.subr.bf16.mxu0 %v3365_v16 }
  0x94   : > { %2786 = vmatprep.subr.bf16.mxu1 %v3371_v17 }
  0x95   : > { %2987 = vmatmul.mubr.msk.bf16.gmra.mxu0 %vm863_vm1, %v3142_v4  ;;  %v3168_v4 = vld [vmem:[%s3638_s26 + $0x48] ss:$28 sps:$4 sm:$0xff]  }
  0x96   : > { %1402 = vmatmul.mubr.bf16.gmra.mxu1 %v3141_v3  ;;  %2753 = vmatpush3.bf16.msra.mxu0 %v3377_v18  ;;  %v3207_v3 = vld [vmem:[%s4012_s4 + $0xb8] sm:$0xff]  }
  0x97   : > { %2787 = vmatpush3.bf16.msra.mxu1 %v3383_v19  ;;  %2754 = vmatprep.subr.bf16.mxu0 %v3389_v20 }
  0x98   : > { %2788 = vmatprep.subr.bf16.mxu1 %v3395_v21  ;;  %1643 = vmatprep.mubr.bf16.mxu0 %v3145_v5  ;;  %v3209_v5 = vld [vmem:[%s4012_s4 + $0xb0] sm:$0xff]  }
  0x99   : > { %1700 = vmatprep.mubr.bf16.mxu1 %v3148_v6  ;;  %v3170_v6 = vld [vmem:[%s3638_s26 + $0x84] ss:$28 sps:$4 sm:$0xff]  }
  0x9a   : > { %2755 = vmatpush3.bf16.msra.mxu0 %v3403_v22 }
  0x9b   : > { %2789 = vmatpush3.bf16.msra.mxu1 %v3409_v23  ;;  %2756 = vmatprep.subr.bf16.mxu0 %v3415_v24 }
  0x9c   : > { %2790 = vmatprep.subr.bf16.mxu1 %v3421_v25 }
  0x9e   : > { %2757 = vmatpush3.bf16.msra.mxu0 %v3430_v26 }
  0x9f   : > { %2791 = vmatpush3.bf16.msra.mxu1 %v3436_v27  ;;  %2758 = vmatprep.subr.bf16.mxu0 %v3442_v28 }
  0xa0   : > { %2792 = vmatprep.subr.bf16.mxu1 %v3448_v29 }
  0xa2   : > { %2759 = vmatpush3.bf16.msra.mxu0 %v3460_v30 }
  0xa3   : > { %2793 = vmatpush3.bf16.msra.mxu1 %v3466_v31  ;;  %2812 = vmatprep.subr.bf16.mxu0 %v3478_v37 }
  0xa4   : > { %2990 = vmatprep.subr.bf16.mxu1 %v3220_v36 }
  0xa5   : > { %1644 = vmatmul.mubr.bf16.vlgmr.msra.gmra.mxu0 %v3143_v7  ;;  %v3175_v7 = vld [vmem:[%s3662_s28 + $0x4] ss:$28 sps:$4 sm:$0xff]  }
  0xa6   : > { %1701 = vmatmul.mubr.bf16.vlgmr.msra.gmra.mxu1 %v3146_v9  ;;  %2813 = vmatpush3.bf16.msra.mxu0 %v3483_v38 }
  0xa7   : > { %2991 = vmatpush3.bf16.msra.mxu1 %v3489_v39  ;;  %2814 = vmatprep.subr.bf16.mxu0 %v3495_v40 }
  0xa8   : > { %1651 = vmatprep.mubr.bf16.mxu0 %v3149_v11  ;;  %1708 = vmatprep.mubr.bf16.mxu1 %v3151_v60  ;;  %v3191_v60 = vld [vmem:[%s3662_s28 + $0x10] ss:$28 sps:$4 sm:$0xff]  }
  0xa9   : > { %2992 = vmatprep.subr.bf16.mxu1 %v3220_v36 }
  0xaa   : > { %2815 = vmatpush3.bf16.msra.mxu0 %v3501_v41 }
  0xab   : > { %2993 = vmatpush3.bf16.msra.mxu1 %v3536_v50  ;;  %2816 = vmatprep.subr.bf16.mxu0 %v3513_v46 }
  0xac   : > { %2851 = vmatprep.subr.bf16.mxu1 %v3268_v0  ;;  %v3161_v0 = vld [vmem:[%s3638_s26 + $0x18] ss:$28 sps:$4 sm:$0xff]  }
  0xad   : > { %1652 = vmatmul.mubr.bf16.gmra.mxu0 %v3153_v63  ;;  %v3194_v63 = vld [vmem:[%s3662_s28 + $0x18] ss:$28 sps:$4 sm:$0xff]  }
  0xae   : > { %1709 = vmatmul.mubr.bf16.gmra.mxu1 %v3154_v33  ;;  %2817 = vmatpush3.bf16.msra.mxu0 %v3518_v47 }
  0xaf   : > { %1659 = vmatprep.mubr.bf16.mxu0 %v3155_v34  ;;  %2818 = vmatprep.subr.bf16.mxu0 %v3524_v48 }
  0xb0   : > { %1716 = vmatprep.mubr.bf16.mxu1 %v3157_v35  ;;  %v3195_v35 = vld [vmem:[%s3662_s28 + $0x4c] ss:$28 sps:$4 sm:$0xff]  }
  0xb2   : > { %2819 = vmatpush3.bf16.msra.mxu0 %v3530_v49 }
  0xb3   : > { %2820 = vmatprep.subr.bf16.mxu0 %v3547_v55 }
  0xb5   : > { %1660 = vmatmul.mubr.bf16.gmra.mxu0 %v3159_v42 }
  0xb6   : > { %1717 = vmatmul.mubr.bf16.gmra.mxu1 %v3160_v43  ;;  %2821 = vmatpush3.bf16.msra.mxu0 %v3552_v56 }
  0xb7   : > { %2994 = vmatprep.mubr.msk.bf16.mxu1 %vm3221_vm0, %v3220_v36  ;;  %2822 = vmatprep.subr.bf16.mxu0 %v3559_v57 }
  0xb8   : > { %1757 = vmatprep.mubr.bf16.mxu0 %v3164_v44 }
  0xba   : > { %2823 = vmatpush3.bf16.msra.mxu0 %v3565_v58 }
  0xbb   : > { %2824 = vmatprep.subr.bf16.mxu0 %v3573_v59 }
  0xbe   : > { %2995 = vmatmul.mubr.msk.bf16.vlgmr.msra.gmra.mxu1 %vm863_vm1, %v3161_v0  ;;  %2825 = vmatpush3.bf16.msra.mxu0 %v3580_v61 }
  0xbf   : > { %2852 = vmatpush3.bf16.msra.mxu1 %v3203_v45  ;;  %2826 = vmatprep.subr.bf16.mxu0 %v3586_v62 }
  0xc0   : > { %2853 = vmatprep.subr.bf16.mxu1 %v3204_v51  ;;  %2998 = vmatprep.mubr.msk.bf16.mxu1 %vm3221_vm0, %v3220_v36 }
  0xc2   : > { %2827 = vmatpush3.bf16.msra.mxu0 %v3595_v32 }
  0xc3   : > { %2854 = vmatpush3.bf16.msra.mxu1 %v3205_v54  ;;  %2885 = vmatprep.subr.bf16.mxu0 %v3206_v1  ;;  %v3197_v1 = vld [vmem:[%s3662_s28 + $0x48] ss:$28 sps:$4 sm:$0xff]  }
  0xc4   : > { %2855 = vmatprep.subr.bf16.mxu1 %v3315_v8  ;;  %v3208_v8 = vld [vmem:[%s4012_s4 + $0xf0] sm:$0xff]  }
  0xc5   : > { %1758 = vmatmul.mubr.bf16.vlgmr.msra.gmra.mxu0 %v3162_v52 }
  0xc6   : > { %2999 = vmatmul.mubr.msk.bf16.gmra.mxu1 %vm863_vm1, %v3165_v53  ;;  %2886 = vmatpush3.bf16.msra.mxu0 %v3207_v3 }
  0xc7   : > { %2856 = vmatpush3.bf16.msra.mxu1 %v3327_v10  ;;  %2887 = vmatprep.subr.bf16.mxu0 %v3208_v8  ;;  %v3169_v10 = vld [vmem:[%s3638_s26 + $0x88] ss:$28 sps:$4 sm:$0xff]  }
  0xc8   : > { %2857 = vmatprep.subr.bf16.mxu1 %v3339_v12  ;;  %1765 = vmatprep.mubr.bf16.mxu0 %v3166_v2  ;;  %v3210_v12 = vld [vmem:[%s4012_s4 + $0xe8] sm:$0xff]  }
  0xc9   : > { %3002 = vmatprep.mubr.msk.bf16.mxu1 %vm3221_vm0, %v3220_v36  ;;  %v3198_v2 = vld [vmem:[%s3662_s28 + $0x50] ss:$28 sps:$4 sm:$0xff]  }
  0xca   : > { %2888 = vmatpush3.bf16.msra.mxu0 %v3209_v5 }
  0xcb   : > { %2858 = vmatpush3.bf16.msra.mxu1 %v3353_v14  ;;  %2889 = vmatprep.subr.bf16.mxu0 %v3210_v12  ;;  %v3211_v14 = vld [vmem:[%s4012_s4 + $0xa8] sm:$0xff]  }
  0xcc   : > { %2859 = vmatprep.subr.bf16.mxu1 %v3365_v16  ;;  %v3172_v16 = vld [vmem:[%s3638_s26 + $0x80] ss:$28 sps:$4 sm:$0xff]  }
  0xcd   : > { %1766 = vmatmul.mubr.bf16.gmra.mxu0 %v3168_v4  ;;  %v3199_v4 = vld [vmem:[%s3662_s28 + $0x84] ss:$28 sps:$4 sm:$0xff]  }
  0xce   : > { %3003 = vmatmul.mubr.msk.bf16.gmra.mxu1 %vm863_vm1, %v3169_v10  ;;  %2890 = vmatpush3.bf16.msra.mxu0 %v3211_v14 }
  0xcf   : > { %2860 = vmatpush3.bf16.msra.mxu1 %v3377_v18  ;;  %2891 = vmatprep.subr.bf16.mxu0 %v3345_v13  ;;  %v3178_v18 = vld [vmem:[%s3662_s28 + $0xc] ss:$28 sps:$4 sm:$0xff]   ;;  %v3173_v13 = vld [vmem:[%s3662_s28] ss:$28 sps:$4 sm:$0xff]  }
  0xd0   : > { %2861 = vmatprep.subr.bf16.mxu1 %v3389_v20  ;;  %1773 = vmatprep.mubr.bf16.mxu0 %v3170_v6  ;;  %v3182_v20 = vld [vmem:[%s3662_s28 + $0x44] ss:$28 sps:$4 sm:$0xff]  }
  0xd1   : > { %2015 = vmatprep.mubr.bf16.mxu1 %v3175_v7 }
  0xd2   : > { %2892 = vmatpush3.bf16.msra.mxu0 %v3359_v15  ;;  %v3179_v15 = vld [vmem:[%s3662_s28 + $0x3c] ss:$28 sps:$4 sm:$0xff]  }
  0xd3   : > { %2862 = vmatpush3.bf16.msra.mxu1 %v3403_v22  ;;  %2893 = vmatprep.subr.bf16.mxu0 %v3371_v17  ;;  %v3176_v17 = vld [vmem:[%s3662_s28 + $0x8] ss:$28 sps:$4 sm:$0xff]   ;;  %v3184_v22 = vld [vmem:[%s3662_s28 + $0x40] ss:$28 sps:$4 sm:$0xff]  }
  0xd4   : > { %2863 = vmatprep.subr.bf16.mxu1 %v3415_v24  ;;  %v3188_v24 = vld [vmem:[%s3662_s28 + $0x7c] ss:$28 sps:$4 sm:$0xff]  }
  0xd5   : > { %1774 = vmatmul.mubr.bf16.gmra.mxu0 %v3172_v16 }
  0xd6   : > { %2894 = vmatpush3.bf16.msra.mxu0 %v3383_v19  ;;  %2072 = vmatprep.mubr.bf16.mxu0 %v3178_v18  ;;  %v3181_v19 = vld [vmem:[%s3662_s28 + $0x38] ss:$28 sps:$4 sm:$0xff]   ;;  %v3201_v18 = vld [vmem:[%s3662_s28 + $0x80] ss:$28 sps:$4 sm:$0xff]  }
  0xd7   : > { %2864 = vmatpush3.bf16.msra.mxu1 %v3430_v26  ;;  %2895 = vmatprep.subr.bf16.mxu0 %v3395_v21  ;;  %v3185_v21 = vld [vmem:[%s3662_s28 + $0x74] ss:$28 sps:$4 sm:$0xff]  }
  0xd8   : > { %2865 = vmatprep.subr.bf16.mxu1 %v3442_v28 }
  0xda   : > { %2896 = vmatpush3.bf16.msra.mxu0 %v3409_v23  ;;  %v3187_v23 = vld [vmem:[%s3662_s28 + $0x70] ss:$28 sps:$4 sm:$0xff]  }
  0xdb   : > { %2866 = vmatpush3.bf16.msra.mxu1 %v3460_v30  ;;  %2897 = vmatprep.subr.bf16.mxu0 %v3421_v25  ;;  %v3193_v25 = vld [vmem:[%s3662_s28 + $0x14] ss:$28 sps:$4 sm:$0xff]  }
  0xdc   : > { %2919 = vmatprep.subr.bf16.mxu1 %v3478_v37 }
  0xde   : > { %2016 = vmatmul.mubr.bf16.vlgmr.msra.gmra.mxu1 %v3173_v13  ;;  %2898 = vmatpush3.bf16.msra.mxu0 %v3436_v27  ;;  %v3202_v13 = vld [vmem:[%s3662_s28 + $0x88] ss:$28 sps:$4 sm:$0xff]  }
  0xdf   : > { %2920 = vmatpush3.bf16.msra.mxu1 %v3483_v38  ;;  %2899 = vmatprep.subr.bf16.mxu0 %v3448_v29 }
  0xe0   : > { %2921 = vmatprep.subr.bf16.mxu1 %v3495_v40  ;;  %2023 = vmatprep.mubr.bf16.mxu1 %v3179_v15 }
  0xe2   : > { %2900 = vmatpush3.bf16.msra.mxu0 %v3466_v31 }
  0xe3   : > { %2922 = vmatpush3.bf16.msra.mxu1 %v3501_v41  ;;  %3006 = vmatprep.subr.bf16.mxu0 %v3220_v36 }
  0xe4   : > { %2923 = vmatprep.subr.bf16.mxu1 %v3513_v46 }
  0xe5   : > { %2073 = vmatmul.mubr.bf16.vlgmr.msra.gmra.mxu0 %v3176_v17 }
  0xe6   : > { %2024 = vmatmul.mubr.bf16.gmra.mxu1 %v3181_v19  ;;  %3007 = vmatpush3.bf16.msra.mxu0 %v3489_v39  ;;  %v3190_v39 = vld [vmem:[%s3662_s28 + $0x78] ss:$28 sps:$4 sm:$0xff]  }
  0xe7   : > { %2924 = vmatpush3.bf16.msra.mxu1 %v3518_v47  ;;  %2080 = vmatprep.mubr.bf16.mxu0 %v3182_v20 }
  0xe8   : > { %2925 = vmatprep.subr.bf16.mxu1 %v3524_v48  ;;  %2031 = vmatprep.mubr.bf16.mxu1 %v3185_v21 }
  0xe9   : > { %3008 = vmatprep.subr.bf16.mxu0 %v3220_v36 }
  0xea   : > { %3009 = vmatpush3.bf16.msra.mxu0 %v3536_v50 }
  0xeb   : > { %2926 = vmatpush3.bf16.msra.mxu1 %v3530_v49 }
  0xec   : > { %2927 = vmatprep.subr.bf16.mxu1 %v3547_v55 }
  0xed   : > { %v2546_v26 = vpop.f32.mrf.mxu0  ;;  %2081 = vmatmul.mubr.bf16.gmra.mxu0 %v3184_v22 }
  0xee   : > { %v2580_v27 = vpop.f32.mrf.mxu1  ;;  %2032 = vmatmul.mubr.bf16.gmra.mxu1 %v3187_v23  ;;  %2088 = vmatprep.mubr.bf16.mxu0 %v3188_v24 }
  0xef   : > { %2928 = vmatpush3.bf16.msra.mxu1 %v3552_v56  ;;  %v2547_v28 = vpop.f32.mrf.mxu0  ;;  %2129 = vmatprep.mubr.bf16.mxu1 %v3193_v25 }
  0xf0   : > { %v2548_v29 = vadd.f32 %v2547_v28, %v2546_v26  ;;  %v2581_v30 = vpop.f32.mrf.mxu1  ;;  %2929 = vmatprep.subr.bf16.mxu1 %v3559_v57 }
  0xf1   : > { %v2582_v31 = vadd.f32 %v2581_v30, %v2580_v27  ;;  %v2549_v37 = vpop.f32.mrf.mxu0 }
  0xf2   : > { %v2583_v38 = vpop.f32.mrf.mxu1 }
  0xf3   : > { %v3870_v40 = vadd.f32 %v2582_v31, %v2548_v29  ;;  %2930 = vmatpush3.bf16.msra.mxu1 %v3565_v58  ;;  %v2550_v41 = vpop.f32.mrf.mxu0 }
  0xf4   : > { %v2551_v46 = vadd.f32 %v2550_v41, %v2549_v37  ;;  %v2584_v47 = vpop.f32.mrf.mxu1  ;;  %2931 = vmatprep.subr.bf16.mxu1 %v3573_v59 }
  0xf5   : > { %v2585_v48 = vadd.f32 %v2584_v47, %v2583_v38  ;;  %v2552_v49 = vpop.f32.mrf.mxu0  ;;  %2089 = vmatmul.mubr.bf16.gmra.mxu0 %v3190_v39 }
  0xf6   : > { %v2586_v50 = vpop.f32.mrf.mxu1  ;;  %3010 = vmatprep.mubr.msk.bf16.mxu0 %vm3221_vm0, %v3220_v36 }
  0xf7   : > { %v3874_v55 = vadd.f32 %v2585_v48, %v2551_v46  ;;  %2932 = vmatpush3.bf16.msra.mxu1 %v3580_v61  ;;  %v2553_v56 = vpop.f32.mrf.mxu0 }
  0xf8   : > { %v2554_v57 = vadd.f32 %v2553_v56, %v2552_v49  ;;  %v2587_v58 = vpop.f32.mrf.mxu1  ;;  %2933 = vmatprep.subr.bf16.mxu1 %v3586_v62 }
  0xf9   : > { %v2588_v9 = vadd.f32 %v2587_v58, %v2586_v50  ;;  %v2555_v59 = vpop.f32.mrf.mxu0 }
  0xfa   : > { %v2589_v11 = vpop.f32.mrf.mxu1 }
  0xfb   : > { %v973_v33 = vadd.f32 %v2588_v9, %v2554_v57  ;;  %2934 = vmatpush3.bf16.msra.mxu1 %v3595_v32  ;;  %v2556_v34 = vpop.f32.mrf.mxu0 }
  0xfc   : > { %v2557_v42 = vadd.f32 %v2556_v34, %v2555_v59  ;;  %v2590_v61 = vpop.f32.mrf.mxu1 }
  0xfd   : > { %v2591_v43 = vadd.f32 %v2590_v61, %v2589_v11  ;;  %v2558_v44 = vpop.f32.mrf.mxu0  ;;  %3011 = vmatmul.mubr.msk.bf16.vlgmr.msra.gmra.mxu0 %vm863_vm1, %v3194_v63 }
  0xfe   : > { %2130 = vmatmul.mubr.bf16.vlgmr.msra.gmra.mxu1 %v3191_v60  ;;  %v2592_v62 = vpop.f32.mrf.mxu1  ;;  %3014 = vmatprep.mubr.msk.bf16.mxu0 %vm3221_vm0, %v3220_v36 }
  0xff   : > { %v976_v0 = vadd.f32 %v2591_v43, %v2557_v42  ;;  %v2559_v45 = vpop.f32.mrf.mxu0  ;;  %2137 = vmatprep.mubr.bf16.mxu1 %v3195_v35 }
 0x100   : > { %v2560_v32 = vadd.f32 %v2559_v45, %v2558_v44  ;;  %v2593_v51 = vpop.f32.mrf.mxu1 }
 0x101   : > { %v2594_v52 = vadd.f32 %v2593_v51, %v2592_v62  ;;  %v2561_v53 = vpop.f32.mrf.mxu0 }
 0x102   : > { %v2595_v54 = vpop.f32.mrf.mxu1 }
 0x103   : > { %v981_v3 = vadd.f32 %v2594_v52, %v2560_v32  ;;  %v2562_v8 = vpop.f32.mrf.mxu0 }
 0x104   : > { %v2563_v10 = vadd.f32 %v2562_v8, %v2561_v53  ;;  %v2596_v5 = vpop.f32.mrf.mxu1 }
 0x105   : > { %v2597_v12 = vadd.f32 %v2596_v5, %v2595_v54  ;;  %3015 = vmatmul.mubr.msk.bf16.gmra.mxu0 %vm863_vm1, %v3198_v2 }
 0x106   : > { %2138 = vmatmul.mubr.bf16.gmra.mxu1 %v3197_v1  ;;  %v1078_v6 = vpop.f32.mrf.mxu1  ;;  %3018 = vmatprep.mubr.msk.bf16.mxu0 %vm3221_vm0, %v3220_v36 }
 0x107   : > { %v984_v7 = vadd.f32 %v2597_v12, %v2563_v10  ;;  %2145 = vmatprep.mubr.bf16.mxu1 %v3199_v4 }
 0x108   : > { %v2964_v14 = vpop.f32.mrf.mxu1 }
 0x10a   : > { %v1081_v16 = vpop.f32.mrf.mxu1 }
 0x10c   : > { %v2965_v15 = vpop.f32.mrf.mxu1 }
 0x10d   : > { %3019 = vmatmul.mubr.msk.bf16.gmra.mxu0 %vm863_vm1, %v3202_v13  ;;  %v2614_v17 = vpop.f32.mrf.mxu0 }
 0x10e   : > { %2146 = vmatmul.mubr.bf16.gmra.mxu1 %v3201_v18  ;;  %v1086_v19 = vpop.f32.mrf.mxu1 }
 0x10f   : > { %v2615_v20 = vpop.f32.mrf.mxu0 }
 0x110   : > { %v2968_v21 = vpop.f32.mrf.mxu1  ;;  %v2616_v22 = vadd.f32 %v2615_v20, %v2614_v17 }
 0x111   : > { %v2617_v23 = vpop.f32.mrf.mxu0 }
 0x112   : > { %v1089_v24 = vpop.f32.mrf.mxu1  ;;  %v1022_v25 = vadd.f32 %v2616_v22, %v3870_v40 }
 0x113   : > { %v2618_v26 = vpop.f32.mrf.mxu0 }
 0x114   : > { %v2969_v27 = vpop.f32.mrf.mxu1  ;;  %v3897_v36 = vadd.f32 %v1078_v6, %v1022_v25  ;;  %v2619_v28 = vadd.f32 %v2618_v26, %v2617_v23 }
 0x115   : > { %v2620_v29 = vpop.f32.mrf.mxu0 }
 0x116   : > { %v1094_v30 = vpop.f32.mrf.mxu1  ;;  %v1025_v31 = vadd.f32 %v2619_v28, %v3874_v55 }
 0x117   : > { %v2621_v37 = vpop.f32.mrf.mxu0 }
 0x118   : > { %v2972_v38 = vpop.f32.mrf.mxu1  ;;  %v3900_v39 = vadd.f32 %v1081_v16, %v1025_v31  ;;  %v2622_v41 = vadd.f32 %v2621_v37, %v2620_v29 }
 0x119   : > { %v2623_v46 = vpop.f32.mrf.mxu0 }
 0x11a   : > { %v1097_v47 = vpop.f32.mrf.mxu1  ;;  %v1030_v48 = vadd.f32 %v2622_v41, %v973_v33 }
 0x11b   : > { %v2624_v49 = vpop.f32.mrf.mxu0 }
 0x11c   : > { %v2973_v50 = vpop.f32.mrf.mxu1  ;;  %v2625_v40 = vadd.f32 %v2624_v49, %v2623_v46  ;;  %v3902_v56 = vadd.f32 %v1086_v19, %v1030_v48 }
 0x11d   : > { %v2626_v57 = vpop.f32.mrf.mxu0 }
 0x11e   : > { %v1033_v58 = vadd.f32 %v2625_v40, %v976_v0 }
 0x11f   : > { %v2627_v9 = vpop.f32.mrf.mxu0 }
 0x120   : > { %v2628_v59 = vadd.f32 %v2627_v9, %v2626_v57  ;;  %v3904_v11 = vadd.f32 %v1089_v24, %v1033_v58 }
 0x121   : > { %v2629_v55 = vpop.f32.mrf.mxu0 }
 0x122   : > { %v1038_v60 = vadd.f32 %v2628_v59, %v981_v3 }
 0x123   : > { %v2630_v63 = vpop.f32.mrf.mxu0 }
 0x124   : > { %v2631_v34 = vadd.f32 %v2630_v63, %v2629_v55  ;;  %v3906_v35 = vadd.f32 %v1094_v30, %v1038_v60 }
 0x126   : > { %v2653_v42 = vpop.f32.mrf.mxu1  ;;  %v1041_v61 = vadd.f32 %v2631_v34, %v984_v7 }
 0x128   : > { %v2654_v33 = vpop.f32.mrf.mxu1  ;;  %v3908_v44 = vadd.f32 %v1097_v47, %v1041_v61 }
 0x129   : > { %v2655_v43 = vadd.f32 %v2654_v33, %v2653_v42 }
 0x12a   : > { %v2656_v62 = vpop.f32.mrf.mxu1 }
 0x12c   : > { %v2657_v45 = vpop.f32.mrf.mxu1 }
 0x12d   : > { %v2658_v32 = vadd.f32 %v2657_v45, %v2656_v62  ;;  %v2687_v0 = vpop.f32.mrf.mxu0 }
 0x12e   : > { %v2659_v51 = vpop.f32.mrf.mxu1 }
 0x12f   : > { %v2688_v52 = vpop.f32.mrf.mxu0 }
 0x130   : > { %v2660_v53 = vpop.f32.mrf.mxu1  ;;  %v2689_v54 = vadd.f32 %v2688_v52, %v2687_v0 }
 0x131   : > { %v2661_v1 = vadd.f32 %v2660_v53, %v2659_v51  ;;  %v2690_v2 = vpop.f32.mrf.mxu0 }
 0x132   : > { %v2662_v3 = vpop.f32.mrf.mxu1  ;;  %v1331_v8 = vadd.f32 %v2689_v54, %v2655_v43 }
 0x133   : > { %v2691_v4 = vpop.f32.mrf.mxu0 }
 0x134   : > { %v2663_v10 = vpop.f32.mrf.mxu1  ;;  %v2692_v5 = vadd.f32 %v2691_v4, %v2690_v2 }
 0x135   : > { %v2664_v12 = vadd.f32 %v2663_v10, %v2662_v3  ;;  %v2693_v6 = vpop.f32.mrf.mxu0 }
 0x136   : > { %v2665_v7 = vpop.f32.mrf.mxu1  ;;  %v1334_v14 = vadd.f32 %v2692_v5, %v2658_v32 }
 0x137   : > { %v2694_v16 = vpop.f32.mrf.mxu0 }
 0x138   : > { %v2666_v18 = vpop.f32.mrf.mxu1  ;;  %v2695_v13 = vadd.f32 %v2694_v16, %v2693_v6 }
 0x139   : > { %v2667_v15 = vadd.f32 %v2666_v18, %v2665_v7  ;;  %v2696_v17 = vpop.f32.mrf.mxu0 }
 0x13a   : > { %v2668_v19 = vpop.f32.mrf.mxu1  ;;  %v1339_v20 = vadd.f32 %v2695_v13, %v2661_v1 }
 0x13b   : > { %v2697_v21 = vpop.f32.mrf.mxu0 }
 0x13c   : > { %v2669_v22 = vpop.f32.mrf.mxu1  ;;  %v2698_v23 = vadd.f32 %v2697_v21, %v2696_v17 }
 0x13d   : > { %v2670_v24 = vadd.f32 %v2669_v22, %v2668_v19  ;;  %v2699_v25 = vpop.f32.mrf.mxu0 }
 0x13e   : > { %v1342_v26 = vadd.f32 %v2698_v23, %v2664_v12 }
 0x13f   : > { %v2700_v27 = vpop.f32.mrf.mxu0 }
 0x140   : > { %v2701_v28 = vadd.f32 %v2700_v27, %v2699_v25 }
 0x141   : > { %v2702_v29 = vpop.f32.mrf.mxu0 }
 0x142   : > { %v1347_v30 = vadd.f32 %v2701_v28, %v2667_v15 }
 0x143   : > { %v2703_v31 = vpop.f32.mrf.mxu0 }
 0x144   : > { %v2704_v37 = vadd.f32 %v2703_v31, %v2702_v29 }
 0x145   : > { %v1444_v41 = vpop.f32.mrf.mxu0 }
 0x146   : > { %v2721_v38 = vpop.f32.mrf.mxu1  ;;  %v1350_v46 = vadd.f32 %v2704_v37, %v2670_v24 }
 0x147   : > { %v2980_v48 = vpop.f32.mrf.mxu0 }
 0x148   : > { %v2722_v47 = vpop.f32.mrf.mxu1 }
 0x149   : > { %v2723_v49 = vadd.f32 %v2722_v47, %v2721_v38  ;;  %v1447_v40 = vpop.f32.mrf.mxu0 }
 0x14a   : > { %v2724_v50 = vpop.f32.mrf.mxu1 }
 0x14b   : > { %v1388_v57 = vadd.f32 %v2723_v49, %v1331_v8  ;;  %v2981_v9 = vpop.f32.mrf.mxu0 }
 0x14c   : > { %v2725_v58 = vpop.f32.mrf.mxu1 }
 0x14d   : > { %v3910_v59 = vadd.f32 %v1444_v41, %v1388_v57  ;;  %v2726_v55 = vadd.f32 %v2725_v58, %v2724_v50  ;;  %v1452_v63 = vpop.f32.mrf.mxu0 }
 0x14e   : > { %v2727_v60 = vpop.f32.mrf.mxu1 }
 0x14f   : > { %v1467_v34 = vmax.f32 %v3897_v36, %v3910_v59  ;;  %v1391_v42 = vadd.f32 %v2726_v55, %v1334_v14  ;;  %v2984_v33 = vpop.f32.mrf.mxu0 }
 0x150   : > { %v2728_v61 = vpop.f32.mrf.mxu1 }
 0x151   : > { %v3914_v43 = vadd.f32 %v1447_v40, %v1391_v42  ;;  %v2729_v62 = vadd.f32 %v2728_v61, %v2727_v60  ;;  %v1455_v32 = vpop.f32.mrf.mxu0 }
 0x152   : > { %v2730_v45 = vpop.f32.mrf.mxu1 }
 0x153   : > { %v1468_v0 = vmax.f32 %v3900_v39, %v3914_v43  ;;  %v1396_v51 = vadd.f32 %v2729_v62, %v1339_v20  ;;  %v2985_v53 = vpop.f32.mrf.mxu0 }
 0x154   : > { %v2731_v52 = vpop.f32.mrf.mxu1 }
 0x155   : > { %v2732_v54 = vadd.f32 %v2731_v52, %v2730_v45  ;;  %v3918_v1 = vadd.f32 %v1452_v63, %v1396_v51  ;;  %v1460_v3 = vpop.f32.mrf.mxu0 }
 0x156   : > { %v2733_v2 = vpop.f32.mrf.mxu1 }
 0x157   : > { %v1469_v8 = vmax.f32 %v3902_v56, %v3918_v1  ;;  %v1399_v4 = vadd.f32 %v2732_v54, %v1342_v26  ;;  %v2988_v5 = vpop.f32.mrf.mxu0 }
 0x158   : > { %v2734_v10 = vpop.f32.mrf.mxu1 }
 0x159   : > { %v2735_v12 = vadd.f32 %v2734_v10, %v2733_v2  ;;  %v3922_v6 = vadd.f32 %v1455_v32, %v1399_v4  ;;  %v1463_v14 = vpop.f32.mrf.mxu0 }
 0x15a   : > { %v2736_v7 = vpop.f32.mrf.mxu1 }
 0x15b   : > { %v1470_v16 = vmax.f32 %v3904_v11, %v3922_v6  ;;  %v1404_v18 = vadd.f32 %v2735_v12, %v1347_v30  ;;  %v2989_v15 = vpop.f32.mrf.mxu0 }
 0x15c   : > { %v2737_v13 = vpop.f32.mrf.mxu1 }
 0x15d   : > { %v2738_v17 = vadd.f32 %v2737_v13, %v2736_v7  ;;  %v3926_v19 = vadd.f32 %v1460_v3, %v1404_v18 }
 0x15f   : > { %v1471_v20 = vmax.f32 %v3906_v35, %v3926_v19  ;;  %v1407_v21 = vadd.f32 %v2738_v17, %v1350_v46 }
 0x161   : > { %v3930_v22 = vadd.f32 %v1463_v14, %v1407_v21 }
 0x163   : > { %v1472_v23 = vmax.f32 %v3908_v44, %v3930_v22 }
 0x165   : > { %v2760_v24 = vpop.f32.mrf.mxu0 }
 0x166   : > { %v2794_v25 = vpop.f32.mrf.mxu1 }
 0x167   : > { %v2761_v26 = vpop.f32.mrf.mxu0 }
 0x168   : > { %v2795_v27 = vpop.f32.mrf.mxu1  ;;  %v2762_v28 = vadd.f32 %v2761_v26, %v2760_v24 }
 0x169   : > { %v2796_v29 = vadd.f32 %v2795_v27, %v2794_v25  ;;  %v2763_v30 = vpop.f32.mrf.mxu0 }
 0x16a   : > { %v2797_v31 = vpop.f32.mrf.mxu1 }
 0x16b   : > { %v1703_v37 = vadd.f32 %v2796_v29, %v2762_v28  ;;  %v2764_v38 = vpop.f32.mrf.mxu0 }
 0x16c   : > { %v2798_v41 = vpop.f32.mrf.mxu1  ;;  %v2765_v47 = vadd.f32 %v2764_v38, %v2763_v30 }
 0x16d   : > { %v2799_v48 = vadd.f32 %v2798_v41, %v2797_v31  ;;  %v2766_v49 = vpop.f32.mrf.mxu0 }
 0x16e   : > { %v2800_v46 = vpop.f32.mrf.mxu1 }
 0x16f   : > { %v1706_v50 = vadd.f32 %v2799_v48, %v2765_v47  ;;  %v2767_v40 = vpop.f32.mrf.mxu0 }
 0x170   : > { %v2801_v57 = vpop.f32.mrf.mxu1  ;;  %v2768_v58 = vadd.f32 %v2767_v40, %v2766_v49 }
 0x171   : > { %v2802_v9 = vadd.f32 %v2801_v57, %v2800_v46  ;;  %v2769_v55 = vpop.f32.mrf.mxu0 }
 0x172   : > { %v2803_v60 = vpop.f32.mrf.mxu1 }
 0x173   : > { %v1711_v63 = vadd.f32 %v2802_v9, %v2768_v58  ;;  %v2770_v42 = vpop.f32.mrf.mxu0 }
 0x174   : > { %v2804_v61 = vpop.f32.mrf.mxu1  ;;  %v2771_v33 = vadd.f32 %v2770_v42, %v2769_v55 }
 0x175   : > { %v2805_v62 = vadd.f32 %v2804_v61, %v2803_v60  ;;  %v2772_v45 = vpop.f32.mrf.mxu0 }
 0x176   : > { %v2806_v32 = vpop.f32.mrf.mxu1 }
 0x177   : > { %v1714_v51 = vadd.f32 %v2805_v62, %v2771_v33  ;;  %v2773_v52 = vpop.f32.mrf.mxu0 }
 0x178   : > { %v2807_v53 = vpop.f32.mrf.mxu1  ;;  %v2774_v54 = vadd.f32 %v2773_v52, %v2772_v45 }
 0x179   : > { %v2808_v2 = vadd.f32 %v2807_v53, %v2806_v32  ;;  %v2775_v3 = vpop.f32.mrf.mxu0 }
 0x17a   : > { %v2809_v4 = vpop.f32.mrf.mxu1 }
 0x17b   : > { %v1719_v10 = vadd.f32 %v2808_v2, %v2774_v54  ;;  %v2776_v5 = vpop.f32.mrf.mxu0 }
 0x17c   : > { %v2810_v12 = vpop.f32.mrf.mxu1  ;;  %v2777_v7 = vadd.f32 %v2776_v5, %v2775_v3 }
 0x17d   : > { %v2811_v14 = vadd.f32 %v2810_v12, %v2809_v4 }
 0x17e   : > { %v1816_v18 = vpop.f32.mrf.mxu1 }
 0x17f   : > { %v1722_v13 = vadd.f32 %v2811_v14, %v2777_v7 }
 0x180   : > { %v2996_v15 = vpop.f32.mrf.mxu1 }
 0x182   : > { %v1819_v17 = vpop.f32.mrf.mxu1 }
 0x184   : > { %v2997_v21 = vpop.f32.mrf.mxu1 }
 0x185   : > { %v2828_v24 = vpop.f32.mrf.mxu0 }
 0x186   : > { %v1824_v25 = vpop.f32.mrf.mxu1 }
 0x187   : > { %v2829_v26 = vpop.f32.mrf.mxu0 }
 0x188   : > { %v3000_v27 = vpop.f32.mrf.mxu1  ;;  %v2830_v28 = vadd.f32 %v2829_v26, %v2828_v24 }
 0x189   : > { %v2831_v29 = vpop.f32.mrf.mxu0 }
 0x18a   : > { %v1827_v30 = vpop.f32.mrf.mxu1  ;;  %v1760_v31 = vadd.f32 %v2830_v28, %v1703_v37 }
 0x18b   : > { %v2832_v38 = vpop.f32.mrf.mxu0 }
 0x18c   : > { %v3001_v41 = vpop.f32.mrf.mxu1  ;;  %v1817_v47 = vadd.f32 %v1816_v18, %v1760_v31  ;;  %v2833_v48 = vadd.f32 %v2832_v38, %v2831_v29 }
 0x18d   : > { %v2834_v49 = vpop.f32.mrf.mxu0 }
 0x18e   : > { %v1832_v46 = vpop.f32.mrf.mxu1  ;;  %v3937_v40 = vmax.f32 %v1467_v34, %v1817_v47  ;;  %v1763_v57 = vadd.f32 %v2833_v48, %v1706_v50 }
 0x18f   : > { %v2835_v58 = vpop.f32.mrf.mxu0 }
 0x190   : > { %v3004_v9 = vpop.f32.mrf.mxu1  ;;  %v1820_v55 = vadd.f32 %v1819_v17, %v1763_v57  ;;  %v2836_v60 = vadd.f32 %v2835_v58, %v2834_v49 }
 0x191   : > { %v2837_v42 = vpop.f32.mrf.mxu0 }
 0x192   : > { %v1835_v61 = vpop.f32.mrf.mxu1  ;;  %v3942_v37 = vmax.f32 %v1468_v0, %v1820_v55  ;;  %v1768_v33 = vadd.f32 %v2836_v60, %v1711_v63 }
 0x193   : > { %v2838_v62 = vpop.f32.mrf.mxu0 }
 0x194   : > { %v3005_v45 = vpop.f32.mrf.mxu1  ;;  %v1825_v32 = vadd.f32 %v1824_v25, %v1768_v33  ;;  %v2839_v52 = vadd.f32 %v2838_v62, %v2837_v42 }
 0x195   : > { %v2840_v36 = vpop.f32.mrf.mxu0  ;;  %v3971_v45 = vld [vmem:[%s4013_s5] ss:$0 sm:$0xff] }
 0x196   : > { %v3947_v59 = vmax.f32 %v1469_v8, %v1825_v32  ;;  %v1771_v34 = vadd.f32 %v2839_v52, %v1714_v51 }
 0x197   : > { %v2841_v50 = vpop.f32.mrf.mxu0 }
 0x198   : > { %v1828_v53 = vadd.f32 %v1827_v30, %v1771_v34  ;;  %v2842_v54 = vadd.f32 %v2841_v50, %v2840_v36 }
 0x199   : > { %v2843_v2 = vpop.f32.mrf.mxu0 }
 0x19a   : > { %v3952_v39 = vmax.f32 %v1470_v16, %v1828_v53  ;;  %v1776_v43 = vadd.f32 %v2842_v54, %v1719_v10 }
 0x19b   : > { %v2844_v0 = vpop.f32.mrf.mxu0 }
 0x19c   : > { %v1833_v63 = vadd.f32 %v1832_v46, %v1776_v43  ;;  %v2845_v3 = vadd.f32 %v2844_v0, %v2843_v2 }
 0x19e   : > { %v2867_v4 = vpop.f32.mrf.mxu1  ;;  %v3957_v56 = vmax.f32 %v1471_v20, %v1833_v63  ;;  %v1779_v1 = vadd.f32 %v2845_v3, %v1722_v13 }
 0x1a0   : > { %v2868_v8 = vpop.f32.mrf.mxu1  ;;  %v1836_v51 = vadd.f32 %v1835_v61, %v1779_v1 }
 0x1a1   : > { %v2869_v31 = vadd.f32 %v2868_v8, %v2867_v4 }
 0x1a2   : > { %v2870_v5 = vpop.f32.mrf.mxu1  ;;  %v3962_v11 = vmax.f32 %v1472_v23, %v1836_v51 }
 0x1a4   : > { %v2871_v6 = vpop.f32.mrf.mxu1 }
 0x1a5   : > { %v2901_v16 = vpop.f32.mrf.mxu0  ;;  %v2872_v58 = vadd.f32 %v2871_v6, %v2870_v5 }
 0x1a6   : > { %v2873_v10 = vpop.f32.mrf.mxu1 }
 0x1a7   : > { %v2902_v12 = vpop.f32.mrf.mxu0 }
 0x1a8   : > { %v2874_v7 = vpop.f32.mrf.mxu1  ;;  %v2903_v28 = vadd.f32 %v2902_v12, %v2901_v16 }
 0x1a9   : > { %v2904_v14 = vpop.f32.mrf.mxu0  ;;  %v2875_v36 = vadd.f32 %v2874_v7, %v2873_v10 }
 0x1aa   : > { %v2876_v18 = vpop.f32.mrf.mxu1  ;;  %v2075_v47 = vadd.f32 %v2903_v28, %v2869_v31 }
 0x1ab   : > { %v2905_v15 = vpop.f32.mrf.mxu0 }
 0x1ac   : > { %v2877_v35 = vpop.f32.mrf.mxu1  ;;  %v2906_v48 = vadd.f32 %v2905_v15, %v2904_v14 }
 0x1ad   : > { %v2907_v19 = vpop.f32.mrf.mxu0  ;;  %v2878_v4 = vadd.f32 %v2877_v35, %v2876_v18 }
 0x1ae   : > { %v2879_v20 = vpop.f32.mrf.mxu1  ;;  %v2078_v42 = vadd.f32 %v2906_v48, %v2872_v58 }
 0x1af   : > { %v2908_v13 = vpop.f32.mrf.mxu0 }
 0x1b0   : > { %v2880_v21 = vpop.f32.mrf.mxu1  ;;  %v2909_v61 = vadd.f32 %v2908_v13, %v2907_v19 }
 0x1b1   : > { %v2910_v17 = vpop.f32.mrf.mxu0  ;;  %v2881_v35 = vadd.f32 %v2880_v21, %v2879_v20 }
 0x1b2   : > { %v3964_v26 = vpop.f32.mrf.mxu1  ;;  %v2083_v43 = vadd.f32 %v2909_v61, %v2875_v36 }
 0x1b3   : > { %v2911_v24 = vpop.f32.mrf.mxu0 }
 0x1b4   : > { %v3966_v23 = vpop.f32.mrf.mxu1  ;;  %v2912_v53 = vadd.f32 %v2911_v24, %v2910_v17 }
 0x1b5   : > { %v2913_v25 = vpop.f32.mrf.mxu0  ;;  %v2884_v20 = vadd.f32 %v3966_v23, %v3964_v26 }
 0x1b6   : > { %v2086_v16 = vadd.f32 %v2912_v53, %v2878_v4 }
 0x1b7   : > { %v2914_v44 = vpop.f32.mrf.mxu0 }
 0x1b8   : > { %v2915_v10 = vadd.f32 %v2914_v44, %v2913_v25 }
 0x1b9   : > { %v2916_v22 = vpop.f32.mrf.mxu0 }
 0x1ba   : > { %v2091_v25 = vadd.f32 %v2915_v10, %v2881_v35 }
 0x1bb   : > { %v2917_v27 = vpop.f32.mrf.mxu0 }
 0x1bc   : > { %v2918_v44 = vadd.f32 %v2917_v27, %v2916_v22 }
 0x1bd   : > { %v2188_v30 = vpop.f32.mrf.mxu0 }
 0x1be   : > { %v2935_v29 = vpop.f32.mrf.mxu1  ;;  %v2094_v27 = vadd.f32 %v2918_v44, %v2884_v20 }
 0x1bf   : > { %v3012_v41 = vpop.f32.mrf.mxu0 }
 0x1c0   : > { %v2936_v38 = vpop.f32.mrf.mxu1 }
 0x1c1   : > { %v2937_v49 = vadd.f32 %v2936_v38, %v2935_v29  ;;  %v2191_v57 = vpop.f32.mrf.mxu0 }
 0x1c2   : > { %v2938_v46 = vpop.f32.mrf.mxu1 }
 0x1c3   : > { %v2132_v9 = vadd.f32 %v2937_v49, %v2075_v47  ;;  %v3013_v60 = vpop.f32.mrf.mxu0 }
 0x1c4   : > { %v2939_v55 = vpop.f32.mrf.mxu1 }
 0x1c5   : > { %v2189_v33 = vadd.f32 %v2188_v30, %v2132_v9  ;;  %v2940_v62 = vadd.f32 %v2939_v55, %v2938_v46  ;;  %v2196_v52 = vpop.f32.mrf.mxu0 }
 0x1c6   : > { %v2941_v32 = vpop.f32.mrf.mxu1 }
 0x1c7   : > { %v2211_v34 = vmax.f32 %v3937_v40, %v2189_v33  ;;  %v2135_v50 = vadd.f32 %v2940_v62, %v2078_v42  ;;  %v3016_v2 = vpop.f32.mrf.mxu0 }
 0x1c8   : > { %v2942_v54 = vpop.f32.mrf.mxu1 }
 0x1c9   : > { %v2224_v0 = vadd.f32 %v3971_v45, %v2211_v34  ;;  %v2192_v63 = vadd.f32 %v2191_v57, %v2135_v50  ;;  %v2943_v3 = vadd.f32 %v2942_v54, %v2941_v32  ;;  %v2199_v8 = vpop.f32.mrf.mxu0 }
 0x1ca   : > { %v2944_v1 = vpop.f32.mrf.mxu1 }
 0x1cb   : > { %v2230_v51 = vmax.f32 %v2224_v0, 0.0  ;;  %v2212_v5 = vmax.f32 %v3942_v37, %v2192_v63  ;;  %v2140_v6 = vadd.f32 %v2943_v3, %v2083_v43  ;;  %v3017_v12 = vpop.f32.mrf.mxu0 }
 0x1cc   : > { %v2945_v40 = vpop.f32.mrf.mxu1 }
 0x1cd   : > { %v2524_v7 = vpack.c.bf16 %v2230_v51, %v2230_v51  ;;  %v2225_v14 = vadd.f32 %v3971_v45, %v2212_v5  ;;  %v2197_v18 = vadd.f32 %v2196_v52, %v2140_v6  ;;  %v2946_v15 = vadd.f32 %v2945_v40, %v2944_v1  ;;  %v2204_v37 = vpop.f32.mrf.mxu0 }
 0x1ce   : > { %v2947_v19 = vpop.f32.mrf.mxu1 }
 0x1cf   : > { %2261 = vst.msk [vmem:[%s3980_s30] sm:$0xf] %vm2260_vm2, %v2524_v7  ;;  %v2231_v13 = vmax.f32 %v2225_v14, 0.0  ;;  %v2213_v17 = vmax.f32 %v3947_v59, %v2197_v18  ;;  %v2143_v24 = vadd.f32 %v2946_v15, %v2086_v16  ;;  %v3020_v29 = vpop.f32.mrf.mxu0 }
 0x1d0   : > { %v2948_v28 = vpop.f32.mrf.mxu1 }
 0x1d1   : > { %v2525_v30 = vpack.c.bf16 %v2231_v13, %v2231_v13  ;;  %v2226_v31 = vadd.f32 %v3971_v45, %v2213_v17  ;;  %v2200_v38 = vadd.f32 %v2199_v8, %v2143_v24  ;;  %v2949_v41 = vadd.f32 %v2948_v28, %v2947_v19  ;;  %v2207_v47 = vpop.f32.mrf.mxu0 }
 0x1d2   : > { %v2950_v21 = vpop.f32.mrf.mxu1 }
 0x1d3   : > { %2262 = vst.msk [vmem:[%s3980_s30 + $0x4] sm:$0xf] %vm2260_vm2, %v2525_v30  ;;  %v2232_v48 = vmax.f32 %v2226_v31, 0.0  ;;  %v2214_v59 = vmax.f32 %v3952_v39, %v2200_v38  ;;  %v2148_v22 = vadd.f32 %v2949_v41, %v2091_v25  ;;  %v3021_v46 = vpop.f32.mrf.mxu0 }
 0x1d4   : > { %v2951_v49 = vpop.f32.mrf.mxu1 }
 0x1d5   : > { %v2526_v57 = vpack.c.bf16 %v2232_v48, %v2232_v48  ;;  %v2227_v58 = vadd.f32 %v3971_v45, %v2214_v59  ;;  %v2205_v9 = vadd.f32 %v2204_v37, %v2148_v22  ;;  %v2952_v55 = vadd.f32 %v2951_v49, %v2950_v21 }
 0x1d7   : > { %2263 = vst.msk [vmem:[%s3980_s30 + $0x8] sm:$0xf] %vm2260_vm2, %v2526_v57  ;;  %v2233_v26 = vmax.f32 %v2227_v58, 0.0  ;;  %v2215_v23 = vmax.f32 %v3957_v56, %v2205_v9  ;;  %v2151_v60 = vadd.f32 %v2952_v55, %v2094_v27 }
 0x1d9   : > { %v2527_v42 = vpack.c.bf16 %v2233_v26, %v2233_v26  ;;  %v2228_v39 = vadd.f32 %v3971_v45, %v2215_v23  ;;  %v2208_v61 = vadd.f32 %v2207_v47, %v2151_v60 }
 0x1db   : > { %2264 = vst.msk [vmem:[%s3980_s30 + $0xc] sm:$0xf] %vm2260_vm2, %v2527_v42  ;;  %v2234_v33 = vmax.f32 %v2228_v39, 0.0  ;;  %v2216_v62 = vmax.f32 %v3962_v11, %v2208_v61 }
 0x1dd   : > { %v2528_v32 = vpack.c.bf16 %v2234_v33, %v2234_v33  ;;  %v2229_v52 = vadd.f32 %v3971_v45, %v2216_v62 }
 0x1df   : > { %2265 = vst.msk [vmem:[%s3980_s30 + $0x10] sm:$0xf] %vm2260_vm2, %v2528_v32  ;;  %v2235_v36 = vmax.f32 %v2229_v52, 0.0 }
 0x1e1   : > { %v2529_v34 = vpack.c.bf16 %v2235_v36, %v2235_v36 }
 0x1e3   : > { %2266 = vst.msk [vmem:[%s3980_s30 + $0x14] sm:$0xf] %vm2260_vm2, %v2529_v34 }
 0x1e4 PF: > { %s16_s21 = sadd.s32 1, %s3218_s21  }
 0x1e5   : > { %p13_p4 = scmp.ge.s32.totalorder %s16_s21, 4  }
 0x1e7   :  { %15 = sbr.rel (!%p13_p4) target bundleno = 1 (0x1), region = 83 }

// kernel: cnn_forward.5
= control target key start
LH: loop header
LB: loop body
LE: loop exit
PB: predicated region body
PF: predicated region fallthrough
CT: control target
= control target key end

     0   :  { %s15076_s1 = inlined_call_operand.vmem [shape: bf16[2304,1024], index: 1, kind: input, shape index: {}]   ;;  %s15077_s0 = inlined_call_operand.vmem [shape: bf16[16,2304], index: 0, kind: input, shape index: {}]   ;;  %s15078_s2 = inlined_call_operand.vmem [shape: f32[1,1024], index: 2, kind: input, shape index: {}]   ;;  %s15079_s3 = inlined_call_operand.vmem [shape: bf16[1024,128], index: 3, kind: input, shape index: {}]   ;;  %s15080_s4 = inlined_call_operand.vmem [shape: f32[1,128], index: 4, kind: input, shape index: {}]   ;;  %s15081_s5 = inlined_call_operand.vmem [shape: f32[16,128], index: 5, kind: output, shape index: {0}]   ;;  %s15082_s6 = inlined_call_operand.vmem [shape: f32[16,128], index: 6, kind: output, shape index: {1}]  }
   0x1   :  { %v97_v0 = vld [vmem:[%s15076_s1 + $0x1c0] sm:$0xff]  ;;  %v10704_v59 = vld [vmem:[%s15077_s0 + $0xc] ss:$72 sps:$4 sm:$0xff]  }
   0x2   :  { %v101_v1 = vld [vmem:[%s15076_s1 + $0x1e0] sm:$0xff]  ;;  %7160 = vmatprep.mubr.bf16.mxu1 %v10704_v59 }
   0x3   :  { %v225_v2 = vld [vmem:[%s15076_s1 + $0x5c0] sm:$0xff]  ;;  %v9454_v3 = vcombine.high %v97_v0, %v101_v1  ;;  %v9453_v5 = vcombine.low %v97_v0, %v101_v1 }
   0x4   :  { %v229_v4 = vld [vmem:[%s15076_s1 + $0x5e0] sm:$0xff] }
   0x5   :  { %v89_v6 = vld [vmem:[%s15076_s1 + $0x180] sm:$0xff]  ;;  %v9582_v8 = vcombine.high %v225_v2, %v229_v4  ;;  %v9581_v9 = vcombine.low %v225_v2, %v229_v4  ;;  %7085 = vmatprep.subr.bf16.mxu0 %v9454_v3 }
   0x6   :  { %v93_v7 = vld [vmem:[%s15076_s1 + $0x1a0] sm:$0xff]  ;;  %7086 = vmatpush1.bf16.msra.mxu0 %v9453_v5 }
   0x7   :  { %v9446_v10 = vcombine.high %v89_v6, %v93_v7  ;;  %v217_v11 = vld [vmem:[%s15076_s1 + $0x580] sm:$0xff]  ;;  %7128 = vmatprep.subr.bf16.mxu1 %v9582_v8  ;;  %v9445_v18 = vcombine.low %v89_v6, %v93_v7 }
   0x8   :  { %v221_v12 = vld [vmem:[%s15076_s1 + $0x5a0] sm:$0xff]  ;;  %7129 = vmatpush1.bf16.msra.mxu1 %v9581_v9 }
   0x9   :  { %v81_v13 = vld [vmem:[%s15076_s1 + $0x140] sm:$0xff]  ;;  %v9574_v14 = vcombine.high %v217_v11, %v221_v12  ;;  %7087 = vmatprep.subr.bf16.mxu0 %v9446_v10  ;;  %v9573_v19 = vcombine.low %v217_v11, %v221_v12 }
   0xa   :  { %v85_v15 = vld [vmem:[%s15076_s1 + $0x160] sm:$0xff]  ;;  %7088 = vmatpush1.bf16.msra.mxu0 %v9445_v18 }
   0xb   :  { %v209_v16 = vld [vmem:[%s15076_s1 + $0x540] sm:$0xff]  ;;  %v9438_v20 = vcombine.high %v81_v13, %v85_v15  ;;  %7130 = vmatprep.subr.bf16.mxu1 %v9574_v14  ;;  %v9437_v26 = vcombine.low %v81_v13, %v85_v15 }
   0xc   :  { %v213_v17 = vld [vmem:[%s15076_s1 + $0x560] sm:$0xff]  ;;  %7131 = vmatpush1.bf16.msra.mxu1 %v9573_v19 }
   0xd   :  { %v9566_v21 = vcombine.high %v209_v16, %v213_v17  ;;  %v73_v22 = vld [vmem:[%s15076_s1 + $0x100] sm:$0xff]  ;;  %7089 = vmatprep.subr.bf16.mxu0 %v9438_v20  ;;  %v9565_v27 = vcombine.low %v209_v16, %v213_v17 }
   0xe   :  { %v77_v23 = vld [vmem:[%s15076_s1 + $0x120] sm:$0xff]  ;;  %7090 = vmatpush1.bf16.msra.mxu0 %v9437_v26 }
   0xf   :  { %v201_v24 = vld [vmem:[%s15076_s1 + $0x500] sm:$0xff]  ;;  %v9430_v28 = vcombine.high %v73_v22, %v77_v23  ;;  %7132 = vmatprep.subr.bf16.mxu1 %v9566_v21  ;;  %v9429_v34 = vcombine.low %v73_v22, %v77_v23 }
  0x10   :  { %v205_v25 = vld [vmem:[%s15076_s1 + $0x520] sm:$0xff]  ;;  %7133 = vmatpush1.bf16.msra.mxu1 %v9565_v27 }
  0x11   :  { %v9558_v29 = vcombine.high %v201_v24, %v205_v25  ;;  %v65_v30 = vld [vmem:[%s15076_s1 + $0xc0] sm:$0xff]  ;;  %7091 = vmatprep.subr.bf16.mxu0 %v9430_v28  ;;  %v9557_v35 = vcombine.low %v201_v24, %v205_v25 }
  0x12   :  { %v69_v31 = vld [vmem:[%s15076_s1 + $0xe0] sm:$0xff]  ;;  %7092 = vmatpush1.bf16.msra.mxu0 %v9429_v34 }
  0x13   :  { %v193_v32 = vld [vmem:[%s15076_s1 + $0x4c0] sm:$0xff]  ;;  %v9422_v36 = vcombine.high %v65_v30, %v69_v31  ;;  %7134 = vmatprep.subr.bf16.mxu1 %v9558_v29  ;;  %v9421_v42 = vcombine.low %v65_v30, %v69_v31 }
  0x14   :  { %v197_v33 = vld [vmem:[%s15076_s1 + $0x4e0] sm:$0xff]  ;;  %7135 = vmatpush1.bf16.msra.mxu1 %v9557_v35 }
  0x15   :  { %v9550_v37 = vcombine.high %v193_v32, %v197_v33  ;;  %v57_v38 = vld [vmem:[%s15076_s1 + $0x80] sm:$0xff]  ;;  %7093 = vmatprep.subr.bf16.mxu0 %v9422_v36  ;;  %v9549_v43 = vcombine.low %v193_v32, %v197_v33 }
  0x16   :  { %v61_v39 = vld [vmem:[%s15076_s1 + $0xa0] sm:$0xff]  ;;  %7094 = vmatpush1.bf16.msra.mxu0 %v9421_v42 }
  0x17   :  { %v185_v40 = vld [vmem:[%s15076_s1 + $0x480] sm:$0xff]  ;;  %v9414_v44 = vcombine.high %v57_v38, %v61_v39  ;;  %7136 = vmatprep.subr.bf16.mxu1 %v9550_v37  ;;  %v9413_v50 = vcombine.low %v57_v38, %v61_v39 }
  0x18   :  { %v189_v41 = vld [vmem:[%s15076_s1 + $0x4a0] sm:$0xff]  ;;  %7137 = vmatpush1.bf16.msra.mxu1 %v9549_v43 }
  0x19   :  { %v9542_v45 = vcombine.high %v185_v40, %v189_v41  ;;  %v49_v46 = vld [vmem:[%s15076_s1 + $0x40] sm:$0xff]  ;;  %7095 = vmatprep.subr.bf16.mxu0 %v9414_v44  ;;  %v9541_v52 = vcombine.low %v185_v40, %v189_v41 }
  0x1a   :  { %v53_v47 = vld [vmem:[%s15076_s1 + $0x60] sm:$0xff]  ;;  %7096 = vmatpush1.bf16.msra.mxu0 %v9413_v50 }
  0x1b   :  { %v177_v48 = vld [vmem:[%s15076_s1 + $0x440] sm:$0xff]  ;;  %v9406_v53 = vcombine.high %v49_v46, %v53_v47  ;;  %7138 = vmatprep.subr.bf16.mxu1 %v9542_v45  ;;  %v9405_v60 = vcombine.low %v49_v46, %v53_v47 }
  0x1c   :  { %v181_v49 = vld [vmem:[%s15076_s1 + $0x460] sm:$0xff]  ;;  %7139 = vmatpush1.bf16.msra.mxu1 %v9541_v52 }
  0x1d   :  { %v41_v51 = vld [vmem:[%s15076_s1] sm:$0xff]  ;;  %v9534_v55 = vcombine.high %v177_v48, %v181_v49  ;;  %7097 = vmatprep.subr.bf16.mxu0 %v9406_v53  ;;  %v9533_v61 = vcombine.low %v177_v48, %v181_v49 }
  0x1e   :  { %v45_v54 = vld [vmem:[%s15076_s1 + $0x20] sm:$0xff]  ;;  %7098 = vmatpush1.bf16.msra.mxu0 %v9405_v60 }
  0x1f   :  { %v10702_v56 = vld [vmem:[%s15077_s0 + $0x4] ss:$72 sps:$4 sm:$0xff]   ;;  %v9398_v62 = vcombine.high %v41_v51, %v45_v54  ;;  %7140 = vmatprep.subr.bf16.mxu1 %v9534_v55  ;;  %v9397_v4 = vcombine.low %v41_v51, %v45_v54 }
  0x20   :  { %v169_v57 = vld [vmem:[%s15076_s1 + $0x400] sm:$0xff]  ;;  %7117 = vmatprep.mubr.bf16.mxu0 %v10702_v56  ;;  %7141 = vmatpush1.bf16.msra.mxu1 %v9533_v61 }
  0x21   :  { %v173_v58 = vld [vmem:[%s15076_s1 + $0x420] sm:$0xff]  ;;  %7099 = vmatprep.subr.bf16.mxu0 %v9398_v62 }
  0x22   :  { %v9526_v63 = vcombine.high %v169_v57, %v173_v58  ;;  %v161_v0 = vld [vmem:[%s15076_s1 + $0x3c0] sm:$0xff]  ;;  %v9525_v5 = vcombine.low %v169_v57, %v173_v58  ;;  %7100 = vmatpush1.bf16.msra.mxu0 %v9397_v4 }
  0x23   :  { %v165_v1 = vld [vmem:[%s15076_s1 + $0x3e0] sm:$0xff] }
  0x24   :  { %v289_v2 = vld [vmem:[%s15076_s1 + $0x7c0] sm:$0xff]  ;;  %v9518_v6 = vcombine.high %v161_v0, %v165_v1  ;;  %7142 = vmatprep.subr.bf16.mxu1 %v9526_v63  ;;  %v9517_v12 = vcombine.low %v161_v0, %v165_v1 }
  0x25   :  { %v293_v3 = vld [vmem:[%s15076_s1 + $0x7e0] sm:$0xff]  ;;  %7143 = vmatpush1.bf16.msra.mxu1 %v9525_v5 }
  0x26   :  { %v9646_v7 = vcombine.high %v289_v2, %v293_v3  ;;  %v153_v8 = vld [vmem:[%s15076_s1 + $0x380] sm:$0xff]  ;;  %7101 = vmatprep.subr.bf16.mxu0 %v9518_v6  ;;  %v9645_v13 = vcombine.low %v289_v2, %v293_v3 }
  0x27   :  { %v157_v9 = vld [vmem:[%s15076_s1 + $0x3a0] sm:$0xff]  ;;  %7102 = vmatpush2.bf16.msra.mxu0 %v9517_v12 }
  0x28   :  { %v281_v10 = vld [vmem:[%s15076_s1 + $0x780] sm:$0xff]  ;;  %v9510_v14 = vcombine.high %v153_v8, %v157_v9  ;;  %7144 = vmatprep.subr.bf16.mxu1 %v9646_v7  ;;  %v9509_v20 = vcombine.low %v153_v8, %v157_v9 }
  0x29   :  { %v285_v11 = vld [vmem:[%s15076_s1 + $0x7a0] sm:$0xff]  ;;  %7145 = vmatpush2.bf16.msra.mxu1 %v9645_v13  ;;  %v10707_v13 = vld [vmem:[%s15077_s0 + $0x8] ss:$72 sps:$4 sm:$0xff]  }
  0x2a   :  { %v9638_v15 = vcombine.high %v281_v10, %v285_v11  ;;  %v145_v16 = vld [vmem:[%s15076_s1 + $0x340] sm:$0xff]  ;;  %7103 = vmatprep.subr.bf16.mxu0 %v9510_v14  ;;  %v9637_v21 = vcombine.low %v281_v10, %v285_v11 }
  0x2b   :  { %v149_v17 = vld [vmem:[%s15076_s1 + $0x360] sm:$0xff]  ;;  %7104 = vmatpush2.bf16.msra.mxu0 %v9509_v20  ;;  %v10708_v20 = vld [vmem:[%s15077_s0 + $0x14] ss:$72 sps:$4 sm:$0xff]  }
  0x2c   :  { %v273_v18 = vld [vmem:[%s15076_s1 + $0x740] sm:$0xff]  ;;  %v9502_v22 = vcombine.high %v145_v16, %v149_v17  ;;  %7146 = vmatprep.subr.bf16.mxu1 %v9638_v15  ;;  %v9501_v28 = vcombine.low %v145_v16, %v149_v17 }
  0x2d   :  { %v277_v19 = vld [vmem:[%s15076_s1 + $0x760] sm:$0xff]  ;;  %7147 = vmatpush2.bf16.msra.mxu1 %v9637_v21 }
  0x2e   :  { %v9630_v23 = vcombine.high %v273_v18, %v277_v19  ;;  %v137_v24 = vld [vmem:[%s15076_s1 + $0x300] sm:$0xff]  ;;  %7105 = vmatprep.subr.bf16.mxu0 %v9502_v22  ;;  %v9629_v29 = vcombine.low %v273_v18, %v277_v19 }
  0x2f   :  { %v141_v25 = vld [vmem:[%s15076_s1 + $0x320] sm:$0xff]  ;;  %7106 = vmatpush2.bf16.msra.mxu0 %v9501_v28 }
  0x30   :  { %v265_v26 = vld [vmem:[%s15076_s1 + $0x700] sm:$0xff]  ;;  %v9494_v30 = vcombine.high %v137_v24, %v141_v25  ;;  %7148 = vmatprep.subr.bf16.mxu1 %v9630_v23  ;;  %v9493_v36 = vcombine.low %v137_v24, %v141_v25 }
  0x31   :  { %v269_v27 = vld [vmem:[%s15076_s1 + $0x720] sm:$0xff]  ;;  %7149 = vmatpush2.bf16.msra.mxu1 %v9629_v29 }
  0x32   :  { %v9622_v31 = vcombine.high %v265_v26, %v269_v27  ;;  %v129_v32 = vld [vmem:[%s15076_s1 + $0x2c0] sm:$0xff]  ;;  %7107 = vmatprep.subr.bf16.mxu0 %v9494_v30  ;;  %v9621_v37 = vcombine.low %v265_v26, %v269_v27 }
  0x33   :  { %v133_v33 = vld [vmem:[%s15076_s1 + $0x2e0] sm:$0xff]  ;;  %7108 = vmatpush2.bf16.msra.mxu0 %v9493_v36 }
  0x34   :  { %v257_v34 = vld [vmem:[%s15076_s1 + $0x6c0] sm:$0xff]  ;;  %v9486_v38 = vcombine.high %v129_v32, %v133_v33  ;;  %7150 = vmatprep.subr.bf16.mxu1 %v9622_v31  ;;  %v9485_v44 = vcombine.low %v129_v32, %v133_v33 }
  0x35   :  { %v261_v35 = vld [vmem:[%s15076_s1 + $0x6e0] sm:$0xff]  ;;  %7151 = vmatpush2.bf16.msra.mxu1 %v9621_v37 }
  0x36   :  { %v121_v39 = vld [vmem:[%s15076_s1 + $0x280] sm:$0xff]  ;;  %v9614_v40 = vcombine.high %v257_v34, %v261_v35  ;;  %7109 = vmatprep.subr.bf16.mxu0 %v9486_v38  ;;  %v9613_v45 = vcombine.low %v257_v34, %v261_v35 }
  0x37   :  { %v125_v41 = vld [vmem:[%s15076_s1 + $0x2a0] sm:$0xff]  ;;  %7110 = vmatpush2.bf16.msra.mxu0 %v9485_v44 }
  0x38   :  { %v249_v42 = vld [vmem:[%s15076_s1 + $0x680] sm:$0xff]  ;;  %v9478_v46 = vcombine.high %v121_v39, %v125_v41  ;;  %7152 = vmatprep.subr.bf16.mxu1 %v9614_v40  ;;  %v9477_v52 = vcombine.low %v121_v39, %v125_v41 }
  0x39   :  { %v253_v43 = vld [vmem:[%s15076_s1 + $0x6a0] sm:$0xff]  ;;  %7153 = vmatpush2.bf16.msra.mxu1 %v9613_v45 }
  0x3a   :  { %v9606_v47 = vcombine.high %v249_v42, %v253_v43  ;;  %v113_v48 = vld [vmem:[%s15076_s1 + $0x240] sm:$0xff]  ;;  %7111 = vmatprep.subr.bf16.mxu0 %v9478_v46  ;;  %v9605_v53 = vcombine.low %v249_v42, %v253_v43 }
  0x3b   :  { %v117_v49 = vld [vmem:[%s15076_s1 + $0x260] sm:$0xff]  ;;  %7112 = vmatpush2.bf16.msra.mxu0 %v9477_v52 }
  0x3c   :  { %v241_v50 = vld [vmem:[%s15076_s1 + $0x640] sm:$0xff]  ;;  %v9470_v54 = vcombine.high %v113_v48, %v117_v49  ;;  %7154 = vmatprep.subr.bf16.mxu1 %v9606_v47  ;;  %v9469_v60 = vcombine.low %v113_v48, %v117_v49 }
  0x3d   :  { %v245_v51 = vld [vmem:[%s15076_s1 + $0x660] sm:$0xff]  ;;  %7155 = vmatpush2.bf16.msra.mxu1 %v9605_v53 }
  0x3e   :  { %v9598_v55 = vcombine.high %v241_v50, %v245_v51  ;;  %v105_v56 = vld [vmem:[%s15076_s1 + $0x200] sm:$0xff]  ;;  %7113 = vmatprep.subr.bf16.mxu0 %v9470_v54  ;;  %v9597_v61 = vcombine.low %v241_v50, %v245_v51 }
  0x3f   :  { %v109_v57 = vld [vmem:[%s15076_s1 + $0x220] sm:$0xff]  ;;  %7114 = vmatpush2.bf16.msra.mxu0 %v9469_v60 }
  0x40   :  { %v233_v58 = vld [vmem:[%s15076_s1 + $0x600] sm:$0xff]  ;;  %v9462_v62 = vcombine.high %v105_v56, %v109_v57  ;;  %7156 = vmatprep.subr.bf16.mxu1 %v9598_v55  ;;  %v9461_v4 = vcombine.low %v105_v56, %v109_v57 }
  0x41   :  { %v237_v59 = vld [vmem:[%s15076_s1 + $0x620] sm:$0xff]  ;;  %7157 = vmatpush2.bf16.msra.mxu1 %v9597_v61 }
  0x42   :  { %v9590_v63 = vcombine.high %v233_v58, %v237_v59  ;;  %v353_v0 = vld [vmem:[%s15076_s1 + $0x9c0] sm:$0xff]  ;;  %7115 = vmatprep.subr.bf16.mxu0 %v9462_v62  ;;  %v9589_v5 = vcombine.low %v233_v58, %v237_v59 }
  0x43   :  { %v357_v1 = vld [vmem:[%s15076_s1 + $0x9e0] sm:$0xff]  ;;  %7116 = vmatpush2.bf16.msra.mxu0 %v9461_v4 }
  0x44   :  { %v481_v2 = vld [vmem:[%s15076_s1 + $0xdc0] sm:$0xff]  ;;  %v9710_v6 = vcombine.high %v353_v0, %v357_v1  ;;  %7158 = vmatprep.subr.bf16.mxu1 %v9590_v63  ;;  %v9709_v14 = vcombine.low %v353_v0, %v357_v1 }
  0x45   :  { %v485_v3 = vld [vmem:[%s15076_s1 + $0xde0] sm:$0xff]  ;;  %7159 = vmatpush2.bf16.msra.mxu1 %v9589_v5 }
  0x46   :  { %v9838_v7 = vcombine.high %v481_v2, %v485_v3  ;;  %v345_v8 = vld [vmem:[%s15076_s1 + $0x980] sm:$0xff]  ;;  %7171 = vmatprep.subr.bf16.mxu0 %v9710_v6  ;;  %v9837_v15 = vcombine.low %v481_v2, %v485_v3 }
  0x47   :  { %v349_v9 = vld [vmem:[%s15076_s1 + $0x9a0] sm:$0xff] }
  0x48   :  { %v10706_v10 = vld [vmem:[%s15077_s0] ss:$72 sps:$4 sm:$0xff]   ;;  %v9702_v16 = vcombine.high %v345_v8, %v349_v9  ;;  %7214 = vmatprep.subr.bf16.mxu1 %v9838_v7  ;;  %v10710_v23 = vld [vmem:[%s15077_s0 + $0x1c] ss:$72 sps:$4 sm:$0xff]   ;;  %7161 = vmatmul.mubr.bf16.vlgmr.msra.gmra.mxu1 %v10707_v13  ;;  %v9701_v24 = vcombine.low %v345_v8, %v349_v9 }
  0x49   :  { %v473_v11 = vld [vmem:[%s15076_s1 + $0xd80] sm:$0xff]  ;;  %7118 = vmatmul.mubr.bf16.vlgmr.msra.gmra.mxu0 %v10706_v10  ;;  %7215 = vmatpush1.bf16.msra.mxu1 %v9837_v15 }
  0x4a   :  { %v477_v12 = vld [vmem:[%s15076_s1 + $0xda0] sm:$0xff]  ;;  %7172 = vmatpush1.bf16.msra.mxu0 %v9709_v14  ;;  %7203 = vmatprep.mubr.bf16.mxu0 %v10708_v20 }
  0x4b   :  { %v9830_v17 = vcombine.high %v473_v11, %v477_v12  ;;  %v337_v18 = vld [vmem:[%s15076_s1 + $0x940] sm:$0xff]  ;;  %7173 = vmatprep.subr.bf16.mxu0 %v9702_v16  ;;  %v9829_v25 = vcombine.low %v473_v11, %v477_v12  ;;  %7246 = vmatprep.mubr.bf16.mxu1 %v10710_v23 }
  0x4c   :  { %v341_v19 = vld [vmem:[%s15076_s1 + $0x960] sm:$0xff] }
  0x4d   :  { %v465_v21 = vld [vmem:[%s15076_s1 + $0xd40] sm:$0xff]  ;;  %v9694_v26 = vcombine.high %v337_v18, %v341_v19  ;;  %7216 = vmatprep.subr.bf16.mxu1 %v9830_v17  ;;  %v9693_v32 = vcombine.low %v337_v18, %v341_v19 }
  0x4e   :  { %v469_v22 = vld [vmem:[%s15076_s1 + $0xd60] sm:$0xff]  ;;  %7174 = vmatpush1.bf16.msra.mxu0 %v9701_v24  ;;  %7217 = vmatpush1.bf16.msra.mxu1 %v9829_v25 }
  0x4f   :  { %v329_v27 = vld [vmem:[%s15076_s1 + $0x900] sm:$0xff]  ;;  %v9822_v28 = vcombine.high %v465_v21, %v469_v22  ;;  %7175 = vmatprep.subr.bf16.mxu0 %v9694_v26  ;;  %v9821_v33 = vcombine.low %v465_v21, %v469_v22 }
  0x50   :  { %v333_v29 = vld [vmem:[%s15076_s1 + $0x920] sm:$0xff] }
  0x51   :  { %v457_v30 = vld [vmem:[%s15076_s1 + $0xd00] sm:$0xff]  ;;  %v9686_v34 = vcombine.high %v329_v27, %v333_v29  ;;  %7218 = vmatprep.subr.bf16.mxu1 %v9822_v28  ;;  %v9685_v40 = vcombine.low %v329_v27, %v333_v29 }
  0x52   :  { %v461_v31 = vld [vmem:[%s15076_s1 + $0xd20] sm:$0xff]  ;;  %7176 = vmatpush1.bf16.msra.mxu0 %v9693_v32  ;;  %7219 = vmatpush1.bf16.msra.mxu1 %v9821_v33 }
  0x53   :  { %v9814_v35 = vcombine.high %v457_v30, %v461_v31  ;;  %v321_v36 = vld [vmem:[%s15076_s1 + $0x8c0] sm:$0xff]  ;;  %7177 = vmatprep.subr.bf16.mxu0 %v9686_v34  ;;  %v9813_v41 = vcombine.low %v457_v30, %v461_v31 }
  0x54   :  { %v325_v37 = vld [vmem:[%s15076_s1 + $0x8e0] sm:$0xff] }
  0x55   :  { %v449_v38 = vld [vmem:[%s15076_s1 + $0xcc0] sm:$0xff]  ;;  %v9678_v42 = vcombine.high %v321_v36, %v325_v37  ;;  %7220 = vmatprep.subr.bf16.mxu1 %v9814_v35  ;;  %v9677_v48 = vcombine.low %v321_v36, %v325_v37 }
  0x56   :  { %v453_v39 = vld [vmem:[%s15076_s1 + $0xce0] sm:$0xff]  ;;  %7178 = vmatpush1.bf16.msra.mxu0 %v9685_v40  ;;  %7221 = vmatpush1.bf16.msra.mxu1 %v9813_v41 }
  0x57   :  { %v313_v43 = vld [vmem:[%s15076_s1 + $0x880] sm:$0xff]  ;;  %v9806_v44 = vcombine.high %v449_v38, %v453_v39  ;;  %7179 = vmatprep.subr.bf16.mxu0 %v9678_v42  ;;  %v9805_v49 = vcombine.low %v449_v38, %v453_v39 }
  0x58   :  { %v317_v45 = vld [vmem:[%s15076_s1 + $0x8a0] sm:$0xff] }
  0x59   :  { %v441_v46 = vld [vmem:[%s15076_s1 + $0xc80] sm:$0xff]  ;;  %v9670_v50 = vcombine.high %v313_v43, %v317_v45  ;;  %7222 = vmatprep.subr.bf16.mxu1 %v9806_v44  ;;  %v9669_v56 = vcombine.low %v313_v43, %v317_v45 }
  0x5a   :  { %v445_v47 = vld [vmem:[%s15076_s1 + $0xca0] sm:$0xff]  ;;  %7180 = vmatpush1.bf16.msra.mxu0 %v9677_v48  ;;  %7223 = vmatpush1.bf16.msra.mxu1 %v9805_v49 }
  0x5b   :  { %v9798_v51 = vcombine.high %v441_v46, %v445_v47  ;;  %v305_v52 = vld [vmem:[%s15076_s1 + $0x840] sm:$0xff]  ;;  %7181 = vmatprep.subr.bf16.mxu0 %v9670_v50  ;;  %v9797_v57 = vcombine.low %v441_v46, %v445_v47 }
  0x5c   :  { %v309_v53 = vld [vmem:[%s15076_s1 + $0x860] sm:$0xff] }
  0x5d   :  { %v433_v54 = vld [vmem:[%s15076_s1 + $0xc40] sm:$0xff]  ;;  %v9662_v58 = vcombine.high %v305_v52, %v309_v53  ;;  %7224 = vmatprep.subr.bf16.mxu1 %v9798_v51  ;;  %v9661_v0 = vcombine.low %v305_v52, %v309_v53 }
  0x5e   :  { %v437_v55 = vld [vmem:[%s15076_s1 + $0xc60] sm:$0xff]  ;;  %7182 = vmatpush1.bf16.msra.mxu0 %v9669_v56  ;;  %7225 = vmatpush1.bf16.msra.mxu1 %v9797_v57 }
  0x5f   :  { %v9790_v59 = vcombine.high %v433_v54, %v437_v55  ;;  %v297_v60 = vld [vmem:[%s15076_s1 + $0x800] sm:$0xff]  ;;  %7183 = vmatprep.subr.bf16.mxu0 %v9662_v58  ;;  %v9789_v1 = vcombine.low %v433_v54, %v437_v55 }
  0x60   :  { %v301_v61 = vld [vmem:[%s15076_s1 + $0x820] sm:$0xff] }
  0x61   :  { %v425_v62 = vld [vmem:[%s15076_s1 + $0xc00] sm:$0xff]  ;;  %v9654_v2 = vcombine.high %v297_v60, %v301_v61  ;;  %7226 = vmatprep.subr.bf16.mxu1 %v9790_v59  ;;  %v9653_v8 = vcombine.low %v297_v60, %v301_v61 }
  0x62   :  { %v429_v63 = vld [vmem:[%s15076_s1 + $0xc20] sm:$0xff]  ;;  %7184 = vmatpush1.bf16.msra.mxu0 %v9661_v0  ;;  %7227 = vmatpush1.bf16.msra.mxu1 %v9789_v1 }
  0x63   :  { %v9782_v3 = vcombine.high %v425_v62, %v429_v63  ;;  %v417_v4 = vld [vmem:[%s15076_s1 + $0xbc0] sm:$0xff]  ;;  %7185 = vmatprep.subr.bf16.mxu0 %v9654_v2  ;;  %v9781_v9 = vcombine.low %v425_v62, %v429_v63 }
  0x64   :  { %v421_v5 = vld [vmem:[%s15076_s1 + $0xbe0] sm:$0xff] }
  0x65   :  { %v545_v6 = vld [vmem:[%s15076_s1 + $0xfc0] sm:$0xff]  ;;  %v9774_v10 = vcombine.high %v417_v4, %v421_v5  ;;  %7228 = vmatprep.subr.bf16.mxu1 %v9782_v3  ;;  %v9773_v16 = vcombine.low %v417_v4, %v421_v5 }
  0x66   :  { %v549_v7 = vld [vmem:[%s15076_s1 + $0xfe0] sm:$0xff]  ;;  %7186 = vmatpush1.bf16.msra.mxu0 %v9653_v8  ;;  %7229 = vmatpush1.bf16.msra.mxu1 %v9781_v9 }
  0x67   :  { %v9902_v11 = vcombine.high %v545_v6, %v549_v7  ;;  %v409_v12 = vld [vmem:[%s15076_s1 + $0xb80] sm:$0xff]  ;;  %7187 = vmatprep.subr.bf16.mxu0 %v9774_v10  ;;  %v9901_v17 = vcombine.low %v545_v6, %v549_v7 }
  0x68   :  { %v413_v13 = vld [vmem:[%s15076_s1 + $0xba0] sm:$0xff] }
  0x69   :  { %v537_v14 = vld [vmem:[%s15076_s1 + $0xf80] sm:$0xff]  ;;  %v9766_v18 = vcombine.high %v409_v12, %v413_v13  ;;  %7230 = vmatprep.subr.bf16.mxu1 %v9902_v11  ;;  %v9765_v24 = vcombine.low %v409_v12, %v413_v13 }
  0x6a   :  { %v541_v15 = vld [vmem:[%s15076_s1 + $0xfa0] sm:$0xff]  ;;  %7188 = vmatpush2.bf16.msra.mxu0 %v9773_v16  ;;  %7231 = vmatpush2.bf16.msra.mxu1 %v9901_v17 }
  0x6b   :  { %v9894_v19 = vcombine.high %v537_v14, %v541_v15  ;;  %v401_v20 = vld [vmem:[%s15076_s1 + $0xb40] sm:$0xff]  ;;  %7189 = vmatprep.subr.bf16.mxu0 %v9766_v18  ;;  %v9893_v25 = vcombine.low %v537_v14, %v541_v15  ;;  %v10712_v14 = vld [vmem:[%s15077_s0 + $0x10] ss:$72 sps:$4 sm:$0xff]  }
  0x6c   :  { %v405_v21 = vld [vmem:[%s15076_s1 + $0xb60] sm:$0xff] }
  0x6d   :  { %v529_v22 = vld [vmem:[%s15076_s1 + $0xf40] sm:$0xff]  ;;  %v9758_v26 = vcombine.high %v401_v20, %v405_v21  ;;  %7232 = vmatprep.subr.bf16.mxu1 %v9894_v19  ;;  %v9757_v32 = vcombine.low %v401_v20, %v405_v21 }
  0x6e   :  { %v533_v23 = vld [vmem:[%s15076_s1 + $0xf60] sm:$0xff]  ;;  %7190 = vmatpush2.bf16.msra.mxu0 %v9765_v24  ;;  %7233 = vmatpush2.bf16.msra.mxu1 %v9893_v25 }
  0x6f   :  { %v9886_v27 = vcombine.high %v529_v22, %v533_v23  ;;  %v393_v28 = vld [vmem:[%s15076_s1 + $0xb00] sm:$0xff]  ;;  %7191 = vmatprep.subr.bf16.mxu0 %v9758_v26  ;;  %v9885_v33 = vcombine.low %v529_v22, %v533_v23 }
  0x70   :  { %v397_v29 = vld [vmem:[%s15076_s1 + $0xb20] sm:$0xff] }
  0x71   :  { %v521_v30 = vld [vmem:[%s15076_s1 + $0xf00] sm:$0xff]  ;;  %v9750_v34 = vcombine.high %v393_v28, %v397_v29  ;;  %7234 = vmatprep.subr.bf16.mxu1 %v9886_v27  ;;  %v9749_v40 = vcombine.low %v393_v28, %v397_v29  ;;  %v10716_v27 = vld [vmem:[%s15077_s0 + $0x2c] ss:$72 sps:$4 sm:$0xff]  }
  0x72   :  { %v525_v31 = vld [vmem:[%s15076_s1 + $0xf20] sm:$0xff]  ;;  %7192 = vmatpush2.bf16.msra.mxu0 %v9757_v32  ;;  %7235 = vmatpush2.bf16.msra.mxu1 %v9885_v33 }
  0x73   :  { %v9878_v35 = vcombine.high %v521_v30, %v525_v31  ;;  %v385_v36 = vld [vmem:[%s15076_s1 + $0xac0] sm:$0xff]  ;;  %7193 = vmatprep.subr.bf16.mxu0 %v9750_v34  ;;  %v9877_v41 = vcombine.low %v521_v30, %v525_v31 }
  0x74   :  { %v389_v37 = vld [vmem:[%s15076_s1 + $0xae0] sm:$0xff] }
  0x75   :  { %v513_v38 = vld [vmem:[%s15076_s1 + $0xec0] sm:$0xff]  ;;  %v9742_v42 = vcombine.high %v385_v36, %v389_v37  ;;  %7236 = vmatprep.subr.bf16.mxu1 %v9878_v35  ;;  %v9741_v48 = vcombine.low %v385_v36, %v389_v37 }
  0x76   :  { %v517_v39 = vld [vmem:[%s15076_s1 + $0xee0] sm:$0xff]  ;;  %7194 = vmatpush2.bf16.msra.mxu0 %v9749_v40  ;;  %7237 = vmatpush2.bf16.msra.mxu1 %v9877_v41 }
  0x77   :  { %v9870_v43 = vcombine.high %v513_v38, %v517_v39  ;;  %v377_v44 = vld [vmem:[%s15076_s1 + $0xa80] sm:$0xff]  ;;  %7195 = vmatprep.subr.bf16.mxu0 %v9742_v42  ;;  %v9869_v49 = vcombine.low %v513_v38, %v517_v39 }
  0x78   :  { %v381_v45 = vld [vmem:[%s15076_s1 + $0xaa0] sm:$0xff] }
  0x79   :  { %v505_v46 = vld [vmem:[%s15076_s1 + $0xe80] sm:$0xff]  ;;  %v9734_v50 = vcombine.high %v377_v44, %v381_v45  ;;  %7238 = vmatprep.subr.bf16.mxu1 %v9870_v43  ;;  %v9733_v56 = vcombine.low %v377_v44, %v381_v45 }
  0x7a   :  { %v509_v47 = vld [vmem:[%s15076_s1 + $0xea0] sm:$0xff]  ;;  %7196 = vmatpush2.bf16.msra.mxu0 %v9741_v48  ;;  %7239 = vmatpush2.bf16.msra.mxu1 %v9869_v49 }
  0x7b   :  { %v9862_v51 = vcombine.high %v505_v46, %v509_v47  ;;  %v369_v52 = vld [vmem:[%s15076_s1 + $0xa40] sm:$0xff]  ;;  %7197 = vmatprep.subr.bf16.mxu0 %v9734_v50  ;;  %v9861_v57 = vcombine.low %v505_v46, %v509_v47 }
  0x7c   :  { %v373_v53 = vld [vmem:[%s15076_s1 + $0xa60] sm:$0xff] }
  0x7d   :  { %v497_v54 = vld [vmem:[%s15076_s1 + $0xe40] sm:$0xff]  ;;  %v9726_v58 = vcombine.high %v369_v52, %v373_v53  ;;  %7240 = vmatprep.subr.bf16.mxu1 %v9862_v51  ;;  %v9725_v0 = vcombine.low %v369_v52, %v373_v53 }
  0x7e   :  { %v501_v55 = vld [vmem:[%s15076_s1 + $0xe60] sm:$0xff]  ;;  %7198 = vmatpush2.bf16.msra.mxu0 %v9733_v56  ;;  %7241 = vmatpush2.bf16.msra.mxu1 %v9861_v57 }
  0x7f   :  { %v9854_v59 = vcombine.high %v497_v54, %v501_v55  ;;  %v361_v60 = vld [vmem:[%s15076_s1 + $0xa00] sm:$0xff]  ;;  %7199 = vmatprep.subr.bf16.mxu0 %v9726_v58  ;;  %v9853_v1 = vcombine.low %v497_v54, %v501_v55 }
  0x80   :  { %v365_v61 = vld [vmem:[%s15076_s1 + $0xa20] sm:$0xff] }
  0x81   :  { %v489_v62 = vld [vmem:[%s15076_s1 + $0xe00] sm:$0xff]  ;;  %v9718_v2 = vcombine.high %v361_v60, %v365_v61  ;;  %7242 = vmatprep.subr.bf16.mxu1 %v9854_v59  ;;  %v9717_v8 = vcombine.low %v361_v60, %v365_v61 }
  0x82   :  { %v493_v63 = vld [vmem:[%s15076_s1 + $0xe20] sm:$0xff]  ;;  %7200 = vmatpush2.bf16.msra.mxu0 %v9725_v0  ;;  %7243 = vmatpush2.bf16.msra.mxu1 %v9853_v1 }
  0x83   :  { %v9846_v3 = vcombine.high %v489_v62, %v493_v63  ;;  %v609_v4 = vld [vmem:[%s15076_s1 + $0x11c0] sm:$0xff]  ;;  %7201 = vmatprep.subr.bf16.mxu0 %v9718_v2  ;;  %v9845_v9 = vcombine.low %v489_v62, %v493_v63 }
  0x84   :  { %v613_v5 = vld [vmem:[%s15076_s1 + $0x11e0] sm:$0xff] }
  0x85   :  { %v737_v6 = vld [vmem:[%s15076_s1 + $0x15c0] sm:$0xff]  ;;  %v9966_v10 = vcombine.high %v609_v4, %v613_v5  ;;  %7244 = vmatprep.subr.bf16.mxu1 %v9846_v3  ;;  %v9965_v18 = vcombine.low %v609_v4, %v613_v5 }
  0x86   :  { %v741_v7 = vld [vmem:[%s15076_s1 + $0x15e0] sm:$0xff]  ;;  %7202 = vmatpush2.bf16.msra.mxu0 %v9717_v8  ;;  %7245 = vmatpush2.bf16.msra.mxu1 %v9845_v9 }
  0x87   :  { %v10094_v11 = vcombine.high %v737_v6, %v741_v7  ;;  %v601_v12 = vld [vmem:[%s15076_s1 + $0x1180] sm:$0xff]  ;;  %7257 = vmatprep.subr.bf16.mxu0 %v9966_v10  ;;  %v10093_v19 = vcombine.low %v737_v6, %v741_v7 }
  0x88   :  { %v605_v13 = vld [vmem:[%s15076_s1 + $0x11a0] sm:$0xff] }
  0x89   :  { %v729_v15 = vld [vmem:[%s15076_s1 + $0x1580] sm:$0xff]  ;;  %v9958_v20 = vcombine.high %v601_v12, %v605_v13  ;;  %7300 = vmatprep.subr.bf16.mxu1 %v10094_v11  ;;  %7204 = vmatmul.mubr.bf16.vlgmr.msra.gmra.mxu0 %v10712_v14  ;;  %v9957_v28 = vcombine.low %v601_v12, %v605_v13 }
  0x8a   :  { %v733_v16 = vld [vmem:[%s15076_s1 + $0x15a0] sm:$0xff]  ;;  %7258 = vmatpush1.bf16.msra.mxu0 %v9965_v18 }
  0x8b   :  { %v10713_v17 = vld [vmem:[%s15077_s0 + $0x18] ss:$72 sps:$4 sm:$0xff]   ;;  %v10086_v21 = vcombine.high %v729_v15, %v733_v16  ;;  %v10714_v24 = vld [vmem:[%s15077_s0 + $0x24] ss:$72 sps:$4 sm:$0xff]   ;;  %7259 = vmatprep.subr.bf16.mxu0 %v9958_v20  ;;  %v10085_v29 = vcombine.low %v729_v15, %v733_v16 }
  0x8c   :  { %v593_v22 = vld [vmem:[%s15076_s1 + $0x1140] sm:$0xff]  ;;  %7247 = vmatmul.mubr.bf16.vlgmr.msra.gmra.mxu1 %v10713_v17  ;;  %7289 = vmatprep.mubr.bf16.mxu0 %v10714_v24 }
  0x8d   :  { %v597_v23 = vld [vmem:[%s15076_s1 + $0x1160] sm:$0xff]  ;;  %7301 = vmatpush1.bf16.msra.mxu1 %v10093_v19  ;;  %7332 = vmatprep.mubr.bf16.mxu1 %v10716_v27 }
  0x8e   :  { %v721_v25 = vld [vmem:[%s15076_s1 + $0x1540] sm:$0xff]  ;;  %v9950_v30 = vcombine.high %v593_v22, %v597_v23  ;;  %7302 = vmatprep.subr.bf16.mxu1 %v10086_v21  ;;  %7260 = vmatpush1.bf16.msra.mxu0 %v9957_v28  ;;  %v9949_v36 = vcombine.low %v593_v22, %v597_v23 }
  0x8f   :  { %v725_v26 = vld [vmem:[%s15076_s1 + $0x1560] sm:$0xff] }
  0x90   :  { %v10078_v31 = vcombine.high %v721_v25, %v725_v26  ;;  %v585_v32 = vld [vmem:[%s15076_s1 + $0x1100] sm:$0xff]  ;;  %7261 = vmatprep.subr.bf16.mxu0 %v9950_v30  ;;  %v10077_v37 = vcombine.low %v721_v25, %v725_v26 }
  0x91   :  { %v589_v33 = vld [vmem:[%s15076_s1 + $0x1120] sm:$0xff]  ;;  %7303 = vmatpush1.bf16.msra.mxu1 %v10085_v29 }
  0x92   :  { %v713_v34 = vld [vmem:[%s15076_s1 + $0x1500] sm:$0xff]  ;;  %v9942_v38 = vcombine.high %v585_v32, %v589_v33  ;;  %7304 = vmatprep.subr.bf16.mxu1 %v10078_v31  ;;  %7262 = vmatpush1.bf16.msra.mxu0 %v9949_v36  ;;  %v9941_v44 = vcombine.low %v585_v32, %v589_v33 }
  0x93   :  { %v717_v35 = vld [vmem:[%s15076_s1 + $0x1520] sm:$0xff] }
  0x94   :  { %v10070_v39 = vcombine.high %v713_v34, %v717_v35  ;;  %v577_v40 = vld [vmem:[%s15076_s1 + $0x10c0] sm:$0xff]  ;;  %7263 = vmatprep.subr.bf16.mxu0 %v9942_v38  ;;  %v10069_v45 = vcombine.low %v713_v34, %v717_v35 }
  0x95   :  { %v581_v41 = vld [vmem:[%s15076_s1 + $0x10e0] sm:$0xff]  ;;  %7305 = vmatpush1.bf16.msra.mxu1 %v10077_v37 }
  0x96   :  { %v705_v42 = vld [vmem:[%s15076_s1 + $0x14c0] sm:$0xff]  ;;  %v9934_v46 = vcombine.high %v577_v40, %v581_v41  ;;  %7306 = vmatprep.subr.bf16.mxu1 %v10070_v39  ;;  %7264 = vmatpush1.bf16.msra.mxu0 %v9941_v44  ;;  %v9933_v52 = vcombine.low %v577_v40, %v581_v41 }
  0x97   :  { %v709_v43 = vld [vmem:[%s15076_s1 + $0x14e0] sm:$0xff] }
  0x98   :  { %v10062_v47 = vcombine.high %v705_v42, %v709_v43  ;;  %v569_v48 = vld [vmem:[%s15076_s1 + $0x1080] sm:$0xff]  ;;  %7265 = vmatprep.subr.bf16.mxu0 %v9934_v46  ;;  %v10061_v53 = vcombine.low %v705_v42, %v709_v43 }
  0x99   :  { %v573_v49 = vld [vmem:[%s15076_s1 + $0x10a0] sm:$0xff]  ;;  %7307 = vmatpush1.bf16.msra.mxu1 %v10069_v45 }
  0x9a   :  { %v697_v50 = vld [vmem:[%s15076_s1 + $0x1480] sm:$0xff]  ;;  %v9926_v54 = vcombine.high %v569_v48, %v573_v49  ;;  %7308 = vmatprep.subr.bf16.mxu1 %v10062_v47  ;;  %7266 = vmatpush1.bf16.msra.mxu0 %v9933_v52  ;;  %v9925_v60 = vcombine.low %v569_v48, %v573_v49 }
  0x9b   :  { %v701_v51 = vld [vmem:[%s15076_s1 + $0x14a0] sm:$0xff] }
  0x9c   :  { %v10054_v55 = vcombine.high %v697_v50, %v701_v51  ;;  %v561_v56 = vld [vmem:[%s15076_s1 + $0x1040] sm:$0xff]  ;;  %7267 = vmatprep.subr.bf16.mxu0 %v9926_v54  ;;  %v10053_v61 = vcombine.low %v697_v50, %v701_v51 }
  0x9d   :  { %v565_v57 = vld [vmem:[%s15076_s1 + $0x1060] sm:$0xff]  ;;  %7309 = vmatpush1.bf16.msra.mxu1 %v10061_v53 }
  0x9e   :  { %v689_v58 = vld [vmem:[%s15076_s1 + $0x1440] sm:$0xff]  ;;  %v9918_v62 = vcombine.high %v561_v56, %v565_v57  ;;  %7310 = vmatprep.subr.bf16.mxu1 %v10054_v55  ;;  %7268 = vmatpush1.bf16.msra.mxu0 %v9925_v60  ;;  %v9917_v4 = vcombine.low %v561_v56, %v565_v57 }
  0x9f   :  { %v693_v59 = vld [vmem:[%s15076_s1 + $0x1460] sm:$0xff] }
  0xa0   :  { %v10046_v63 = vcombine.high %v689_v58, %v693_v59  ;;  %v553_v0 = vld [vmem:[%s15076_s1 + $0x1000] sm:$0xff]  ;;  %7269 = vmatprep.subr.bf16.mxu0 %v9918_v62  ;;  %v10045_v5 = vcombine.low %v689_v58, %v693_v59 }
  0xa1   :  { %v557_v1 = vld [vmem:[%s15076_s1 + $0x1020] sm:$0xff]  ;;  %7311 = vmatpush1.bf16.msra.mxu1 %v10053_v61 }
  0xa2   :  { %v681_v2 = vld [vmem:[%s15076_s1 + $0x1400] sm:$0xff]  ;;  %v9910_v6 = vcombine.high %v553_v0, %v557_v1  ;;  %7312 = vmatprep.subr.bf16.mxu1 %v10046_v63  ;;  %7270 = vmatpush1.bf16.msra.mxu0 %v9917_v4  ;;  %v9909_v12 = vcombine.low %v553_v0, %v557_v1 }
  0xa3   :  { %v685_v3 = vld [vmem:[%s15076_s1 + $0x1420] sm:$0xff] }
  0xa4   :  { %v10038_v7 = vcombine.high %v681_v2, %v685_v3  ;;  %v673_v8 = vld [vmem:[%s15076_s1 + $0x13c0] sm:$0xff]  ;;  %7271 = vmatprep.subr.bf16.mxu0 %v9910_v6  ;;  %v10037_v13 = vcombine.low %v681_v2, %v685_v3 }
  0xa5   :  { %v677_v9 = vld [vmem:[%s15076_s1 + $0x13e0] sm:$0xff]  ;;  %7313 = vmatpush1.bf16.msra.mxu1 %v10045_v5 }
  0xa6   :  { %v801_v10 = vld [vmem:[%s15076_s1 + $0x17c0] sm:$0xff]  ;;  %v10030_v14 = vcombine.high %v673_v8, %v677_v9  ;;  %7314 = vmatprep.subr.bf16.mxu1 %v10038_v7  ;;  %7272 = vmatpush1.bf16.msra.mxu0 %v9909_v12  ;;  %v10029_v20 = vcombine.low %v673_v8, %v677_v9 }
  0xa7   :  { %v805_v11 = vld [vmem:[%s15076_s1 + $0x17e0] sm:$0xff] }
  0xa8   :  { %v10158_v15 = vcombine.high %v801_v10, %v805_v11  ;;  %v665_v16 = vld [vmem:[%s15076_s1 + $0x1380] sm:$0xff]  ;;  %7273 = vmatprep.subr.bf16.mxu0 %v10030_v14  ;;  %v10157_v21 = vcombine.low %v801_v10, %v805_v11 }
  0xa9   :  { %v669_v17 = vld [vmem:[%s15076_s1 + $0x13a0] sm:$0xff]  ;;  %7315 = vmatpush1.bf16.msra.mxu1 %v10037_v13 }
  0xaa   :  { %v793_v18 = vld [vmem:[%s15076_s1 + $0x1780] sm:$0xff]  ;;  %v10022_v22 = vcombine.high %v665_v16, %v669_v17  ;;  %7316 = vmatprep.subr.bf16.mxu1 %v10158_v15  ;;  %7274 = vmatpush2.bf16.msra.mxu0 %v10029_v20  ;;  %v10021_v28 = vcombine.low %v665_v16, %v669_v17 }
  0xab   :  { %v797_v19 = vld [vmem:[%s15076_s1 + $0x17a0] sm:$0xff] }
  0xac   :  { %v10150_v23 = vcombine.high %v793_v18, %v797_v19  ;;  %v657_v24 = vld [vmem:[%s15076_s1 + $0x1340] sm:$0xff]  ;;  %7275 = vmatprep.subr.bf16.mxu0 %v10022_v22  ;;  %v10149_v29 = vcombine.low %v793_v18, %v797_v19 }
  0xad   :  { %v661_v25 = vld [vmem:[%s15076_s1 + $0x1360] sm:$0xff]  ;;  %7317 = vmatpush2.bf16.msra.mxu1 %v10157_v21  ;;  %v10719_v21 = vld [vmem:[%s15077_s0 + $0x28] ss:$72 sps:$4 sm:$0xff]  }
  0xae   :  { %v785_v26 = vld [vmem:[%s15076_s1 + $0x1740] sm:$0xff]  ;;  %v10014_v30 = vcombine.high %v657_v24, %v661_v25  ;;  %7318 = vmatprep.subr.bf16.mxu1 %v10150_v23  ;;  %7276 = vmatpush2.bf16.msra.mxu0 %v10021_v28  ;;  %v10013_v36 = vcombine.low %v657_v24, %v661_v25  ;;  %v10720_v28 = vld [vmem:[%s15077_s0 + $0x34] ss:$72 sps:$4 sm:$0xff]  }
  0xaf   :  { %v789_v27 = vld [vmem:[%s15076_s1 + $0x1760] sm:$0xff] }
  0xb0   :  { %v10142_v31 = vcombine.high %v785_v26, %v789_v27  ;;  %v649_v32 = vld [vmem:[%s15076_s1 + $0x1300] sm:$0xff]  ;;  %7277 = vmatprep.subr.bf16.mxu0 %v10014_v30  ;;  %v10141_v37 = vcombine.low %v785_v26, %v789_v27 }
  0xb1   :  { %v653_v33 = vld [vmem:[%s15076_s1 + $0x1320] sm:$0xff]  ;;  %7319 = vmatpush2.bf16.msra.mxu1 %v10149_v29 }
  0xb2   :  { %v777_v34 = vld [vmem:[%s15076_s1 + $0x1700] sm:$0xff]  ;;  %v10006_v38 = vcombine.high %v649_v32, %v653_v33  ;;  %7320 = vmatprep.subr.bf16.mxu1 %v10142_v31  ;;  %7278 = vmatpush2.bf16.msra.mxu0 %v10013_v36  ;;  %v10005_v44 = vcombine.low %v649_v32, %v653_v33 }
  0xb3   :  { %v781_v35 = vld [vmem:[%s15076_s1 + $0x1720] sm:$0xff] }
  0xb4   :  { %v10134_v39 = vcombine.high %v777_v34, %v781_v35  ;;  %v641_v40 = vld [vmem:[%s15076_s1 + $0x12c0] sm:$0xff]  ;;  %7279 = vmatprep.subr.bf16.mxu0 %v10006_v38  ;;  %v10133_v45 = vcombine.low %v777_v34, %v781_v35 }
  0xb5   :  { %v645_v41 = vld [vmem:[%s15076_s1 + $0x12e0] sm:$0xff]  ;;  %7321 = vmatpush2.bf16.msra.mxu1 %v10141_v37 }
  0xb6   :  { %v769_v42 = vld [vmem:[%s15076_s1 + $0x16c0] sm:$0xff]  ;;  %v9998_v46 = vcombine.high %v641_v40, %v645_v41  ;;  %7322 = vmatprep.subr.bf16.mxu1 %v10134_v39  ;;  %7280 = vmatpush2.bf16.msra.mxu0 %v10005_v44  ;;  %v9997_v52 = vcombine.low %v641_v40, %v645_v41 }
  0xb7   :  { %v773_v43 = vld [vmem:[%s15076_s1 + $0x16e0] sm:$0xff] }
  0xb8   :  { %v10126_v47 = vcombine.high %v769_v42, %v773_v43  ;;  %v633_v48 = vld [vmem:[%s15076_s1 + $0x1280] sm:$0xff]  ;;  %7281 = vmatprep.subr.bf16.mxu0 %v9998_v46  ;;  %v10125_v53 = vcombine.low %v769_v42, %v773_v43 }
  0xb9   :  { %v637_v49 = vld [vmem:[%s15076_s1 + $0x12a0] sm:$0xff]  ;;  %7323 = vmatpush2.bf16.msra.mxu1 %v10133_v45 }
  0xba   :  { %v761_v50 = vld [vmem:[%s15076_s1 + $0x1680] sm:$0xff]  ;;  %v9990_v54 = vcombine.high %v633_v48, %v637_v49  ;;  %7324 = vmatprep.subr.bf16.mxu1 %v10126_v47  ;;  %7282 = vmatpush2.bf16.msra.mxu0 %v9997_v52  ;;  %v9989_v60 = vcombine.low %v633_v48, %v637_v49 }
  0xbb   :  { %v765_v51 = vld [vmem:[%s15076_s1 + $0x16a0] sm:$0xff] }
  0xbc   :  { %v10118_v55 = vcombine.high %v761_v50, %v765_v51  ;;  %v625_v56 = vld [vmem:[%s15076_s1 + $0x1240] sm:$0xff]  ;;  %7283 = vmatprep.subr.bf16.mxu0 %v9990_v54  ;;  %v10117_v61 = vcombine.low %v761_v50, %v765_v51 }
  0xbd   :  { %v629_v57 = vld [vmem:[%s15076_s1 + $0x1260] sm:$0xff]  ;;  %7325 = vmatpush2.bf16.msra.mxu1 %v10125_v53 }
  0xbe   :  { %v753_v58 = vld [vmem:[%s15076_s1 + $0x1640] sm:$0xff]  ;;  %v9982_v62 = vcombine.high %v625_v56, %v629_v57  ;;  %7326 = vmatprep.subr.bf16.mxu1 %v10118_v55  ;;  %7284 = vmatpush2.bf16.msra.mxu0 %v9989_v60  ;;  %v9981_v4 = vcombine.low %v625_v56, %v629_v57 }
  0xbf   :  { %v757_v59 = vld [vmem:[%s15076_s1 + $0x1660] sm:$0xff] }
  0xc0   :  { %v10110_v63 = vcombine.high %v753_v58, %v757_v59  ;;  %v617_v0 = vld [vmem:[%s15076_s1 + $0x1200] sm:$0xff]  ;;  %7285 = vmatprep.subr.bf16.mxu0 %v9982_v62  ;;  %v10109_v5 = vcombine.low %v753_v58, %v757_v59 }
  0xc1   :  { %v621_v1 = vld [vmem:[%s15076_s1 + $0x1220] sm:$0xff]  ;;  %7327 = vmatpush2.bf16.msra.mxu1 %v10117_v61 }
  0xc2   :  { %v745_v2 = vld [vmem:[%s15076_s1 + $0x1600] sm:$0xff]  ;;  %v9974_v6 = vcombine.high %v617_v0, %v621_v1  ;;  %7328 = vmatprep.subr.bf16.mxu1 %v10110_v63  ;;  %7286 = vmatpush2.bf16.msra.mxu0 %v9981_v4  ;;  %v9973_v12 = vcombine.low %v617_v0, %v621_v1 }
  0xc3   :  { %v749_v3 = vld [vmem:[%s15076_s1 + $0x1620] sm:$0xff] }
  0xc4   :  { %v10102_v7 = vcombine.high %v745_v2, %v749_v3  ;;  %v865_v8 = vld [vmem:[%s15076_s1 + $0x19c0] sm:$0xff]  ;;  %7287 = vmatprep.subr.bf16.mxu0 %v9974_v6  ;;  %v10101_v13 = vcombine.low %v745_v2, %v749_v3 }
  0xc5   :  { %v869_v9 = vld [vmem:[%s15076_s1 + $0x19e0] sm:$0xff]  ;;  %7329 = vmatpush2.bf16.msra.mxu1 %v10109_v5 }
  0xc6   :  { %v993_v10 = vld [vmem:[%s15076_s1 + $0x1dc0] sm:$0xff]  ;;  %v10222_v14 = vcombine.high %v865_v8, %v869_v9  ;;  %7330 = vmatprep.subr.bf16.mxu1 %v10102_v7  ;;  %7288 = vmatpush2.bf16.msra.mxu0 %v9973_v12  ;;  %v10221_v22 = vcombine.low %v865_v8, %v869_v9 }
  0xc7   :  { %v997_v11 = vld [vmem:[%s15076_s1 + $0x1de0] sm:$0xff] }
  0xc8   :  { %v10350_v15 = vcombine.high %v993_v10, %v997_v11  ;;  %v857_v16 = vld [vmem:[%s15076_s1 + $0x1980] sm:$0xff]  ;;  %7343 = vmatprep.subr.bf16.mxu0 %v10222_v14  ;;  %v10349_v23 = vcombine.low %v993_v10, %v997_v11 }
  0xc9   :  { %v861_v17 = vld [vmem:[%s15076_s1 + $0x19a0] sm:$0xff]  ;;  %7331 = vmatpush2.bf16.msra.mxu1 %v10101_v13 }
  0xca   :  { %v10718_v18 = vld [vmem:[%s15077_s0 + $0x20] ss:$72 sps:$4 sm:$0xff]   ;;  %v10214_v24 = vcombine.high %v857_v16, %v861_v17  ;;  %7386 = vmatprep.subr.bf16.mxu1 %v10350_v15  ;;  %v10722_v31 = vld [vmem:[%s15077_s0 + $0x3c] ss:$72 sps:$4 sm:$0xff]   ;;  %v10213_v32 = vcombine.low %v857_v16, %v861_v17 }
  0xcb   :  { %v985_v19 = vld [vmem:[%s15076_s1 + $0x1d80] sm:$0xff]  ;;  %7290 = vmatmul.mubr.bf16.vlgmr.msra.gmra.mxu0 %v10718_v18 }
  0xcc   :  { %v989_v20 = vld [vmem:[%s15076_s1 + $0x1da0] sm:$0xff]  ;;  %7333 = vmatmul.mubr.bf16.vlgmr.msra.gmra.mxu1 %v10719_v21  ;;  %7344 = vmatpush1.bf16.msra.mxu0 %v10221_v22 }
  0xcd   :  { %v10342_v25 = vcombine.high %v985_v19, %v989_v20  ;;  %v849_v26 = vld [vmem:[%s15076_s1 + $0x1940] sm:$0xff]  ;;  %7387 = vmatpush1.bf16.msra.mxu1 %v10349_v23  ;;  %7345 = vmatprep.subr.bf16.mxu0 %v10214_v24  ;;  %v10341_v33 = vcombine.low %v985_v19, %v989_v20 }
  0xce   :  { %v853_v27 = vld [vmem:[%s15076_s1 + $0x1960] sm:$0xff]  ;;  %7375 = vmatprep.mubr.bf16.mxu0 %v10720_v28  ;;  %7418 = vmatprep.mubr.bf16.mxu1 %v10722_v31 }
  0xcf   :  { %v977_v29 = vld [vmem:[%s15076_s1 + $0x1d40] sm:$0xff]  ;;  %v10206_v34 = vcombine.high %v849_v26, %v853_v27  ;;  %7388 = vmatprep.subr.bf16.mxu1 %v10342_v25  ;;  %v10205_v40 = vcombine.low %v849_v26, %v853_v27 }
  0xd0   :  { %v981_v30 = vld [vmem:[%s15076_s1 + $0x1d60] sm:$0xff]  ;;  %7346 = vmatpush1.bf16.msra.mxu0 %v10213_v32 }
  0xd1   :  { %v10334_v35 = vcombine.high %v977_v29, %v981_v30  ;;  %v841_v36 = vld [vmem:[%s15076_s1 + $0x1900] sm:$0xff]  ;;  %7389 = vmatpush1.bf16.msra.mxu1 %v10341_v33  ;;  %7347 = vmatprep.subr.bf16.mxu0 %v10206_v34  ;;  %v10333_v41 = vcombine.low %v977_v29, %v981_v30 }
  0xd2   :  { %v845_v37 = vld [vmem:[%s15076_s1 + $0x1920] sm:$0xff] }
  0xd3   :  { %v969_v38 = vld [vmem:[%s15076_s1 + $0x1d00] sm:$0xff]  ;;  %v10198_v42 = vcombine.high %v841_v36, %v845_v37  ;;  %7390 = vmatprep.subr.bf16.mxu1 %v10334_v35  ;;  %v10197_v48 = vcombine.low %v841_v36, %v845_v37 }
  0xd4   :  { %v973_v39 = vld [vmem:[%s15076_s1 + $0x1d20] sm:$0xff]  ;;  %7348 = vmatpush1.bf16.msra.mxu0 %v10205_v40 }
  0xd5   :  { %v10326_v43 = vcombine.high %v969_v38, %v973_v39  ;;  %v833_v44 = vld [vmem:[%s15076_s1 + $0x18c0] sm:$0xff]  ;;  %7391 = vmatpush1.bf16.msra.mxu1 %v10333_v41  ;;  %7349 = vmatprep.subr.bf16.mxu0 %v10198_v42  ;;  %v10325_v49 = vcombine.low %v969_v38, %v973_v39 }
  0xd6   :  { %v837_v45 = vld [vmem:[%s15076_s1 + $0x18e0] sm:$0xff] }
  0xd7   :  { %v961_v46 = vld [vmem:[%s15076_s1 + $0x1cc0] sm:$0xff]  ;;  %v10190_v50 = vcombine.high %v833_v44, %v837_v45  ;;  %7392 = vmatprep.subr.bf16.mxu1 %v10326_v43  ;;  %v10189_v56 = vcombine.low %v833_v44, %v837_v45 }
  0xd8   :  { %v965_v47 = vld [vmem:[%s15076_s1 + $0x1ce0] sm:$0xff]  ;;  %7350 = vmatpush1.bf16.msra.mxu0 %v10197_v48 }
  0xd9   :  { %v10318_v51 = vcombine.high %v961_v46, %v965_v47  ;;  %v825_v52 = vld [vmem:[%s15076_s1 + $0x1880] sm:$0xff]  ;;  %7393 = vmatpush1.bf16.msra.mxu1 %v10325_v49  ;;  %7351 = vmatprep.subr.bf16.mxu0 %v10190_v50  ;;  %v10317_v57 = vcombine.low %v961_v46, %v965_v47 }
  0xda   :  { %v829_v53 = vld [vmem:[%s15076_s1 + $0x18a0] sm:$0xff] }
  0xdb   :  { %v953_v54 = vld [vmem:[%s15076_s1 + $0x1c80] sm:$0xff]  ;;  %v10182_v58 = vcombine.high %v825_v52, %v829_v53  ;;  %7394 = vmatprep.subr.bf16.mxu1 %v10318_v51  ;;  %v10181_v0 = vcombine.low %v825_v52, %v829_v53 }
  0xdc   :  { %v957_v55 = vld [vmem:[%s15076_s1 + $0x1ca0] sm:$0xff]  ;;  %7352 = vmatpush1.bf16.msra.mxu0 %v10189_v56 }
  0xdd   :  { %v10310_v59 = vcombine.high %v953_v54, %v957_v55  ;;  %v817_v60 = vld [vmem:[%s15076_s1 + $0x1840] sm:$0xff]  ;;  %7395 = vmatpush1.bf16.msra.mxu1 %v10317_v57  ;;  %7353 = vmatprep.subr.bf16.mxu0 %v10182_v58  ;;  %v10309_v1 = vcombine.low %v953_v54, %v957_v55 }
  0xde   :  { %v821_v61 = vld [vmem:[%s15076_s1 + $0x1860] sm:$0xff] }
  0xdf   :  { %v945_v62 = vld [vmem:[%s15076_s1 + $0x1c40] sm:$0xff]  ;;  %v10174_v2 = vcombine.high %v817_v60, %v821_v61  ;;  %7396 = vmatprep.subr.bf16.mxu1 %v10310_v59  ;;  %v10173_v8 = vcombine.low %v817_v60, %v821_v61 }
  0xe0   :  { %v949_v63 = vld [vmem:[%s15076_s1 + $0x1c60] sm:$0xff]  ;;  %7354 = vmatpush1.bf16.msra.mxu0 %v10181_v0 }
  0xe1   :  { %v10302_v3 = vcombine.high %v945_v62, %v949_v63  ;;  %v809_v4 = vld [vmem:[%s15076_s1 + $0x1800] sm:$0xff]  ;;  %7397 = vmatpush1.bf16.msra.mxu1 %v10309_v1  ;;  %7355 = vmatprep.subr.bf16.mxu0 %v10174_v2  ;;  %v10301_v9 = vcombine.low %v945_v62, %v949_v63  ;;  %v15083_v1 = vlaneseq }
  0xe2   :  { %v813_v5 = vld [vmem:[%s15076_s1 + $0x1820] sm:$0xff] }
  0xe3   :  { %v937_v6 = vld [vmem:[%s15076_s1 + $0x1c00] sm:$0xff]  ;;  %v10166_v10 = vcombine.high %v809_v4, %v813_v5  ;;  %7398 = vmatprep.subr.bf16.mxu1 %v10302_v3  ;;  %v10165_v16 = vcombine.low %v809_v4, %v813_v5 }
  0xe4   :  { %v941_v7 = vld [vmem:[%s15076_s1 + $0x1c20] sm:$0xff]  ;;  %7356 = vmatpush1.bf16.msra.mxu0 %v10173_v8 }
  0xe5   :  { %v10294_v11 = vcombine.high %v937_v6, %v941_v7  ;;  %v929_v12 = vld [vmem:[%s15076_s1 + $0x1bc0] sm:$0xff]  ;;  %7399 = vmatpush1.bf16.msra.mxu1 %v10301_v9  ;;  %7357 = vmatprep.subr.bf16.mxu0 %v10166_v10  ;;  %v10293_v17 = vcombine.low %v937_v6, %v941_v7  ;;  %v11702_v10 = vshrl.u32 %v15083_v1, 7  ;;  %v972_v1 = vld [vmem:[%s15076_s1 + $0x1d18] sm:$0xff] }
  0xe6   :  { %v933_v13 = vld [vmem:[%s15076_s1 + $0x1be0] sm:$0xff] }
  0xe7   :  { %v1057_v14 = vld [vmem:[%s15076_s1 + $0x1fc0] sm:$0xff]  ;;  %v10286_v18 = vcombine.high %v929_v12, %v933_v13  ;;  %7400 = vmatprep.subr.bf16.mxu1 %v10294_v11  ;;  %v10285_v24 = vcombine.low %v929_v12, %v933_v13 }
  0xe8   :  { %v1061_v15 = vld [vmem:[%s15076_s1 + $0x1fe0] sm:$0xff]  ;;  %7358 = vmatpush1.bf16.msra.mxu0 %v10165_v16  ;;  %v98_v16 = vld [vmem:[%s15076_s1 + $0x1c8] sm:$0xff] }
  0xe9   :  { %v10414_v19 = vcombine.high %v1057_v14, %v1061_v15  ;;  %v921_v20 = vld [vmem:[%s15076_s1 + $0x1b80] sm:$0xff]  ;;  %7401 = vmatpush1.bf16.msra.mxu1 %v10293_v17  ;;  %7359 = vmatprep.subr.bf16.mxu0 %v10286_v18  ;;  %v10413_v25 = vcombine.low %v1057_v14, %v1061_v15  ;;  %v102_v17 = vld [vmem:[%s15076_s1 + $0x1e8] sm:$0xff] }
  0xea   :  { %v925_v21 = vld [vmem:[%s15076_s1 + $0x1ba0] sm:$0xff] }
  0xeb   :  { %v1049_v22 = vld [vmem:[%s15076_s1 + $0x1f80] sm:$0xff]  ;;  %v10278_v26 = vcombine.high %v921_v20, %v925_v21  ;;  %7402 = vmatprep.subr.bf16.mxu1 %v10414_v19  ;;  %v10277_v32 = vcombine.low %v921_v20, %v925_v21  ;;  %v1197_v19 = vsub.s32 0, %v11702_v10 }
  0xec   :  { %v1053_v23 = vld [vmem:[%s15076_s1 + $0x1fa0] sm:$0xff]  ;;  %7360 = vmatpush2.bf16.msra.mxu0 %v10285_v24 }
  0xed   :  { %v10406_v27 = vcombine.high %v1049_v22, %v1053_v23  ;;  %v913_v28 = vld [vmem:[%s15076_s1 + $0x1b40] sm:$0xff]  ;;  %7403 = vmatpush2.bf16.msra.mxu1 %v10413_v25  ;;  %7361 = vmatprep.subr.bf16.mxu0 %v10278_v26  ;;  %v10405_v33 = vcombine.low %v1049_v22, %v1053_v23  ;;  %v9456_v23 = vcombine.high %v98_v16, %v102_v17  ;;  %v10724_v26 = vld [vmem:[%s15077_s0 + $0x30] ss:$72 sps:$4 sm:$0xff]  }
  0xee   :  { %v917_v29 = vld [vmem:[%s15076_s1 + $0x1b60] sm:$0xff] }
  0xef   :  { %v1041_v30 = vld [vmem:[%s15076_s1 + $0x1f40] sm:$0xff]  ;;  %v10270_v34 = vcombine.high %v913_v28, %v917_v29  ;;  %7404 = vmatprep.subr.bf16.mxu1 %v10406_v27  ;;  %v10269_v40 = vcombine.low %v913_v28, %v917_v29  ;;  %v90_v27 = vld [vmem:[%s15076_s1 + $0x188] sm:$0xff] }
  0xf0   :  { %v1045_v31 = vld [vmem:[%s15076_s1 + $0x1f60] sm:$0xff]  ;;  %7362 = vmatpush2.bf16.msra.mxu0 %v10277_v32  ;;  %v94_v28 = vld [vmem:[%s15076_s1 + $0x1a8] sm:$0xff]  ;;  %v9455_v32 = vcombine.low %v98_v16, %v102_v17 }
  0xf1   :  { %v10398_v35 = vcombine.high %v1041_v30, %v1045_v31  ;;  %v905_v36 = vld [vmem:[%s15076_s1 + $0x1b00] sm:$0xff]  ;;  %7405 = vmatpush2.bf16.msra.mxu1 %v10405_v33  ;;  %7363 = vmatprep.subr.bf16.mxu0 %v10270_v34  ;;  %v10397_v41 = vcombine.low %v1041_v30, %v1045_v31  ;;  %v9448_v34 = vcombine.high %v90_v27, %v94_v28 }
  0xf2   :  { %v909_v37 = vld [vmem:[%s15076_s1 + $0x1b20] sm:$0xff] }
  0xf3   :  { %v1033_v38 = vld [vmem:[%s15076_s1 + $0x1f00] sm:$0xff]  ;;  %v10262_v42 = vcombine.high %v905_v36, %v909_v37  ;;  %7406 = vmatprep.subr.bf16.mxu1 %v10398_v35  ;;  %v10261_v48 = vcombine.low %v905_v36, %v909_v37 }
  0xf4   :  { %v1037_v39 = vld [vmem:[%s15076_s1 + $0x1f20] sm:$0xff]  ;;  %7364 = vmatpush2.bf16.msra.mxu0 %v10269_v40  ;;  %v86_v40 = vld [vmem:[%s15076_s1 + $0x168] sm:$0xff] }
  0xf5   :  { %v10390_v43 = vcombine.high %v1033_v38, %v1037_v39  ;;  %v897_v44 = vld [vmem:[%s15076_s1 + $0x1ac0] sm:$0xff]  ;;  %7407 = vmatpush2.bf16.msra.mxu1 %v10397_v41  ;;  %7365 = vmatprep.subr.bf16.mxu0 %v10262_v42  ;;  %v10389_v49 = vcombine.low %v1033_v38, %v1037_v39  ;;  %v82_v39 = vld [vmem:[%s15076_s1 + $0x148] sm:$0xff] }
  0xf6   :  { %v901_v45 = vld [vmem:[%s15076_s1 + $0x1ae0] sm:$0xff] }
  0xf7   :  { %v1025_v46 = vld [vmem:[%s15076_s1 + $0x1ec0] sm:$0xff]  ;;  %v10254_v50 = vcombine.high %v897_v44, %v901_v45  ;;  %7408 = vmatprep.subr.bf16.mxu1 %v10390_v43  ;;  %v10253_v56 = vcombine.low %v897_v44, %v901_v45  ;;  %v9447_v45 = vcombine.low %v90_v27, %v94_v28  ;;  %v42_v27 = vld [vmem:[%s15076_s1 + $0x8] sm:$0xff] }
  0xf8   :  { %v1029_v47 = vld [vmem:[%s15076_s1 + $0x1ee0] sm:$0xff]  ;;  %7366 = vmatpush2.bf16.msra.mxu0 %v10261_v48  ;;  %v46_v28 = vld [vmem:[%s15076_s1 + $0x28] sm:$0xff] }
  0xf9   :  { %v10382_v51 = vcombine.high %v1025_v46, %v1029_v47  ;;  %v889_v52 = vld [vmem:[%s15076_s1 + $0x1a80] sm:$0xff]  ;;  %7409 = vmatpush2.bf16.msra.mxu1 %v10389_v49  ;;  %7367 = vmatprep.subr.bf16.mxu0 %v10254_v50  ;;  %v10381_v57 = vcombine.low %v1025_v46, %v1029_v47  ;;  %v9440_v49 = vcombine.high %v82_v39, %v86_v40 }
  0xfa   :  { %v893_v53 = vld [vmem:[%s15076_s1 + $0x1aa0] sm:$0xff] }
  0xfb   :  { %v1017_v54 = vld [vmem:[%s15076_s1 + $0x1e80] sm:$0xff]  ;;  %v10246_v58 = vcombine.high %v889_v52, %v893_v53  ;;  %7410 = vmatprep.subr.bf16.mxu1 %v10382_v51  ;;  %v10245_v0 = vcombine.low %v889_v52, %v893_v53  ;;  %v74_v53 = vld [vmem:[%s15076_s1 + $0x108] sm:$0xff] }
  0xfc   :  { %v1021_v55 = vld [vmem:[%s15076_s1 + $0x1ea0] sm:$0xff]  ;;  %7368 = vmatpush2.bf16.msra.mxu0 %v10253_v56 }
  0xfd   :  { %v10374_v59 = vcombine.high %v1017_v54, %v1021_v55  ;;  %v881_v60 = vld [vmem:[%s15076_s1 + $0x1a40] sm:$0xff]  ;;  %7411 = vmatpush2.bf16.msra.mxu1 %v10381_v57  ;;  %7369 = vmatprep.subr.bf16.mxu0 %v10246_v58  ;;  %v10373_v2 = vcombine.low %v1017_v54, %v1021_v55  ;;  %v78_v54 = vld [vmem:[%s15076_s1 + $0x128] sm:$0xff] }
  0xfe   :  { %v885_v61 = vld [vmem:[%s15076_s1 + $0x1a60] sm:$0xff] }
  0xff   :  { %v1009_v62 = vld [vmem:[%s15076_s1 + $0x1e40] sm:$0xff]  ;;  %v10238_v3 = vcombine.high %v881_v60, %v885_v61  ;;  %7412 = vmatprep.subr.bf16.mxu1 %v10374_v59  ;;  %v10237_v9 = vcombine.low %v881_v60, %v885_v61  ;;  %v9439_v59 = vcombine.low %v82_v39, %v86_v40 }
 0x100   :  { %v1013_v63 = vld [vmem:[%s15076_s1 + $0x1e60] sm:$0xff]  ;;  %7370 = vmatpush2.bf16.msra.mxu0 %v10245_v0 }
 0x101   :  { %v10366_v4 = vcombine.high %v1009_v62, %v1013_v63  ;;  %v873_v5 = vld [vmem:[%s15076_s1 + $0x1a00] sm:$0xff]  ;;  %7413 = vmatpush2.bf16.msra.mxu1 %v10373_v2  ;;  %7371 = vmatprep.subr.bf16.mxu0 %v10238_v3  ;;  %v10365_v11 = vcombine.low %v1009_v62, %v1013_v63  ;;  %v9432_v62 = vcombine.high %v74_v53, %v78_v54  ;;  %v66_v2 = vld [vmem:[%s15076_s1 + $0xc8] sm:$0xff] }
 0x102   :  { %v877_v6 = vld [vmem:[%s15076_s1 + $0x1a20] sm:$0xff]  ;;  %v70_v3 = vld [vmem:[%s15076_s1 + $0xe8] sm:$0xff] }
 0x103   :  { %v1001_v7 = vld [vmem:[%s15076_s1 + $0x1e00] sm:$0xff]  ;;  %v10230_v12 = vcombine.high %v873_v5, %v877_v6  ;;  %7414 = vmatprep.subr.bf16.mxu1 %v10366_v4  ;;  %v10229_v18 = vcombine.low %v873_v5, %v877_v6  ;;  %v9431_v5 = vcombine.low %v74_v53, %v78_v54  ;;  %v146_v54 = vld [vmem:[%s15076_s1 + $0x348] sm:$0xff] }
 0x104   :  { %v1005_v8 = vld [vmem:[%s15076_s1 + $0x1e20] sm:$0xff]  ;;  %7372 = vmatpush2.bf16.msra.mxu0 %v10237_v9 }
 0x105   :  { %v10358_v13 = vcombine.high %v1001_v7, %v1005_v8  ;;  %v1121_v14 = vld [vmem:[%s15076_s1 + $0x21c0] sm:$0xff]  ;;  %7415 = vmatpush2.bf16.msra.mxu1 %v10365_v11  ;;  %7373 = vmatprep.subr.bf16.mxu0 %v10230_v12  ;;  %v10357_v20 = vcombine.low %v1001_v7, %v1005_v8  ;;  %v9424_v7 = vcombine.high %v66_v2, %v70_v3  ;;  %v58_v11 = vld [vmem:[%s15076_s1 + $0x88] sm:$0xff] }
 0x106   :  { %v1125_v15 = vld [vmem:[%s15076_s1 + $0x21e0] sm:$0xff]  ;;  %v62_v12 = vld [vmem:[%s15076_s1 + $0xa8] sm:$0xff] }
 0x107   :  { %v1193_v21 = vld [vmem:[%s15078_s2] sm:$0xff]  ;;  %v10478_v22 = vcombine.high %v1121_v14, %v1125_v15  ;;  %7416 = vmatprep.subr.bf16.mxu1 %v10358_v13  ;;  %v10477_v31 = vcombine.low %v1121_v14, %v1125_v15  ;;  %v9423_v14 = vcombine.low %v66_v2, %v70_v3  ;;  %v9416_v16 = vcombine.high %v58_v11, %v62_v12 }
 0x108   :  { %v1113_v24 = vld [vmem:[%s15076_s1 + $0x2180] sm:$0xff]  ;;  %7374 = vmatpush2.bf16.msra.mxu0 %v10229_v18  ;;  %v1198_v29 = vrot.slane %v1193_v21, %v1197_v19  ;;  %v7162_v42 = vpop.f32.mrf.mxu1  ;;  %v50_v19 = vld [vmem:[%s15076_s1 + $0x48] sm:$0xff] }
 0x109   :  { %v1117_v25 = vld [vmem:[%s15076_s1 + $0x21a0] sm:$0xff]  ;;  %7417 = vmatpush2.bf16.msra.mxu1 %v10357_v20  ;;  %7429 = vmatprep.subr.bf16.mxu0 %v10478_v22  ;;  %v7119_v38 = vpop.f32.mrf.mxu0  ;;  %v54_v20 = vld [vmem:[%s15076_s1 + $0x68] sm:$0xff]  ;;  %v9415_v22 = vcombine.low %v58_v11, %v62_v12 }
 0x10a   :  { %v10725_v30 = vld [vmem:[%s15077_s0 + $0x38] ss:$72 sps:$4 sm:$0xff]   ;;  %v10470_v33 = vcombine.high %v1113_v24, %v1117_v25  ;;  %7472 = vmatprep.subr.bf16.mxu1 %v9456_v23  ;;  %v10726_v37 = vld [vmem:[%s15077_s0 + $0x44] ss:$72 sps:$4 sm:$0xff]   ;;  %v7120_v41 = vadd.f32 %v7119_v38, %v1198_v29  ;;  %v10469_v43 = vcombine.low %v1113_v24, %v1117_v25  ;;  %v11757_v48 = vpop.f32.mrf.mxu1  ;;  %v9408_v24 = vcombine.high %v50_v19, %v54_v20 }
 0x10b   :  { %v1105_v35 = vld [vmem:[%s15076_s1 + $0x2140] sm:$0xff]  ;;  %7376 = vmatmul.mubr.bf16.vlgmr.msra.gmra.mxu0 %v10724_v26  ;;  %v11753_v44 = vpop.f32.mrf.mxu0  ;;  %v9399_v38 = vcombine.low %v42_v27, %v46_v28 }
 0x10c   :  { %v1109_v36 = vld [vmem:[%s15076_s1 + $0x2160] sm:$0xff]  ;;  %7419 = vmatmul.mubr.bf16.vlgmr.msra.gmra.mxu1 %v10725_v30  ;;  %7430 = vmatpush1.bf16.msra.mxu0 %v10477_v31  ;;  %v11755_v47 = vadd.f32 %v7162_v42, %v7120_v41  ;;  %v7166_v58 = vpop.f32.mrf.mxu1  ;;  %v9407_v30 = vcombine.low %v50_v19, %v54_v20 }
 0x10d   :  { %7473 = vmatpush1.bf16.msra.mxu1 %v9455_v32  ;;  %7431 = vmatprep.subr.bf16.mxu0 %v10470_v33  ;;  %v10462_v46 = vcombine.high %v1105_v35, %v1109_v36  ;;  %v1097_v50 = vld [vmem:[%s15076_s1 + $0x2100] sm:$0xff]  ;;  %v7123_v52 = vpop.f32.mrf.mxu0  ;;  %v10461_v57 = vcombine.low %v1105_v35, %v1109_v36  ;;  %v9400_v32 = vcombine.high %v42_v27, %v46_v28  ;;  %v162_v35 = vld [vmem:[%s15076_s1 + $0x3c8] sm:$0xff] }
 0x10e   :  { %7474 = vmatprep.subr.bf16.mxu1 %v9448_v34  ;;  %v1101_v51 = vld [vmem:[%s15076_s1 + $0x2120] sm:$0xff]  ;;  %7461 = vmatprep.mubr.bf16.mxu0 %v10726_v37  ;;  %v7124_v56 = vadd.f32 %v7123_v52, %v1198_v29  ;;  %v166_v36 = vld [vmem:[%s15076_s1 + $0x3e8] sm:$0xff] }
 0x10f   :  { %v10801_v55 = vld [vmem:[%s15077_s0 + $0x4] ss:$72 sps:$4 sm:$0xff]   ;;  %v10454_v60 = vcombine.high %v1097_v50, %v1101_v51  ;;  %v10453_v4 = vcombine.low %v1097_v50, %v1101_v51  ;;  %v9520_v40 = vcombine.high %v162_v35, %v166_v36 }
 0x110   :  { %7504 = vmatprep.mubr.bf16.mxu1 %v10801_v55  ;;  %7432 = vmatpush1.bf16.msra.mxu0 %v10469_v43  ;;  %v11774_v61 = vadd.f32 %v7166_v58, %v7124_v56  ;;  %v1089_v63 = vld [vmem:[%s15076_s1 + $0x20c0] sm:$0xff]  ;;  %v154_v43 = vld [vmem:[%s15076_s1 + $0x388] sm:$0xff] }
 0x111   :  { %7475 = vmatpush1.bf16.msra.mxu1 %v9447_v45  ;;  %7433 = vmatprep.subr.bf16.mxu0 %v10462_v46  ;;  %v1093_v0 = vld [vmem:[%s15076_s1 + $0x20e0] sm:$0xff]  ;;  %v158_v45 = vld [vmem:[%s15076_s1 + $0x3a8] sm:$0xff] }
 0x112   :  { %7476 = vmatprep.subr.bf16.mxu1 %v9440_v49  ;;  %v10446_v6 = vcombine.high %v1089_v63, %v1093_v0  ;;  %v1081_v8 = vld [vmem:[%s15076_s1 + $0x2080] sm:$0xff]  ;;  %v10445_v13 = vcombine.low %v1089_v63, %v1093_v0  ;;  %v9519_v49 = vcombine.low %v162_v35, %v166_v36  ;;  %v9512_v51 = vcombine.high %v154_v43, %v158_v45  ;;  %v150_v55 = vld [vmem:[%s15076_s1 + $0x368] sm:$0xff] }
 0x113   :  { %v1085_v9 = vld [vmem:[%s15076_s1 + $0x20a0] sm:$0xff]  ;;  %v138_v63 = vld [vmem:[%s15076_s1 + $0x308] sm:$0xff]  ;;  %v9503_v3 = vcombine.low %v146_v54, %v150_v55 }
 0x114   :  { %7434 = vmatpush1.bf16.msra.mxu0 %v10461_v57  ;;  %v10438_v15 = vcombine.high %v1081_v8, %v1085_v9  ;;  %v1073_v17 = vld [vmem:[%s15076_s1 + $0x2040] sm:$0xff]  ;;  %v10437_v21 = vcombine.low %v1081_v8, %v1085_v9  ;;  %v9511_v57 = vcombine.low %v154_v43, %v158_v45  ;;  %v142_v0 = vld [vmem:[%s15076_s1 + $0x328] sm:$0xff] }
 0x115   :  { %7477 = vmatpush1.bf16.msra.mxu1 %v9439_v59  ;;  %7435 = vmatprep.subr.bf16.mxu0 %v10454_v60  ;;  %v1077_v18 = vld [vmem:[%s15076_s1 + $0x2060] sm:$0xff]  ;;  %v9504_v59 = vcombine.high %v146_v54, %v150_v55  ;;  %v130_v8 = vld [vmem:[%s15076_s1 + $0x2c8] sm:$0xff]  ;;  %v9495_v12 = vcombine.low %v138_v63, %v142_v0 }
 0x116   :  { %7478 = vmatprep.subr.bf16.mxu1 %v9432_v62  ;;  %v10430_v23 = vcombine.high %v1073_v17, %v1077_v18  ;;  %v1065_v25 = vld [vmem:[%s15076_s1 + $0x2000] sm:$0xff]  ;;  %v10429_v29 = vcombine.low %v1073_v17, %v1077_v18  ;;  %v134_v9 = vld [vmem:[%s15076_s1 + $0x2e8] sm:$0xff] }
 0x117   :  { %v1069_v26 = vld [vmem:[%s15076_s1 + $0x2020] sm:$0xff]  ;;  %v122_v17 = vld [vmem:[%s15076_s1 + $0x288] sm:$0xff]  ;;  %v9487_v20 = vcombine.low %v130_v8, %v134_v9 }
 0x118   :  { %7436 = vmatpush1.bf16.msra.mxu0 %v10453_v4  ;;  %v10422_v31 = vcombine.high %v1065_v25, %v1069_v26  ;;  %v1185_v33 = vld [vmem:[%s15076_s1 + $0x23c0] sm:$0xff]  ;;  %v10421_v37 = vcombine.low %v1065_v25, %v1069_v26  ;;  %v126_v18 = vld [vmem:[%s15076_s1 + $0x2a8] sm:$0xff] }
 0x119   :  { %7479 = vmatpush1.bf16.msra.mxu1 %v9431_v5  ;;  %7437 = vmatprep.subr.bf16.mxu0 %v10446_v6  ;;  %v1189_v34 = vld [vmem:[%s15076_s1 + $0x23e0] sm:$0xff]  ;;  %v9496_v5 = vcombine.high %v138_v63, %v142_v0  ;;  %v114_v25 = vld [vmem:[%s15076_s1 + $0x248] sm:$0xff]  ;;  %v9479_v28 = vcombine.low %v122_v17, %v126_v18 }
 0x11a   :  { %7480 = vmatprep.subr.bf16.mxu1 %v9424_v7  ;;  %v10542_v39 = vcombine.high %v1185_v33, %v1189_v34  ;;  %v1177_v41 = vld [vmem:[%s15076_s1 + $0x2380] sm:$0xff]  ;;  %v10541_v46 = vcombine.low %v1185_v33, %v1189_v34  ;;  %v118_v26 = vld [vmem:[%s15076_s1 + $0x268] sm:$0xff] }
 0x11b   :  { %v1181_v42 = vld [vmem:[%s15076_s1 + $0x23a0] sm:$0xff]  ;;  %v106_v33 = vld [vmem:[%s15076_s1 + $0x208] sm:$0xff]  ;;  %v9471_v36 = vcombine.low %v114_v25, %v118_v26 }
 0x11c   :  { %7438 = vmatpush1.bf16.msra.mxu0 %v10445_v13  ;;  %v10534_v50 = vcombine.high %v1177_v41, %v1181_v42  ;;  %v1169_v52 = vld [vmem:[%s15076_s1 + $0x2340] sm:$0xff]  ;;  %v10533_v56 = vcombine.low %v1177_v41, %v1181_v42  ;;  %v110_v34 = vld [vmem:[%s15076_s1 + $0x228] sm:$0xff] }
 0x11d   :  { %7481 = vmatpush1.bf16.msra.mxu1 %v9423_v14  ;;  %7439 = vmatprep.subr.bf16.mxu0 %v10438_v15  ;;  %v1173_v53 = vld [vmem:[%s15076_s1 + $0x2360] sm:$0xff]  ;;  %v9488_v14 = vcombine.high %v130_v8, %v134_v9  ;;  %v354_v41 = vld [vmem:[%s15076_s1 + $0x9c8] sm:$0xff]  ;;  %v9463_v45 = vcombine.low %v106_v33, %v110_v34 }
 0x11e   :  { %7482 = vmatprep.subr.bf16.mxu1 %v9416_v16  ;;  %v10526_v58 = vcombine.high %v1169_v52, %v1173_v53  ;;  %v1161_v60 = vld [vmem:[%s15076_s1 + $0x2300] sm:$0xff]  ;;  %v10525_v2 = vcombine.low %v1169_v52, %v1173_v53  ;;  %v358_v42 = vld [vmem:[%s15076_s1 + $0x9e8] sm:$0xff] }
 0x11f   :  { %v1165_v62 = vld [vmem:[%s15076_s1 + $0x2320] sm:$0xff]  ;;  %v346_v53 = vld [vmem:[%s15076_s1 + $0x988] sm:$0xff] }
 0x120   :  { %7440 = vmatpush1.bf16.msra.mxu0 %v10437_v21  ;;  %v10518_v4 = vcombine.high %v1161_v60, %v1165_v62  ;;  %v1153_v6 = vld [vmem:[%s15076_s1 + $0x22c0] sm:$0xff]  ;;  %v10517_v11 = vcombine.low %v1161_v60, %v1165_v62  ;;  %v350_v54 = vld [vmem:[%s15076_s1 + $0x9a8] sm:$0xff] }
 0x121   :  { %7483 = vmatpush1.bf16.msra.mxu1 %v9415_v22  ;;  %7441 = vmatprep.subr.bf16.mxu0 %v10430_v23  ;;  %v1157_v7 = vld [vmem:[%s15076_s1 + $0x22e0] sm:$0xff]  ;;  %v9480_v22 = vcombine.high %v122_v17, %v126_v18  ;;  %v9704_v60 = vcombine.high %v346_v53, %v350_v54  ;;  %v210_v62 = vld [vmem:[%s15076_s1 + $0x548] sm:$0xff]  ;;  %v9703_v9 = vcombine.low %v346_v53, %v350_v54 }
 0x122   :  { %7484 = vmatprep.subr.bf16.mxu1 %v9408_v24  ;;  %v10510_v13 = vcombine.high %v1153_v6, %v1157_v7  ;;  %v1145_v15 = vld [vmem:[%s15076_s1 + $0x2280] sm:$0xff]  ;;  %v10509_v19 = vcombine.low %v1153_v6, %v1157_v7  ;;  %v214_v63 = vld [vmem:[%s15076_s1 + $0x568] sm:$0xff] }
 0x123   :  { %v1149_v16 = vld [vmem:[%s15076_s1 + $0x22a0] sm:$0xff]  ;;  %v330_v18 = vld [vmem:[%s15076_s1 + $0x908] sm:$0xff] }
 0x124   :  { %7442 = vmatpush1.bf16.msra.mxu0 %v10429_v29  ;;  %v10502_v21 = vcombine.high %v1145_v15, %v1149_v16  ;;  %v1137_v23 = vld [vmem:[%s15076_s1 + $0x2240] sm:$0xff]  ;;  %v10501_v27 = vcombine.low %v1145_v15, %v1149_v16  ;;  %v206_v15 = vld [vmem:[%s15076_s1 + $0x528] sm:$0xff] }
 0x125   :  { %7485 = vmatpush1.bf16.msra.mxu1 %v9407_v30  ;;  %7443 = vmatprep.subr.bf16.mxu0 %v10422_v31  ;;  %v1141_v24 = vld [vmem:[%s15076_s1 + $0x2260] sm:$0xff]  ;;  %v9472_v30 = vcombine.high %v114_v25, %v118_v26  ;;  %v10803_v16 = vld [vmem:[%s15077_s0 + $0xc] ss:$72 sps:$4 sm:$0xff]  }
 0x126   :  { %7486 = vmatprep.subr.bf16.mxu1 %v9400_v32  ;;  %v10494_v29 = vcombine.high %v1137_v23, %v1141_v24  ;;  %v1129_v31 = vld [vmem:[%s15076_s1 + $0x2200] sm:$0xff]  ;;  %v10493_v35 = vcombine.low %v1137_v23, %v1141_v24  ;;  %v170_v54 = vld [vmem:[%s15076_s1 + $0x408] sm:$0xff] }
 0x127   :  { %v1133_v32 = vld [vmem:[%s15076_s1 + $0x2220] sm:$0xff] }
 0x128   :  { %7444 = vmatpush1.bf16.msra.mxu0 %v10421_v37  ;;  %v10486_v37 = vcombine.high %v1129_v31, %v1133_v32  ;;  %v10485_v43 = vcombine.low %v1129_v31, %v1133_v32  ;;  %v10728_v52 = vld [vmem:[%s15077_s0 + $0x40] ss:$72 sps:$4 sm:$0xff]  }
 0x129   :  { %7487 = vmatpush1.bf16.msra.mxu1 %v9399_v38  ;;  %7445 = vmatprep.subr.bf16.mxu0 %v10542_v39  ;;  %v9464_v38 = vcombine.high %v106_v33, %v110_v34  ;;  %v226_v39 = vld [vmem:[%s15076_s1 + $0x5c8] sm:$0xff] }
 0x12a   :  { %7488 = vmatprep.subr.bf16.mxu1 %v9520_v40  ;;  %v230_v40 = vld [vmem:[%s15076_s1 + $0x5e8] sm:$0xff] }
 0x12b   :  { %v9583_v55 = vcombine.low %v226_v39, %v230_v40  ;;  %v10802_v6 = vld [vmem:[%s15077_s0] ss:$72 sps:$4 sm:$0xff]  }
 0x12c   :  { %7446 = vmatpush2.bf16.msra.mxu0 %v10541_v46  ;;  %v9584_v46 = vcombine.high %v226_v39, %v230_v40 }
 0x12d   :  { %7489 = vmatpush2.bf16.msra.mxu1 %v9519_v49  ;;  %7447 = vmatprep.subr.bf16.mxu0 %v10534_v50  ;;  %v9712_v49 = vcombine.high %v354_v41, %v358_v42  ;;  %v218_v50 = vld [vmem:[%s15076_s1 + $0x588] sm:$0xff] }
 0x12e   :  { %7490 = vmatprep.subr.bf16.mxu1 %v9512_v51  ;;  %v222_v51 = vld [vmem:[%s15076_s1 + $0x5a8] sm:$0xff] }
 0x12f   :  { %v9575_v7 = vcombine.low %v218_v50, %v222_v51 }
 0x130   :  { %7448 = vmatpush2.bf16.msra.mxu0 %v10533_v56  ;;  %v11947_v56 = vpop.f32.mrf.mxu0 }
 0x131   :  { %7491 = vmatpush2.bf16.msra.mxu1 %v9511_v57  ;;  %7449 = vmatprep.subr.bf16.mxu0 %v10526_v58  ;;  %v9711_v57 = vcombine.low %v354_v41, %v358_v42  ;;  %v9576_v58 = vcombine.high %v218_v50, %v222_v51 }
 0x132   :  { %7492 = vmatprep.subr.bf16.mxu1 %v9504_v59  ;;  %v11949_v59 = vpop.f32.mrf.mxu1 }
 0x134   :  { %7450 = vmatpush2.bf16.msra.mxu0 %v10525_v2  ;;  %v338_v2 = vld [vmem:[%s15076_s1 + $0x948] sm:$0xff] }
 0x135   :  { %7493 = vmatpush2.bf16.msra.mxu1 %v9503_v3  ;;  %7451 = vmatprep.subr.bf16.mxu0 %v10518_v4  ;;  %v342_v3 = vld [vmem:[%s15076_s1 + $0x968] sm:$0xff] }
 0x136   :  { %7494 = vmatprep.subr.bf16.mxu1 %v9496_v5  ;;  %v9695_v24 = vcombine.low %v338_v2, %v342_v3 }
 0x138   :  { %7452 = vmatpush2.bf16.msra.mxu0 %v10517_v11  ;;  %v9568_v11 = vcombine.high %v210_v62, %v214_v63 }
 0x139   :  { %7495 = vmatpush2.bf16.msra.mxu1 %v9495_v12  ;;  %7453 = vmatprep.subr.bf16.mxu0 %v10510_v13 }
 0x13a   :  { %7496 = vmatprep.subr.bf16.mxu1 %v9488_v14  ;;  %v202_v14 = vld [vmem:[%s15076_s1 + $0x508] sm:$0xff] }
 0x13b   :  { %v9560_v25 = vcombine.high %v202_v14, %v206_v15  ;;  %v9559_v31 = vcombine.low %v202_v14, %v206_v15  ;;  %v286_v14 = vld [vmem:[%s15076_s1 + $0x7a8] sm:$0xff] }
 0x13c   :  { %7454 = vmatpush2.bf16.msra.mxu0 %v10509_v19  ;;  %v334_v19 = vld [vmem:[%s15076_s1 + $0x928] sm:$0xff] }
 0x13d   :  { %7497 = vmatpush2.bf16.msra.mxu1 %v9487_v20  ;;  %7455 = vmatprep.subr.bf16.mxu0 %v10502_v21  ;;  %v10804_v20 = vld [vmem:[%s15077_s0 + $0x14] ss:$72 sps:$4 sm:$0xff]   ;;  %v9687_v32 = vcombine.low %v330_v18, %v334_v19  ;;  %v410_v15 = vld [vmem:[%s15076_s1 + $0xb88] sm:$0xff] }
 0x13e   :  { %7498 = vmatprep.subr.bf16.mxu1 %v9480_v22  ;;  %v9567_v22 = vcombine.low %v210_v62, %v214_v63 }
 0x140   :  { %7456 = vmatpush2.bf16.msra.mxu0 %v10501_v27  ;;  %v9688_v27 = vcombine.high %v330_v18, %v334_v19 }
 0x141   :  { %7499 = vmatpush2.bf16.msra.mxu1 %v9479_v28  ;;  %7457 = vmatprep.subr.bf16.mxu0 %v10494_v29  ;;  %v194_v28 = vld [vmem:[%s15076_s1 + $0x4c8] sm:$0xff] }
 0x142   :  { %7500 = vmatprep.subr.bf16.mxu1 %v9472_v30  ;;  %v198_v29 = vld [vmem:[%s15076_s1 + $0x4e8] sm:$0xff] }
 0x143   :  { %v326_v30 = vld [vmem:[%s15076_s1 + $0x8e8] sm:$0xff]  ;;  %v9552_v33 = vcombine.high %v194_v28, %v198_v29  ;;  %v9551_v39 = vcombine.low %v194_v28, %v198_v29 }
 0x144   :  { %7458 = vmatpush2.bf16.msra.mxu0 %v10493_v35  ;;  %v186_v35 = vld [vmem:[%s15076_s1 + $0x488] sm:$0xff] }
 0x145   :  { %7501 = vmatpush2.bf16.msra.mxu1 %v9471_v36  ;;  %7459 = vmatprep.subr.bf16.mxu0 %v10486_v37  ;;  %v190_v36 = vld [vmem:[%s15076_s1 + $0x4a8] sm:$0xff] }
 0x146   :  { %7502 = vmatprep.subr.bf16.mxu1 %v9464_v38  ;;  %v314_v37 = vld [vmem:[%s15076_s1 + $0x888] sm:$0xff]  ;;  %v9544_v41 = vcombine.high %v186_v35, %v190_v36  ;;  %v9543_v50 = vcombine.low %v186_v35, %v190_v36 }
 0x147   :  { %v318_v38 = vld [vmem:[%s15076_s1 + $0x8a8] sm:$0xff] }
 0x148   :  { %7460 = vmatpush2.bf16.msra.mxu0 %v10485_v43  ;;  %v9672_v42 = vcombine.high %v314_v37, %v318_v38  ;;  %v178_v43 = vld [vmem:[%s15076_s1 + $0x448] sm:$0xff]  ;;  %v9671_v51 = vcombine.low %v314_v37, %v318_v38 }
 0x149   :  { %7503 = vmatpush2.bf16.msra.mxu1 %v9463_v45  ;;  %7515 = vmatprep.subr.bf16.mxu0 %v9584_v46  ;;  %v7205_v0 = vpop.f32.mrf.mxu0  ;;  %v182_v45 = vld [vmem:[%s15076_s1 + $0x468] sm:$0xff] }
 0x14a   :  { %7558 = vmatprep.subr.bf16.mxu1 %v9712_v49  ;;  %v7206_v4 = vadd.f32 %v7205_v0, %v11755_v47  ;;  %v9696_v47 = vcombine.high %v338_v2, %v342_v3  ;;  %v306_v46 = vld [vmem:[%s15076_s1 + $0x848] sm:$0xff] }
 0x14b   :  { %7462 = vmatmul.mubr.bf16.vlgmr.msra.gmra.mxu0 %v10728_v52  ;;  %v11967_v8 = vpop.f32.mrf.mxu0  ;;  %v310_v49 = vld [vmem:[%s15076_s1 + $0x868] sm:$0xff]  ;;  %v9536_v52 = vcombine.high %v178_v43, %v182_v45 }
 0x14c   :  { %v7248_v5 = vpop.f32.mrf.mxu1  ;;  %7505 = vmatmul.mubr.bf16.vlgmr.msra.gmra.mxu1 %v10802_v6  ;;  %7516 = vmatpush1.bf16.msra.mxu0 %v9583_v55  ;;  %v9664_v53 = vcombine.high %v306_v46, %v310_v49  ;;  %v174_v55 = vld [vmem:[%s15076_s1 + $0x428] sm:$0xff]  ;;  %v9663_v62 = vcombine.low %v306_v46, %v310_v49 }
 0x14d   :  { %7559 = vmatpush1.bf16.msra.mxu1 %v9711_v57  ;;  %7517 = vmatprep.subr.bf16.mxu0 %v9576_v58  ;;  %v11969_v12 = vadd.f32 %v7248_v5, %v7206_v4  ;;  %v7209_v17 = vpop.f32.mrf.mxu0  ;;  %v298_v57 = vld [vmem:[%s15076_s1 + $0x808] sm:$0xff]  ;;  %v9528_v63 = vcombine.high %v170_v54, %v174_v55  ;;  %v9527_v6 = vcombine.low %v170_v54, %v174_v55 }
 0x14e   :  { %v11971_v13 = vpop.f32.mrf.mxu1  ;;  %7560 = vmatprep.subr.bf16.mxu1 %v9704_v60  ;;  %7547 = vmatprep.mubr.bf16.mxu0 %v10803_v16  ;;  %v7210_v21 = vadd.f32 %v7209_v17, %v11774_v61  ;;  %v322_v61 = vld [vmem:[%s15076_s1 + $0x8c8] sm:$0xff]  ;;  %v9535_v60 = vcombine.low %v178_v43, %v182_v45 }
 0x14f   :  { %7590 = vmatprep.mubr.bf16.mxu1 %v10804_v20  ;;  %v9680_v34 = vcombine.high %v322_v61, %v326_v30  ;;  %v9679_v40 = vcombine.low %v322_v61, %v326_v30  ;;  %v302_v58 = vld [vmem:[%s15076_s1 + $0x828] sm:$0xff] }
 0x150   :  { %7518 = vmatpush1.bf16.msra.mxu0 %v9575_v7  ;;  %v7252_v23 = vpop.f32.mrf.mxu1  ;;  %v9656_v0 = vcombine.high %v298_v57, %v302_v58  ;;  %v290_v2 = vld [vmem:[%s15076_s1 + $0x7c8] sm:$0xff]  ;;  %v9655_v7 = vcombine.low %v298_v57, %v302_v58 }
 0x151   :  { %7561 = vmatpush1.bf16.msra.mxu1 %v9703_v9  ;;  %7519 = vmatprep.subr.bf16.mxu0 %v9568_v11  ;;  %v11992_v26 = vadd.f32 %v7252_v23, %v7210_v21  ;;  %v294_v3 = vld [vmem:[%s15076_s1 + $0x7e8] sm:$0xff] }
 0x152   :  { %7562 = vmatprep.subr.bf16.mxu1 %v9696_v47  ;;  %v418_v4 = vld [vmem:[%s15076_s1 + $0xbc8] sm:$0xff]  ;;  %v9648_v9 = vcombine.high %v290_v2, %v294_v3  ;;  %v9647_v17 = vcombine.low %v290_v2, %v294_v3 }
 0x153   :  { %v422_v5 = vld [vmem:[%s15076_s1 + $0xbe8] sm:$0xff] }
 0x154   :  { %7520 = vmatpush1.bf16.msra.mxu0 %v9567_v22  ;;  %v9776_v11 = vcombine.high %v418_v4, %v422_v5  ;;  %v282_v47 = vld [vmem:[%s15076_s1 + $0x788] sm:$0xff]  ;;  %v9775_v18 = vcombine.low %v418_v4, %v422_v5 }
 0x155   :  { %7563 = vmatpush1.bf16.msra.mxu1 %v9695_v24  ;;  %7521 = vmatprep.subr.bf16.mxu0 %v9560_v25  ;;  %v414_v16 = vld [vmem:[%s15076_s1 + $0xba8] sm:$0xff]  ;;  %v9640_v19 = vcombine.high %v282_v47, %v286_v14  ;;  %v9639_v25 = vcombine.low %v282_v47, %v286_v14 }
 0x156   :  { %7564 = vmatprep.subr.bf16.mxu1 %v9688_v27  ;;  %v9768_v20 = vcombine.high %v410_v15, %v414_v16  ;;  %v274_v21 = vld [vmem:[%s15076_s1 + $0x748] sm:$0xff]  ;;  %v9767_v27 = vcombine.low %v410_v15, %v414_v16 }
 0x157   :  { %v278_v22 = vld [vmem:[%s15076_s1 + $0x768] sm:$0xff] }
 0x158   :  { %7522 = vmatpush1.bf16.msra.mxu0 %v9559_v31  ;;  %v402_v23 = vld [vmem:[%s15076_s1 + $0xb48] sm:$0xff]  ;;  %v9632_v28 = vcombine.high %v274_v21, %v278_v22 }
 0x159   :  { %7565 = vmatpush1.bf16.msra.mxu1 %v9687_v32  ;;  %7523 = vmatprep.subr.bf16.mxu0 %v9552_v33  ;;  %v406_v24 = vld [vmem:[%s15076_s1 + $0xb68] sm:$0xff]  ;;  %v9631_v33 = vcombine.low %v274_v21, %v278_v22 }
 0x15a   :  { %7566 = vmatprep.subr.bf16.mxu1 %v9680_v34  ;;  %v9760_v29 = vcombine.high %v402_v23, %v406_v24  ;;  %v266_v61 = vld [vmem:[%s15076_s1 + $0x708] sm:$0xff]  ;;  %v9759_v34 = vcombine.low %v402_v23, %v406_v24 }
 0x15b   :  { %v270_v30 = vld [vmem:[%s15076_s1 + $0x728] sm:$0xff] }
 0x15c   :  { %7524 = vmatpush1.bf16.msra.mxu0 %v9551_v39  ;;  %v394_v31 = vld [vmem:[%s15076_s1 + $0xb08] sm:$0xff]  ;;  %v9624_v35 = vcombine.high %v266_v61, %v270_v30 }
 0x15d   :  { %7567 = vmatpush1.bf16.msra.mxu1 %v9679_v40  ;;  %7525 = vmatprep.subr.bf16.mxu0 %v9544_v41  ;;  %v398_v32 = vld [vmem:[%s15076_s1 + $0xb28] sm:$0xff]  ;;  %v9623_v41 = vcombine.low %v266_v61, %v270_v30 }
 0x15e   :  { %7568 = vmatprep.subr.bf16.mxu1 %v9672_v42  ;;  %v9752_v36 = vcombine.high %v394_v31, %v398_v32  ;;  %v258_v37 = vld [vmem:[%s15076_s1 + $0x6c8] sm:$0xff]  ;;  %v9751_v42 = vcombine.low %v394_v31, %v398_v32  ;;  %v12164_v31 = vpop.f32.mrf.mxu1 }
 0x15f   :  { %v262_v38 = vld [vmem:[%s15076_s1 + $0x6e8] sm:$0xff] }
 0x160   :  { %7526 = vmatpush1.bf16.msra.mxu0 %v9543_v50  ;;  %v386_v39 = vld [vmem:[%s15076_s1 + $0xac8] sm:$0xff]  ;;  %v9616_v43 = vcombine.high %v258_v37, %v262_v38 }
 0x161   :  { %7569 = vmatpush1.bf16.msra.mxu1 %v9671_v51  ;;  %7527 = vmatprep.subr.bf16.mxu0 %v9536_v52  ;;  %v390_v40 = vld [vmem:[%s15076_s1 + $0xae8] sm:$0xff]  ;;  %v9615_v52 = vcombine.low %v258_v37, %v262_v38 }
 0x162   :  { %7570 = vmatprep.subr.bf16.mxu1 %v9664_v53  ;;  %v9744_v45 = vcombine.high %v386_v39, %v390_v40  ;;  %v250_v46 = vld [vmem:[%s15076_s1 + $0x688] sm:$0xff]  ;;  %v9743_v53 = vcombine.low %v386_v39, %v390_v40 }
 0x163   :  { %v254_v49 = vld [vmem:[%s15076_s1 + $0x6a8] sm:$0xff] }
 0x164   :  { %7528 = vmatpush1.bf16.msra.mxu0 %v9535_v60  ;;  %v378_v50 = vld [vmem:[%s15076_s1 + $0xa88] sm:$0xff]  ;;  %v9608_v54 = vcombine.high %v250_v46, %v254_v49 }
 0x165   :  { %7571 = vmatpush1.bf16.msra.mxu1 %v9663_v62  ;;  %7529 = vmatprep.subr.bf16.mxu0 %v9528_v63  ;;  %v382_v51 = vld [vmem:[%s15076_s1 + $0xaa8] sm:$0xff]  ;;  %v9607_v63 = vcombine.low %v250_v46, %v254_v49 }
 0x166   :  { %7572 = vmatprep.subr.bf16.mxu1 %v9656_v0  ;;  %v9736_v55 = vcombine.high %v378_v50, %v382_v51  ;;  %v242_v57 = vld [vmem:[%s15076_s1 + $0x648] sm:$0xff]  ;;  %v9735_v0 = vcombine.low %v378_v50, %v382_v51 }
 0x167   :  { %v246_v58 = vld [vmem:[%s15076_s1 + $0x668] sm:$0xff] }
 0x168   :  { %7530 = vmatpush1.bf16.msra.mxu0 %v9527_v6  ;;  %v370_v60 = vld [vmem:[%s15076_s1 + $0xa48] sm:$0xff]  ;;  %v9600_v2 = vcombine.high %v242_v57, %v246_v58 }
 0x169   :  { %7573 = vmatpush1.bf16.msra.mxu1 %v9655_v7  ;;  %7531 = vmatprep.subr.bf16.mxu0 %v9648_v9  ;;  %v374_v62 = vld [vmem:[%s15076_s1 + $0xa68] sm:$0xff]  ;;  %v9599_v9 = vcombine.low %v242_v57, %v246_v58 }
 0x16a   :  { %7574 = vmatprep.subr.bf16.mxu1 %v9776_v11  ;;  %v9728_v3 = vcombine.high %v370_v60, %v374_v62  ;;  %v234_v4 = vld [vmem:[%s15076_s1 + $0x608] sm:$0xff]  ;;  %v9727_v11 = vcombine.low %v370_v60, %v374_v62 }
 0x16b   :  { %v238_v5 = vld [vmem:[%s15076_s1 + $0x628] sm:$0xff] }
 0x16c   :  { %7532 = vmatpush2.bf16.msra.mxu0 %v9647_v17  ;;  %v362_v6 = vld [vmem:[%s15076_s1 + $0xa08] sm:$0xff]  ;;  %v9592_v47 = vcombine.high %v234_v4, %v238_v5 }
 0x16d   :  { %7575 = vmatpush2.bf16.msra.mxu1 %v9775_v18  ;;  %7533 = vmatprep.subr.bf16.mxu0 %v9640_v19  ;;  %v366_v7 = vld [vmem:[%s15076_s1 + $0xa28] sm:$0xff]  ;;  %v9591_v19 = vcombine.low %v234_v4, %v238_v5 }
 0x16e   :  { %7576 = vmatprep.subr.bf16.mxu1 %v9768_v20  ;;  %v9720_v14 = vcombine.high %v362_v6, %v366_v7  ;;  %v482_v15 = vld [vmem:[%s15076_s1 + $0xdc8] sm:$0xff]  ;;  %v9719_v20 = vcombine.low %v362_v6, %v366_v7 }
 0x16f   :  { %v486_v16 = vld [vmem:[%s15076_s1 + $0xde8] sm:$0xff] }
 0x170   :  { %7534 = vmatpush2.bf16.msra.mxu0 %v9639_v25  ;;  %v610_v17 = vld [vmem:[%s15076_s1 + $0x11c8] sm:$0xff]  ;;  %v9840_v21 = vcombine.high %v482_v15, %v486_v16 }
 0x171   :  { %7577 = vmatpush2.bf16.msra.mxu1 %v9767_v27  ;;  %7535 = vmatprep.subr.bf16.mxu0 %v9632_v28  ;;  %v614_v18 = vld [vmem:[%s15076_s1 + $0x11e8] sm:$0xff]  ;;  %v9839_v28 = vcombine.low %v482_v15, %v486_v16 }
 0x172   :  { %7578 = vmatprep.subr.bf16.mxu1 %v9760_v29  ;;  %v9968_v22 = vcombine.high %v610_v17, %v614_v18  ;;  %v474_v23 = vld [vmem:[%s15076_s1 + $0xd88] sm:$0xff]  ;;  %v12162_v29 = vpop.f32.mrf.mxu0  ;;  %v9967_v61 = vcombine.low %v610_v17, %v614_v18 }
 0x173   :  { %v478_v24 = vld [vmem:[%s15076_s1 + $0xda8] sm:$0xff] }
 0x174   :  { %7536 = vmatpush2.bf16.msra.mxu0 %v9631_v33  ;;  %v602_v25 = vld [vmem:[%s15076_s1 + $0x1188] sm:$0xff]  ;;  %v9832_v30 = vcombine.high %v474_v23, %v478_v24 }
 0x175   :  { %7579 = vmatpush2.bf16.msra.mxu1 %v9759_v34  ;;  %7537 = vmatprep.subr.bf16.mxu0 %v9624_v35  ;;  %v606_v27 = vld [vmem:[%s15076_s1 + $0x11a8] sm:$0xff] }
 0x176   :  { %7580 = vmatprep.subr.bf16.mxu1 %v9752_v36  ;;  %v9960_v32 = vcombine.high %v602_v25, %v606_v27  ;;  %v466_v33 = vld [vmem:[%s15076_s1 + $0xd48] sm:$0xff] }
 0x177   :  { %v470_v34 = vld [vmem:[%s15076_s1 + $0xd68] sm:$0xff] }
 0x178   :  { %7538 = vmatpush2.bf16.msra.mxu0 %v9623_v41  ;;  %v10805_v36 = vld [vmem:[%s15077_s0 + $0x8] ss:$72 sps:$4 sm:$0xff]   ;;  %v9824_v46 = vcombine.high %v466_v33, %v470_v34  ;;  %v10808_v58 = vld [vmem:[%s15077_s0 + $0x24] ss:$72 sps:$4 sm:$0xff]   ;;  %v9823_v62 = vcombine.low %v466_v33, %v470_v34 }
 0x179   :  { %7581 = vmatpush2.bf16.msra.mxu1 %v9751_v42  ;;  %7539 = vmatprep.subr.bf16.mxu0 %v9616_v43  ;;  %v594_v37 = vld [vmem:[%s15076_s1 + $0x1148] sm:$0xff]  ;;  %v10806_v41 = vld [vmem:[%s15077_s0 + $0x10] ss:$72 sps:$4 sm:$0xff]   ;;  %v9831_v42 = vcombine.low %v474_v23, %v478_v24 }
 0x17a   :  { %7582 = vmatprep.subr.bf16.mxu1 %v9744_v45  ;;  %v598_v38 = vld [vmem:[%s15076_s1 + $0x1168] sm:$0xff]  ;;  %v9959_v45 = vcombine.low %v602_v25, %v606_v27 }
 0x17b   :  { %v458_v51 = vld [vmem:[%s15076_s1 + $0xd08] sm:$0xff] }
 0x17c   :  { %7540 = vmatpush2.bf16.msra.mxu0 %v9615_v52  ;;  %v462_v52 = vld [vmem:[%s15076_s1 + $0xd28] sm:$0xff] }
 0x17d   :  { %7583 = vmatpush2.bf16.msra.mxu1 %v9743_v53  ;;  %7541 = vmatprep.subr.bf16.mxu0 %v9608_v54  ;;  %v10807_v53 = vld [vmem:[%s15077_s0 + $0x1c] ss:$72 sps:$4 sm:$0xff]   ;;  %v590_v57 = vld [vmem:[%s15076_s1 + $0x1128] sm:$0xff] }
 0x17e   :  { %7584 = vmatprep.subr.bf16.mxu1 %v9736_v55  ;;  %v586_v55 = vld [vmem:[%s15076_s1 + $0x1108] sm:$0xff] }
 0x17f   :  { %v9944_v4 = vcombine.high %v586_v55, %v590_v57  ;;  %v450_v5 = vld [vmem:[%s15076_s1 + $0xcc8] sm:$0xff] }
 0x180   :  { %7542 = vmatpush2.bf16.msra.mxu0 %v9607_v63  ;;  %v454_v6 = vld [vmem:[%s15076_s1 + $0xce8] sm:$0xff] }
 0x181   :  { %7585 = vmatpush2.bf16.msra.mxu1 %v9735_v0  ;;  %7543 = vmatprep.subr.bf16.mxu0 %v9600_v2  ;;  %v9951_v0 = vcombine.low %v594_v37, %v598_v38  ;;  %v9816_v2 = vcombine.high %v458_v51, %v462_v52  ;;  %v582_v7 = vld [vmem:[%s15076_s1 + $0x10e8] sm:$0xff] }
 0x182   :  { %7586 = vmatprep.subr.bf16.mxu1 %v9728_v3  ;;  %v442_v15 = vld [vmem:[%s15076_s1 + $0xc88] sm:$0xff] }
 0x183   :  { %v446_v16 = vld [vmem:[%s15076_s1 + $0xca8] sm:$0xff] }
 0x184   :  { %7544 = vmatpush2.bf16.msra.mxu0 %v9599_v9  ;;  %v9815_v9 = vcombine.low %v458_v51, %v462_v52  ;;  %v570_v17 = vld [vmem:[%s15076_s1 + $0x1088] sm:$0xff] }
 0x185   :  { %7587 = vmatpush2.bf16.msra.mxu1 %v9727_v11  ;;  %7545 = vmatprep.subr.bf16.mxu0 %v9592_v47  ;;  %v9943_v11 = vcombine.low %v586_v55, %v590_v57  ;;  %v9808_v47 = vcombine.high %v450_v5, %v454_v6  ;;  %v574_v18 = vld [vmem:[%s15076_s1 + $0x10a8] sm:$0xff] }
 0x186   :  { %7588 = vmatprep.subr.bf16.mxu1 %v9720_v14  ;;  %v434_v23 = vld [vmem:[%s15076_s1 + $0xc48] sm:$0xff] }
 0x187   :  { %v438_v24 = vld [vmem:[%s15076_s1 + $0xc68] sm:$0xff] }
 0x188   :  { %7546 = vmatpush2.bf16.msra.mxu0 %v9591_v19  ;;  %v9807_v19 = vcombine.low %v450_v5, %v454_v6  ;;  %v562_v25 = vld [vmem:[%s15076_s1 + $0x1048] sm:$0xff] }
 0x189   :  { %7589 = vmatpush2.bf16.msra.mxu1 %v9719_v20  ;;  %7601 = vmatprep.subr.bf16.mxu0 %v9840_v21  ;;  %v9800_v21 = vcombine.high %v442_v15, %v446_v16  ;;  %v566_v27 = vld [vmem:[%s15076_s1 + $0x1068] sm:$0xff] }
 0x18a   :  { %7644 = vmatprep.subr.bf16.mxu1 %v9968_v22  ;;  %v9928_v22 = vcombine.high %v570_v17, %v574_v18  ;;  %v426_v33 = vld [vmem:[%s15076_s1 + $0xc08] sm:$0xff] }
 0x18b   :  { %v7291_v35 = vpop.f32.mrf.mxu0  ;;  %7548 = vmatmul.mubr.bf16.vlgmr.msra.gmra.mxu0 %v10805_v36  ;;  %v430_v34 = vld [vmem:[%s15076_s1 + $0xc28] sm:$0xff] }
 0x18c   :  { %v7292_v39 = vadd.f32 %v7291_v35, %v11969_v12  ;;  %v7334_v40 = vpop.f32.mrf.mxu1  ;;  %7591 = vmatmul.mubr.bf16.vlgmr.msra.gmra.mxu1 %v10806_v41  ;;  %7602 = vmatpush1.bf16.msra.mxu0 %v9839_v28  ;;  %v9952_v12 = vcombine.high %v594_v37, %v598_v38  ;;  %v9799_v28 = vcombine.low %v442_v15, %v446_v16  ;;  %v554_v35 = vld [vmem:[%s15076_s1 + $0x1008] sm:$0xff] }
 0x18d   :  { %7645 = vmatpush1.bf16.msra.mxu1 %v9967_v61  ;;  %v12185_v43 = vpop.f32.mrf.mxu0  ;;  %7603 = vmatprep.subr.bf16.mxu0 %v9832_v30  ;;  %v9927_v61 = vcombine.low %v570_v17, %v574_v18  ;;  %v9792_v30 = vcombine.high %v434_v23, %v438_v24  ;;  %v558_v36 = vld [vmem:[%s15076_s1 + $0x1028] sm:$0xff]  ;;  %v9791_v37 = vcombine.low %v434_v23, %v438_v24 }
 0x18e   :  { %v12187_v49 = vadd.f32 %v7334_v40, %v7292_v39  ;;  %v12189_v50 = vpop.f32.mrf.mxu1  ;;  %7646 = vmatprep.subr.bf16.mxu1 %v9960_v32  ;;  %7633 = vmatprep.mubr.bf16.mxu0 %v10807_v53  ;;  %v9920_v32 = vcombine.high %v562_v25, %v566_v27  ;;  %v9919_v38 = vcombine.low %v562_v25, %v566_v27  ;;  %v546_v41 = vld [vmem:[%s15076_s1 + $0xfc8] sm:$0xff] }
 0x18f   :  { %v7295_v54 = vpop.f32.mrf.mxu0  ;;  %7676 = vmatprep.mubr.bf16.mxu1 %v10808_v58  ;;  %v9784_v39 = vcombine.high %v426_v33, %v430_v34  ;;  %v9912_v40 = vcombine.high %v554_v35, %v558_v36  ;;  %v9911_v51 = vcombine.low %v554_v35, %v558_v36  ;;  %v542_v55 = vld [vmem:[%s15076_s1 + $0xfa8] sm:$0xff] }
 0x190   :  { %v7296_v60 = vadd.f32 %v7295_v54, %v11992_v26  ;;  %7604 = vmatpush1.bf16.msra.mxu0 %v9831_v42  ;;  %v7338_v63 = vpop.f32.mrf.mxu1  ;;  %v578_v26 = vld [vmem:[%s15076_s1 + $0x10c8] sm:$0xff] }
 0x191   :  { %7647 = vmatpush1.bf16.msra.mxu1 %v9959_v45  ;;  %7605 = vmatprep.subr.bf16.mxu0 %v9824_v46  ;;  %v9936_v14 = vcombine.high %v578_v26, %v582_v7  ;;  %v9935_v20 = vcombine.low %v578_v26, %v582_v7  ;;  %v550_v42 = vld [vmem:[%s15076_s1 + $0xfe8] sm:$0xff] }
 0x192   :  { %v12210_v3 = vadd.f32 %v7338_v63, %v7296_v60  ;;  %7648 = vmatprep.subr.bf16.mxu1 %v9952_v12  ;;  %v674_v45 = vld [vmem:[%s15076_s1 + $0x13c8] sm:$0xff]  ;;  %v9783_v12 = vcombine.low %v426_v33, %v430_v34  ;;  %v9904_v52 = vcombine.high %v546_v41, %v550_v42  ;;  %v9903_v60 = vcombine.low %v546_v41, %v550_v42 }
 0x193   :  { %v678_v46 = vld [vmem:[%s15076_s1 + $0x13e8] sm:$0xff] }
 0x194   :  { %7606 = vmatpush1.bf16.msra.mxu0 %v9823_v62  ;;  %v10032_v53 = vcombine.high %v674_v45, %v678_v46  ;;  %v538_v54 = vld [vmem:[%s15076_s1 + $0xf88] sm:$0xff]  ;;  %v10031_v62 = vcombine.low %v674_v45, %v678_v46 }
 0x195   :  { %7649 = vmatpush1.bf16.msra.mxu1 %v9951_v0  ;;  %7607 = vmatprep.subr.bf16.mxu0 %v9816_v2  ;;  %v666_v57 = vld [vmem:[%s15076_s1 + $0x1388] sm:$0xff]  ;;  %v9896_v63 = vcombine.high %v538_v54, %v542_v55  ;;  %v9895_v26 = vcombine.low %v538_v54, %v542_v55 }
 0x196   :  { %7650 = vmatprep.subr.bf16.mxu1 %v9944_v4  ;;  %v670_v58 = vld [vmem:[%s15076_s1 + $0x13a8] sm:$0xff] }
 0x197   :  { %v10024_v0 = vcombine.high %v666_v57, %v670_v58  ;;  %v530_v2 = vld [vmem:[%s15076_s1 + $0xf48] sm:$0xff]  ;;  %v10023_v7 = vcombine.low %v666_v57, %v670_v58 }
 0x198   :  { %7608 = vmatpush1.bf16.msra.mxu0 %v9815_v9  ;;  %v534_v4 = vld [vmem:[%s15076_s1 + $0xf68] sm:$0xff] }
 0x199   :  { %7651 = vmatpush1.bf16.msra.mxu1 %v9943_v11  ;;  %7609 = vmatprep.subr.bf16.mxu0 %v9808_v47  ;;  %v658_v5 = vld [vmem:[%s15076_s1 + $0x1348] sm:$0xff]  ;;  %v9888_v9 = vcombine.high %v530_v2, %v534_v4  ;;  %v9887_v17 = vcombine.low %v530_v2, %v534_v4 }
 0x19a   :  { %7652 = vmatprep.subr.bf16.mxu1 %v9936_v14  ;;  %v662_v6 = vld [vmem:[%s15076_s1 + $0x1368] sm:$0xff] }
 0x19b   :  { %v10016_v11 = vcombine.high %v658_v5, %v662_v6  ;;  %v522_v47 = vld [vmem:[%s15076_s1 + $0xf08] sm:$0xff]  ;;  %v10015_v18 = vcombine.low %v658_v5, %v662_v6 }
 0x19c   :  { %7610 = vmatpush1.bf16.msra.mxu0 %v9807_v19  ;;  %v526_v14 = vld [vmem:[%s15076_s1 + $0xf28] sm:$0xff] }
 0x19d   :  { %7653 = vmatpush1.bf16.msra.mxu1 %v9935_v20  ;;  %7611 = vmatprep.subr.bf16.mxu0 %v9800_v21  ;;  %v650_v15 = vld [vmem:[%s15076_s1 + $0x1308] sm:$0xff]  ;;  %v9880_v19 = vcombine.high %v522_v47, %v526_v14  ;;  %v9879_v25 = vcombine.low %v522_v47, %v526_v14 }
 0x19e   :  { %7654 = vmatprep.subr.bf16.mxu1 %v9928_v22  ;;  %v654_v16 = vld [vmem:[%s15076_s1 + $0x1328] sm:$0xff] }
 0x19f   :  { %v10008_v20 = vcombine.high %v650_v15, %v654_v16  ;;  %v514_v21 = vld [vmem:[%s15076_s1 + $0xec8] sm:$0xff]  ;;  %v10007_v27 = vcombine.low %v650_v15, %v654_v16  ;;  %v12380_v16 = vpop.f32.mrf.mxu0 }
 0x1a0   :  { %7612 = vmatpush1.bf16.msra.mxu0 %v9799_v28  ;;  %v518_v22 = vld [vmem:[%s15076_s1 + $0xee8] sm:$0xff] }
 0x1a1   :  { %7655 = vmatpush1.bf16.msra.mxu1 %v9927_v61  ;;  %7613 = vmatprep.subr.bf16.mxu0 %v9792_v30  ;;  %v642_v23 = vld [vmem:[%s15076_s1 + $0x12c8] sm:$0xff]  ;;  %v9872_v28 = vcombine.high %v514_v21, %v518_v22  ;;  %v9871_v35 = vcombine.low %v514_v21, %v518_v22 }
 0x1a2   :  { %7656 = vmatprep.subr.bf16.mxu1 %v9920_v32  ;;  %v646_v24 = vld [vmem:[%s15076_s1 + $0x12e8] sm:$0xff] }
 0x1a3   :  { %v10000_v61 = vcombine.high %v642_v23, %v646_v24  ;;  %v506_v30 = vld [vmem:[%s15076_s1 + $0xe88] sm:$0xff]  ;;  %v9999_v36 = vcombine.low %v642_v23, %v646_v24  ;;  %v10809_v24 = vld [vmem:[%s15077_s0 + $0x18] ss:$72 sps:$4 sm:$0xff]  }
 0x1a4   :  { %7614 = vmatpush1.bf16.msra.mxu0 %v9791_v37  ;;  %v510_v32 = vld [vmem:[%s15076_s1 + $0xea8] sm:$0xff] }
 0x1a5   :  { %7657 = vmatpush1.bf16.msra.mxu1 %v9919_v38  ;;  %7615 = vmatprep.subr.bf16.mxu0 %v9784_v39  ;;  %v634_v33 = vld [vmem:[%s15076_s1 + $0x1288] sm:$0xff]  ;;  %v9864_v37 = vcombine.high %v506_v30, %v510_v32  ;;  %v9863_v45 = vcombine.low %v506_v30, %v510_v32 }
 0x1a6   :  { %7658 = vmatprep.subr.bf16.mxu1 %v9912_v40  ;;  %v638_v34 = vld [vmem:[%s15076_s1 + $0x12a8] sm:$0xff] }
 0x1a7   :  { %v9992_v38 = vcombine.high %v634_v33, %v638_v34  ;;  %v498_v39 = vld [vmem:[%s15076_s1 + $0xe48] sm:$0xff]  ;;  %v9991_v46 = vcombine.low %v634_v33, %v638_v34 }
 0x1a8   :  { %7616 = vmatpush1.bf16.msra.mxu0 %v9783_v12  ;;  %v502_v40 = vld [vmem:[%s15076_s1 + $0xe68] sm:$0xff] }
 0x1a9   :  { %7659 = vmatpush1.bf16.msra.mxu1 %v9911_v51  ;;  %7617 = vmatprep.subr.bf16.mxu0 %v9904_v52  ;;  %v626_v41 = vld [vmem:[%s15076_s1 + $0x1248] sm:$0xff]  ;;  %v9856_v12 = vcombine.high %v498_v39, %v502_v40  ;;  %v9855_v57 = vcombine.low %v498_v39, %v502_v40 }
 0x1aa   :  { %7660 = vmatprep.subr.bf16.mxu1 %v10032_v53  ;;  %v630_v42 = vld [vmem:[%s15076_s1 + $0x1268] sm:$0xff] }
 0x1ab   :  { %v9984_v51 = vcombine.high %v626_v41, %v630_v42  ;;  %v490_v52 = vld [vmem:[%s15076_s1 + $0xe08] sm:$0xff]  ;;  %v9983_v58 = vcombine.low %v626_v41, %v630_v42 }
 0x1ac   :  { %7618 = vmatpush2.bf16.msra.mxu0 %v9903_v60  ;;  %v494_v53 = vld [vmem:[%s15076_s1 + $0xe28] sm:$0xff] }
 0x1ad   :  { %7661 = vmatpush2.bf16.msra.mxu1 %v10031_v62  ;;  %7619 = vmatprep.subr.bf16.mxu0 %v9896_v63  ;;  %v618_v54 = vld [vmem:[%s15076_s1 + $0x1208] sm:$0xff]  ;;  %v9848_v60 = vcombine.high %v490_v52, %v494_v53  ;;  %v9847_v5 = vcombine.low %v490_v52, %v494_v53 }
 0x1ae   :  { %7662 = vmatprep.subr.bf16.mxu1 %v10024_v0  ;;  %v622_v55 = vld [vmem:[%s15076_s1 + $0x1228] sm:$0xff] }
 0x1af   :  { %v9976_v62 = vcombine.high %v618_v54, %v622_v55  ;;  %v738_v63 = vld [vmem:[%s15076_s1 + $0x15c8] sm:$0xff]  ;;  %v9975_v6 = vcombine.low %v618_v54, %v622_v55 }
 0x1b0   :  { %7620 = vmatpush2.bf16.msra.mxu0 %v9895_v26  ;;  %v742_v0 = vld [vmem:[%s15076_s1 + $0x15e8] sm:$0xff] }
 0x1b1   :  { %7663 = vmatpush2.bf16.msra.mxu1 %v10023_v7  ;;  %7621 = vmatprep.subr.bf16.mxu0 %v9888_v9  ;;  %v866_v2 = vld [vmem:[%s15076_s1 + $0x19c8] sm:$0xff]  ;;  %v10096_v26 = vcombine.high %v738_v63, %v742_v0  ;;  %v10095_v15 = vcombine.low %v738_v63, %v742_v0 }
 0x1b2   :  { %7664 = vmatprep.subr.bf16.mxu1 %v10016_v11  ;;  %v870_v4 = vld [vmem:[%s15076_s1 + $0x19e8] sm:$0xff] }
 0x1b3   :  { %v10224_v7 = vcombine.high %v866_v2, %v870_v4  ;;  %v730_v9 = vld [vmem:[%s15076_s1 + $0x1588] sm:$0xff] }
 0x1b4   :  { %7622 = vmatpush2.bf16.msra.mxu0 %v9887_v17  ;;  %v734_v11 = vld [vmem:[%s15076_s1 + $0x15a8] sm:$0xff]  ;;  %v10223_v17 = vcombine.low %v866_v2, %v870_v4 }
 0x1b5   :  { %7665 = vmatpush2.bf16.msra.mxu1 %v10015_v18  ;;  %7623 = vmatprep.subr.bf16.mxu0 %v9880_v19  ;;  %v858_v47 = vld [vmem:[%s15076_s1 + $0x1988] sm:$0xff]  ;;  %v10088_v18 = vcombine.high %v730_v9, %v734_v11  ;;  %v12382_v19 = vpop.f32.mrf.mxu1  ;;  %v10087_v32 = vcombine.low %v730_v9, %v734_v11 }
 0x1b6   :  { %7666 = vmatprep.subr.bf16.mxu1 %v10008_v20  ;;  %v862_v14 = vld [vmem:[%s15076_s1 + $0x19a8] sm:$0xff] }
 0x1b7   :  { %v10216_v20 = vcombine.high %v858_v47, %v862_v14  ;;  %v722_v21 = vld [vmem:[%s15076_s1 + $0x1548] sm:$0xff]  ;;  %v10215_v34 = vcombine.low %v858_v47, %v862_v14 }
 0x1b8   :  { %7624 = vmatpush2.bf16.msra.mxu0 %v9879_v25  ;;  %v726_v22 = vld [vmem:[%s15076_s1 + $0x1568] sm:$0xff] }
 0x1b9   :  { %7667 = vmatpush2.bf16.msra.mxu1 %v10007_v27  ;;  %7625 = vmatprep.subr.bf16.mxu0 %v9872_v28  ;;  %v850_v25 = vld [vmem:[%s15076_s1 + $0x1948] sm:$0xff] }
 0x1ba   :  { %7668 = vmatprep.subr.bf16.mxu1 %v10000_v61  ;;  %v854_v27 = vld [vmem:[%s15076_s1 + $0x1968] sm:$0xff] }
 0x1bb   :  { %v10810_v30 = vld [vmem:[%s15077_s0 + $0x20] ss:$72 sps:$4 sm:$0xff]   ;;  %v10811_v40 = vld [vmem:[%s15077_s0 + $0x2c] ss:$72 sps:$4 sm:$0xff]   ;;  %v10207_v53 = vcombine.low %v850_v25, %v854_v27 }
 0x1bc   :  { %7626 = vmatpush2.bf16.msra.mxu0 %v9871_v35  ;;  %v10080_v35 = vcombine.high %v722_v21, %v726_v22  ;;  %v718_v39 = vld [vmem:[%s15076_s1 + $0x1528] sm:$0xff] }
 0x1bd   :  { %7669 = vmatpush2.bf16.msra.mxu1 %v9999_v36  ;;  %7627 = vmatprep.subr.bf16.mxu0 %v9864_v37  ;;  %v842_v42 = vld [vmem:[%s15076_s1 + $0x1908] sm:$0xff] }
 0x1be   :  { %7670 = vmatprep.subr.bf16.mxu1 %v9992_v38  ;;  %v714_v38 = vld [vmem:[%s15076_s1 + $0x1508] sm:$0xff] }
 0x1bf   :  { %v10072_v54 = vcombine.high %v714_v38, %v718_v39  ;;  %v10071_v63 = vcombine.low %v714_v38, %v718_v39  ;;  %v806_v38 = vld [vmem:[%s15076_s1 + $0x17e8] sm:$0xff] }
 0x1c0   :  { %7628 = vmatpush2.bf16.msra.mxu0 %v9863_v45  ;;  %v846_v45 = vld [vmem:[%s15076_s1 + $0x1928] sm:$0xff] }
 0x1c1   :  { %7671 = vmatpush2.bf16.msra.mxu1 %v9991_v46  ;;  %7629 = vmatprep.subr.bf16.mxu0 %v9856_v12  ;;  %v10812_v46 = vld [vmem:[%s15077_s0 + $0x34] ss:$72 sps:$4 sm:$0xff]   ;;  %v10199_v0 = vcombine.low %v842_v42, %v846_v45  ;;  %v930_v39 = vld [vmem:[%s15076_s1 + $0x1bc8] sm:$0xff] }
 0x1c2   :  { %7672 = vmatprep.subr.bf16.mxu1 %v9984_v51  ;;  %v10079_v51 = vcombine.low %v722_v21, %v726_v22 }
 0x1c4   :  { %7630 = vmatpush2.bf16.msra.mxu0 %v9855_v57  ;;  %v10200_v57 = vcombine.high %v842_v42, %v846_v45 }
 0x1c5   :  { %7673 = vmatpush2.bf16.msra.mxu1 %v9983_v58  ;;  %7631 = vmatprep.subr.bf16.mxu0 %v9848_v60  ;;  %v706_v58 = vld [vmem:[%s15076_s1 + $0x14c8] sm:$0xff] }
 0x1c6   :  { %7674 = vmatprep.subr.bf16.mxu1 %v9976_v62  ;;  %v710_v60 = vld [vmem:[%s15076_s1 + $0x14e8] sm:$0xff] }
 0x1c7   :  { %v838_v62 = vld [vmem:[%s15076_s1 + $0x18e8] sm:$0xff]  ;;  %v10064_v2 = vcombine.high %v706_v58, %v710_v60  ;;  %v10063_v9 = vcombine.low %v706_v58, %v710_v60 }
 0x1c8   :  { %7632 = vmatpush2.bf16.msra.mxu0 %v9847_v5  ;;  %v698_v5 = vld [vmem:[%s15076_s1 + $0x1488] sm:$0xff] }
 0x1c9   :  { %7675 = vmatpush2.bf16.msra.mxu1 %v9975_v6  ;;  %7687 = vmatprep.subr.bf16.mxu0 %v10096_v26  ;;  %v702_v6 = vld [vmem:[%s15076_s1 + $0x14a8] sm:$0xff] }
 0x1ca   :  { %7730 = vmatprep.subr.bf16.mxu1 %v10224_v7  ;;  %v826_v26 = vld [vmem:[%s15076_s1 + $0x1888] sm:$0xff]  ;;  %v10056_v47 = vcombine.high %v698_v5, %v702_v6  ;;  %v10055_v21 = vcombine.low %v698_v5, %v702_v6 }
 0x1cb   :  { %v7377_v23 = vpop.f32.mrf.mxu0  ;;  %7634 = vmatmul.mubr.bf16.vlgmr.msra.gmra.mxu0 %v10809_v24  ;;  %v830_v7 = vld [vmem:[%s15076_s1 + $0x18a8] sm:$0xff] }
 0x1cc   :  { %v7378_v28 = vadd.f32 %v7377_v23, %v12187_v49  ;;  %v7420_v61 = vpop.f32.mrf.mxu1  ;;  %7677 = vmatmul.mubr.bf16.vlgmr.msra.gmra.mxu1 %v10810_v30  ;;  %7688 = vmatpush1.bf16.msra.mxu0 %v10095_v15  ;;  %v10208_v49 = vcombine.high %v850_v25, %v854_v27  ;;  %v10184_v14 = vcombine.high %v826_v26, %v830_v7  ;;  %v690_v15 = vld [vmem:[%s15076_s1 + $0x1448] sm:$0xff] }
 0x1cd   :  { %7731 = vmatpush1.bf16.msra.mxu1 %v10223_v17  ;;  %v12403_v33 = vpop.f32.mrf.mxu0  ;;  %7689 = vmatprep.subr.bf16.mxu0 %v10088_v18  ;;  %v694_v17 = vld [vmem:[%s15076_s1 + $0x1468] sm:$0xff]  ;;  %v10183_v22 = vcombine.low %v826_v26, %v830_v7 }
 0x1ce   :  { %v12405_v36 = vadd.f32 %v7420_v61, %v7378_v28  ;;  %v12407_v37 = vpop.f32.mrf.mxu1  ;;  %7732 = vmatprep.subr.bf16.mxu1 %v10216_v20  ;;  %7719 = vmatprep.mubr.bf16.mxu0 %v10811_v40  ;;  %v818_v18 = vld [vmem:[%s15076_s1 + $0x1848] sm:$0xff]  ;;  %v10048_v23 = vcombine.high %v690_v15, %v694_v17  ;;  %v10047_v30 = vcombine.low %v690_v15, %v694_v17 }
 0x1cf   :  { %v7381_v41 = vpop.f32.mrf.mxu0  ;;  %7762 = vmatprep.mubr.bf16.mxu1 %v10812_v46  ;;  %v822_v20 = vld [vmem:[%s15076_s1 + $0x1868] sm:$0xff] }
 0x1d0   :  { %v7382_v12 = vadd.f32 %v7381_v41, %v12210_v3  ;;  %7690 = vmatpush1.bf16.msra.mxu0 %v10087_v32  ;;  %v7424_v52 = vpop.f32.mrf.mxu1  ;;  %v834_v3 = vld [vmem:[%s15076_s1 + $0x18c8] sm:$0xff]  ;;  %v10176_v24 = vcombine.high %v818_v18, %v822_v20  ;;  %v10175_v32 = vcombine.low %v818_v18, %v822_v20 }
 0x1d1   :  { %7733 = vmatpush1.bf16.msra.mxu1 %v10215_v34  ;;  %7691 = vmatprep.subr.bf16.mxu0 %v10080_v35  ;;  %v10192_v4 = vcombine.high %v834_v3, %v838_v62  ;;  %v10191_v11 = vcombine.low %v834_v3, %v838_v62  ;;  %v682_v25 = vld [vmem:[%s15076_s1 + $0x1408] sm:$0xff] }
 0x1d2   :  { %v12428_v55 = vadd.f32 %v7424_v52, %v7382_v12  ;;  %7734 = vmatprep.subr.bf16.mxu1 %v10208_v49  ;;  %v686_v27 = vld [vmem:[%s15076_s1 + $0x1428] sm:$0xff] }
 0x1d3   :  { %v810_v28 = vld [vmem:[%s15076_s1 + $0x1808] sm:$0xff]  ;;  %v10040_v34 = vcombine.high %v682_v25, %v686_v27  ;;  %v10039_v41 = vcombine.low %v682_v25, %v686_v27 }
 0x1d4   :  { %7692 = vmatpush1.bf16.msra.mxu0 %v10079_v51  ;;  %v814_v61 = vld [vmem:[%s15076_s1 + $0x1828] sm:$0xff] }
 0x1d5   :  { %7735 = vmatpush1.bf16.msra.mxu1 %v10207_v53  ;;  %7693 = vmatprep.subr.bf16.mxu0 %v10072_v54  ;;  %v10168_v35 = vcombine.high %v810_v28, %v814_v61  ;;  %v802_v49 = vld [vmem:[%s15076_s1 + $0x17c8] sm:$0xff]  ;;  %v10167_v42 = vcombine.low %v810_v28, %v814_v61 }
 0x1d6   :  { %7736 = vmatprep.subr.bf16.mxu1 %v10200_v57  ;;  %v934_v40 = vld [vmem:[%s15076_s1 + $0x1be8] sm:$0xff]  ;;  %v10160_v45 = vcombine.high %v802_v49, %v806_v38  ;;  %v10159_v54 = vcombine.low %v802_v49, %v806_v38 }
 0x1d7   :  { %v10288_v46 = vcombine.high %v930_v39, %v934_v40  ;;  %v794_v12 = vld [vmem:[%s15076_s1 + $0x1788] sm:$0xff]  ;;  %v10287_v57 = vcombine.low %v930_v39, %v934_v40 }
 0x1d8   :  { %7694 = vmatpush1.bf16.msra.mxu0 %v10071_v63  ;;  %v798_v51 = vld [vmem:[%s15076_s1 + $0x17a8] sm:$0xff] }
 0x1d9   :  { %7737 = vmatpush1.bf16.msra.mxu1 %v10199_v0  ;;  %7695 = vmatprep.subr.bf16.mxu0 %v10064_v2  ;;  %v922_v52 = vld [vmem:[%s15076_s1 + $0x1b88] sm:$0xff]  ;;  %v10152_v58 = vcombine.high %v794_v12, %v798_v51  ;;  %v10151_v2 = vcombine.low %v794_v12, %v798_v51 }
 0x1da   :  { %7738 = vmatprep.subr.bf16.mxu1 %v10192_v4  ;;  %v926_v53 = vld [vmem:[%s15076_s1 + $0x1ba8] sm:$0xff] }
 0x1db   :  { %v10280_v60 = vcombine.high %v922_v52, %v926_v53  ;;  %v786_v3 = vld [vmem:[%s15076_s1 + $0x1748] sm:$0xff]  ;;  %v10279_v4 = vcombine.low %v922_v52, %v926_v53 }
 0x1dc   :  { %7696 = vmatpush1.bf16.msra.mxu0 %v10063_v9  ;;  %v790_v62 = vld [vmem:[%s15076_s1 + $0x1768] sm:$0xff] }
 0x1dd   :  { %7739 = vmatpush1.bf16.msra.mxu1 %v10191_v11  ;;  %7697 = vmatprep.subr.bf16.mxu0 %v10056_v47  ;;  %v914_v63 = vld [vmem:[%s15076_s1 + $0x1b48] sm:$0xff]  ;;  %v10144_v5 = vcombine.high %v786_v3, %v790_v62  ;;  %v10143_v47 = vcombine.low %v786_v3, %v790_v62 }
 0x1de   :  { %7740 = vmatprep.subr.bf16.mxu1 %v10184_v14  ;;  %v918_v0 = vld [vmem:[%s15076_s1 + $0x1b68] sm:$0xff] }
 0x1df   :  { %v10272_v6 = vcombine.high %v914_v63, %v918_v0  ;;  %v778_v26 = vld [vmem:[%s15076_s1 + $0x1708] sm:$0xff]  ;;  %v10271_v14 = vcombine.low %v914_v63, %v918_v0 }
 0x1e0   :  { %7698 = vmatpush1.bf16.msra.mxu0 %v10055_v21  ;;  %v782_v7 = vld [vmem:[%s15076_s1 + $0x1728] sm:$0xff] }
 0x1e1   :  { %7741 = vmatpush1.bf16.msra.mxu1 %v10183_v22  ;;  %7699 = vmatprep.subr.bf16.mxu0 %v10048_v23  ;;  %v906_v9 = vld [vmem:[%s15076_s1 + $0x1b08] sm:$0xff]  ;;  %v10136_v15 = vcombine.high %v778_v26, %v782_v7  ;;  %v10135_v23 = vcombine.low %v778_v26, %v782_v7 }
 0x1e2   :  { %7742 = vmatprep.subr.bf16.mxu1 %v10176_v24  ;;  %v910_v11 = vld [vmem:[%s15076_s1 + $0x1b28] sm:$0xff] }
 0x1e3   :  { %v10264_v17 = vcombine.high %v906_v9, %v910_v11  ;;  %v770_v18 = vld [vmem:[%s15076_s1 + $0x16c8] sm:$0xff]  ;;  %v10263_v24 = vcombine.low %v906_v9, %v910_v11 }
 0x1e4   :  { %7700 = vmatpush1.bf16.msra.mxu0 %v10047_v30  ;;  %v774_v20 = vld [vmem:[%s15076_s1 + $0x16e8] sm:$0xff] }
 0x1e5   :  { %7743 = vmatpush1.bf16.msra.mxu1 %v10175_v32  ;;  %7701 = vmatprep.subr.bf16.mxu0 %v10040_v34  ;;  %v898_v21 = vld [vmem:[%s15076_s1 + $0x1ac8] sm:$0xff]  ;;  %v10128_v25 = vcombine.high %v770_v18, %v774_v20  ;;  %v10127_v34 = vcombine.low %v770_v18, %v774_v20 }
 0x1e6   :  { %7744 = vmatprep.subr.bf16.mxu1 %v10168_v35  ;;  %v902_v22 = vld [vmem:[%s15076_s1 + $0x1ae8] sm:$0xff] }
 0x1e7   :  { %v10256_v27 = vcombine.high %v898_v21, %v902_v22  ;;  %v762_v28 = vld [vmem:[%s15076_s1 + $0x1688] sm:$0xff]  ;;  %v10255_v35 = vcombine.low %v898_v21, %v902_v22 }
 0x1e8   :  { %7702 = vmatpush1.bf16.msra.mxu0 %v10039_v41  ;;  %v766_v61 = vld [vmem:[%s15076_s1 + $0x16a8] sm:$0xff] }
 0x1e9   :  { %7745 = vmatpush1.bf16.msra.mxu1 %v10167_v42  ;;  %7703 = vmatprep.subr.bf16.mxu0 %v10160_v45  ;;  %v890_v30 = vld [vmem:[%s15076_s1 + $0x1a88] sm:$0xff]  ;;  %v10120_v49 = vcombine.high %v762_v28, %v766_v61  ;;  %v10119_v45 = vcombine.low %v762_v28, %v766_v61 }
 0x1ea   :  { %7746 = vmatprep.subr.bf16.mxu1 %v10288_v46  ;;  %v894_v32 = vld [vmem:[%s15076_s1 + $0x1aa8] sm:$0xff] }
 0x1eb   :  { %v10248_v38 = vcombine.high %v890_v30, %v894_v32  ;;  %v754_v39 = vld [vmem:[%s15076_s1 + $0x1648] sm:$0xff]  ;;  %v10247_v46 = vcombine.low %v890_v30, %v894_v32  ;;  %v10814_v30 = vld [vmem:[%s15077_s0 + $0x30] ss:$72 sps:$4 sm:$0xff]  }
 0x1ec   :  { %7704 = vmatpush2.bf16.msra.mxu0 %v10159_v54  ;;  %v758_v40 = vld [vmem:[%s15076_s1 + $0x1668] sm:$0xff] }
 0x1ed   :  { %7747 = vmatpush2.bf16.msra.mxu1 %v10287_v57  ;;  %7705 = vmatprep.subr.bf16.mxu0 %v10152_v58  ;;  %v882_v41 = vld [vmem:[%s15076_s1 + $0x1a48] sm:$0xff]  ;;  %v10112_v12 = vcombine.high %v754_v39, %v758_v40  ;;  %v10111_v58 = vcombine.low %v754_v39, %v758_v40  ;;  %v10815_v40 = vld [vmem:[%s15077_s0 + $0x3c] ss:$72 sps:$4 sm:$0xff]  }
 0x1ee   :  { %7748 = vmatprep.subr.bf16.mxu1 %v10280_v60  ;;  %v886_v42 = vld [vmem:[%s15076_s1 + $0x1a68] sm:$0xff] }
 0x1ef   :  { %v10240_v51 = vcombine.high %v882_v41, %v886_v42  ;;  %v746_v52 = vld [vmem:[%s15076_s1 + $0x1608] sm:$0xff]  ;;  %v10239_v60 = vcombine.low %v882_v41, %v886_v42 }
 0x1f0   :  { %7706 = vmatpush2.bf16.msra.mxu0 %v10151_v2  ;;  %v750_v53 = vld [vmem:[%s15076_s1 + $0x1628] sm:$0xff] }
 0x1f1   :  { %7749 = vmatpush2.bf16.msra.mxu1 %v10279_v4  ;;  %7707 = vmatprep.subr.bf16.mxu0 %v10144_v5  ;;  %v874_v54 = vld [vmem:[%s15076_s1 + $0x1a08] sm:$0xff]  ;;  %v10104_v3 = vcombine.high %v746_v52, %v750_v53  ;;  %v10103_v5 = vcombine.low %v746_v52, %v750_v53 }
 0x1f2   :  { %7750 = vmatprep.subr.bf16.mxu1 %v10272_v6  ;;  %v878_v57 = vld [vmem:[%s15076_s1 + $0x1a28] sm:$0xff] }
 0x1f3   :  { %v10232_v62 = vcombine.high %v874_v54, %v878_v57  ;;  %v994_v63 = vld [vmem:[%s15076_s1 + $0x1dc8] sm:$0xff]  ;;  %v10231_v6 = vcombine.low %v874_v54, %v878_v57 }
 0x1f4   :  { %7708 = vmatpush2.bf16.msra.mxu0 %v10143_v47  ;;  %v998_v0 = vld [vmem:[%s15076_s1 + $0x1de8] sm:$0xff] }
 0x1f5   :  { %7751 = vmatpush2.bf16.msra.mxu1 %v10271_v14  ;;  %7709 = vmatprep.subr.bf16.mxu0 %v10136_v15  ;;  %v1122_v2 = vld [vmem:[%s15076_s1 + $0x21c8] sm:$0xff]  ;;  %v10352_v26 = vcombine.high %v994_v63, %v998_v0  ;;  %v10351_v15 = vcombine.low %v994_v63, %v998_v0 }
 0x1f6   :  { %7752 = vmatprep.subr.bf16.mxu1 %v10264_v17  ;;  %v1126_v4 = vld [vmem:[%s15076_s1 + $0x21e8] sm:$0xff]  ;;  %v12598_v17 = vpop.f32.mrf.mxu0 }
 0x1f7   :  { %v10480_v7 = vcombine.high %v1122_v2, %v1126_v4  ;;  %v986_v9 = vld [vmem:[%s15076_s1 + $0x1d88] sm:$0xff]  ;;  %v10479_v18 = vcombine.low %v1122_v2, %v1126_v4 }
 0x1f8   :  { %7710 = vmatpush2.bf16.msra.mxu0 %v10135_v23  ;;  %v990_v11 = vld [vmem:[%s15076_s1 + $0x1da8] sm:$0xff] }
 0x1f9   :  { %7753 = vmatpush2.bf16.msra.mxu1 %v10263_v24  ;;  %7711 = vmatprep.subr.bf16.mxu0 %v10128_v25  ;;  %v1114_v47 = vld [vmem:[%s15076_s1 + $0x2188] sm:$0xff]  ;;  %v10344_v20 = vcombine.high %v986_v9, %v990_v11  ;;  %v10343_v32 = vcombine.low %v986_v9, %v990_v11 }
 0x1fa   :  { %7754 = vmatprep.subr.bf16.mxu1 %v10256_v27  ;;  %v1118_v14 = vld [vmem:[%s15076_s1 + $0x21a8] sm:$0xff] }
 0x1fb   :  { %v10472_v21 = vcombine.high %v1114_v47, %v1118_v14  ;;  %v978_v22 = vld [vmem:[%s15076_s1 + $0x1d48] sm:$0xff] }
 0x1fc   :  { %7712 = vmatpush2.bf16.msra.mxu0 %v10127_v34  ;;  %v982_v23 = vld [vmem:[%s15076_s1 + $0x1d68] sm:$0xff] }
 0x1fd   :  { %7755 = vmatpush2.bf16.msra.mxu1 %v10255_v35  ;;  %7713 = vmatprep.subr.bf16.mxu0 %v10120_v49  ;;  %v10813_v25 = vld [vmem:[%s15077_s0 + $0x28] ss:$72 sps:$4 sm:$0xff]   ;;  %v10471_v35 = vcombine.low %v1114_v47, %v1118_v14  ;;  %v10336_v49 = vcombine.high %v978_v22, %v982_v23 }
 0x1fe   :  { %7756 = vmatprep.subr.bf16.mxu1 %v10248_v38  ;;  %v1106_v27 = vld [vmem:[%s15076_s1 + $0x2148] sm:$0xff] }
 0x1ff   :  { %v1110_v28 = vld [vmem:[%s15076_s1 + $0x2168] sm:$0xff] }
 0x200   :  { %7714 = vmatpush2.bf16.msra.mxu0 %v10119_v45  ;;  %v10464_v38 = vcombine.high %v1106_v27, %v1110_v28  ;;  %v970_v39 = vld [vmem:[%s15076_s1 + $0x1d08] sm:$0xff]  ;;  %v10463_v52 = vcombine.low %v1106_v27, %v1110_v28 }
 0x201   :  { %7757 = vmatpush2.bf16.msra.mxu1 %v10247_v46  ;;  %7715 = vmatprep.subr.bf16.mxu0 %v10112_v12  ;;  %v1098_v42 = vld [vmem:[%s15076_s1 + $0x2108] sm:$0xff] }
 0x202   :  { %7758 = vmatprep.subr.bf16.mxu1 %v10240_v51  ;;  %v1102_v45 = vld [vmem:[%s15076_s1 + $0x2128] sm:$0xff]  ;;  %v10335_v51 = vcombine.low %v978_v22, %v982_v23 }
 0x203   :  { %v10816_v46 = vld [vmem:[%s15077_s0 + $0x44] ss:$72 sps:$4 sm:$0xff]   ;;  %v10455_v2 = vcombine.low %v1098_v42, %v1102_v45 }
 0x204   :  { %7716 = vmatpush2.bf16.msra.mxu0 %v10111_v58  ;;  %v10456_v58 = vcombine.high %v1098_v42, %v1102_v45  ;;  %v1086_v9 = vld [vmem:[%s15076_s1 + $0x20a8] sm:$0xff] }
 0x205   :  { %7759 = vmatpush2.bf16.msra.mxu1 %v10239_v60  ;;  %7717 = vmatprep.subr.bf16.mxu0 %v10104_v3  ;;  %v962_v60 = vld [vmem:[%s15076_s1 + $0x1cc8] sm:$0xff] }
 0x206   :  { %7760 = vmatprep.subr.bf16.mxu1 %v10232_v62  ;;  %v966_v3 = vld [vmem:[%s15076_s1 + $0x1ce8] sm:$0xff] }
 0x207   :  { %v1094_v62 = vld [vmem:[%s15076_s1 + $0x20e8] sm:$0xff]  ;;  %v10320_v4 = vcombine.high %v962_v60, %v966_v3  ;;  %v10319_v11 = vcombine.low %v962_v60, %v966_v3 }
 0x208   :  { %7718 = vmatpush2.bf16.msra.mxu0 %v10103_v5  ;;  %v1078_v22 = vld [vmem:[%s15076_s1 + $0x2068] sm:$0xff] }
 0x209   :  { %7761 = vmatpush2.bf16.msra.mxu1 %v10231_v6  ;;  %7773 = vmatprep.subr.bf16.mxu0 %v10352_v26  ;;  %v954_v6 = vld [vmem:[%s15076_s1 + $0x1c88] sm:$0xff] }
 0x20a   :  { %7816 = vmatprep.subr.bf16.mxu1 %v10480_v7  ;;  %v958_v26 = vld [vmem:[%s15076_s1 + $0x1ca8] sm:$0xff] }
 0x20b   :  { %v7463_v24 = vpop.f32.mrf.mxu0  ;;  %7720 = vmatmul.mubr.bf16.vlgmr.msra.gmra.mxu0 %v10813_v25  ;;  %v1082_v7 = vld [vmem:[%s15076_s1 + $0x2088] sm:$0xff]  ;;  %v10312_v14 = vcombine.high %v954_v6, %v958_v26  ;;  %v10311_v23 = vcombine.low %v954_v6, %v958_v26 }
 0x20c   :  { %v7464_v61 = vadd.f32 %v7463_v24, %v12405_v36  ;;  %7763 = vmatmul.mubr.bf16.vlgmr.msra.gmra.mxu1 %v10814_v30  ;;  %7774 = vmatpush1.bf16.msra.mxu0 %v10351_v15  ;;  %v974_v36 = vld [vmem:[%s15076_s1 + $0x1d28] sm:$0xff]  ;;  %v10440_v15 = vcombine.high %v1082_v7, %v1086_v9  ;;  %v10439_v24 = vcombine.low %v1082_v7, %v1086_v9 }
 0x20d   :  { %7817 = vmatpush1.bf16.msra.mxu1 %v10479_v18  ;;  %v12619_v34 = vpop.f32.mrf.mxu0  ;;  %7775 = vmatprep.subr.bf16.mxu0 %v10344_v20  ;;  %v10328_v53 = vcombine.high %v970_v39, %v974_v36  ;;  %v10327_v0 = vcombine.low %v970_v39, %v974_v36  ;;  %v946_v18 = vld [vmem:[%s15076_s1 + $0x1c48] sm:$0xff] }
 0x20e   :  { %7818 = vmatprep.subr.bf16.mxu1 %v10472_v21  ;;  %7805 = vmatprep.mubr.bf16.mxu0 %v10815_v40  ;;  %v8633_v54 = vmax.f32 %v7464_v61, 0.0  ;;  %v950_v20 = vld [vmem:[%s15076_s1 + $0x1c68] sm:$0xff] }
 0x20f   :  { %v7467_v41 = vpop.f32.mrf.mxu0  ;;  %7848 = vmatprep.mubr.bf16.mxu1 %v10816_v46  ;;  %v1074_v21 = vld [vmem:[%s15076_s1 + $0x2048] sm:$0xff]  ;;  %v10304_v25 = vcombine.high %v946_v18, %v950_v20 }
 0x210   :  { %v7468_v12 = vadd.f32 %v7467_v41, %v12428_v55  ;;  %7776 = vmatpush1.bf16.msra.mxu0 %v10343_v32  ;;  %v1090_v55 = vld [vmem:[%s15076_s1 + $0x20c8] sm:$0xff]  ;;  %v10432_v27 = vcombine.high %v1074_v21, %v1078_v22 }
 0x211   :  { %7819 = vmatpush1.bf16.msra.mxu1 %v10471_v35  ;;  %7777 = vmatprep.subr.bf16.mxu0 %v10336_v49  ;;  %v10448_v5 = vcombine.high %v1090_v55, %v1094_v62  ;;  %v10447_v47 = vcombine.low %v1090_v55, %v1094_v62  ;;  %v938_v28 = vld [vmem:[%s15076_s1 + $0x1c08] sm:$0xff]  ;;  %v10303_v35 = vcombine.low %v946_v18, %v950_v20 }
 0x212   :  { %v8641_v57 = vmax.f32 %v7468_v12, 0.0  ;;  %7820 = vmatprep.subr.bf16.mxu1 %v10464_v38  ;;  %v942_v61 = vld [vmem:[%s15076_s1 + $0x1c28] sm:$0xff]  ;;  %v10431_v49 = vcombine.low %v1074_v21, %v1078_v22 }
 0x213   :  { %v1066_v30 = vld [vmem:[%s15076_s1 + $0x2008] sm:$0xff]  ;;  %v10296_v38 = vcombine.high %v938_v28, %v942_v61  ;;  %v10295_v45 = vcombine.low %v938_v28, %v942_v61 }
 0x214   :  { %v12652_v63 = vpack.c.bf16 %v8641_v57, %v8633_v54  ;;  %7778 = vmatpush1.bf16.msra.mxu0 %v10335_v51  ;;  %v1070_v32 = vld [vmem:[%s15076_s1 + $0x2028] sm:$0xff] }
 0x215   :  { %7821 = vmatpush1.bf16.msra.mxu1 %v10463_v52  ;;  %7779 = vmatprep.subr.bf16.mxu0 %v10328_v53  ;;  %v10424_v39 = vcombine.high %v1066_v30, %v1070_v32  ;;  %v1058_v36 = vld [vmem:[%s15076_s1 + $0x1fc8] sm:$0xff]  ;;  %v10423_v46 = vcombine.low %v1066_v30, %v1070_v32 }
 0x216   :  { %15084 = vst [vmem:[#allocation2_spill] sm:$0xff] %v12652_v63  ;;  %7822 = vmatprep.subr.bf16.mxu1 %v10456_v58  ;;  %v1062_v40 = vld [vmem:[%s15076_s1 + $0x1fe8] sm:$0xff] }
 0x217   :  { %v1186_v41 = vld [vmem:[%s15076_s1 + $0x23c8] sm:$0xff]  ;;  %v10416_v12 = vcombine.high %v1058_v36, %v1062_v40  ;;  %v10415_v58 = vcombine.low %v1058_v36, %v1062_v40 }
 0x218   :  { %7780 = vmatpush1.bf16.msra.mxu0 %v10327_v0  ;;  %v1190_v42 = vld [vmem:[%s15076_s1 + $0x23e8] sm:$0xff] }
 0x219   :  { %7823 = vmatpush1.bf16.msra.mxu1 %v10455_v2  ;;  %7781 = vmatprep.subr.bf16.mxu0 %v10320_v4  ;;  %v10544_v51 = vcombine.high %v1186_v41, %v1190_v42  ;;  %v1050_v52 = vld [vmem:[%s15076_s1 + $0x1f88] sm:$0xff]  ;;  %v10543_v60 = vcombine.low %v1186_v41, %v1190_v42 }
 0x21a   :  { %7824 = vmatprep.subr.bf16.mxu1 %v10448_v5  ;;  %v1054_v53 = vld [vmem:[%s15076_s1 + $0x1fa8] sm:$0xff] }
 0x21b   :  { %v1178_v54 = vld [vmem:[%s15076_s1 + $0x2388] sm:$0xff]  ;;  %v10408_v3 = vcombine.high %v1050_v52, %v1054_v53  ;;  %v10407_v5 = vcombine.low %v1050_v52, %v1054_v53 }
 0x21c   :  { %7782 = vmatpush1.bf16.msra.mxu0 %v10319_v11  ;;  %v1182_v57 = vld [vmem:[%s15076_s1 + $0x23a8] sm:$0xff] }
 0x21d   :  { %7825 = vmatpush1.bf16.msra.mxu1 %v10447_v47  ;;  %7783 = vmatprep.subr.bf16.mxu0 %v10312_v14  ;;  %v10536_v55 = vcombine.high %v1178_v54, %v1182_v57  ;;  %v1042_v62 = vld [vmem:[%s15076_s1 + $0x1f48] sm:$0xff]  ;;  %v10535_v6 = vcombine.low %v1178_v54, %v1182_v57 }
 0x21e   :  { %7826 = vmatprep.subr.bf16.mxu1 %v10440_v15  ;;  %v1046_v0 = vld [vmem:[%s15076_s1 + $0x1f68] sm:$0xff] }
 0x21f   :  { %v1170_v2 = vld [vmem:[%s15076_s1 + $0x2348] sm:$0xff]  ;;  %v10400_v26 = vcombine.high %v1042_v62, %v1046_v0  ;;  %v10399_v15 = vcombine.low %v1042_v62, %v1046_v0 }
 0x220   :  { %7784 = vmatpush1.bf16.msra.mxu0 %v10311_v23  ;;  %v1174_v4 = vld [vmem:[%s15076_s1 + $0x2368] sm:$0xff] }
 0x221   :  { %7827 = vmatpush1.bf16.msra.mxu1 %v10439_v24  ;;  %7785 = vmatprep.subr.bf16.mxu0 %v10304_v25  ;;  %v10528_v7 = vcombine.high %v1170_v2, %v1174_v4  ;;  %v1034_v9 = vld [vmem:[%s15076_s1 + $0x1f08] sm:$0xff]  ;;  %v10527_v18 = vcombine.low %v1170_v2, %v1174_v4  ;;  %v99_v4 = vld [vmem:[%s15076_s1 + $0x1d0] sm:$0xff] }
 0x222   :  { %7828 = vmatprep.subr.bf16.mxu1 %v10432_v27  ;;  %v1038_v11 = vld [vmem:[%s15076_s1 + $0x1f28] sm:$0xff] }
 0x223   :  { %v1162_v47 = vld [vmem:[%s15076_s1 + $0x2308] sm:$0xff]  ;;  %v10392_v20 = vcombine.high %v1034_v9, %v1038_v11  ;;  %v10391_v27 = vcombine.low %v1034_v9, %v1038_v11 }
 0x224   :  { %7786 = vmatpush1.bf16.msra.mxu0 %v10303_v35  ;;  %v1166_v14 = vld [vmem:[%s15076_s1 + $0x2328] sm:$0xff] }
 0x225   :  { %7829 = vmatpush1.bf16.msra.mxu1 %v10431_v49  ;;  %7787 = vmatprep.subr.bf16.mxu0 %v10296_v38  ;;  %v10520_v21 = vcombine.high %v1162_v47, %v1166_v14  ;;  %v1026_v22 = vld [vmem:[%s15076_s1 + $0x1ec8] sm:$0xff]  ;;  %v10519_v28 = vcombine.low %v1162_v47, %v1166_v14  ;;  %v91_v14 = vld [vmem:[%s15076_s1 + $0x190] sm:$0xff] }
 0x226   :  { %7830 = vmatprep.subr.bf16.mxu1 %v10424_v39  ;;  %v1030_v23 = vld [vmem:[%s15076_s1 + $0x1ee8] sm:$0xff] }
 0x227   :  { %v1154_v24 = vld [vmem:[%s15076_s1 + $0x22c8] sm:$0xff]  ;;  %v10384_v61 = vcombine.high %v1026_v22, %v1030_v23  ;;  %v10383_v39 = vcombine.low %v1026_v22, %v1030_v23 }
 0x228   :  { %7788 = vmatpush1.bf16.msra.mxu0 %v10295_v45  ;;  %v1158_v25 = vld [vmem:[%s15076_s1 + $0x22e8] sm:$0xff] }
 0x229   :  { %7831 = vmatpush1.bf16.msra.mxu1 %v10423_v46  ;;  %7789 = vmatprep.subr.bf16.mxu0 %v10416_v12  ;;  %v10512_v30 = vcombine.high %v1154_v24, %v1158_v25  ;;  %v1018_v32 = vld [vmem:[%s15076_s1 + $0x1e88] sm:$0xff]  ;;  %v10511_v36 = vcombine.low %v1154_v24, %v1158_v25  ;;  %v83_v25 = vld [vmem:[%s15076_s1 + $0x150] sm:$0xff] }
 0x22a   :  { %7832 = vmatprep.subr.bf16.mxu1 %v10544_v51  ;;  %v1022_v35 = vld [vmem:[%s15076_s1 + $0x1ea8] sm:$0xff] }
 0x22b   :  { %v1146_v49 = vld [vmem:[%s15076_s1 + $0x2288] sm:$0xff]  ;;  %v10376_v40 = vcombine.high %v1018_v32, %v1022_v35  ;;  %v10375_v51 = vcombine.low %v1018_v32, %v1022_v35 }
 0x22c   :  { %7790 = vmatpush2.bf16.msra.mxu0 %v10415_v58  ;;  %v1150_v38 = vld [vmem:[%s15076_s1 + $0x22a8] sm:$0xff] }
 0x22d   :  { %7833 = vmatpush2.bf16.msra.mxu1 %v10543_v60  ;;  %7791 = vmatprep.subr.bf16.mxu0 %v10408_v3  ;;  %v10504_v41 = vcombine.high %v1146_v49, %v1150_v38  ;;  %v1010_v42 = vld [vmem:[%s15076_s1 + $0x1e48] sm:$0xff]  ;;  %v10503_v52 = vcombine.low %v1146_v49, %v1150_v38 }
 0x22e   :  { %7834 = vmatprep.subr.bf16.mxu1 %v10536_v55  ;;  %v1014_v45 = vld [vmem:[%s15076_s1 + $0x1e68] sm:$0xff] }
 0x22f   :  { %v1138_v46 = vld [vmem:[%s15076_s1 + $0x2248] sm:$0xff]  ;;  %v10368_v53 = vcombine.high %v1010_v42, %v1014_v45  ;;  %v10367_v55 = vcombine.low %v1010_v42, %v1014_v45  ;;  %v203_v42 = vld [vmem:[%s15076_s1 + $0x510] sm:$0xff] }
 0x230   :  { %7792 = vmatpush2.bf16.msra.mxu0 %v10407_v5  ;;  %v1142_v12 = vld [vmem:[%s15076_s1 + $0x2268] sm:$0xff]  ;;  %v103_v5 = vld [vmem:[%s15076_s1 + $0x1f0] sm:$0xff] }
 0x231   :  { %7835 = vmatpush2.bf16.msra.mxu1 %v10535_v6  ;;  %7793 = vmatprep.subr.bf16.mxu0 %v10400_v26  ;;  %v10496_v54 = vcombine.high %v1138_v46, %v1142_v12  ;;  %v1002_v57 = vld [vmem:[%s15076_s1 + $0x1e08] sm:$0xff]  ;;  %v10495_v62 = vcombine.low %v1138_v46, %v1142_v12  ;;  %v227_v6 = vld [vmem:[%s15076_s1 + $0x5d0] sm:$0xff]  ;;  %v9458_v11 = vcombine.high %v99_v4, %v103_v5 }
 0x232   :  { %7836 = vmatprep.subr.bf16.mxu1 %v10528_v7  ;;  %v1006_v58 = vld [vmem:[%s15076_s1 + $0x1e28] sm:$0xff]  ;;  %v231_v26 = vld [vmem:[%s15076_s1 + $0x5f0] sm:$0xff] }
 0x233   :  { %v1130_v60 = vld [vmem:[%s15076_s1 + $0x2208] sm:$0xff]  ;;  %v10360_v0 = vcombine.high %v1002_v57, %v1006_v58  ;;  %v10359_v7 = vcombine.low %v1002_v57, %v1006_v58  ;;  %v9586_v47 = vcombine.high %v227_v6, %v231_v26  ;;  %v9585_v22 = vcombine.low %v227_v6, %v231_v26  ;;  %v207_v45 = vld [vmem:[%s15076_s1 + $0x530] sm:$0xff] }
 0x234   :  { %7794 = vmatpush2.bf16.msra.mxu0 %v10399_v15  ;;  %v1134_v3 = vld [vmem:[%s15076_s1 + $0x2228] sm:$0xff]  ;;  %v95_v15 = vld [vmem:[%s15076_s1 + $0x1b0] sm:$0xff] }
 0x235   :  { %7837 = vmatpush2.bf16.msra.mxu1 %v10527_v18  ;;  %7795 = vmatprep.subr.bf16.mxu0 %v10392_v20  ;;  %v10488_v2 = vcombine.high %v1130_v60, %v1134_v3  ;;  %v10487_v9 = vcombine.low %v1130_v60, %v1134_v3  ;;  %v219_v18 = vld [vmem:[%s15076_s1 + $0x590] sm:$0xff]  ;;  %v9450_v23 = vcombine.high %v91_v14, %v95_v15  ;;  %v10818_v32 = vld [vmem:[%s15077_s0 + $0x40] ss:$72 sps:$4 sm:$0xff]  }
 0x236   :  { %7838 = vmatprep.subr.bf16.mxu1 %v10520_v21  ;;  %v223_v20 = vld [vmem:[%s15076_s1 + $0x5b0] sm:$0xff]  ;;  %v9457_v21 = vcombine.low %v99_v4, %v103_v5  ;;  %v9449_v35 = vcombine.low %v91_v14, %v95_v15 }
 0x237   :  { %v9578_v24 = vcombine.high %v219_v18, %v223_v20  ;;  %v9577_v49 = vcombine.low %v219_v18, %v223_v20  ;;  %v10820_v46 = vld [vmem:[%s15077_s0 + $0xc] ss:$72 sps:$4 sm:$0xff]  }
 0x238   :  { %7796 = vmatpush2.bf16.msra.mxu0 %v10391_v27  ;;  %v87_v27 = vld [vmem:[%s15076_s1 + $0x170] sm:$0xff] }
 0x239   :  { %7839 = vmatpush2.bf16.msra.mxu1 %v10519_v28  ;;  %7797 = vmatprep.subr.bf16.mxu0 %v10384_v61  ;;  %v10817_v28 = vld [vmem:[%s15077_s0 + $0x38] ss:$72 sps:$4 sm:$0xff]   ;;  %v211_v61 = vld [vmem:[%s15076_s1 + $0x550] sm:$0xff]  ;;  %v9442_v38 = vcombine.high %v83_v25, %v87_v27  ;;  %v9441_v12 = vcombine.low %v83_v25, %v87_v27 }
 0x23a   :  { %7840 = vmatprep.subr.bf16.mxu1 %v10512_v30  ;;  %v215_v30 = vld [vmem:[%s15076_s1 + $0x570] sm:$0xff] }
 0x23b   :  { %v71_v57 = vld [vmem:[%s15076_s1 + $0xf0] sm:$0xff] }
 0x23c   :  { %7798 = vmatpush2.bf16.msra.mxu0 %v10383_v39  ;;  %v9570_v39 = vcombine.high %v211_v61, %v215_v30  ;;  %v195_v58 = vld [vmem:[%s15076_s1 + $0x4d0] sm:$0xff] }
 0x23d   :  { %7841 = vmatpush2.bf16.msra.mxu1 %v10511_v36  ;;  %7799 = vmatprep.subr.bf16.mxu0 %v10376_v40  ;;  %v75_v36 = vld [vmem:[%s15076_s1 + $0x110] sm:$0xff] }
 0x23e   :  { %7842 = vmatprep.subr.bf16.mxu1 %v10504_v41  ;;  %v79_v40 = vld [vmem:[%s15076_s1 + $0x130] sm:$0xff]  ;;  %v10819_v41 = vld [vmem:[%s15077_s0 + $0x4] ss:$72 sps:$4 sm:$0xff]  }
 0x23f   :  { %v199_v60 = vld [vmem:[%s15076_s1 + $0x4f0] sm:$0xff]  ;;  %v9433_v3 = vcombine.low %v75_v36, %v79_v40 }
 0x240   :  { %7800 = vmatpush2.bf16.msra.mxu0 %v10375_v51  ;;  %v9569_v51 = vcombine.low %v211_v61, %v215_v30  ;;  %v63_v4 = vld [vmem:[%s15076_s1 + $0xb0] sm:$0xff] }
 0x241   :  { %7843 = vmatpush2.bf16.msra.mxu1 %v10503_v52  ;;  %7801 = vmatprep.subr.bf16.mxu0 %v10368_v53  ;;  %v9434_v52 = vcombine.high %v75_v36, %v79_v40  ;;  %v9562_v53 = vcombine.high %v203_v42, %v207_v45  ;;  %v187_v5 = vld [vmem:[%s15076_s1 + $0x490] sm:$0xff] }
 0x242   :  { %7844 = vmatprep.subr.bf16.mxu1 %v10496_v54  ;;  %v67_v54 = vld [vmem:[%s15076_s1 + $0xd0] sm:$0xff] }
 0x243   :  { %v191_v6 = vld [vmem:[%s15076_s1 + $0x4b0] sm:$0xff]  ;;  %v9425_v26 = vcombine.low %v67_v54, %v71_v57 }
 0x244   :  { %7802 = vmatpush2.bf16.msra.mxu0 %v10367_v55  ;;  %v9561_v55 = vcombine.low %v203_v42, %v207_v45  ;;  %v55_v14 = vld [vmem:[%s15076_s1 + $0x70] sm:$0xff] }
 0x245   :  { %7845 = vmatpush2.bf16.msra.mxu1 %v10495_v62  ;;  %7803 = vmatprep.subr.bf16.mxu0 %v10360_v0  ;;  %v9426_v62 = vcombine.high %v67_v54, %v71_v57  ;;  %v9554_v0 = vcombine.high %v195_v58, %v199_v60  ;;  %v179_v15 = vld [vmem:[%s15076_s1 + $0x450] sm:$0xff] }
 0x246   :  { %7846 = vmatprep.subr.bf16.mxu1 %v10488_v2  ;;  %v59_v2 = vld [vmem:[%s15076_s1 + $0x90] sm:$0xff] }
 0x247   :  { %v183_v18 = vld [vmem:[%s15076_s1 + $0x470] sm:$0xff]  ;;  %v9417_v20 = vcombine.low %v59_v2, %v63_v4 }
 0x248   :  { %7804 = vmatpush2.bf16.msra.mxu0 %v10359_v7  ;;  %v9553_v7 = vcombine.low %v195_v58, %v199_v60  ;;  %v47_v25 = vld [vmem:[%s15076_s1 + $0x30] sm:$0xff]  ;;  %v9537_v30 = vcombine.low %v179_v15, %v183_v18 }
 0x249   :  { %7847 = vmatpush2.bf16.msra.mxu1 %v10487_v9  ;;  %7859 = vmatprep.subr.bf16.mxu0 %v9458_v11  ;;  %v9418_v9 = vcombine.high %v59_v2, %v63_v4  ;;  %v9546_v11 = vcombine.high %v187_v5, %v191_v6  ;;  %v171_v27 = vld [vmem:[%s15076_s1 + $0x410] sm:$0xff] }
 0x24a   :  { %7902 = vmatprep.subr.bf16.mxu1 %v9586_v47  ;;  %v51_v47 = vld [vmem:[%s15076_s1 + $0x50] sm:$0xff] }
 0x24b   :  { %7806 = vmatmul.mubr.bf16.vlgmr.msra.gmra.mxu0 %v10817_v28  ;;  %v175_v28 = vld [vmem:[%s15076_s1 + $0x430] sm:$0xff]  ;;  %v9409_v61 = vcombine.low %v51_v47, %v55_v14 }
 0x24c   :  { %7849 = vmatmul.mubr.bf16.vlgmr.msra.gmra.mxu1 %v10818_v32  ;;  %7860 = vmatpush1.bf16.msra.mxu0 %v9457_v21  ;;  %v9545_v21 = vcombine.low %v187_v5, %v191_v6  ;;  %v295_v36 = vld [vmem:[%s15076_s1 + $0x7f0] sm:$0xff] }
 0x24d   :  { %7903 = vmatpush1.bf16.msra.mxu1 %v9585_v22  ;;  %7861 = vmatprep.subr.bf16.mxu0 %v9450_v23  ;;  %v9410_v22 = vcombine.high %v51_v47, %v55_v14  ;;  %v9538_v23 = vcombine.high %v179_v15, %v183_v18  ;;  %v147_v60 = vld [vmem:[%s15076_s1 + $0x350] sm:$0xff] }
 0x24e   :  { %7904 = vmatprep.subr.bf16.mxu1 %v9578_v24  ;;  %7891 = vmatprep.mubr.bf16.mxu0 %v10819_v41  ;;  %v43_v24 = vld [vmem:[%s15076_s1 + $0x10] sm:$0xff]  ;;  %v9529_v41 = vcombine.low %v171_v27, %v175_v28 }
 0x24f   :  { %7934 = vmatprep.mubr.bf16.mxu1 %v10820_v46  ;;  %v9402_v32 = vcombine.high %v43_v24, %v47_v25  ;;  %v9401_v40 = vcombine.low %v43_v24, %v47_v25  ;;  %v155_v46 = vld [vmem:[%s15076_s1 + $0x390] sm:$0xff] }
 0x250   :  { %7862 = vmatpush1.bf16.msra.mxu0 %v9449_v35  ;;  %v9530_v35 = vcombine.high %v171_v27, %v175_v28  ;;  %v139_v6 = vld [vmem:[%s15076_s1 + $0x310] sm:$0xff] }
 0x251   :  { %7905 = vmatpush1.bf16.msra.mxu1 %v9577_v49  ;;  %7863 = vmatprep.subr.bf16.mxu0 %v9442_v38  ;;  %v163_v49 = vld [vmem:[%s15076_s1 + $0x3d0] sm:$0xff] }
 0x252   :  { %7906 = vmatprep.subr.bf16.mxu1 %v9570_v39  ;;  %v167_v38 = vld [vmem:[%s15076_s1 + $0x3f0] sm:$0xff] }
 0x253   :  { %v291_v39 = vld [vmem:[%s15076_s1 + $0x7d0] sm:$0xff]  ;;  %v9522_v42 = vcombine.high %v163_v49, %v167_v38 }
 0x254   :  { %7864 = vmatpush1.bf16.msra.mxu0 %v9441_v12  ;;  %v9650_v45 = vcombine.high %v291_v39, %v295_v36  ;;  %v159_v12 = vld [vmem:[%s15076_s1 + $0x3b0] sm:$0xff]  ;;  %v9649_v54 = vcombine.low %v291_v39, %v295_v36 }
 0x255   :  { %7907 = vmatpush1.bf16.msra.mxu1 %v9569_v51  ;;  %7865 = vmatprep.subr.bf16.mxu0 %v9434_v52  ;;  %v283_v51 = vld [vmem:[%s15076_s1 + $0x790] sm:$0xff]  ;;  %v9514_v57 = vcombine.high %v155_v46, %v159_v12 }
 0x256   :  { %7908 = vmatprep.subr.bf16.mxu1 %v9562_v53  ;;  %v287_v52 = vld [vmem:[%s15076_s1 + $0x7b0] sm:$0xff]  ;;  %v9521_v53 = vcombine.low %v163_v49, %v167_v38 }
 0x257   :  { %v9642_v58 = vcombine.high %v283_v51, %v287_v52  ;;  %v9641_v2 = vcombine.low %v283_v51, %v287_v52  ;;  %v131_v18 = vld [vmem:[%s15076_s1 + $0x2d0] sm:$0xff] }
 0x258   :  { %7866 = vmatpush1.bf16.msra.mxu0 %v9433_v3  ;;  %v151_v3 = vld [vmem:[%s15076_s1 + $0x370] sm:$0xff] }
 0x259   :  { %7909 = vmatpush1.bf16.msra.mxu1 %v9561_v55  ;;  %7867 = vmatprep.subr.bf16.mxu0 %v9426_v62  ;;  %v275_v55 = vld [vmem:[%s15076_s1 + $0x750] sm:$0xff]  ;;  %v9506_v4 = vcombine.high %v147_v60, %v151_v3 }
 0x25a   :  { %7910 = vmatprep.subr.bf16.mxu1 %v9554_v0  ;;  %v279_v62 = vld [vmem:[%s15076_s1 + $0x770] sm:$0xff]  ;;  %v9513_v0 = vcombine.low %v155_v46, %v159_v12 }
 0x25b   :  { %v9634_v5 = vcombine.high %v275_v55, %v279_v62  ;;  %v9633_v47 = vcombine.low %v275_v55, %v279_v62  ;;  %v123_v28 = vld [vmem:[%s15076_s1 + $0x290] sm:$0xff] }
 0x25c   :  { %7868 = vmatpush1.bf16.msra.mxu0 %v9425_v26  ;;  %v143_v26 = vld [vmem:[%s15076_s1 + $0x330] sm:$0xff] }
 0x25d   :  { %7911 = vmatpush1.bf16.msra.mxu1 %v9553_v7  ;;  %7869 = vmatprep.subr.bf16.mxu0 %v9418_v9  ;;  %v267_v7 = vld [vmem:[%s15076_s1 + $0x710] sm:$0xff]  ;;  %v9498_v14 = vcombine.high %v139_v6, %v143_v26 }
 0x25e   :  { %7912 = vmatprep.subr.bf16.mxu1 %v9546_v11  ;;  %v271_v9 = vld [vmem:[%s15076_s1 + $0x730] sm:$0xff]  ;;  %v9505_v11 = vcombine.low %v147_v60, %v151_v3 }
 0x25f   :  { %v9626_v15 = vcombine.high %v267_v7, %v271_v9  ;;  %v9625_v24 = vcombine.low %v267_v7, %v271_v9  ;;  %v115_v36 = vld [vmem:[%s15076_s1 + $0x250] sm:$0xff] }
 0x260   :  { %7870 = vmatpush1.bf16.msra.mxu0 %v9417_v20  ;;  %v135_v20 = vld [vmem:[%s15076_s1 + $0x2f0] sm:$0xff] }
 0x261   :  { %7913 = vmatpush1.bf16.msra.mxu1 %v9545_v21  ;;  %7871 = vmatprep.subr.bf16.mxu0 %v9410_v22  ;;  %v259_v21 = vld [vmem:[%s15076_s1 + $0x6d0] sm:$0xff]  ;;  %v9490_v25 = vcombine.high %v131_v18, %v135_v20 }
 0x262   :  { %7914 = vmatprep.subr.bf16.mxu1 %v9538_v23  ;;  %v263_v22 = vld [vmem:[%s15076_s1 + $0x6f0] sm:$0xff]  ;;  %v9497_v23 = vcombine.low %v139_v6, %v143_v26 }
 0x263   :  { %v9618_v27 = vcombine.high %v259_v21, %v263_v22  ;;  %v9617_v49 = vcombine.low %v259_v21, %v263_v22  ;;  %v107_v52 = vld [vmem:[%s15076_s1 + $0x210] sm:$0xff] }
 0x264   :  { %7872 = vmatpush1.bf16.msra.mxu0 %v9409_v61  ;;  %v127_v61 = vld [vmem:[%s15076_s1 + $0x2b0] sm:$0xff] }
 0x265   :  { %7915 = vmatpush1.bf16.msra.mxu1 %v9537_v30  ;;  %7873 = vmatprep.subr.bf16.mxu0 %v9402_v32  ;;  %v251_v30 = vld [vmem:[%s15076_s1 + $0x690] sm:$0xff]  ;;  %v9482_v38 = vcombine.high %v123_v28, %v127_v61 }
 0x266   :  { %7916 = vmatprep.subr.bf16.mxu1 %v9530_v35  ;;  %v255_v32 = vld [vmem:[%s15076_s1 + $0x6b0] sm:$0xff]  ;;  %v9489_v35 = vcombine.low %v131_v18, %v135_v20 }
 0x267   :  { %v9610_v39 = vcombine.high %v251_v30, %v255_v32  ;;  %v9609_v46 = vcombine.low %v251_v30, %v255_v32  ;;  %v355_v62 = vld [vmem:[%s15076_s1 + $0x9d0] sm:$0xff] }
 0x268   :  { %7874 = vmatpush1.bf16.msra.mxu0 %v9401_v40  ;;  %v119_v40 = vld [vmem:[%s15076_s1 + $0x270] sm:$0xff] }
 0x269   :  { %7917 = vmatpush1.bf16.msra.mxu1 %v9529_v41  ;;  %7875 = vmatprep.subr.bf16.mxu0 %v9522_v42  ;;  %v243_v41 = vld [vmem:[%s15076_s1 + $0x650] sm:$0xff]  ;;  %v9474_v12 = vcombine.high %v115_v36, %v119_v40 }
 0x26a   :  { %7918 = vmatprep.subr.bf16.mxu1 %v9650_v45  ;;  %v247_v42 = vld [vmem:[%s15076_s1 + $0x670] sm:$0xff]  ;;  %v9481_v45 = vcombine.low %v123_v28, %v127_v61 }
 0x26b   :  { %v9602_v51 = vcombine.high %v243_v41, %v247_v42  ;;  %v9601_v60 = vcombine.low %v243_v41, %v247_v42  ;;  %v347_v9 = vld [vmem:[%s15076_s1 + $0x990] sm:$0xff]  ;;  %v10824_v41 = vld [vmem:[%s15077_s0 + $0x1c] ss:$72 sps:$4 sm:$0xff]  }
 0x26c   :  { %7876 = vmatpush2.bf16.msra.mxu0 %v9521_v53  ;;  %v111_v53 = vld [vmem:[%s15076_s1 + $0x230] sm:$0xff] }
 0x26d   :  { %7919 = vmatpush2.bf16.msra.mxu1 %v9649_v54  ;;  %7877 = vmatprep.subr.bf16.mxu0 %v9514_v57  ;;  %v235_v54 = vld [vmem:[%s15076_s1 + $0x610] sm:$0xff]  ;;  %v9466_v3 = vcombine.high %v107_v52, %v111_v53 }
 0x26e   :  { %7920 = vmatprep.subr.bf16.mxu1 %v9642_v58  ;;  %v239_v57 = vld [vmem:[%s15076_s1 + $0x630] sm:$0xff]  ;;  %v9473_v58 = vcombine.low %v115_v36, %v119_v40 }
 0x26f   :  { %v9594_v55 = vcombine.high %v235_v54, %v239_v57  ;;  %v9593_v6 = vcombine.low %v235_v54, %v239_v57  ;;  %v339_v22 = vld [vmem:[%s15076_s1 + $0x950] sm:$0xff] }
 0x270   :  { %7878 = vmatpush2.bf16.msra.mxu0 %v9513_v0  ;;  %v359_v0 = vld [vmem:[%s15076_s1 + $0x9f0] sm:$0xff] }
 0x271   :  { %7921 = vmatpush2.bf16.msra.mxu1 %v9641_v2  ;;  %7879 = vmatprep.subr.bf16.mxu0 %v9506_v4  ;;  %v483_v2 = vld [vmem:[%s15076_s1 + $0xdd0] sm:$0xff]  ;;  %v9714_v26 = vcombine.high %v355_v62, %v359_v0 }
 0x272   :  { %7922 = vmatprep.subr.bf16.mxu1 %v9634_v5  ;;  %v487_v4 = vld [vmem:[%s15076_s1 + $0xdf0] sm:$0xff]  ;;  %v9465_v5 = vcombine.low %v107_v52, %v111_v53 }
 0x273   :  { %v9842_v7 = vcombine.high %v483_v2, %v487_v4  ;;  %v9841_v18 = vcombine.low %v483_v2, %v487_v4  ;;  %v10822_v28 = vld [vmem:[%s15077_s0 + $0x8] ss:$72 sps:$4 sm:$0xff]  }
 0x274   :  { %7880 = vmatpush2.bf16.msra.mxu0 %v9505_v11  ;;  %v351_v11 = vld [vmem:[%s15076_s1 + $0x9b0] sm:$0xff] }
 0x275   :  { %7923 = vmatpush2.bf16.msra.mxu1 %v9633_v47  ;;  %7881 = vmatprep.subr.bf16.mxu0 %v9498_v14  ;;  %v475_v47 = vld [vmem:[%s15076_s1 + $0xd90] sm:$0xff]  ;;  %v9706_v20 = vcombine.high %v347_v9, %v351_v11  ;;  %v9705_v61 = vcombine.low %v347_v9, %v351_v11 }
 0x276   :  { %7924 = vmatprep.subr.bf16.mxu1 %v9626_v15  ;;  %v479_v14 = vld [vmem:[%s15076_s1 + $0xdb0] sm:$0xff]  ;;  %v9713_v15 = vcombine.low %v355_v62, %v359_v0 }
 0x277   :  { %v9834_v21 = vcombine.high %v475_v47, %v479_v14  ;;  %v9833_v30 = vcombine.low %v475_v47, %v479_v14  ;;  %v459_v36 = vld [vmem:[%s15076_s1 + $0xd10] sm:$0xff] }
 0x278   :  { %7882 = vmatpush2.bf16.msra.mxu0 %v9497_v23  ;;  %v343_v23 = vld [vmem:[%s15076_s1 + $0x970] sm:$0xff] }
 0x279   :  { %7925 = vmatpush2.bf16.msra.mxu1 %v9625_v24  ;;  %7883 = vmatprep.subr.bf16.mxu0 %v9490_v25  ;;  %v10821_v24 = vld [vmem:[%s15077_s0] ss:$72 sps:$4 sm:$0xff]   ;;  %v467_v25 = vld [vmem:[%s15076_s1 + $0xd50] sm:$0xff]  ;;  %v9698_v32 = vcombine.high %v339_v22, %v343_v23  ;;  %v9697_v42 = vcombine.low %v339_v22, %v343_v23 }
 0x27a   :  { %7926 = vmatprep.subr.bf16.mxu1 %v9618_v27  ;;  %v471_v27 = vld [vmem:[%s15076_s1 + $0xd70] sm:$0xff] }
 0x27b   :  { %v463_v40 = vld [vmem:[%s15076_s1 + $0xd30] sm:$0xff] }
 0x27c   :  { %7884 = vmatpush2.bf16.msra.mxu0 %v9489_v35  ;;  %v9826_v35 = vcombine.high %v467_v25, %v471_v27  ;;  %v327_v52 = vld [vmem:[%s15076_s1 + $0x8f0] sm:$0xff] }
 0x27d   :  { %7927 = vmatpush2.bf16.msra.mxu1 %v9617_v49  ;;  %7885 = vmatprep.subr.bf16.mxu0 %v9482_v38  ;;  %v331_v49 = vld [vmem:[%s15076_s1 + $0x910] sm:$0xff] }
 0x27e   :  { %7928 = vmatprep.subr.bf16.mxu1 %v9610_v39  ;;  %v335_v38 = vld [vmem:[%s15076_s1 + $0x930] sm:$0xff] }
 0x27f   :  { %v10823_v39 = vld [vmem:[%s15077_s0 + $0x14] ss:$72 sps:$4 sm:$0xff]   ;;  %v9689_v57 = vcombine.low %v331_v49, %v335_v38 }
 0x280   :  { %7886 = vmatpush2.bf16.msra.mxu0 %v9481_v45  ;;  %v9825_v45 = vcombine.low %v467_v25, %v471_v27  ;;  %v451_v53 = vld [vmem:[%s15076_s1 + $0xcd0] sm:$0xff] }
 0x281   :  { %7929 = vmatpush2.bf16.msra.mxu1 %v9609_v46  ;;  %7887 = vmatprep.subr.bf16.mxu0 %v9474_v12  ;;  %v9690_v46 = vcombine.high %v331_v49, %v335_v38  ;;  %v9818_v12 = vcombine.high %v459_v36, %v463_v40  ;;  %v455_v54 = vld [vmem:[%s15076_s1 + $0xcf0] sm:$0xff] }
 0x282   :  { %7930 = vmatprep.subr.bf16.mxu1 %v9602_v51  ;;  %v323_v51 = vld [vmem:[%s15076_s1 + $0x8d0] sm:$0xff] }
 0x283   :  { %v319_v62 = vld [vmem:[%s15076_s1 + $0x8b0] sm:$0xff]  ;;  %v9681_v4 = vcombine.low %v323_v51, %v327_v52 }
 0x284   :  { %7888 = vmatpush2.bf16.msra.mxu0 %v9473_v58  ;;  %v9817_v58 = vcombine.low %v459_v36, %v463_v40  ;;  %v443_v0 = vld [vmem:[%s15076_s1 + $0xc90] sm:$0xff] }
 0x285   :  { %7931 = vmatpush2.bf16.msra.mxu1 %v9601_v60  ;;  %7889 = vmatprep.subr.bf16.mxu0 %v9466_v3  ;;  %v9682_v60 = vcombine.high %v323_v51, %v327_v52  ;;  %v9810_v3 = vcombine.high %v451_v53, %v455_v54  ;;  %v447_v2 = vld [vmem:[%s15076_s1 + $0xcb0] sm:$0xff] }
 0x286   :  { %7932 = vmatprep.subr.bf16.mxu1 %v9594_v55  ;;  %v315_v55 = vld [vmem:[%s15076_s1 + $0x890] sm:$0xff] }
 0x287   :  { %v311_v9 = vld [vmem:[%s15076_s1 + $0x870] sm:$0xff]  ;;  %v9673_v14 = vcombine.low %v315_v55, %v319_v62 }
 0x288   :  { %7890 = vmatpush2.bf16.msra.mxu0 %v9465_v5  ;;  %v9809_v5 = vcombine.low %v451_v53, %v455_v54  ;;  %v435_v11 = vld [vmem:[%s15076_s1 + $0xc50] sm:$0xff] }
 0x289   :  { %7933 = vmatpush2.bf16.msra.mxu1 %v9593_v6  ;;  %7945 = vmatprep.subr.bf16.mxu0 %v9714_v26  ;;  %v9674_v6 = vcombine.high %v315_v55, %v319_v62  ;;  %v9802_v26 = vcombine.high %v443_v0, %v447_v2  ;;  %v439_v47 = vld [vmem:[%s15076_s1 + $0xc70] sm:$0xff] }
 0x28a   :  { %7988 = vmatprep.subr.bf16.mxu1 %v9842_v7  ;;  %v307_v7 = vld [vmem:[%s15076_s1 + $0x850] sm:$0xff]  ;;  %v9793_v27 = vcombine.low %v435_v11, %v439_v47 }
 0x28b   :  { %7892 = vmatmul.mubr.bf16.vlgmr.msra.gmra.mxu0 %v10821_v24  ;;  %v303_v22 = vld [vmem:[%s15076_s1 + $0x830] sm:$0xff]  ;;  %v9665_v25 = vcombine.low %v307_v7, %v311_v9 }
 0x28c   :  { %7935 = vmatmul.mubr.bf16.vlgmr.msra.gmra.mxu1 %v10822_v28  ;;  %7946 = vmatpush1.bf16.msra.mxu0 %v9713_v15  ;;  %v9801_v15 = vcombine.low %v443_v0, %v447_v2  ;;  %v427_v23 = vld [vmem:[%s15076_s1 + $0xc10] sm:$0xff] }
 0x28d   :  { %7989 = vmatpush1.bf16.msra.mxu1 %v9841_v18  ;;  %7947 = vmatprep.subr.bf16.mxu0 %v9706_v20  ;;  %v9666_v18 = vcombine.high %v307_v7, %v311_v9  ;;  %v9794_v20 = vcombine.high %v435_v11, %v439_v47  ;;  %v431_v24 = vld [vmem:[%s15076_s1 + $0xc30] sm:$0xff] }
 0x28e   :  { %7990 = vmatprep.subr.bf16.mxu1 %v9834_v21  ;;  %7977 = vmatprep.mubr.bf16.mxu0 %v10823_v39  ;;  %v299_v21 = vld [vmem:[%s15076_s1 + $0x810] sm:$0xff]  ;;  %v9785_v39 = vcombine.low %v427_v23, %v431_v24 }
 0x28f   :  { %8020 = vmatprep.mubr.bf16.mxu1 %v10824_v41  ;;  %v9658_v28 = vcombine.high %v299_v21, %v303_v22  ;;  %v551_v49 = vld [vmem:[%s15076_s1 + $0xff0] sm:$0xff]  ;;  %v9657_v38 = vcombine.low %v299_v21, %v303_v22 }
 0x290   :  { %7948 = vmatpush1.bf16.msra.mxu0 %v9705_v61  ;;  %v9786_v61 = vcombine.high %v427_v23, %v431_v24  ;;  %v411_v41 = vld [vmem:[%s15076_s1 + $0xb90] sm:$0xff] }
 0x291   :  { %7991 = vmatpush1.bf16.msra.mxu1 %v9833_v30  ;;  %7949 = vmatprep.subr.bf16.mxu0 %v9698_v32  ;;  %v419_v30 = vld [vmem:[%s15076_s1 + $0xbd0] sm:$0xff] }
 0x292   :  { %7992 = vmatprep.subr.bf16.mxu1 %v9826_v35  ;;  %v423_v32 = vld [vmem:[%s15076_s1 + $0xbf0] sm:$0xff] }
 0x293   :  { %v547_v35 = vld [vmem:[%s15076_s1 + $0xfd0] sm:$0xff]  ;;  %v9778_v36 = vcombine.high %v419_v30, %v423_v32 }
 0x294   :  { %7950 = vmatpush1.bf16.msra.mxu0 %v9697_v42  ;;  %v9906_v40 = vcombine.high %v547_v35, %v551_v49  ;;  %v415_v42 = vld [vmem:[%s15076_s1 + $0xbb0] sm:$0xff]  ;;  %v9905_v51 = vcombine.low %v547_v35, %v551_v49 }
 0x295   :  { %7993 = vmatpush1.bf16.msra.mxu1 %v9825_v45  ;;  %7951 = vmatprep.subr.bf16.mxu0 %v9690_v46  ;;  %v539_v45 = vld [vmem:[%s15076_s1 + $0xf90] sm:$0xff]  ;;  %v9770_v52 = vcombine.high %v411_v41, %v415_v42 }
 0x296   :  { %7994 = vmatprep.subr.bf16.mxu1 %v9818_v12  ;;  %v543_v46 = vld [vmem:[%s15076_s1 + $0xfb0] sm:$0xff]  ;;  %v9777_v12 = vcombine.low %v419_v30, %v423_v32 }
 0x297   :  { %v9898_v53 = vcombine.high %v539_v45, %v543_v46  ;;  %v403_v54 = vld [vmem:[%s15076_s1 + $0xb50] sm:$0xff]  ;;  %v9897_v55 = vcombine.low %v539_v45, %v543_v46 }
 0x298   :  { %7952 = vmatpush1.bf16.msra.mxu0 %v9689_v57  ;;  %v407_v57 = vld [vmem:[%s15076_s1 + $0xb70] sm:$0xff] }
 0x299   :  { %7995 = vmatpush1.bf16.msra.mxu1 %v9817_v58  ;;  %7953 = vmatprep.subr.bf16.mxu0 %v9682_v60  ;;  %v531_v58 = vld [vmem:[%s15076_s1 + $0xf50] sm:$0xff]  ;;  %v9762_v62 = vcombine.high %v403_v54, %v407_v57 }
 0x29a   :  { %7996 = vmatprep.subr.bf16.mxu1 %v9810_v3  ;;  %v535_v60 = vld [vmem:[%s15076_s1 + $0xf70] sm:$0xff]  ;;  %v9769_v3 = vcombine.low %v411_v41, %v415_v42 }
 0x29b   :  { %v9890_v0 = vcombine.high %v531_v58, %v535_v60  ;;  %v395_v2 = vld [vmem:[%s15076_s1 + $0xb10] sm:$0xff]  ;;  %v9889_v7 = vcombine.low %v531_v58, %v535_v60 }
 0x29c   :  { %7954 = vmatpush1.bf16.msra.mxu0 %v9681_v4  ;;  %v399_v4 = vld [vmem:[%s15076_s1 + $0xb30] sm:$0xff] }
 0x29d   :  { %7997 = vmatpush1.bf16.msra.mxu1 %v9809_v5  ;;  %7955 = vmatprep.subr.bf16.mxu0 %v9674_v6  ;;  %v523_v5 = vld [vmem:[%s15076_s1 + $0xf10] sm:$0xff]  ;;  %v9754_v9 = vcombine.high %v395_v2, %v399_v4 }
 0x29e   :  { %7998 = vmatprep.subr.bf16.mxu1 %v9802_v26  ;;  %v527_v6 = vld [vmem:[%s15076_s1 + $0xf30] sm:$0xff]  ;;  %v9761_v26 = vcombine.low %v403_v54, %v407_v57 }
 0x29f   :  { %v9882_v11 = vcombine.high %v523_v5, %v527_v6  ;;  %v387_v47 = vld [vmem:[%s15076_s1 + $0xad0] sm:$0xff]  ;;  %v9881_v21 = vcombine.low %v523_v5, %v527_v6 }
 0x2a0   :  { %7956 = vmatpush1.bf16.msra.mxu0 %v9673_v14  ;;  %v391_v14 = vld [vmem:[%s15076_s1 + $0xaf0] sm:$0xff] }
 0x2a1   :  { %7999 = vmatpush1.bf16.msra.mxu1 %v9801_v15  ;;  %7957 = vmatprep.subr.bf16.mxu0 %v9666_v18  ;;  %v515_v15 = vld [vmem:[%s15076_s1 + $0xed0] sm:$0xff]  ;;  %v9746_v22 = vcombine.high %v387_v47, %v391_v14 }
 0x2a2   :  { %8000 = vmatprep.subr.bf16.mxu1 %v9794_v20  ;;  %v519_v18 = vld [vmem:[%s15076_s1 + $0xef0] sm:$0xff]  ;;  %v9753_v20 = vcombine.low %v395_v2, %v399_v4 }
 0x2a3   :  { %v9874_v23 = vcombine.high %v515_v15, %v519_v18  ;;  %v379_v24 = vld [vmem:[%s15076_s1 + $0xa90] sm:$0xff]  ;;  %v9873_v30 = vcombine.low %v515_v15, %v519_v18 }
 0x2a4   :  { %7958 = vmatpush1.bf16.msra.mxu0 %v9665_v25  ;;  %v383_v25 = vld [vmem:[%s15076_s1 + $0xab0] sm:$0xff] }
 0x2a5   :  { %8001 = vmatpush1.bf16.msra.mxu1 %v9793_v27  ;;  %7959 = vmatprep.subr.bf16.mxu0 %v9658_v28  ;;  %v507_v27 = vld [vmem:[%s15076_s1 + $0xe90] sm:$0xff]  ;;  %v9738_v32 = vcombine.high %v379_v24, %v383_v25 }
 0x2a6   :  { %8002 = vmatprep.subr.bf16.mxu1 %v9786_v61  ;;  %v511_v28 = vld [vmem:[%s15076_s1 + $0xeb0] sm:$0xff]  ;;  %v9745_v61 = vcombine.low %v387_v47, %v391_v14 }
 0x2a7   :  { %v9866_v35 = vcombine.high %v507_v27, %v511_v28  ;;  %v371_v49 = vld [vmem:[%s15076_s1 + $0xa50] sm:$0xff]  ;;  %v9865_v41 = vcombine.low %v507_v27, %v511_v28 }
 0x2a8   :  { %7960 = vmatpush1.bf16.msra.mxu0 %v9657_v38  ;;  %v375_v38 = vld [vmem:[%s15076_s1 + $0xa70] sm:$0xff] }
 0x2a9   :  { %8003 = vmatpush1.bf16.msra.mxu1 %v9785_v39  ;;  %7961 = vmatprep.subr.bf16.mxu0 %v9778_v36  ;;  %v499_v39 = vld [vmem:[%s15076_s1 + $0xe50] sm:$0xff]  ;;  %v9730_v42 = vcombine.high %v371_v49, %v375_v38 }
 0x2aa   :  { %8004 = vmatprep.subr.bf16.mxu1 %v9906_v40  ;;  %v503_v36 = vld [vmem:[%s15076_s1 + $0xe70] sm:$0xff]  ;;  %v9737_v40 = vcombine.low %v379_v24, %v383_v25  ;;  %v10826_v24 = vld [vmem:[%s15077_s0 + $0x18] ss:$72 sps:$4 sm:$0xff]  }
 0x2ab   :  { %v9858_v45 = vcombine.high %v499_v39, %v503_v36  ;;  %v363_v46 = vld [vmem:[%s15076_s1 + $0xa10] sm:$0xff]  ;;  %v9857_v54 = vcombine.low %v499_v39, %v503_v36 }
 0x2ac   :  { %7962 = vmatpush2.bf16.msra.mxu0 %v9777_v12  ;;  %v367_v12 = vld [vmem:[%s15076_s1 + $0xa30] sm:$0xff] }
 0x2ad   :  { %8005 = vmatpush2.bf16.msra.mxu1 %v9905_v51  ;;  %7963 = vmatprep.subr.bf16.mxu0 %v9770_v52  ;;  %v491_v51 = vld [vmem:[%s15076_s1 + $0xe10] sm:$0xff]  ;;  %v9722_v57 = vcombine.high %v363_v46, %v367_v12 }
 0x2ae   :  { %8006 = vmatprep.subr.bf16.mxu1 %v9898_v53  ;;  %v495_v52 = vld [vmem:[%s15076_s1 + $0xe30] sm:$0xff]  ;;  %v9729_v53 = vcombine.low %v371_v49, %v375_v38 }
 0x2af   :  { %v9850_v58 = vcombine.high %v491_v51, %v495_v52  ;;  %v611_v60 = vld [vmem:[%s15076_s1 + $0x11d0] sm:$0xff]  ;;  %v9849_v2 = vcombine.low %v491_v51, %v495_v52 }
 0x2b0   :  { %7964 = vmatpush2.bf16.msra.mxu0 %v9769_v3  ;;  %v615_v3 = vld [vmem:[%s15076_s1 + $0x11f0] sm:$0xff] }
 0x2b1   :  { %8007 = vmatpush2.bf16.msra.mxu1 %v9897_v55  ;;  %7965 = vmatprep.subr.bf16.mxu0 %v9762_v62  ;;  %v739_v55 = vld [vmem:[%s15076_s1 + $0x15d0] sm:$0xff]  ;;  %v9970_v4 = vcombine.high %v611_v60, %v615_v3 }
 0x2b2   :  { %8008 = vmatprep.subr.bf16.mxu1 %v9890_v0  ;;  %v743_v62 = vld [vmem:[%s15076_s1 + $0x15f0] sm:$0xff]  ;;  %v9721_v0 = vcombine.low %v363_v46, %v367_v12 }
 0x2b3   :  { %v10098_v5 = vcombine.high %v739_v55, %v743_v62  ;;  %v603_v6 = vld [vmem:[%s15076_s1 + $0x1190] sm:$0xff]  ;;  %v10097_v47 = vcombine.low %v739_v55, %v743_v62 }
 0x2b4   :  { %7966 = vmatpush2.bf16.msra.mxu0 %v9761_v26  ;;  %v607_v26 = vld [vmem:[%s15076_s1 + $0x11b0] sm:$0xff] }
 0x2b5   :  { %8009 = vmatpush2.bf16.msra.mxu1 %v9889_v7  ;;  %7967 = vmatprep.subr.bf16.mxu0 %v9754_v9  ;;  %v731_v7 = vld [vmem:[%s15076_s1 + $0x1590] sm:$0xff]  ;;  %v9962_v14 = vcombine.high %v603_v6, %v607_v26  ;;  %v9961_v25 = vcombine.low %v603_v6, %v607_v26 }
 0x2b6   :  { %8010 = vmatprep.subr.bf16.mxu1 %v9882_v11  ;;  %v735_v9 = vld [vmem:[%s15076_s1 + $0x15b0] sm:$0xff]  ;;  %v9969_v11 = vcombine.low %v611_v60, %v615_v3 }
 0x2b7   :  { %v10090_v15 = vcombine.high %v731_v7, %v735_v9  ;;  %v595_v18 = vld [vmem:[%s15076_s1 + $0x1150] sm:$0xff]  ;;  %v10089_v27 = vcombine.low %v731_v7, %v735_v9 }
 0x2b8   :  { %7968 = vmatpush2.bf16.msra.mxu0 %v9753_v20  ;;  %v599_v20 = vld [vmem:[%s15076_s1 + $0x1170] sm:$0xff] }
 0x2b9   :  { %8011 = vmatpush2.bf16.msra.mxu1 %v9881_v21  ;;  %7969 = vmatprep.subr.bf16.mxu0 %v9746_v22  ;;  %v10825_v21 = vld [vmem:[%s15077_s0 + $0x10] ss:$72 sps:$4 sm:$0xff]   ;;  %v9954_v28 = vcombine.high %v595_v18, %v599_v20  ;;  %v10828_v39 = vld [vmem:[%s15077_s0 + $0x2c] ss:$72 sps:$4 sm:$0xff]   ;;  %v9953_v36 = vcombine.low %v595_v18, %v599_v20 }
 0x2ba   :  { %8012 = vmatprep.subr.bf16.mxu1 %v9874_v23  ;;  %v723_v22 = vld [vmem:[%s15076_s1 + $0x1550] sm:$0xff] }
 0x2bb   :  { %v727_v23 = vld [vmem:[%s15076_s1 + $0x1570] sm:$0xff] }
 0x2bc   :  { %7970 = vmatpush2.bf16.msra.mxu0 %v9745_v61  ;;  %v10082_v61 = vcombine.high %v723_v22, %v727_v23  ;;  %v715_v49 = vld [vmem:[%s15076_s1 + $0x1510] sm:$0xff] }
 0x2bd   :  { %8013 = vmatpush2.bf16.msra.mxu1 %v9873_v30  ;;  %7971 = vmatprep.subr.bf16.mxu0 %v9738_v32  ;;  %v587_v30 = vld [vmem:[%s15076_s1 + $0x1110] sm:$0xff] }
 0x2be   :  { %8014 = vmatprep.subr.bf16.mxu1 %v9866_v35  ;;  %v591_v32 = vld [vmem:[%s15076_s1 + $0x1130] sm:$0xff]  ;;  %v10827_v35 = vld [vmem:[%s15077_s0 + $0x24] ss:$72 sps:$4 sm:$0xff]  }
 0x2bf   :  { %v719_v38 = vld [vmem:[%s15076_s1 + $0x1530] sm:$0xff]  ;;  %v9945_v52 = vcombine.low %v587_v30, %v591_v32 }
 0x2c0   :  { %7972 = vmatpush2.bf16.msra.mxu0 %v9737_v40  ;;  %v10081_v40 = vcombine.low %v723_v22, %v727_v23  ;;  %v583_v46 = vld [vmem:[%s15076_s1 + $0x10f0] sm:$0xff] }
 0x2c1   :  { %8015 = vmatpush2.bf16.msra.mxu1 %v9865_v41  ;;  %7973 = vmatprep.subr.bf16.mxu0 %v9730_v42  ;;  %v9946_v41 = vcombine.high %v587_v30, %v591_v32  ;;  %v10074_v42 = vcombine.high %v715_v49, %v719_v38  ;;  %v707_v12 = vld [vmem:[%s15076_s1 + $0x14d0] sm:$0xff] }
 0x2c2   :  { %8016 = vmatprep.subr.bf16.mxu1 %v9858_v45  ;;  %v579_v45 = vld [vmem:[%s15076_s1 + $0x10d0] sm:$0xff] }
 0x2c3   :  { %v711_v51 = vld [vmem:[%s15076_s1 + $0x14f0] sm:$0xff]  ;;  %v9937_v62 = vcombine.low %v579_v45, %v583_v46 }
 0x2c4   :  { %7974 = vmatpush2.bf16.msra.mxu0 %v9729_v53  ;;  %v10073_v53 = vcombine.low %v715_v49, %v719_v38  ;;  %v575_v60 = vld [vmem:[%s15076_s1 + $0x10b0] sm:$0xff] }
 0x2c5   :  { %8017 = vmatpush2.bf16.msra.mxu1 %v9857_v54  ;;  %7975 = vmatprep.subr.bf16.mxu0 %v9722_v57  ;;  %v9938_v54 = vcombine.high %v579_v45, %v583_v46  ;;  %v10066_v57 = vcombine.high %v707_v12, %v711_v51  ;;  %v699_v3 = vld [vmem:[%s15076_s1 + $0x1490] sm:$0xff] }
 0x2c6   :  { %8018 = vmatprep.subr.bf16.mxu1 %v9850_v58  ;;  %v571_v58 = vld [vmem:[%s15076_s1 + $0x1090] sm:$0xff] }
 0x2c7   :  { %v703_v55 = vld [vmem:[%s15076_s1 + $0x14b0] sm:$0xff]  ;;  %v9929_v9 = vcombine.low %v571_v58, %v575_v60 }
 0x2c8   :  { %7976 = vmatpush2.bf16.msra.mxu0 %v9721_v0  ;;  %v10065_v0 = vcombine.low %v707_v12, %v711_v51  ;;  %v567_v6 = vld [vmem:[%s15076_s1 + $0x1070] sm:$0xff] }
 0x2c9   :  { %8019 = vmatpush2.bf16.msra.mxu1 %v9849_v2  ;;  %8031 = vmatprep.subr.bf16.mxu0 %v9970_v4  ;;  %v9930_v2 = vcombine.high %v571_v58, %v575_v60  ;;  %v10058_v4 = vcombine.high %v699_v3, %v703_v55  ;;  %v691_v26 = vld [vmem:[%s15076_s1 + $0x1450] sm:$0xff] }
 0x2ca   :  { %8074 = vmatprep.subr.bf16.mxu1 %v10098_v5  ;;  %v563_v5 = vld [vmem:[%s15076_s1 + $0x1050] sm:$0xff] }
 0x2cb   :  { %7978 = vmatmul.mubr.bf16.vlgmr.msra.gmra.mxu0 %v10825_v21  ;;  %v695_v7 = vld [vmem:[%s15076_s1 + $0x1470] sm:$0xff]  ;;  %v9921_v22 = vcombine.low %v563_v5, %v567_v6 }
 0x2cc   :  { %8021 = vmatmul.mubr.bf16.vlgmr.msra.gmra.mxu1 %v10826_v24  ;;  %8032 = vmatpush1.bf16.msra.mxu0 %v9969_v11  ;;  %v10057_v11 = vcombine.low %v699_v3, %v703_v55  ;;  %v559_v18 = vld [vmem:[%s15076_s1 + $0x1030] sm:$0xff]  ;;  %v10049_v23 = vcombine.low %v691_v26, %v695_v7 }
 0x2cd   :  { %8075 = vmatpush1.bf16.msra.mxu1 %v10097_v47  ;;  %8033 = vmatprep.subr.bf16.mxu0 %v9962_v14  ;;  %v9922_v47 = vcombine.high %v563_v5, %v567_v6  ;;  %v10050_v14 = vcombine.high %v691_v26, %v695_v7  ;;  %v683_v20 = vld [vmem:[%s15076_s1 + $0x1410] sm:$0xff] }
 0x2ce   :  { %8076 = vmatprep.subr.bf16.mxu1 %v10090_v15  ;;  %8063 = vmatprep.mubr.bf16.mxu0 %v10827_v35  ;;  %v555_v15 = vld [vmem:[%s15076_s1 + $0x1010] sm:$0xff] }
 0x2cf   :  { %8106 = vmatprep.mubr.bf16.mxu1 %v10828_v39  ;;  %v687_v21 = vld [vmem:[%s15076_s1 + $0x1430] sm:$0xff]  ;;  %v9914_v24 = vcombine.high %v555_v15, %v559_v18  ;;  %v9913_v32 = vcombine.low %v555_v15, %v559_v18 }
 0x2d0   :  { %8034 = vmatpush1.bf16.msra.mxu0 %v9961_v25  ;;  %v10042_v25 = vcombine.high %v683_v20, %v687_v21  ;;  %v807_v30 = vld [vmem:[%s15076_s1 + $0x17f0] sm:$0xff]  ;;  %v10041_v35 = vcombine.low %v683_v20, %v687_v21 }
 0x2d1   :  { %8077 = vmatpush1.bf16.msra.mxu1 %v10089_v27  ;;  %8035 = vmatprep.subr.bf16.mxu0 %v9954_v28  ;;  %v675_v27 = vld [vmem:[%s15076_s1 + $0x13d0] sm:$0xff] }
 0x2d2   :  { %8078 = vmatprep.subr.bf16.mxu1 %v10082_v61  ;;  %v679_v28 = vld [vmem:[%s15076_s1 + $0x13f0] sm:$0xff] }
 0x2d3   :  { %v803_v61 = vld [vmem:[%s15076_s1 + $0x17d0] sm:$0xff]  ;;  %v10034_v49 = vcombine.high %v675_v27, %v679_v28 }
 0x2d4   :  { %8036 = vmatpush1.bf16.msra.mxu0 %v9953_v36  ;;  %v10162_v38 = vcombine.high %v803_v61, %v807_v30  ;;  %v667_v39 = vld [vmem:[%s15076_s1 + $0x1390] sm:$0xff]  ;;  %v10161_v45 = vcombine.low %v803_v61, %v807_v30 }
 0x2d5   :  { %8079 = vmatpush1.bf16.msra.mxu1 %v10081_v40  ;;  %8037 = vmatprep.subr.bf16.mxu0 %v9946_v41  ;;  %v671_v36 = vld [vmem:[%s15076_s1 + $0x13b0] sm:$0xff] }
 0x2d6   :  { %8080 = vmatprep.subr.bf16.mxu1 %v10074_v42  ;;  %v795_v40 = vld [vmem:[%s15076_s1 + $0x1790] sm:$0xff]  ;;  %v10033_v42 = vcombine.low %v675_v27, %v679_v28  ;;  %v10026_v46 = vcombine.high %v667_v39, %v671_v36 }
 0x2d7   :  { %v799_v41 = vld [vmem:[%s15076_s1 + $0x17b0] sm:$0xff] }
 0x2d8   :  { %8038 = vmatpush1.bf16.msra.mxu0 %v9945_v52  ;;  %v10154_v12 = vcombine.high %v795_v40, %v799_v41  ;;  %v659_v51 = vld [vmem:[%s15076_s1 + $0x1350] sm:$0xff]  ;;  %v10153_v58 = vcombine.low %v795_v40, %v799_v41 }
 0x2d9   :  { %8081 = vmatpush1.bf16.msra.mxu1 %v10073_v53  ;;  %8039 = vmatprep.subr.bf16.mxu0 %v9938_v54  ;;  %v663_v52 = vld [vmem:[%s15076_s1 + $0x1370] sm:$0xff] }
 0x2da   :  { %8082 = vmatprep.subr.bf16.mxu1 %v10066_v57  ;;  %v787_v53 = vld [vmem:[%s15076_s1 + $0x1750] sm:$0xff]  ;;  %v10025_v57 = vcombine.low %v667_v39, %v671_v36  ;;  %v10018_v60 = vcombine.high %v659_v51, %v663_v52 }
 0x2db   :  { %v791_v54 = vld [vmem:[%s15076_s1 + $0x1770] sm:$0xff] }
 0x2dc   :  { %8040 = vmatpush1.bf16.msra.mxu0 %v9937_v62  ;;  %v10146_v3 = vcombine.high %v787_v53, %v791_v54  ;;  %v651_v55 = vld [vmem:[%s15076_s1 + $0x1310] sm:$0xff]  ;;  %v10145_v5 = vcombine.low %v787_v53, %v791_v54 }
 0x2dd   :  { %8083 = vmatpush1.bf16.msra.mxu1 %v10065_v0  ;;  %8041 = vmatprep.subr.bf16.mxu0 %v9930_v2  ;;  %v655_v62 = vld [vmem:[%s15076_s1 + $0x1330] sm:$0xff] }
 0x2de   :  { %8084 = vmatprep.subr.bf16.mxu1 %v10058_v4  ;;  %v779_v0 = vld [vmem:[%s15076_s1 + $0x1710] sm:$0xff]  ;;  %v10017_v4 = vcombine.low %v659_v51, %v663_v52  ;;  %v10010_v6 = vcombine.high %v651_v55, %v655_v62 }
 0x2df   :  { %v783_v2 = vld [vmem:[%s15076_s1 + $0x1730] sm:$0xff] }
 0x2e0   :  { %8042 = vmatpush1.bf16.msra.mxu0 %v9929_v9  ;;  %v10138_v26 = vcombine.high %v779_v0, %v783_v2  ;;  %v643_v7 = vld [vmem:[%s15076_s1 + $0x12d0] sm:$0xff]  ;;  %v10137_v15 = vcombine.low %v779_v0, %v783_v2 }
 0x2e1   :  { %8085 = vmatpush1.bf16.msra.mxu1 %v10057_v11  ;;  %8043 = vmatprep.subr.bf16.mxu0 %v9922_v47  ;;  %v647_v9 = vld [vmem:[%s15076_s1 + $0x12f0] sm:$0xff] }
 0x2e2   :  { %8086 = vmatprep.subr.bf16.mxu1 %v10050_v14  ;;  %v771_v11 = vld [vmem:[%s15076_s1 + $0x16d0] sm:$0xff]  ;;  %v10009_v14 = vcombine.low %v651_v55, %v655_v62  ;;  %v10002_v18 = vcombine.high %v643_v7, %v647_v9 }
 0x2e3   :  { %v775_v47 = vld [vmem:[%s15076_s1 + $0x16f0] sm:$0xff] }
 0x2e4   :  { %8044 = vmatpush1.bf16.msra.mxu0 %v9921_v22  ;;  %v10130_v20 = vcombine.high %v771_v11, %v775_v47  ;;  %v635_v21 = vld [vmem:[%s15076_s1 + $0x1290] sm:$0xff]  ;;  %v10129_v27 = vcombine.low %v771_v11, %v775_v47 }
 0x2e5   :  { %8087 = vmatpush1.bf16.msra.mxu1 %v10049_v23  ;;  %8045 = vmatprep.subr.bf16.mxu0 %v9914_v24  ;;  %v639_v22 = vld [vmem:[%s15076_s1 + $0x12b0] sm:$0xff] }
 0x2e6   :  { %8088 = vmatprep.subr.bf16.mxu1 %v10042_v25  ;;  %v763_v23 = vld [vmem:[%s15076_s1 + $0x1690] sm:$0xff]  ;;  %v10001_v25 = vcombine.low %v643_v7, %v647_v9  ;;  %v9994_v28 = vcombine.high %v635_v21, %v639_v22 }
 0x2e7   :  { %v767_v24 = vld [vmem:[%s15076_s1 + $0x16b0] sm:$0xff] }
 0x2e8   :  { %8046 = vmatpush1.bf16.msra.mxu0 %v9913_v32  ;;  %v10122_v61 = vcombine.high %v763_v23, %v767_v24  ;;  %v627_v30 = vld [vmem:[%s15076_s1 + $0x1250] sm:$0xff]  ;;  %v10121_v39 = vcombine.low %v763_v23, %v767_v24 }
 0x2e9   :  { %8089 = vmatpush1.bf16.msra.mxu1 %v10041_v35  ;;  %8047 = vmatprep.subr.bf16.mxu0 %v10034_v49  ;;  %v631_v32 = vld [vmem:[%s15076_s1 + $0x1270] sm:$0xff] }
 0x2ea   :  { %8090 = vmatprep.subr.bf16.mxu1 %v10162_v38  ;;  %v755_v35 = vld [vmem:[%s15076_s1 + $0x1650] sm:$0xff]  ;;  %v9993_v38 = vcombine.low %v635_v21, %v639_v22  ;;  %v9986_v36 = vcombine.high %v627_v30, %v631_v32 }
 0x2eb   :  { %v759_v49 = vld [vmem:[%s15076_s1 + $0x1670] sm:$0xff] }
 0x2ec   :  { %8048 = vmatpush2.bf16.msra.mxu0 %v10033_v42  ;;  %v10114_v40 = vcombine.high %v755_v35, %v759_v49  ;;  %v619_v41 = vld [vmem:[%s15076_s1 + $0x1210] sm:$0xff]  ;;  %v10113_v51 = vcombine.low %v755_v35, %v759_v49  ;;  %v10832_v35 = vld [vmem:[%s15077_s0 + $0x3c] ss:$72 sps:$4 sm:$0xff]  }
 0x2ed   :  { %8091 = vmatpush2.bf16.msra.mxu1 %v10161_v45  ;;  %8049 = vmatprep.subr.bf16.mxu0 %v10026_v46  ;;  %v623_v42 = vld [vmem:[%s15076_s1 + $0x1230] sm:$0xff] }
 0x2ee   :  { %8092 = vmatprep.subr.bf16.mxu1 %v10154_v12  ;;  %v747_v45 = vld [vmem:[%s15076_s1 + $0x1610] sm:$0xff]  ;;  %v9985_v12 = vcombine.low %v627_v30, %v631_v32  ;;  %v9978_v52 = vcombine.high %v619_v41, %v623_v42 }
 0x2ef   :  { %v751_v46 = vld [vmem:[%s15076_s1 + $0x1630] sm:$0xff] }
 0x2f0   :  { %8050 = vmatpush2.bf16.msra.mxu0 %v10025_v57  ;;  %v10106_v53 = vcombine.high %v747_v45, %v751_v46  ;;  %v867_v54 = vld [vmem:[%s15076_s1 + $0x19d0] sm:$0xff]  ;;  %v10105_v55 = vcombine.low %v747_v45, %v751_v46 }
 0x2f1   :  { %8093 = vmatpush2.bf16.msra.mxu1 %v10153_v58  ;;  %8051 = vmatprep.subr.bf16.mxu0 %v10018_v60  ;;  %v871_v57 = vld [vmem:[%s15076_s1 + $0x19f0] sm:$0xff] }
 0x2f2   :  { %8094 = vmatprep.subr.bf16.mxu1 %v10146_v3  ;;  %v995_v58 = vld [vmem:[%s15076_s1 + $0x1dd0] sm:$0xff]  ;;  %v9977_v3 = vcombine.low %v619_v41, %v623_v42  ;;  %v10226_v62 = vcombine.high %v867_v54, %v871_v57 }
 0x2f3   :  { %v999_v60 = vld [vmem:[%s15076_s1 + $0x1df0] sm:$0xff] }
 0x2f4   :  { %8052 = vmatpush2.bf16.msra.mxu0 %v10017_v4  ;;  %v10354_v0 = vcombine.high %v995_v58, %v999_v60  ;;  %v859_v2 = vld [vmem:[%s15076_s1 + $0x1990] sm:$0xff]  ;;  %v10353_v7 = vcombine.low %v995_v58, %v999_v60 }
 0x2f5   :  { %8095 = vmatpush2.bf16.msra.mxu1 %v10145_v5  ;;  %8053 = vmatprep.subr.bf16.mxu0 %v10010_v6  ;;  %v863_v4 = vld [vmem:[%s15076_s1 + $0x19b0] sm:$0xff] }
 0x2f6   :  { %8096 = vmatprep.subr.bf16.mxu1 %v10138_v26  ;;  %v987_v5 = vld [vmem:[%s15076_s1 + $0x1d90] sm:$0xff]  ;;  %v10225_v26 = vcombine.low %v867_v54, %v871_v57  ;;  %v10218_v9 = vcombine.high %v859_v2, %v863_v4  ;;  %v10217_v22 = vcombine.low %v859_v2, %v863_v4 }
 0x2f7   :  { %v991_v6 = vld [vmem:[%s15076_s1 + $0x1db0] sm:$0xff] }
 0x2f8   :  { %8054 = vmatpush2.bf16.msra.mxu0 %v10009_v14  ;;  %v10346_v11 = vcombine.high %v987_v5, %v991_v6  ;;  %v851_v47 = vld [vmem:[%s15076_s1 + $0x1950] sm:$0xff]  ;;  %v10345_v23 = vcombine.low %v987_v5, %v991_v6 }
 0x2f9   :  { %8097 = vmatpush2.bf16.msra.mxu1 %v10137_v15  ;;  %8055 = vmatprep.subr.bf16.mxu0 %v10002_v18  ;;  %v855_v14 = vld [vmem:[%s15076_s1 + $0x1970] sm:$0xff]  ;;  %v10829_v15 = vld [vmem:[%s15077_s0 + $0x20] ss:$72 sps:$4 sm:$0xff]  }
 0x2fa   :  { %8098 = vmatprep.subr.bf16.mxu1 %v10130_v20  ;;  %v979_v18 = vld [vmem:[%s15076_s1 + $0x1d50] sm:$0xff]  ;;  %v10210_v24 = vcombine.high %v851_v47, %v855_v14  ;;  %v10209_v49 = vcombine.low %v851_v47, %v855_v14 }
 0x2fb   :  { %v983_v20 = vld [vmem:[%s15076_s1 + $0x1d70] sm:$0xff] }
 0x2fc   :  { %8056 = vmatpush2.bf16.msra.mxu0 %v10001_v25  ;;  %v10830_v21 = vld [vmem:[%s15077_s0 + $0x28] ss:$72 sps:$4 sm:$0xff]   ;;  %v10338_v25 = vcombine.high %v979_v18, %v983_v20 }
 0x2fd   :  { %8099 = vmatpush2.bf16.msra.mxu1 %v10129_v27  ;;  %8057 = vmatprep.subr.bf16.mxu0 %v9994_v28  ;;  %v843_v27 = vld [vmem:[%s15076_s1 + $0x1910] sm:$0xff] }
 0x2fe   :  { %8100 = vmatprep.subr.bf16.mxu1 %v10122_v61  ;;  %v847_v28 = vld [vmem:[%s15076_s1 + $0x1930] sm:$0xff] }
 0x2ff   :  { %v10831_v61 = vld [vmem:[%s15077_s0 + $0x34] ss:$72 sps:$4 sm:$0xff]   ;;  %v10201_v46 = vcombine.low %v843_v27, %v847_v28 }
 0x300   :  { %8058 = vmatpush2.bf16.msra.mxu0 %v9993_v38  ;;  %v971_v30 = vld [vmem:[%s15076_s1 + $0x1d10] sm:$0xff]  ;;  %v10337_v38 = vcombine.low %v979_v18, %v983_v20 }
 0x301   :  { %8101 = vmatpush2.bf16.msra.mxu1 %v10121_v39  ;;  %8059 = vmatprep.subr.bf16.mxu0 %v9986_v36  ;;  %v975_v32 = vld [vmem:[%s15076_s1 + $0x1d30] sm:$0xff]  ;;  %v10202_v39 = vcombine.high %v843_v27, %v847_v28 }
 0x302   :  { %8102 = vmatprep.subr.bf16.mxu1 %v10114_v40  ;;  %v10330_v36 = vcombine.high %v971_v30, %v975_v32  ;;  %v835_v40 = vld [vmem:[%s15076_s1 + $0x18d0] sm:$0xff] }
 0x303   :  { %v839_v41 = vld [vmem:[%s15076_s1 + $0x18f0] sm:$0xff] }
 0x304   :  { %8060 = vmatpush2.bf16.msra.mxu0 %v9985_v12  ;;  %v963_v42 = vld [vmem:[%s15076_s1 + $0x1cd0] sm:$0xff]  ;;  %v10329_v12 = vcombine.low %v971_v30, %v975_v32  ;;  %v10193_v60 = vcombine.low %v835_v40, %v839_v41 }
 0x305   :  { %8103 = vmatpush2.bf16.msra.mxu1 %v10113_v51  ;;  %8061 = vmatprep.subr.bf16.mxu0 %v9978_v52  ;;  %v967_v45 = vld [vmem:[%s15076_s1 + $0x1cf0] sm:$0xff]  ;;  %v10194_v51 = vcombine.high %v835_v40, %v839_v41 }
 0x306   :  { %8104 = vmatprep.subr.bf16.mxu1 %v10106_v53  ;;  %v10322_v52 = vcombine.high %v963_v42, %v967_v45  ;;  %v827_v53 = vld [vmem:[%s15076_s1 + $0x1890] sm:$0xff] }
 0x307   :  { %v831_v54 = vld [vmem:[%s15076_s1 + $0x18b0] sm:$0xff] }
 0x308   :  { %8062 = vmatpush2.bf16.msra.mxu0 %v9977_v3  ;;  %v955_v57 = vld [vmem:[%s15076_s1 + $0x1c90] sm:$0xff]  ;;  %v10321_v3 = vcombine.low %v963_v42, %v967_v45  ;;  %v10185_v6 = vcombine.low %v827_v53, %v831_v54 }
 0x309   :  { %8105 = vmatpush2.bf16.msra.mxu1 %v10105_v55  ;;  %8117 = vmatprep.subr.bf16.mxu0 %v10226_v62  ;;  %v959_v58 = vld [vmem:[%s15076_s1 + $0x1cb0] sm:$0xff]  ;;  %v10186_v55 = vcombine.high %v827_v53, %v831_v54 }
 0x30a   :  { %8160 = vmatprep.subr.bf16.mxu1 %v10354_v0  ;;  %v10314_v62 = vcombine.high %v955_v57, %v959_v58  ;;  %v819_v0 = vld [vmem:[%s15076_s1 + $0x1850] sm:$0xff] }
 0x30b   :  { %8064 = vmatmul.mubr.bf16.vlgmr.msra.gmra.mxu0 %v10829_v15  ;;  %v823_v2 = vld [vmem:[%s15076_s1 + $0x1870] sm:$0xff] }
 0x30c   :  { %8107 = vmatmul.mubr.bf16.vlgmr.msra.gmra.mxu1 %v10830_v21  ;;  %8118 = vmatpush1.bf16.msra.mxu0 %v10225_v26  ;;  %v947_v4 = vld [vmem:[%s15076_s1 + $0x1c50] sm:$0xff]  ;;  %v10313_v26 = vcombine.low %v955_v57, %v959_v58  ;;  %v10177_v18 = vcombine.low %v819_v0, %v823_v2 }
 0x30d   :  { %8161 = vmatpush1.bf16.msra.mxu1 %v10353_v7  ;;  %8119 = vmatprep.subr.bf16.mxu0 %v10218_v9  ;;  %v951_v5 = vld [vmem:[%s15076_s1 + $0x1c70] sm:$0xff]  ;;  %v10178_v7 = vcombine.high %v819_v0, %v823_v2 }
 0x30e   :  { %8162 = vmatprep.subr.bf16.mxu1 %v10346_v11  ;;  %8149 = vmatprep.mubr.bf16.mxu0 %v10831_v61  ;;  %v10306_v9 = vcombine.high %v947_v4, %v951_v5  ;;  %v811_v11 = vld [vmem:[%s15076_s1 + $0x1810] sm:$0xff]  ;;  %v10305_v20 = vcombine.low %v947_v4, %v951_v5 }
 0x30f   :  { %8192 = vmatprep.mubr.bf16.mxu1 %v10832_v35  ;;  %v815_v47 = vld [vmem:[%s15076_s1 + $0x1830] sm:$0xff] }
 0x310   :  { %8120 = vmatpush1.bf16.msra.mxu0 %v10217_v22  ;;  %v939_v14 = vld [vmem:[%s15076_s1 + $0x1c10] sm:$0xff]  ;;  %v10170_v21 = vcombine.high %v811_v11, %v815_v47  ;;  %v10169_v28 = vcombine.low %v811_v11, %v815_v47 }
 0x311   :  { %8163 = vmatpush1.bf16.msra.mxu1 %v10345_v23  ;;  %8121 = vmatprep.subr.bf16.mxu0 %v10210_v24  ;;  %v943_v15 = vld [vmem:[%s15076_s1 + $0x1c30] sm:$0xff] }
 0x312   :  { %8164 = vmatprep.subr.bf16.mxu1 %v10338_v25  ;;  %v10298_v22 = vcombine.high %v939_v14, %v943_v15  ;;  %v931_v23 = vld [vmem:[%s15076_s1 + $0x1bd0] sm:$0xff]  ;;  %v10297_v61 = vcombine.low %v939_v14, %v943_v15 }
 0x313   :  { %v935_v24 = vld [vmem:[%s15076_s1 + $0x1bf0] sm:$0xff] }
 0x314   :  { %8122 = vmatpush1.bf16.msra.mxu0 %v10209_v49  ;;  %v1059_v25 = vld [vmem:[%s15076_s1 + $0x1fd0] sm:$0xff]  ;;  %v10290_v30 = vcombine.high %v931_v23, %v935_v24 }
 0x315   :  { %8165 = vmatpush1.bf16.msra.mxu1 %v10337_v38  ;;  %8123 = vmatprep.subr.bf16.mxu0 %v10202_v39  ;;  %v1063_v27 = vld [vmem:[%s15076_s1 + $0x1ff0] sm:$0xff] }
 0x316   :  { %8166 = vmatprep.subr.bf16.mxu1 %v10330_v36  ;;  %v10418_v32 = vcombine.high %v1059_v25, %v1063_v27  ;;  %v923_v35 = vld [vmem:[%s15076_s1 + $0x1b90] sm:$0xff]  ;;  %v10289_v36 = vcombine.low %v931_v23, %v935_v24  ;;  %v10417_v40 = vcombine.low %v1059_v25, %v1063_v27 }
 0x317   :  { %v927_v49 = vld [vmem:[%s15076_s1 + $0x1bb0] sm:$0xff] }
 0x318   :  { %8124 = vmatpush1.bf16.msra.mxu0 %v10201_v46  ;;  %v1051_v38 = vld [vmem:[%s15076_s1 + $0x1f90] sm:$0xff]  ;;  %v10282_v41 = vcombine.high %v923_v35, %v927_v49 }
 0x319   :  { %8167 = vmatpush1.bf16.msra.mxu1 %v10329_v12  ;;  %8125 = vmatprep.subr.bf16.mxu0 %v10194_v51  ;;  %v1055_v39 = vld [vmem:[%s15076_s1 + $0x1fb0] sm:$0xff] }
 0x31a   :  { %8168 = vmatprep.subr.bf16.mxu1 %v10322_v52  ;;  %v10410_v42 = vcombine.high %v1051_v38, %v1055_v39  ;;  %v915_v45 = vld [vmem:[%s15076_s1 + $0x1b50] sm:$0xff]  ;;  %v10281_v52 = vcombine.low %v923_v35, %v927_v49  ;;  %v10409_v53 = vcombine.low %v1051_v38, %v1055_v39 }
 0x31b   :  { %v919_v46 = vld [vmem:[%s15076_s1 + $0x1b70] sm:$0xff] }
 0x31c   :  { %8126 = vmatpush1.bf16.msra.mxu0 %v10193_v60  ;;  %v1043_v12 = vld [vmem:[%s15076_s1 + $0x1f50] sm:$0xff]  ;;  %v10274_v54 = vcombine.high %v915_v45, %v919_v46 }
 0x31d   :  { %8169 = vmatpush1.bf16.msra.mxu1 %v10321_v3  ;;  %8127 = vmatprep.subr.bf16.mxu0 %v10186_v55  ;;  %v1047_v51 = vld [vmem:[%s15076_s1 + $0x1f70] sm:$0xff] }
 0x31e   :  { %8170 = vmatprep.subr.bf16.mxu1 %v10314_v62  ;;  %v10402_v57 = vcombine.high %v1043_v12, %v1047_v51  ;;  %v907_v58 = vld [vmem:[%s15076_s1 + $0x1b10] sm:$0xff]  ;;  %v10273_v62 = vcombine.low %v915_v45, %v919_v46  ;;  %v10401_v0 = vcombine.low %v1043_v12, %v1047_v51 }
 0x31f   :  { %v911_v60 = vld [vmem:[%s15076_s1 + $0x1b30] sm:$0xff] }
 0x320   :  { %8128 = vmatpush1.bf16.msra.mxu0 %v10185_v6  ;;  %v1035_v3 = vld [vmem:[%s15076_s1 + $0x1f10] sm:$0xff]  ;;  %v10266_v2 = vcombine.high %v907_v58, %v911_v60 }
 0x321   :  { %8171 = vmatpush1.bf16.msra.mxu1 %v10313_v26  ;;  %8129 = vmatprep.subr.bf16.mxu0 %v10178_v7  ;;  %v1039_v55 = vld [vmem:[%s15076_s1 + $0x1f30] sm:$0xff] }
 0x322   :  { %8172 = vmatprep.subr.bf16.mxu1 %v10306_v9  ;;  %v10394_v4 = vcombine.high %v1035_v3, %v1039_v55  ;;  %v899_v5 = vld [vmem:[%s15076_s1 + $0x1ad0] sm:$0xff]  ;;  %v10265_v9 = vcombine.low %v907_v58, %v911_v60  ;;  %v10393_v11 = vcombine.low %v1035_v3, %v1039_v55 }
 0x323   :  { %v903_v6 = vld [vmem:[%s15076_s1 + $0x1af0] sm:$0xff] }
 0x324   :  { %8130 = vmatpush1.bf16.msra.mxu0 %v10177_v18  ;;  %v1027_v26 = vld [vmem:[%s15076_s1 + $0x1ed0] sm:$0xff]  ;;  %v10258_v47 = vcombine.high %v899_v5, %v903_v6 }
 0x325   :  { %8173 = vmatpush1.bf16.msra.mxu1 %v10305_v20  ;;  %8131 = vmatprep.subr.bf16.mxu0 %v10170_v21  ;;  %v1031_v7 = vld [vmem:[%s15076_s1 + $0x1ef0] sm:$0xff] }
 0x326   :  { %8174 = vmatprep.subr.bf16.mxu1 %v10298_v22  ;;  %v10386_v14 = vcombine.high %v1027_v26, %v1031_v7  ;;  %v891_v15 = vld [vmem:[%s15076_s1 + $0x1a90] sm:$0xff]  ;;  %v10257_v22 = vcombine.low %v899_v5, %v903_v6  ;;  %v10385_v23 = vcombine.low %v1027_v26, %v1031_v7 }
 0x327   :  { %v895_v18 = vld [vmem:[%s15076_s1 + $0x1ab0] sm:$0xff] }
 0x328   :  { %8132 = vmatpush1.bf16.msra.mxu0 %v10169_v28  ;;  %v1019_v20 = vld [vmem:[%s15076_s1 + $0x1e90] sm:$0xff]  ;;  %v10250_v24 = vcombine.high %v891_v15, %v895_v18 }
 0x329   :  { %8175 = vmatpush1.bf16.msra.mxu1 %v10297_v61  ;;  %8133 = vmatprep.subr.bf16.mxu0 %v10290_v30  ;;  %v1023_v21 = vld [vmem:[%s15076_s1 + $0x1eb0] sm:$0xff] }
 0x32a   :  { %8176 = vmatprep.subr.bf16.mxu1 %v10418_v32  ;;  %v10378_v25 = vcombine.high %v1019_v20, %v1023_v21  ;;  %v883_v27 = vld [vmem:[%s15076_s1 + $0x1a50] sm:$0xff]  ;;  %v10249_v32 = vcombine.low %v891_v15, %v895_v18  ;;  %v10377_v35 = vcombine.low %v1019_v20, %v1023_v21  ;;  %v10834_v15 = vld [vmem:[%s15077_s0 + $0x38] ss:$72 sps:$4 sm:$0xff]  }
 0x32b   :  { %v887_v28 = vld [vmem:[%s15076_s1 + $0x1a70] sm:$0xff] }
 0x32c   :  { %8134 = vmatpush2.bf16.msra.mxu0 %v10289_v36  ;;  %v1011_v61 = vld [vmem:[%s15076_s1 + $0x1e50] sm:$0xff]  ;;  %v10242_v49 = vcombine.high %v883_v27, %v887_v28 }
 0x32d   :  { %8177 = vmatpush2.bf16.msra.mxu1 %v10417_v40  ;;  %8135 = vmatprep.subr.bf16.mxu0 %v10282_v41  ;;  %v1015_v30 = vld [vmem:[%s15076_s1 + $0x1e70] sm:$0xff] }
 0x32e   :  { %8178 = vmatprep.subr.bf16.mxu1 %v10410_v42  ;;  %v10370_v38 = vcombine.high %v1011_v61, %v1015_v30  ;;  %v875_v39 = vld [vmem:[%s15076_s1 + $0x1a10] sm:$0xff]  ;;  %v10241_v42 = vcombine.low %v883_v27, %v887_v28  ;;  %v10369_v45 = vcombine.low %v1011_v61, %v1015_v30  ;;  %v76_v27 = vld [vmem:[%s15076_s1 + $0x118] sm:$0xff]  ;;  %v10836_v61 = vld [vmem:[%s15077_s0 + $0x4] ss:$72 sps:$4 sm:$0xff]  }
 0x32f   :  { %v879_v36 = vld [vmem:[%s15076_s1 + $0x1a30] sm:$0xff]  ;;  %v80_v28 = vld [vmem:[%s15076_s1 + $0x138] sm:$0xff] }
 0x330   :  { %8136 = vmatpush2.bf16.msra.mxu0 %v10281_v52  ;;  %v1003_v40 = vld [vmem:[%s15076_s1 + $0x1e10] sm:$0xff]  ;;  %v10234_v46 = vcombine.high %v875_v39, %v879_v36 }
 0x331   :  { %8179 = vmatpush2.bf16.msra.mxu1 %v10409_v53  ;;  %8137 = vmatprep.subr.bf16.mxu0 %v10274_v54  ;;  %v1007_v41 = vld [vmem:[%s15076_s1 + $0x1e30] sm:$0xff]  ;;  %v100_v53 = vld [vmem:[%s15076_s1 + $0x1d8] sm:$0xff] }
 0x332   :  { %8180 = vmatprep.subr.bf16.mxu1 %v10402_v57  ;;  %v10362_v12 = vcombine.high %v1003_v40, %v1007_v41  ;;  %v1123_v51 = vld [vmem:[%s15076_s1 + $0x21d0] sm:$0xff]  ;;  %v104_v54 = vld [vmem:[%s15076_s1 + $0x1f8] sm:$0xff]  ;;  %v10233_v57 = vcombine.low %v875_v39, %v879_v36  ;;  %v10361_v58 = vcombine.low %v1003_v40, %v1007_v41 }
 0x333   :  { %v1127_v52 = vld [vmem:[%s15076_s1 + $0x21f0] sm:$0xff]  ;;  %v9460_v3 = vcombine.high %v100_v53, %v104_v54  ;;  %v9459_v5 = vcombine.low %v100_v53, %v104_v54  ;;  %v68_v36 = vld [vmem:[%s15076_s1 + $0xd8] sm:$0xff] }
 0x334   :  { %8138 = vmatpush2.bf16.msra.mxu0 %v10273_v62  ;;  %v10482_v60 = vcombine.high %v1123_v51, %v1127_v52  ;;  %v1115_v55 = vld [vmem:[%s15076_s1 + $0x2190] sm:$0xff]  ;;  %v72_v40 = vld [vmem:[%s15076_s1 + $0xf8] sm:$0xff] }
 0x335   :  { %8181 = vmatpush2.bf16.msra.mxu1 %v10401_v0  ;;  %8139 = vmatprep.subr.bf16.mxu0 %v10266_v2  ;;  %v1119_v62 = vld [vmem:[%s15076_s1 + $0x21b0] sm:$0xff]  ;;  %v92_v0 = vld [vmem:[%s15076_s1 + $0x198] sm:$0xff] }
 0x336   :  { %8182 = vmatprep.subr.bf16.mxu1 %v10394_v4  ;;  %v96_v2 = vld [vmem:[%s15076_s1 + $0x1b8] sm:$0xff]  ;;  %v10481_v4 = vcombine.low %v1123_v51, %v1127_v52  ;;  %v10474_v6 = vcombine.high %v1115_v55, %v1119_v62  ;;  %v1107_v7 = vld [vmem:[%s15076_s1 + $0x2150] sm:$0xff]  ;;  %v10473_v18 = vcombine.low %v1115_v55, %v1119_v62 }
 0x337   :  { %v9452_v26 = vcombine.high %v92_v0, %v96_v2  ;;  %v9451_v20 = vcombine.low %v92_v0, %v96_v2  ;;  %v1095_v39 = vld [vmem:[%s15076_s1 + $0x20f0] sm:$0xff]  ;;  %v60_v52 = vld [vmem:[%s15076_s1 + $0x98] sm:$0xff] }
 0x338   :  { %8140 = vmatpush2.bf16.msra.mxu0 %v10265_v9  ;;  %v1111_v9 = vld [vmem:[%s15076_s1 + $0x2170] sm:$0xff]  ;;  %v64_v53 = vld [vmem:[%s15076_s1 + $0xb8] sm:$0xff] }
 0x339   :  { %8183 = vmatpush2.bf16.msra.mxu1 %v10393_v11  ;;  %8141 = vmatprep.subr.bf16.mxu0 %v10258_v47  ;;  %v10833_v11 = vld [vmem:[%s15077_s0 + $0x30] ss:$72 sps:$4 sm:$0xff]   ;;  %v10466_v21 = vcombine.high %v1107_v7, %v1111_v9  ;;  %v10465_v30 = vcombine.low %v1107_v7, %v1111_v9 }
 0x33a   :  { %8184 = vmatprep.subr.bf16.mxu1 %v10386_v14  ;;  %v84_v47 = vld [vmem:[%s15076_s1 + $0x158] sm:$0xff]  ;;  %v1087_v51 = vld [vmem:[%s15076_s1 + $0x20b0] sm:$0xff] }
 0x33b   :  { %v88_v14 = vld [vmem:[%s15076_s1 + $0x178] sm:$0xff]  ;;  %v1079_v55 = vld [vmem:[%s15076_s1 + $0x2070] sm:$0xff] }
 0x33c   :  { %8142 = vmatpush2.bf16.msra.mxu0 %v10257_v22  ;;  %v9444_v22 = vcombine.high %v84_v47, %v88_v14  ;;  %v52_v62 = vld [vmem:[%s15076_s1 + $0x58] sm:$0xff]  ;;  %v1071_v7 = vld [vmem:[%s15076_s1 + $0x2030] sm:$0xff] }
 0x33d   :  { %8185 = vmatpush2.bf16.msra.mxu1 %v10385_v23  ;;  %8143 = vmatprep.subr.bf16.mxu0 %v10250_v24  ;;  %v1099_v23 = vld [vmem:[%s15076_s1 + $0x2110] sm:$0xff]  ;;  %v56_v0 = vld [vmem:[%s15076_s1 + $0x78] sm:$0xff] }
 0x33e   :  { %8186 = vmatprep.subr.bf16.mxu1 %v10378_v25  ;;  %v1103_v24 = vld [vmem:[%s15076_s1 + $0x2130] sm:$0xff]  ;;  %v10835_v25 = vld [vmem:[%s15077_s0 + $0x44] ss:$72 sps:$4 sm:$0xff]   ;;  %v44_v9 = vld [vmem:[%s15076_s1 + $0x18] sm:$0xff] }
 0x33f   :  { %v10457_v41 = vcombine.low %v1099_v23, %v1103_v24 }
 0x340   :  { %8144 = vmatpush2.bf16.msra.mxu0 %v10249_v32  ;;  %v9443_v32 = vcombine.low %v84_v47, %v88_v14  ;;  %v9411_v14 = vcombine.low %v52_v62, %v56_v0 }
 0x341   :  { %8187 = vmatpush2.bf16.msra.mxu1 %v10377_v35  ;;  %8145 = vmatprep.subr.bf16.mxu0 %v10242_v49  ;;  %v10458_v35 = vcombine.high %v1099_v23, %v1103_v24  ;;  %v9436_v49 = vcombine.high %v76_v27, %v80_v28  ;;  %v168_v23 = vld [vmem:[%s15076_s1 + $0x3f8] sm:$0xff] }
 0x342   :  { %8188 = vmatprep.subr.bf16.mxu1 %v10370_v38  ;;  %v1091_v38 = vld [vmem:[%s15076_s1 + $0x20d0] sm:$0xff] }
 0x343   :  { %v10449_v54 = vcombine.low %v1091_v38, %v1095_v39 }
 0x344   :  { %8146 = vmatpush2.bf16.msra.mxu0 %v10241_v42  ;;  %v9435_v42 = vcombine.low %v76_v27, %v80_v28 }
 0x345   :  { %8189 = vmatpush2.bf16.msra.mxu1 %v10369_v45  ;;  %8147 = vmatprep.subr.bf16.mxu0 %v10234_v46  ;;  %v10450_v45 = vcombine.high %v1091_v38, %v1095_v39  ;;  %v9428_v46 = vcombine.high %v68_v36, %v72_v40 }
 0x346   :  { %8190 = vmatprep.subr.bf16.mxu1 %v10362_v12  ;;  %v1083_v12 = vld [vmem:[%s15076_s1 + $0x2090] sm:$0xff] }
 0x347   :  { %v10441_v2 = vcombine.low %v1083_v12, %v1087_v51 }
 0x348   :  { %8148 = vmatpush2.bf16.msra.mxu0 %v10233_v57  ;;  %v9427_v57 = vcombine.low %v68_v36, %v72_v40  ;;  %v1171_v40 = vld [vmem:[%s15076_s1 + $0x2350] sm:$0xff] }
 0x349   :  { %8191 = vmatpush2.bf16.msra.mxu1 %v10361_v58  ;;  %8203 = vmatprep.subr.bf16.mxu0 %v10482_v60  ;;  %v10442_v58 = vcombine.high %v1083_v12, %v1087_v51  ;;  %v9420_v60 = vcombine.high %v60_v52, %v64_v53 }
 0x34a   :  { %8246 = vmatprep.subr.bf16.mxu1 %v9460_v3  ;;  %v1075_v3 = vld [vmem:[%s15076_s1 + $0x2050] sm:$0xff] }
 0x34b   :  { %8150 = vmatmul.mubr.bf16.vlgmr.msra.gmra.mxu0 %v10833_v11  ;;  %v48_v11 = vld [vmem:[%s15076_s1 + $0x38] sm:$0xff]  ;;  %v10433_v47 = vcombine.low %v1075_v3, %v1079_v55 }
 0x34c   :  { %8193 = vmatmul.mubr.bf16.vlgmr.msra.gmra.mxu1 %v10834_v15  ;;  %8204 = vmatpush1.bf16.msra.mxu0 %v10481_v4  ;;  %v9419_v4 = vcombine.low %v60_v52, %v64_v53  ;;  %v1163_v53 = vld [vmem:[%s15076_s1 + $0x2310] sm:$0xff] }
 0x34d   :  { %8247 = vmatpush1.bf16.msra.mxu1 %v9459_v5  ;;  %8205 = vmatprep.subr.bf16.mxu0 %v10474_v6  ;;  %v10434_v5 = vcombine.high %v1075_v3, %v1079_v55  ;;  %v9412_v6 = vcombine.high %v52_v62, %v56_v0  ;;  %v1155_v0 = vld [vmem:[%s15076_s1 + $0x22d0] sm:$0xff] }
 0x34e   :  { %8248 = vmatprep.subr.bf16.mxu1 %v9452_v26  ;;  %8235 = vmatprep.mubr.bf16.mxu0 %v10835_v25  ;;  %v1067_v26 = vld [vmem:[%s15076_s1 + $0x2010] sm:$0xff]  ;;  %v9403_v25 = vcombine.low %v44_v9, %v48_v11 }
 0x34f   :  { %8278 = vmatprep.mubr.bf16.mxu1 %v10836_v61  ;;  %v10426_v15 = vcombine.high %v1067_v26, %v1071_v7  ;;  %v10425_v24 = vcombine.low %v1067_v26, %v1071_v7  ;;  %v1179_v61 = vld [vmem:[%s15076_s1 + $0x2390] sm:$0xff] }
 0x350   :  { %8206 = vmatpush1.bf16.msra.mxu0 %v10473_v18  ;;  %v9404_v18 = vcombine.high %v44_v9, %v48_v11  ;;  %v1147_v11 = vld [vmem:[%s15076_s1 + $0x2290] sm:$0xff] }
 0x351   :  { %8249 = vmatpush1.bf16.msra.mxu1 %v9451_v20  ;;  %8207 = vmatprep.subr.bf16.mxu0 %v10466_v21  ;;  %v1187_v20 = vld [vmem:[%s15076_s1 + $0x23d0] sm:$0xff] }
 0x352   :  { %8250 = vmatprep.subr.bf16.mxu1 %v9444_v22  ;;  %v1191_v21 = vld [vmem:[%s15076_s1 + $0x23f0] sm:$0xff]  ;;  %v164_v22 = vld [vmem:[%s15076_s1 + $0x3d8] sm:$0xff] }
 0x353   :  { %v10546_v27 = vcombine.high %v1187_v20, %v1191_v21  ;;  %v9524_v28 = vcombine.high %v164_v22, %v168_v23  ;;  %v9523_v38 = vcombine.low %v164_v22, %v168_v23  ;;  %v1139_v23 = vld [vmem:[%s15076_s1 + $0x2250] sm:$0xff] }
 0x354   :  { %8208 = vmatpush1.bf16.msra.mxu0 %v10465_v30  ;;  %v1183_v30 = vld [vmem:[%s15076_s1 + $0x23b0] sm:$0xff] }
 0x355   :  { %8251 = vmatpush1.bf16.msra.mxu1 %v9443_v32  ;;  %8209 = vmatprep.subr.bf16.mxu0 %v10458_v35  ;;  %v156_v32 = vld [vmem:[%s15076_s1 + $0x398] sm:$0xff]  ;;  %v10538_v39 = vcombine.high %v1179_v61, %v1183_v30 }
 0x356   :  { %8252 = vmatprep.subr.bf16.mxu1 %v9436_v49  ;;  %v160_v35 = vld [vmem:[%s15076_s1 + $0x3b8] sm:$0xff]  ;;  %v10545_v49 = vcombine.low %v1187_v20, %v1191_v21 }
 0x357   :  { %v9516_v36 = vcombine.high %v156_v32, %v160_v35  ;;  %v9515_v12 = vcombine.low %v156_v32, %v160_v35  ;;  %v1131_v35 = vld [vmem:[%s15076_s1 + $0x2210] sm:$0xff] }
 0x358   :  { %8210 = vmatpush1.bf16.msra.mxu0 %v10457_v41  ;;  %v1175_v41 = vld [vmem:[%s15076_s1 + $0x2370] sm:$0xff] }
 0x359   :  { %8253 = vmatpush1.bf16.msra.mxu1 %v9435_v42  ;;  %8211 = vmatprep.subr.bf16.mxu0 %v10450_v45  ;;  %v148_v42 = vld [vmem:[%s15076_s1 + $0x358] sm:$0xff]  ;;  %v10530_v51 = vcombine.high %v1171_v40, %v1175_v41 }
 0x35a   :  { %8254 = vmatprep.subr.bf16.mxu1 %v9428_v46  ;;  %v152_v45 = vld [vmem:[%s15076_s1 + $0x378] sm:$0xff]  ;;  %v10537_v46 = vcombine.low %v1179_v61, %v1183_v30 }
 0x35b   :  { %v9508_v52 = vcombine.high %v148_v42, %v152_v45  ;;  %v9507_v3 = vcombine.low %v148_v42, %v152_v45  ;;  %v228_v45 = vld [vmem:[%s15076_s1 + $0x5d8] sm:$0xff] }
 0x35c   :  { %8212 = vmatpush1.bf16.msra.mxu0 %v10449_v54  ;;  %v1167_v54 = vld [vmem:[%s15076_s1 + $0x2330] sm:$0xff] }
 0x35d   :  { %8255 = vmatpush1.bf16.msra.mxu1 %v9427_v57  ;;  %8213 = vmatprep.subr.bf16.mxu0 %v10442_v58  ;;  %v140_v57 = vld [vmem:[%s15076_s1 + $0x318] sm:$0xff]  ;;  %v10522_v55 = vcombine.high %v1163_v53, %v1167_v54 }
 0x35e   :  { %8256 = vmatprep.subr.bf16.mxu1 %v9420_v60  ;;  %v144_v58 = vld [vmem:[%s15076_s1 + $0x338] sm:$0xff]  ;;  %v10529_v60 = vcombine.low %v1171_v40, %v1175_v41 }
 0x35f   :  { %v9500_v62 = vcombine.high %v140_v57, %v144_v58  ;;  %v9499_v26 = vcombine.low %v140_v57, %v144_v58  ;;  %v220_v58 = vld [vmem:[%s15076_s1 + $0x598] sm:$0xff] }
 0x360   :  { %8214 = vmatpush1.bf16.msra.mxu0 %v10441_v2  ;;  %v1159_v2 = vld [vmem:[%s15076_s1 + $0x22f0] sm:$0xff] }
 0x361   :  { %8257 = vmatpush1.bf16.msra.mxu1 %v9419_v4  ;;  %8215 = vmatprep.subr.bf16.mxu0 %v10434_v5  ;;  %v132_v4 = vld [vmem:[%s15076_s1 + $0x2d8] sm:$0xff]  ;;  %v10514_v7 = vcombine.high %v1155_v0, %v1159_v2 }
 0x362   :  { %8258 = vmatprep.subr.bf16.mxu1 %v9412_v6  ;;  %v136_v5 = vld [vmem:[%s15076_s1 + $0x2f8] sm:$0xff]  ;;  %v10521_v6 = vcombine.low %v1163_v53, %v1167_v54 }
 0x363   :  { %v9492_v9 = vcombine.high %v132_v4, %v136_v5  ;;  %v9491_v20 = vcombine.low %v132_v4, %v136_v5  ;;  %v212_v5 = vld [vmem:[%s15076_s1 + $0x558] sm:$0xff] }
 0x364   :  { %8216 = vmatpush1.bf16.msra.mxu0 %v10433_v47  ;;  %v1151_v47 = vld [vmem:[%s15076_s1 + $0x22b0] sm:$0xff] }
 0x365   :  { %8259 = vmatpush1.bf16.msra.mxu1 %v9411_v14  ;;  %8217 = vmatprep.subr.bf16.mxu0 %v10426_v15  ;;  %v124_v14 = vld [vmem:[%s15076_s1 + $0x298] sm:$0xff]  ;;  %v10506_v21 = vcombine.high %v1147_v11, %v1151_v47 }
 0x366   :  { %8260 = vmatprep.subr.bf16.mxu1 %v9404_v18  ;;  %v128_v15 = vld [vmem:[%s15076_s1 + $0x2b8] sm:$0xff]  ;;  %v10513_v18 = vcombine.low %v1155_v0, %v1159_v2 }
 0x367   :  { %v9484_v22 = vcombine.high %v124_v14, %v128_v15  ;;  %v9483_v61 = vcombine.low %v124_v14, %v128_v15 }
 0x368   :  { %8218 = vmatpush1.bf16.msra.mxu0 %v10425_v24  ;;  %v1143_v24 = vld [vmem:[%s15076_s1 + $0x2270] sm:$0xff] }
 0x369   :  { %8261 = vmatpush1.bf16.msra.mxu1 %v9403_v25  ;;  %8219 = vmatprep.subr.bf16.mxu0 %v10546_v27  ;;  %v116_v25 = vld [vmem:[%s15076_s1 + $0x258] sm:$0xff]  ;;  %v10498_v30 = vcombine.high %v1139_v23, %v1143_v24 }
 0x36a   :  { %8262 = vmatprep.subr.bf16.mxu1 %v9524_v28  ;;  %v120_v27 = vld [vmem:[%s15076_s1 + $0x278] sm:$0xff]  ;;  %v10505_v28 = vcombine.low %v1147_v11, %v1151_v47  ;;  %v10838_v11 = vld [vmem:[%s15077_s0] ss:$72 sps:$4 sm:$0xff]  }
 0x36b   :  { %v9476_v32 = vcombine.high %v116_v25, %v120_v27  ;;  %v9475_v40 = vcombine.low %v116_v25, %v120_v27  ;;  %v10840_v25 = vld [vmem:[%s15077_s0 + $0x14] ss:$72 sps:$4 sm:$0xff]  }
 0x36c   :  { %8220 = vmatpush2.bf16.msra.mxu0 %v10545_v49  ;;  %v1135_v49 = vld [vmem:[%s15076_s1 + $0x2230] sm:$0xff] }
 0x36d   :  { %8263 = vmatpush2.bf16.msra.mxu1 %v9523_v38  ;;  %8221 = vmatprep.subr.bf16.mxu0 %v10538_v39  ;;  %v108_v38 = vld [vmem:[%s15076_s1 + $0x218] sm:$0xff]  ;;  %v10490_v41 = vcombine.high %v1131_v35, %v1135_v49 }
 0x36e   :  { %8264 = vmatprep.subr.bf16.mxu1 %v9516_v36  ;;  %v112_v39 = vld [vmem:[%s15076_s1 + $0x238] sm:$0xff]  ;;  %v10497_v36 = vcombine.low %v1139_v23, %v1143_v24 }
 0x36f   :  { %v9468_v42 = vcombine.high %v108_v38, %v112_v39  ;;  %v9467_v53 = vcombine.low %v108_v38, %v112_v39  ;;  %v332_v23 = vld [vmem:[%s15076_s1 + $0x918] sm:$0xff] }
 0x370   :  { %8222 = vmatpush2.bf16.msra.mxu0 %v10537_v46  ;;  %v232_v46 = vld [vmem:[%s15076_s1 + $0x5f8] sm:$0xff] }
 0x371   :  { %8265 = vmatpush2.bf16.msra.mxu1 %v9515_v12  ;;  %8223 = vmatprep.subr.bf16.mxu0 %v10530_v51  ;;  %v356_v12 = vld [vmem:[%s15076_s1 + $0x9d8] sm:$0xff]  ;;  %v9588_v54 = vcombine.high %v228_v45, %v232_v46 }
 0x372   :  { %8266 = vmatprep.subr.bf16.mxu1 %v9508_v52  ;;  %v360_v51 = vld [vmem:[%s15076_s1 + $0x9f8] sm:$0xff]  ;;  %v10489_v52 = vcombine.low %v1131_v35, %v1135_v49 }
 0x373   :  { %v9716_v57 = vcombine.high %v356_v12, %v360_v51  ;;  %v9715_v0 = vcombine.low %v356_v12, %v360_v51  ;;  %v336_v24 = vld [vmem:[%s15076_s1 + $0x938] sm:$0xff] }
 0x374   :  { %8224 = vmatpush2.bf16.msra.mxu0 %v10529_v60  ;;  %v224_v60 = vld [vmem:[%s15076_s1 + $0x5b8] sm:$0xff] }
 0x375   :  { %8267 = vmatpush2.bf16.msra.mxu1 %v9507_v3  ;;  %8225 = vmatprep.subr.bf16.mxu0 %v10522_v55  ;;  %v348_v3 = vld [vmem:[%s15076_s1 + $0x998] sm:$0xff]  ;;  %v9580_v2 = vcombine.high %v220_v58, %v224_v60  ;;  %v9579_v47 = vcombine.low %v220_v58, %v224_v60 }
 0x376   :  { %8268 = vmatprep.subr.bf16.mxu1 %v9500_v62  ;;  %v352_v55 = vld [vmem:[%s15076_s1 + $0x9b8] sm:$0xff]  ;;  %v9587_v62 = vcombine.low %v228_v45, %v232_v46 }
 0x377   :  { %v9708_v4 = vcombine.high %v348_v3, %v352_v55  ;;  %v9707_v14 = vcombine.low %v348_v3, %v352_v55  ;;  %v200_v35 = vld [vmem:[%s15076_s1 + $0x4f8] sm:$0xff] }
 0x378   :  { %8226 = vmatpush2.bf16.msra.mxu0 %v10521_v6  ;;  %v216_v6 = vld [vmem:[%s15076_s1 + $0x578] sm:$0xff] }
 0x379   :  { %8269 = vmatpush2.bf16.msra.mxu1 %v9499_v26  ;;  %8227 = vmatprep.subr.bf16.mxu0 %v10514_v7  ;;  %v10837_v26 = vld [vmem:[%s15077_s0 + $0x40] ss:$72 sps:$4 sm:$0xff]   ;;  %v340_v7 = vld [vmem:[%s15076_s1 + $0x958] sm:$0xff]  ;;  %v9572_v15 = vcombine.high %v212_v5, %v216_v6  ;;  %v9571_v27 = vcombine.low %v212_v5, %v216_v6 }
 0x37a   :  { %8270 = vmatprep.subr.bf16.mxu1 %v9492_v9  ;;  %v344_v9 = vld [vmem:[%s15076_s1 + $0x978] sm:$0xff] }
 0x37b   :  { %v324_v49 = vld [vmem:[%s15076_s1 + $0x8d8] sm:$0xff] }
 0x37c   :  { %8228 = vmatpush2.bf16.msra.mxu0 %v10513_v18  ;;  %v9700_v18 = vcombine.high %v340_v7, %v344_v9  ;;  %v328_v38 = vld [vmem:[%s15076_s1 + $0x8f8] sm:$0xff] }
 0x37d   :  { %8271 = vmatpush2.bf16.msra.mxu1 %v9491_v20  ;;  %8229 = vmatprep.subr.bf16.mxu0 %v10506_v21  ;;  %v204_v20 = vld [vmem:[%s15076_s1 + $0x518] sm:$0xff] }
 0x37e   :  { %8272 = vmatprep.subr.bf16.mxu1 %v9484_v22  ;;  %v208_v21 = vld [vmem:[%s15076_s1 + $0x538] sm:$0xff]  ;;  %v10839_v22 = vld [vmem:[%s15077_s0 + $0xc] ss:$72 sps:$4 sm:$0xff]  }
 0x37f   :  { %v9563_v39 = vcombine.low %v204_v20, %v208_v21  ;;  %v192_v45 = vld [vmem:[%s15076_s1 + $0x4b8] sm:$0xff] }
 0x380   :  { %8230 = vmatpush2.bf16.msra.mxu0 %v10505_v28  ;;  %v9699_v28 = vcombine.low %v340_v7, %v344_v9  ;;  %v316_v46 = vld [vmem:[%s15076_s1 + $0x898] sm:$0xff] }
 0x381   :  { %8273 = vmatpush2.bf16.msra.mxu1 %v9483_v61  ;;  %8231 = vmatprep.subr.bf16.mxu0 %v10498_v30  ;;  %v9564_v61 = vcombine.high %v204_v20, %v208_v21  ;;  %v9692_v30 = vcombine.high %v332_v23, %v336_v24  ;;  %v320_v12 = vld [vmem:[%s15076_s1 + $0x8b8] sm:$0xff] }
 0x382   :  { %8274 = vmatprep.subr.bf16.mxu1 %v9476_v32  ;;  %v196_v32 = vld [vmem:[%s15076_s1 + $0x4d8] sm:$0xff] }
 0x383   :  { %v9555_v51 = vcombine.low %v196_v32, %v200_v35  ;;  %v184_v58 = vld [vmem:[%s15076_s1 + $0x478] sm:$0xff] }
 0x384   :  { %8232 = vmatpush2.bf16.msra.mxu0 %v10497_v36  ;;  %v9691_v36 = vcombine.low %v332_v23, %v336_v24  ;;  %v308_v60 = vld [vmem:[%s15076_s1 + $0x858] sm:$0xff] }
 0x385   :  { %8275 = vmatpush2.bf16.msra.mxu1 %v9475_v40  ;;  %8233 = vmatprep.subr.bf16.mxu0 %v10490_v41  ;;  %v9556_v40 = vcombine.high %v196_v32, %v200_v35  ;;  %v9684_v41 = vcombine.high %v324_v49, %v328_v38  ;;  %v312_v3 = vld [vmem:[%s15076_s1 + $0x878] sm:$0xff] }
 0x386   :  { %8276 = vmatprep.subr.bf16.mxu1 %v9468_v42  ;;  %v188_v42 = vld [vmem:[%s15076_s1 + $0x498] sm:$0xff]  ;;  %v9667_v9 = vcombine.low %v308_v60, %v312_v3 }
 0x387   :  { %v9547_v55 = vcombine.low %v188_v42, %v192_v45  ;;  %v176_v5 = vld [vmem:[%s15076_s1 + $0x438] sm:$0xff] }
 0x388   :  { %8234 = vmatpush2.bf16.msra.mxu0 %v10489_v52  ;;  %v9683_v52 = vcombine.low %v324_v49, %v328_v38  ;;  %v300_v6 = vld [vmem:[%s15076_s1 + $0x818] sm:$0xff] }
 0x389   :  { %8277 = vmatpush2.bf16.msra.mxu1 %v9467_v53  ;;  %8289 = vmatprep.subr.bf16.mxu0 %v9588_v54  ;;  %v9548_v53 = vcombine.high %v188_v42, %v192_v45  ;;  %v9676_v54 = vcombine.high %v316_v46, %v320_v12  ;;  %v424_v20 = vld [vmem:[%s15076_s1 + $0xbf8] sm:$0xff] }
 0x38a   :  { %8332 = vmatprep.subr.bf16.mxu1 %v9716_v57  ;;  %v180_v57 = vld [vmem:[%s15076_s1 + $0x458] sm:$0xff] }
 0x38b   :  { %8236 = vmatmul.mubr.bf16.vlgmr.msra.gmra.mxu0 %v10837_v26  ;;  %v304_v26 = vld [vmem:[%s15076_s1 + $0x838] sm:$0xff]  ;;  %v9539_v7 = vcombine.low %v180_v57, %v184_v58 }
 0x38c   :  { %8279 = vmatmul.mubr.bf16.vlgmr.msra.gmra.mxu1 %v10838_v11  ;;  %8290 = vmatpush1.bf16.msra.mxu0 %v9587_v62  ;;  %v9675_v62 = vcombine.low %v316_v46, %v320_v12  ;;  %v276_v38 = vld [vmem:[%s15076_s1 + $0x758] sm:$0xff] }
 0x38d   :  { %8333 = vmatpush1.bf16.msra.mxu1 %v9715_v0  ;;  %8291 = vmatprep.subr.bf16.mxu0 %v9580_v2  ;;  %v9540_v0 = vcombine.high %v180_v57, %v184_v58  ;;  %v9668_v2 = vcombine.high %v308_v60, %v312_v3  ;;  %v268_v12 = vld [vmem:[%s15076_s1 + $0x718] sm:$0xff] }
 0x38e   :  { %8334 = vmatprep.subr.bf16.mxu1 %v9708_v4  ;;  %8321 = vmatprep.mubr.bf16.mxu0 %v10839_v22  ;;  %v172_v4 = vld [vmem:[%s15076_s1 + $0x418] sm:$0xff]  ;;  %v9659_v22 = vcombine.low %v300_v6, %v304_v26 }
 0x38f   :  { %8364 = vmatprep.mubr.bf16.mxu1 %v10840_v25  ;;  %v9532_v11 = vcombine.high %v172_v4, %v176_v5  ;;  %v9531_v21 = vcombine.low %v172_v4, %v176_v5  ;;  %v284_v25 = vld [vmem:[%s15076_s1 + $0x798] sm:$0xff] }
 0x390   :  { %8292 = vmatpush1.bf16.msra.mxu0 %v9579_v47  ;;  %v9660_v47 = vcombine.high %v300_v6, %v304_v26  ;;  %v260_v3 = vld [vmem:[%s15076_s1 + $0x6d8] sm:$0xff] }
 0x391   :  { %8335 = vmatpush1.bf16.msra.mxu1 %v9707_v14  ;;  %8293 = vmatprep.subr.bf16.mxu0 %v9572_v15  ;;  %v292_v14 = vld [vmem:[%s15076_s1 + $0x7d8] sm:$0xff] }
 0x392   :  { %8336 = vmatprep.subr.bf16.mxu1 %v9700_v18  ;;  %v296_v15 = vld [vmem:[%s15076_s1 + $0x7f8] sm:$0xff] }
 0x393   :  { %v420_v18 = vld [vmem:[%s15076_s1 + $0xbd8] sm:$0xff]  ;;  %v9652_v23 = vcombine.high %v292_v14, %v296_v15 }
 0x394   :  { %8294 = vmatpush1.bf16.msra.mxu0 %v9571_v27  ;;  %v9780_v24 = vcombine.high %v420_v18, %v424_v20  ;;  %v288_v27 = vld [vmem:[%s15076_s1 + $0x7b8] sm:$0xff]  ;;  %v9779_v32 = vcombine.low %v420_v18, %v424_v20 }
 0x395   :  { %8337 = vmatpush1.bf16.msra.mxu1 %v9699_v28  ;;  %8295 = vmatprep.subr.bf16.mxu0 %v9564_v61  ;;  %v412_v28 = vld [vmem:[%s15076_s1 + $0xb98] sm:$0xff]  ;;  %v9644_v35 = vcombine.high %v284_v25, %v288_v27 }
 0x396   :  { %8338 = vmatprep.subr.bf16.mxu1 %v9692_v30  ;;  %v416_v61 = vld [vmem:[%s15076_s1 + $0xbb8] sm:$0xff]  ;;  %v9651_v30 = vcombine.low %v292_v14, %v296_v15 }
 0x397   :  { %v9772_v49 = vcombine.high %v412_v28, %v416_v61  ;;  %v9771_v42 = vcombine.low %v412_v28, %v416_v61  ;;  %v252_v26 = vld [vmem:[%s15076_s1 + $0x698] sm:$0xff] }
 0x398   :  { %8296 = vmatpush1.bf16.msra.mxu0 %v9563_v39  ;;  %v280_v39 = vld [vmem:[%s15076_s1 + $0x778] sm:$0xff] }
 0x399   :  { %8339 = vmatpush1.bf16.msra.mxu1 %v9691_v36  ;;  %8297 = vmatprep.subr.bf16.mxu0 %v9556_v40  ;;  %v404_v36 = vld [vmem:[%s15076_s1 + $0xb58] sm:$0xff]  ;;  %v9636_v45 = vcombine.high %v276_v38, %v280_v39 }
 0x39a   :  { %8340 = vmatprep.subr.bf16.mxu1 %v9684_v41  ;;  %v408_v40 = vld [vmem:[%s15076_s1 + $0xb78] sm:$0xff]  ;;  %v9643_v41 = vcombine.low %v284_v25, %v288_v27 }
 0x39b   :  { %v9764_v46 = vcombine.high %v404_v36, %v408_v40  ;;  %v9763_v57 = vcombine.low %v404_v36, %v408_v40  ;;  %v244_v20 = vld [vmem:[%s15076_s1 + $0x658] sm:$0xff] }
 0x39c   :  { %8298 = vmatpush1.bf16.msra.mxu0 %v9555_v51  ;;  %v272_v51 = vld [vmem:[%s15076_s1 + $0x738] sm:$0xff] }
 0x39d   :  { %8341 = vmatpush1.bf16.msra.mxu1 %v9683_v52  ;;  %8299 = vmatprep.subr.bf16.mxu0 %v9548_v53  ;;  %v396_v52 = vld [vmem:[%s15076_s1 + $0xb18] sm:$0xff]  ;;  %v9628_v58 = vcombine.high %v268_v12, %v272_v51 }
 0x39e   :  { %8342 = vmatprep.subr.bf16.mxu1 %v9676_v54  ;;  %v400_v53 = vld [vmem:[%s15076_s1 + $0xb38] sm:$0xff]  ;;  %v9635_v54 = vcombine.low %v276_v38, %v280_v39 }
 0x39f   :  { %v9756_v60 = vcombine.high %v396_v52, %v400_v53  ;;  %v9755_v4 = vcombine.low %v396_v52, %v400_v53  ;;  %v236_v61 = vld [vmem:[%s15076_s1 + $0x618] sm:$0xff] }
 0x3a0   :  { %8300 = vmatpush1.bf16.msra.mxu0 %v9547_v55  ;;  %v264_v55 = vld [vmem:[%s15076_s1 + $0x6f8] sm:$0xff] }
 0x3a1   :  { %8343 = vmatpush1.bf16.msra.mxu1 %v9675_v62  ;;  %8301 = vmatprep.subr.bf16.mxu0 %v9540_v0  ;;  %v388_v62 = vld [vmem:[%s15076_s1 + $0xad8] sm:$0xff]  ;;  %v9620_v5 = vcombine.high %v260_v3, %v264_v55 }
 0x3a2   :  { %8344 = vmatprep.subr.bf16.mxu1 %v9668_v2  ;;  %v392_v0 = vld [vmem:[%s15076_s1 + $0xaf8] sm:$0xff]  ;;  %v9627_v2 = vcombine.low %v268_v12, %v272_v51 }
 0x3a3   :  { %v9748_v6 = vcombine.high %v388_v62, %v392_v0  ;;  %v9747_v14 = vcombine.low %v388_v62, %v392_v0  ;;  %v484_v40 = vld [vmem:[%s15076_s1 + $0xdd8] sm:$0xff] }
 0x3a4   :  { %8302 = vmatpush1.bf16.msra.mxu0 %v9539_v7  ;;  %v256_v7 = vld [vmem:[%s15076_s1 + $0x6b8] sm:$0xff] }
 0x3a5   :  { %8345 = vmatpush1.bf16.msra.mxu1 %v9667_v9  ;;  %8303 = vmatprep.subr.bf16.mxu0 %v9532_v11  ;;  %v380_v9 = vld [vmem:[%s15076_s1 + $0xa98] sm:$0xff]  ;;  %v9612_v15 = vcombine.high %v252_v26, %v256_v7 }
 0x3a6   :  { %8346 = vmatprep.subr.bf16.mxu1 %v9660_v47  ;;  %v384_v11 = vld [vmem:[%s15076_s1 + $0xab8] sm:$0xff]  ;;  %v9619_v47 = vcombine.low %v260_v3, %v264_v55 }
 0x3a7   :  { %v9740_v18 = vcombine.high %v380_v9, %v384_v11  ;;  %v9739_v25 = vcombine.low %v380_v9, %v384_v11  ;;  %v476_v53 = vld [vmem:[%s15076_s1 + $0xd98] sm:$0xff] }
 0x3a8   :  { %8304 = vmatpush1.bf16.msra.mxu0 %v9531_v21  ;;  %v248_v21 = vld [vmem:[%s15076_s1 + $0x678] sm:$0xff] }
 0x3a9   :  { %8347 = vmatpush1.bf16.msra.mxu1 %v9659_v22  ;;  %8305 = vmatprep.subr.bf16.mxu0 %v9652_v23  ;;  %v372_v22 = vld [vmem:[%s15076_s1 + $0xa58] sm:$0xff]  ;;  %v9604_v27 = vcombine.high %v244_v20, %v248_v21 }
 0x3aa   :  { %8348 = vmatprep.subr.bf16.mxu1 %v9780_v24  ;;  %v376_v23 = vld [vmem:[%s15076_s1 + $0xa78] sm:$0xff]  ;;  %v9611_v24 = vcombine.low %v252_v26, %v256_v7 }
 0x3ab   :  { %v9732_v28 = vcombine.high %v372_v22, %v376_v23  ;;  %v9731_v38 = vcombine.low %v372_v22, %v376_v23  ;;  %v468_v0 = vld [vmem:[%s15076_s1 + $0xd58] sm:$0xff]  ;;  %v10844_v22 = vld [vmem:[%s15077_s0 + $0x24] ss:$72 sps:$4 sm:$0xff]  }
 0x3ac   :  { %8306 = vmatpush2.bf16.msra.mxu0 %v9651_v30  ;;  %v240_v30 = vld [vmem:[%s15076_s1 + $0x638] sm:$0xff] }
 0x3ad   :  { %8349 = vmatpush2.bf16.msra.mxu1 %v9779_v32  ;;  %8307 = vmatprep.subr.bf16.mxu0 %v9644_v35  ;;  %v364_v32 = vld [vmem:[%s15076_s1 + $0xa18] sm:$0xff]  ;;  %v9596_v39 = vcombine.high %v236_v61, %v240_v30 }
 0x3ae   :  { %8350 = vmatprep.subr.bf16.mxu1 %v9772_v49  ;;  %v368_v35 = vld [vmem:[%s15076_s1 + $0xa38] sm:$0xff]  ;;  %v9603_v49 = vcombine.low %v244_v20, %v248_v21 }
 0x3af   :  { %v9724_v36 = vcombine.high %v364_v32, %v368_v35  ;;  %v9723_v12 = vcombine.low %v364_v32, %v368_v35  ;;  %v10842_v26 = vld [vmem:[%s15077_s0 + $0x10] ss:$72 sps:$4 sm:$0xff]  }
 0x3b0   :  { %8308 = vmatpush2.bf16.msra.mxu0 %v9643_v41  ;;  %v488_v41 = vld [vmem:[%s15076_s1 + $0xdf8] sm:$0xff] }
 0x3b1   :  { %8351 = vmatpush2.bf16.msra.mxu1 %v9771_v42  ;;  %8309 = vmatprep.subr.bf16.mxu0 %v9636_v45  ;;  %v612_v42 = vld [vmem:[%s15076_s1 + $0x11d8] sm:$0xff]  ;;  %v9844_v51 = vcombine.high %v484_v40, %v488_v41 }
 0x3b2   :  { %8352 = vmatprep.subr.bf16.mxu1 %v9764_v46  ;;  %v616_v45 = vld [vmem:[%s15076_s1 + $0x11f8] sm:$0xff]  ;;  %v9595_v46 = vcombine.low %v236_v61, %v240_v30 }
 0x3b3   :  { %v9972_v52 = vcombine.high %v612_v42, %v616_v45  ;;  %v9971_v3 = vcombine.low %v612_v42, %v616_v45  ;;  %v588_v20 = vld [vmem:[%s15076_s1 + $0x1118] sm:$0xff] }
 0x3b4   :  { %8310 = vmatpush2.bf16.msra.mxu0 %v9635_v54  ;;  %v480_v54 = vld [vmem:[%s15076_s1 + $0xdb8] sm:$0xff] }
 0x3b5   :  { %8353 = vmatpush2.bf16.msra.mxu1 %v9763_v57  ;;  %8311 = vmatprep.subr.bf16.mxu0 %v9628_v58  ;;  %v604_v57 = vld [vmem:[%s15076_s1 + $0x1198] sm:$0xff]  ;;  %v9836_v55 = vcombine.high %v476_v53, %v480_v54  ;;  %v9835_v7 = vcombine.low %v476_v53, %v480_v54 }
 0x3b6   :  { %8354 = vmatprep.subr.bf16.mxu1 %v9756_v60  ;;  %v608_v58 = vld [vmem:[%s15076_s1 + $0x11b8] sm:$0xff]  ;;  %v9843_v60 = vcombine.low %v484_v40, %v488_v41 }
 0x3b7   :  { %v9964_v62 = vcombine.high %v604_v57, %v608_v58  ;;  %v9963_v9 = vcombine.low %v604_v57, %v608_v58  ;;  %v592_v21 = vld [vmem:[%s15076_s1 + $0x1138] sm:$0xff] }
 0x3b8   :  { %8312 = vmatpush2.bf16.msra.mxu0 %v9627_v2  ;;  %v472_v2 = vld [vmem:[%s15076_s1 + $0xd78] sm:$0xff] }
 0x3b9   :  { %8355 = vmatpush2.bf16.msra.mxu1 %v9755_v4  ;;  %8313 = vmatprep.subr.bf16.mxu0 %v9620_v5  ;;  %v10841_v4 = vld [vmem:[%s15077_s0 + $0x8] ss:$72 sps:$4 sm:$0xff]   ;;  %v596_v5 = vld [vmem:[%s15076_s1 + $0x1158] sm:$0xff]  ;;  %v9828_v11 = vcombine.high %v468_v0, %v472_v2  ;;  %v9827_v23 = vcombine.low %v468_v0, %v472_v2 }
 0x3ba   :  { %8356 = vmatprep.subr.bf16.mxu1 %v9748_v6  ;;  %v600_v6 = vld [vmem:[%s15076_s1 + $0x1178] sm:$0xff] }
 0x3bb   :  { %v456_v61 = vld [vmem:[%s15076_s1 + $0xcf8] sm:$0xff] }
 0x3bc   :  { %8314 = vmatpush2.bf16.msra.mxu0 %v9619_v47  ;;  %v9956_v47 = vcombine.high %v596_v5, %v600_v6  ;;  %v580_v30 = vld [vmem:[%s15076_s1 + $0x10d8] sm:$0xff] }
 0x3bd   :  { %8357 = vmatpush2.bf16.msra.mxu1 %v9747_v14  ;;  %8315 = vmatprep.subr.bf16.mxu0 %v9612_v15  ;;  %v460_v14 = vld [vmem:[%s15076_s1 + $0xd18] sm:$0xff] }
 0x3be   :  { %8358 = vmatprep.subr.bf16.mxu1 %v9740_v18  ;;  %v464_v15 = vld [vmem:[%s15076_s1 + $0xd38] sm:$0xff] }
 0x3bf   :  { %v10843_v18 = vld [vmem:[%s15077_s0 + $0x1c] ss:$72 sps:$4 sm:$0xff]   ;;  %v9819_v35 = vcombine.low %v460_v14, %v464_v15 }
 0x3c0   :  { %8316 = vmatpush2.bf16.msra.mxu0 %v9611_v24  ;;  %v9955_v24 = vcombine.low %v596_v5, %v600_v6  ;;  %v584_v32 = vld [vmem:[%s15076_s1 + $0x10f8] sm:$0xff] }
 0x3c1   :  { %8359 = vmatpush2.bf16.msra.mxu1 %v9739_v25  ;;  %8317 = vmatprep.subr.bf16.mxu0 %v9604_v27  ;;  %v9820_v25 = vcombine.high %v460_v14, %v464_v15  ;;  %v9948_v27 = vcombine.high %v588_v20, %v592_v21  ;;  %v448_v40 = vld [vmem:[%s15076_s1 + $0xcb8] sm:$0xff] }
 0x3c2   :  { %8360 = vmatprep.subr.bf16.mxu1 %v9732_v28  ;;  %v452_v28 = vld [vmem:[%s15076_s1 + $0xcd8] sm:$0xff] }
 0x3c3   :  { %v572_v41 = vld [vmem:[%s15076_s1 + $0x1098] sm:$0xff]  ;;  %v9811_v45 = vcombine.low %v452_v28, %v456_v61 }
 0x3c4   :  { %8318 = vmatpush2.bf16.msra.mxu0 %v9603_v49  ;;  %v9947_v49 = vcombine.low %v588_v20, %v592_v21  ;;  %v576_v42 = vld [vmem:[%s15076_s1 + $0x10b8] sm:$0xff] }
 0x3c5   :  { %8361 = vmatpush2.bf16.msra.mxu1 %v9731_v38  ;;  %8319 = vmatprep.subr.bf16.mxu0 %v9596_v39  ;;  %v9812_v38 = vcombine.high %v452_v28, %v456_v61  ;;  %v9940_v39 = vcombine.high %v580_v30, %v584_v32  ;;  %v440_v53 = vld [vmem:[%s15076_s1 + $0xc78] sm:$0xff] }
 0x3c6   :  { %8362 = vmatprep.subr.bf16.mxu1 %v9724_v36  ;;  %v444_v36 = vld [vmem:[%s15076_s1 + $0xc98] sm:$0xff] }
 0x3c7   :  { %v564_v54 = vld [vmem:[%s15076_s1 + $0x1058] sm:$0xff]  ;;  %v9803_v58 = vcombine.low %v444_v36, %v448_v40 }
 0x3c8   :  { %8320 = vmatpush2.bf16.msra.mxu0 %v9595_v46  ;;  %v9939_v46 = vcombine.low %v580_v30, %v584_v32  ;;  %v568_v57 = vld [vmem:[%s15076_s1 + $0x1078] sm:$0xff] }
 0x3c9   :  { %8363 = vmatpush2.bf16.msra.mxu1 %v9723_v12  ;;  %8375 = vmatprep.subr.bf16.mxu0 %v9844_v51  ;;  %v9804_v12 = vcombine.high %v444_v36, %v448_v40  ;;  %v9932_v51 = vcombine.high %v572_v41, %v576_v42  ;;  %v432_v0 = vld [vmem:[%s15076_s1 + $0xc38] sm:$0xff]  ;;  %v9923_v6 = vcombine.low %v564_v54, %v568_v57 }
 0x3ca   :  { %8418 = vmatprep.subr.bf16.mxu1 %v9972_v52  ;;  %v436_v52 = vld [vmem:[%s15076_s1 + $0xc58] sm:$0xff] }
 0x3cb   :  { %8322 = vmatmul.mubr.bf16.vlgmr.msra.gmra.mxu0 %v10841_v4  ;;  %v556_v2 = vld [vmem:[%s15076_s1 + $0x1018] sm:$0xff]  ;;  %v9795_v5 = vcombine.low %v436_v52, %v440_v53 }
 0x3cc   :  { %8365 = vmatmul.mubr.bf16.vlgmr.msra.gmra.mxu1 %v10842_v26  ;;  %8376 = vmatpush1.bf16.msra.mxu0 %v9843_v60  ;;  %v9931_v60 = vcombine.low %v572_v41, %v576_v42  ;;  %v560_v4 = vld [vmem:[%s15076_s1 + $0x1038] sm:$0xff] }
 0x3cd   :  { %8419 = vmatpush1.bf16.msra.mxu1 %v9971_v3  ;;  %8377 = vmatprep.subr.bf16.mxu0 %v9836_v55  ;;  %v9796_v3 = vcombine.high %v436_v52, %v440_v53  ;;  %v9924_v55 = vcombine.high %v564_v54, %v568_v57  ;;  %v680_v14 = vld [vmem:[%s15076_s1 + $0x13f8] sm:$0xff] }
 0x3ce   :  { %8420 = vmatprep.subr.bf16.mxu1 %v9964_v62  ;;  %8407 = vmatprep.mubr.bf16.mxu0 %v10843_v18  ;;  %v428_v62 = vld [vmem:[%s15076_s1 + $0xc18] sm:$0xff]  ;;  %v9915_v18 = vcombine.low %v556_v2, %v560_v4 }
 0x3cf   :  { %8450 = vmatprep.mubr.bf16.mxu1 %v10844_v22  ;;  %v9788_v26 = vcombine.high %v428_v62, %v432_v0  ;;  %v9787_v15 = vcombine.low %v428_v62, %v432_v0  ;;  %v540_v22 = vld [vmem:[%s15076_s1 + $0xf98] sm:$0xff] }
 0x3d0   :  { %8378 = vmatpush1.bf16.msra.mxu0 %v9835_v7  ;;  %v9916_v7 = vcombine.high %v556_v2, %v560_v4  ;;  %v532_v32 = vld [vmem:[%s15076_s1 + $0xf58] sm:$0xff] }
 0x3d1   :  { %8421 = vmatpush1.bf16.msra.mxu1 %v9963_v9  ;;  %8379 = vmatprep.subr.bf16.mxu0 %v9828_v11  ;;  %v548_v9 = vld [vmem:[%s15076_s1 + $0xfd8] sm:$0xff] }
 0x3d2   :  { %8422 = vmatprep.subr.bf16.mxu1 %v9956_v47  ;;  %v552_v11 = vld [vmem:[%s15076_s1 + $0xff8] sm:$0xff] }
 0x3d3   :  { %v676_v47 = vld [vmem:[%s15076_s1 + $0x13d8] sm:$0xff]  ;;  %v9908_v20 = vcombine.high %v548_v9, %v552_v11 }
 0x3d4   :  { %8380 = vmatpush1.bf16.msra.mxu0 %v9827_v23  ;;  %v10036_v21 = vcombine.high %v676_v47, %v680_v14  ;;  %v544_v23 = vld [vmem:[%s15076_s1 + $0xfb8] sm:$0xff]  ;;  %v10035_v28 = vcombine.low %v676_v47, %v680_v14 }
 0x3d5   :  { %8423 = vmatpush1.bf16.msra.mxu1 %v9955_v24  ;;  %8381 = vmatprep.subr.bf16.mxu0 %v9820_v25  ;;  %v668_v24 = vld [vmem:[%s15076_s1 + $0x1398] sm:$0xff]  ;;  %v9900_v61 = vcombine.high %v540_v22, %v544_v23 }
 0x3d6   :  { %8424 = vmatprep.subr.bf16.mxu1 %v9948_v27  ;;  %v672_v25 = vld [vmem:[%s15076_s1 + $0x13b8] sm:$0xff]  ;;  %v9907_v27 = vcombine.low %v548_v9, %v552_v11 }
 0x3d7   :  { %v10028_v30 = vcombine.high %v668_v24, %v672_v25  ;;  %v10027_v36 = vcombine.low %v668_v24, %v672_v25  ;;  %v524_v42 = vld [vmem:[%s15076_s1 + $0xf18] sm:$0xff] }
 0x3d8   :  { %8382 = vmatpush1.bf16.msra.mxu0 %v9819_v35  ;;  %v536_v35 = vld [vmem:[%s15076_s1 + $0xf78] sm:$0xff] }
 0x3d9   :  { %8425 = vmatpush1.bf16.msra.mxu1 %v9947_v49  ;;  %8383 = vmatprep.subr.bf16.mxu0 %v9812_v38  ;;  %v660_v49 = vld [vmem:[%s15076_s1 + $0x1358] sm:$0xff]  ;;  %v9892_v40 = vcombine.high %v532_v32, %v536_v35 }
 0x3da   :  { %8426 = vmatprep.subr.bf16.mxu1 %v9940_v39  ;;  %v664_v38 = vld [vmem:[%s15076_s1 + $0x1378] sm:$0xff]  ;;  %v9899_v39 = vcombine.low %v540_v22, %v544_v23 }
 0x3db   :  { %v10020_v41 = vcombine.high %v660_v49, %v664_v38  ;;  %v10019_v52 = vcombine.low %v660_v49, %v664_v38  ;;  %v516_v57 = vld [vmem:[%s15076_s1 + $0xed8] sm:$0xff] }
 0x3dc   :  { %8384 = vmatpush1.bf16.msra.mxu0 %v9811_v45  ;;  %v528_v45 = vld [vmem:[%s15076_s1 + $0xf38] sm:$0xff] }
 0x3dd   :  { %8427 = vmatpush1.bf16.msra.mxu1 %v9939_v46  ;;  %8385 = vmatprep.subr.bf16.mxu0 %v9804_v12  ;;  %v652_v46 = vld [vmem:[%s15076_s1 + $0x1318] sm:$0xff]  ;;  %v9884_v53 = vcombine.high %v524_v42, %v528_v45 }
 0x3de   :  { %8428 = vmatprep.subr.bf16.mxu1 %v9932_v51  ;;  %v656_v12 = vld [vmem:[%s15076_s1 + $0x1338] sm:$0xff]  ;;  %v9891_v51 = vcombine.low %v532_v32, %v536_v35 }
 0x3df   :  { %v10012_v54 = vcombine.high %v652_v46, %v656_v12  ;;  %v10011_v62 = vcombine.low %v652_v46, %v656_v12  ;;  %v508_v4 = vld [vmem:[%s15076_s1 + $0xe98] sm:$0xff] }
 0x3e0   :  { %8386 = vmatpush1.bf16.msra.mxu0 %v9803_v58  ;;  %v520_v58 = vld [vmem:[%s15076_s1 + $0xef8] sm:$0xff] }
 0x3e1   :  { %8429 = vmatpush1.bf16.msra.mxu1 %v9931_v60  ;;  %8387 = vmatprep.subr.bf16.mxu0 %v9796_v3  ;;  %v644_v60 = vld [vmem:[%s15076_s1 + $0x12d8] sm:$0xff]  ;;  %v9876_v0 = vcombine.high %v516_v57, %v520_v58 }
 0x3e2   :  { %8430 = vmatprep.subr.bf16.mxu1 %v9924_v55  ;;  %v648_v3 = vld [vmem:[%s15076_s1 + $0x12f8] sm:$0xff]  ;;  %v9883_v55 = vcombine.low %v524_v42, %v528_v45 }
 0x3e3   :  { %v10004_v2 = vcombine.high %v644_v60, %v648_v3  ;;  %v10003_v9 = vcombine.low %v644_v60, %v648_v3  ;;  %v500_v14 = vld [vmem:[%s15076_s1 + $0xe58] sm:$0xff] }
 0x3e4   :  { %8388 = vmatpush1.bf16.msra.mxu0 %v9795_v5  ;;  %v512_v5 = vld [vmem:[%s15076_s1 + $0xeb8] sm:$0xff] }
 0x3e5   :  { %8431 = vmatpush1.bf16.msra.mxu1 %v9923_v6  ;;  %8389 = vmatprep.subr.bf16.mxu0 %v9788_v26  ;;  %v636_v6 = vld [vmem:[%s15076_s1 + $0x1298] sm:$0xff]  ;;  %v9868_v11 = vcombine.high %v508_v4, %v512_v5 }
 0x3e6   :  { %8432 = vmatprep.subr.bf16.mxu1 %v9916_v7  ;;  %v640_v26 = vld [vmem:[%s15076_s1 + $0x12b8] sm:$0xff]  ;;  %v9875_v7 = vcombine.low %v516_v57, %v520_v58 }
 0x3e7   :  { %v9996_v47 = vcombine.high %v636_v6, %v640_v26  ;;  %v9995_v22 = vcombine.low %v636_v6, %v640_v26  ;;  %v492_v25 = vld [vmem:[%s15076_s1 + $0xe18] sm:$0xff] }
 0x3e8   :  { %8390 = vmatpush1.bf16.msra.mxu0 %v9787_v15  ;;  %v504_v15 = vld [vmem:[%s15076_s1 + $0xe78] sm:$0xff] }
 0x3e9   :  { %8433 = vmatpush1.bf16.msra.mxu1 %v9915_v18  ;;  %8391 = vmatprep.subr.bf16.mxu0 %v9908_v20  ;;  %v628_v18 = vld [vmem:[%s15076_s1 + $0x1258] sm:$0xff]  ;;  %v9860_v23 = vcombine.high %v500_v14, %v504_v15 }
 0x3ea   :  { %8434 = vmatprep.subr.bf16.mxu1 %v10036_v21  ;;  %v632_v20 = vld [vmem:[%s15076_s1 + $0x1278] sm:$0xff]  ;;  %v9867_v21 = vcombine.low %v508_v4, %v512_v5  ;;  %v10846_v4 = vld [vmem:[%s15077_s0 + $0x20] ss:$72 sps:$4 sm:$0xff]  }
 0x3eb   :  { %v9988_v24 = vcombine.high %v628_v18, %v632_v20  ;;  %v9987_v32 = vcombine.low %v628_v18, %v632_v20  ;;  %v740_v38 = vld [vmem:[%s15076_s1 + $0x15d8] sm:$0xff] }
 0x3ec   :  { %8392 = vmatpush2.bf16.msra.mxu0 %v9907_v27  ;;  %v496_v27 = vld [vmem:[%s15076_s1 + $0xe38] sm:$0xff] }
 0x3ed   :  { %8435 = vmatpush2.bf16.msra.mxu1 %v10035_v28  ;;  %8393 = vmatprep.subr.bf16.mxu0 %v9900_v61  ;;  %v620_v28 = vld [vmem:[%s15076_s1 + $0x1218] sm:$0xff]  ;;  %v9852_v35 = vcombine.high %v492_v25, %v496_v27 }
 0x3ee   :  { %8436 = vmatprep.subr.bf16.mxu1 %v10028_v30  ;;  %v624_v61 = vld [vmem:[%s15076_s1 + $0x1238] sm:$0xff]  ;;  %v9859_v30 = vcombine.low %v500_v14, %v504_v15 }
 0x3ef   :  { %v9980_v49 = vcombine.high %v620_v28, %v624_v61  ;;  %v9979_v42 = vcombine.low %v620_v28, %v624_v61  ;;  %v732_v12 = vld [vmem:[%s15076_s1 + $0x1598] sm:$0xff] }
 0x3f0   :  { %8394 = vmatpush2.bf16.msra.mxu0 %v9899_v39  ;;  %v744_v39 = vld [vmem:[%s15076_s1 + $0x15f8] sm:$0xff] }
 0x3f1   :  { %8437 = vmatpush2.bf16.msra.mxu1 %v10027_v36  ;;  %8395 = vmatprep.subr.bf16.mxu0 %v9892_v40  ;;  %v868_v36 = vld [vmem:[%s15076_s1 + $0x19d8] sm:$0xff]  ;;  %v10100_v45 = vcombine.high %v740_v38, %v744_v39 }
 0x3f2   :  { %8438 = vmatprep.subr.bf16.mxu1 %v10020_v41  ;;  %v872_v40 = vld [vmem:[%s15076_s1 + $0x19f8] sm:$0xff]  ;;  %v9851_v41 = vcombine.low %v492_v25, %v496_v27 }
 0x3f3   :  { %v10228_v46 = vcombine.high %v868_v36, %v872_v40  ;;  %v10227_v57 = vcombine.low %v868_v36, %v872_v40  ;;  %v724_v60 = vld [vmem:[%s15076_s1 + $0x1558] sm:$0xff] }
 0x3f4   :  { %8396 = vmatpush2.bf16.msra.mxu0 %v9891_v51  ;;  %v736_v51 = vld [vmem:[%s15076_s1 + $0x15b8] sm:$0xff] }
 0x3f5   :  { %8439 = vmatpush2.bf16.msra.mxu1 %v10019_v52  ;;  %8397 = vmatprep.subr.bf16.mxu0 %v9884_v53  ;;  %v860_v52 = vld [vmem:[%s15076_s1 + $0x1998] sm:$0xff]  ;;  %v10092_v58 = vcombine.high %v732_v12, %v736_v51  ;;  %v10091_v5 = vcombine.low %v732_v12, %v736_v51 }
 0x3f6   :  { %8440 = vmatprep.subr.bf16.mxu1 %v10012_v54  ;;  %v864_v53 = vld [vmem:[%s15076_s1 + $0x19b8] sm:$0xff]  ;;  %v10099_v54 = vcombine.low %v740_v38, %v744_v39 }
 0x3f7   :  { %v728_v3 = vld [vmem:[%s15076_s1 + $0x1578] sm:$0xff]  ;;  %v10219_v26 = vcombine.low %v860_v52, %v864_v53 }
 0x3f8   :  { %8398 = vmatpush2.bf16.msra.mxu0 %v9883_v55  ;;  %v10220_v55 = vcombine.high %v860_v52, %v864_v53  ;;  %v716_v6 = vld [vmem:[%s15076_s1 + $0x1518] sm:$0xff]  ;;  %v10083_v20 = vcombine.low %v724_v60, %v728_v3 }
 0x3f9   :  { %8441 = vmatpush2.bf16.msra.mxu1 %v10011_v62  ;;  %8399 = vmatprep.subr.bf16.mxu0 %v9876_v0  ;;  %v852_v62 = vld [vmem:[%s15076_s1 + $0x1958] sm:$0xff] }
 0x3fa   :  { %8442 = vmatprep.subr.bf16.mxu1 %v10004_v2  ;;  %v10845_v0 = vld [vmem:[%s15077_s0 + $0x18] ss:$72 sps:$4 sm:$0xff]   ;;  %v10848_v18 = vld [vmem:[%s15077_s0 + $0x34] ss:$72 sps:$4 sm:$0xff]  }
 0x3fb   :  { %v856_v2 = vld [vmem:[%s15076_s1 + $0x1978] sm:$0xff] }
 0x3fc   :  { %8400 = vmatpush2.bf16.msra.mxu0 %v9875_v7  ;;  %v10084_v7 = vcombine.high %v724_v60, %v728_v3  ;;  %v844_v14 = vld [vmem:[%s15076_s1 + $0x1918] sm:$0xff] }
 0x3fd   :  { %8443 = vmatpush2.bf16.msra.mxu1 %v10003_v9  ;;  %8401 = vmatprep.subr.bf16.mxu0 %v9868_v11  ;;  %v720_v9 = vld [vmem:[%s15076_s1 + $0x1538] sm:$0xff]  ;;  %v10212_v11 = vcombine.high %v852_v62, %v856_v2 }
 0x3fe   :  { %8444 = vmatprep.subr.bf16.mxu1 %v9996_v47  ;;  %v10847_v47 = vld [vmem:[%s15077_s0 + $0x2c] ss:$72 sps:$4 sm:$0xff]   ;;  %v848_v15 = vld [vmem:[%s15076_s1 + $0x1938] sm:$0xff]  ;;  %v10075_v61 = vcombine.low %v716_v6, %v720_v9 }
 0x3ff   :  { %v10204_v25 = vcombine.high %v844_v14, %v848_v15  ;;  %v836_v27 = vld [vmem:[%s15076_s1 + $0x18d8] sm:$0xff] }
 0x400   :  { %8402 = vmatpush2.bf16.msra.mxu0 %v9867_v21  ;;  %v708_v21 = vld [vmem:[%s15076_s1 + $0x14d8] sm:$0xff] }
 0x401   :  { %8445 = vmatpush2.bf16.msra.mxu1 %v9995_v22  ;;  %8403 = vmatprep.subr.bf16.mxu0 %v9860_v23  ;;  %v10211_v22 = vcombine.low %v852_v62, %v856_v2  ;;  %v10076_v23 = vcombine.high %v716_v6, %v720_v9  ;;  %v840_v28 = vld [vmem:[%s15076_s1 + $0x18f8] sm:$0xff] }
 0x402   :  { %8446 = vmatprep.subr.bf16.mxu1 %v9988_v24  ;;  %v712_v24 = vld [vmem:[%s15076_s1 + $0x14f8] sm:$0xff]  ;;  %v10196_v38 = vcombine.high %v836_v27, %v840_v28 }
 0x403   :  { %v828_v39 = vld [vmem:[%s15076_s1 + $0x1898] sm:$0xff]  ;;  %v10067_v40 = vcombine.low %v708_v21, %v712_v24 }
 0x404   :  { %8404 = vmatpush2.bf16.msra.mxu0 %v9859_v30  ;;  %v700_v30 = vld [vmem:[%s15076_s1 + $0x1498] sm:$0xff] }
 0x405   :  { %8447 = vmatpush2.bf16.msra.mxu1 %v9987_v32  ;;  %8405 = vmatprep.subr.bf16.mxu0 %v9852_v35  ;;  %v10203_v32 = vcombine.low %v844_v14, %v848_v15  ;;  %v10068_v35 = vcombine.high %v708_v21, %v712_v24  ;;  %v832_v36 = vld [vmem:[%s15076_s1 + $0x18b8] sm:$0xff] }
 0x406   :  { %8448 = vmatprep.subr.bf16.mxu1 %v9980_v49  ;;  %v704_v49 = vld [vmem:[%s15076_s1 + $0x14b8] sm:$0xff]  ;;  %v10188_v12 = vcombine.high %v828_v39, %v832_v36 }
 0x407   :  { %v820_v51 = vld [vmem:[%s15076_s1 + $0x1858] sm:$0xff]  ;;  %v10059_v53 = vcombine.low %v700_v30, %v704_v49 }
 0x408   :  { %8406 = vmatpush2.bf16.msra.mxu0 %v9851_v41  ;;  %v692_v41 = vld [vmem:[%s15076_s1 + $0x1458] sm:$0xff] }
 0x409   :  { %8449 = vmatpush2.bf16.msra.mxu1 %v9979_v42  ;;  %8461 = vmatprep.subr.bf16.mxu0 %v10100_v45  ;;  %v10195_v42 = vcombine.low %v836_v27, %v840_v28  ;;  %v10060_v45 = vcombine.high %v700_v30, %v704_v49  ;;  %v824_v52 = vld [vmem:[%s15076_s1 + $0x1878] sm:$0xff] }
 0x40a   :  { %8504 = vmatprep.subr.bf16.mxu1 %v10228_v46  ;;  %v696_v46 = vld [vmem:[%s15076_s1 + $0x1478] sm:$0xff]  ;;  %v10180_v3 = vcombine.high %v820_v51, %v824_v52 }
 0x40b   :  { %8408 = vmatmul.mubr.bf16.vlgmr.msra.gmra.mxu0 %v10845_v0  ;;  %v688_v60 = vld [vmem:[%s15076_s1 + $0x1438] sm:$0xff]  ;;  %v10051_v0 = vcombine.low %v692_v41, %v696_v46 }
 0x40c   :  { %8451 = vmatmul.mubr.bf16.vlgmr.msra.gmra.mxu1 %v10846_v4  ;;  %8462 = vmatpush1.bf16.msra.mxu0 %v10099_v54  ;;  %v684_v54 = vld [vmem:[%s15076_s1 + $0x1418] sm:$0xff]  ;;  %v10179_v4 = vcombine.low %v820_v51, %v824_v52 }
 0x40d   :  { %8505 = vmatpush1.bf16.msra.mxu1 %v10227_v57  ;;  %8463 = vmatprep.subr.bf16.mxu0 %v10092_v58  ;;  %v10187_v57 = vcombine.low %v828_v39, %v832_v36  ;;  %v10052_v58 = vcombine.high %v692_v41, %v696_v46  ;;  %v816_v62 = vld [vmem:[%s15076_s1 + $0x1838] sm:$0xff] }
 0x40e   :  { %8506 = vmatprep.subr.bf16.mxu1 %v10220_v55  ;;  %8493 = vmatprep.mubr.bf16.mxu0 %v10847_v47  ;;  %v812_v55 = vld [vmem:[%s15076_s1 + $0x1818] sm:$0xff] }
 0x40f   :  { %8536 = vmatprep.mubr.bf16.mxu1 %v10848_v18  ;;  %v804_v2 = vld [vmem:[%s15076_s1 + $0x17d8] sm:$0xff]  ;;  %v10172_v9 = vcombine.high %v812_v55, %v816_v62  ;;  %v10043_v18 = vcombine.low %v684_v54, %v688_v60  ;;  %v10171_v21 = vcombine.low %v812_v55, %v816_v62 }
 0x410   :  { %8464 = vmatpush1.bf16.msra.mxu0 %v10091_v5  ;;  %v10044_v5 = vcombine.high %v684_v54, %v688_v60  ;;  %v808_v6 = vld [vmem:[%s15076_s1 + $0x17f8] sm:$0xff] }
 0x411   :  { %8507 = vmatpush1.bf16.msra.mxu1 %v10219_v26  ;;  %8465 = vmatprep.subr.bf16.mxu0 %v10084_v7  ;;  %v14328_v26 = vpop.f32.mrf.mxu1  ;;  %v14330_v7 = vpop.f32.mrf.mxu0  ;;  %v936_v47 = vld [vmem:[%s15076_s1 + $0x1bf8] sm:$0xff]  ;;  %v10163_v30 = vcombine.low %v804_v2, %v808_v6 }
 0x412   :  { %8508 = vmatprep.subr.bf16.mxu1 %v10212_v11  ;;  %v932_v11 = vld [vmem:[%s15076_s1 + $0x1bd8] sm:$0xff] }
 0x413   :  { %v14338_v14 = vpop.f32.mrf.mxu1  ;;  %v14340_v15 = vpop.f32.mrf.mxu0  ;;  %v10292_v24 = vcombine.high %v932_v11, %v936_v47  ;;  %v928_v27 = vld [vmem:[%s15076_s1 + $0x1bb8] sm:$0xff]  ;;  %v10291_v49 = vcombine.low %v932_v11, %v936_v47 }
 0x414   :  { %8466 = vmatpush1.bf16.msra.mxu0 %v10083_v20  ;;  %15085 = vst [vmem:[#allocation3_spill] sm:$0xff] %v14338_v14  ;;  %15086 = vst [vmem:[#allocation4_spill] sm:$0xff] %v14340_v15  ;;  %v796_v20 = vld [vmem:[%s15076_s1 + $0x1798] sm:$0xff] }
 0x415   :  { %8509 = vmatpush1.bf16.msra.mxu1 %v10211_v22  ;;  %8467 = vmatprep.subr.bf16.mxu0 %v10076_v23  ;;  %v10164_v22 = vcombine.high %v804_v2, %v808_v6  ;;  %v800_v23 = vld [vmem:[%s15076_s1 + $0x17b8] sm:$0xff]  ;;  %v14354_v28 = vpop.f32.mrf.mxu1 }
 0x416   :  { %8510 = vmatprep.subr.bf16.mxu1 %v10204_v25  ;;  %v924_v25 = vld [vmem:[%s15076_s1 + $0x1b98] sm:$0xff] }
 0x417   :  { %v916_v39 = vld [vmem:[%s15076_s1 + $0x1b58] sm:$0xff]  ;;  %v10284_v36 = vcombine.high %v924_v25, %v928_v27  ;;  %v14370_v41 = vpop.f32.mrf.mxu1  ;;  %v10283_v51 = vcombine.low %v924_v25, %v928_v27 }
 0x418   :  { %8468 = vmatpush1.bf16.msra.mxu0 %v10075_v61  ;;  %v14356_v61 = vpop.f32.mrf.mxu0  ;;  %v780_v46 = vld [vmem:[%s15076_s1 + $0x1718] sm:$0xff] }
 0x419   :  { %8511 = vmatpush1.bf16.msra.mxu1 %v10203_v32  ;;  %8469 = vmatprep.subr.bf16.mxu0 %v10068_v35  ;;  %v788_v32 = vld [vmem:[%s15076_s1 + $0x1758] sm:$0xff] }
 0x41a   :  { %8512 = vmatprep.subr.bf16.mxu1 %v10196_v38  ;;  %v792_v35 = vld [vmem:[%s15076_s1 + $0x1778] sm:$0xff]  ;;  %v10156_v38 = vcombine.high %v796_v20, %v800_v23 }
 0x41b   :  { %v10148_v52 = vcombine.high %v788_v32, %v792_v35  ;;  %v912_v54 = vld [vmem:[%s15076_s1 + $0x1b38] sm:$0xff] }
 0x41c   :  { %8470 = vmatpush1.bf16.msra.mxu0 %v10067_v40  ;;  %v920_v40 = vld [vmem:[%s15076_s1 + $0x1b78] sm:$0xff] }
 0x41d   :  { %8513 = vmatpush1.bf16.msra.mxu1 %v10195_v42  ;;  %8471 = vmatprep.subr.bf16.mxu0 %v10060_v45  ;;  %v14372_v42 = vpop.f32.mrf.mxu0  ;;  %v10155_v45 = vcombine.low %v796_v20, %v800_v23  ;;  %v772_v55 = vld [vmem:[%s15076_s1 + $0x16d8] sm:$0xff] }
 0x41e   :  { %8514 = vmatprep.subr.bf16.mxu1 %v10188_v12  ;;  %15087 = vst [vmem:[#allocation5_spill] sm:$0xff] %v14372_v42  ;;  %v784_v12 = vld [vmem:[%s15076_s1 + $0x1738] sm:$0xff] }
 0x41f   :  { %v14388_v60 = vpop.f32.mrf.mxu0  ;;  %v776_v62 = vld [vmem:[%s15076_s1 + $0x16f8] sm:$0xff]  ;;  %v10140_v2 = vcombine.high %v780_v46, %v784_v12  ;;  %v10139_v47 = vcombine.low %v780_v46, %v784_v12 }
 0x420   :  { %8472 = vmatpush1.bf16.msra.mxu0 %v10059_v53  ;;  %v908_v53 = vld [vmem:[%s15076_s1 + $0x1b18] sm:$0xff] }
 0x421   :  { %8515 = vmatpush1.bf16.msra.mxu1 %v10187_v57  ;;  %8473 = vmatprep.subr.bf16.mxu0 %v10052_v58  ;;  %v10276_v57 = vcombine.high %v916_v39, %v920_v40  ;;  %v14386_v58 = vpop.f32.mrf.mxu1  ;;  %v10268_v11 = vcombine.high %v908_v53, %v912_v54  ;;  %v768_v20 = vld [vmem:[%s15076_s1 + $0x16b8] sm:$0xff] }
 0x422   :  { %8516 = vmatprep.subr.bf16.mxu1 %v10180_v3  ;;  %v10147_v3 = vcombine.low %v788_v32, %v792_v35  ;;  %v892_v23 = vld [vmem:[%s15076_s1 + $0x1a98] sm:$0xff]  ;;  %v10131_v32 = vcombine.low %v772_v55, %v776_v62 }
 0x423   :  { %v14402_v6 = vpop.f32.mrf.mxu1  ;;  %v756_v35 = vld [vmem:[%s15076_s1 + $0x1658] sm:$0xff] }
 0x424   :  { %8474 = vmatpush1.bf16.msra.mxu0 %v10051_v0  ;;  %v10275_v0 = vcombine.low %v916_v39, %v920_v40  ;;  %15088 = vst [vmem:[#allocation6_spill] sm:$0xff] %v14402_v6  ;;  %v888_v40 = vld [vmem:[%s15076_s1 + $0x1a78] sm:$0xff] }
 0x425   :  { %8517 = vmatpush1.bf16.msra.mxu1 %v10179_v4  ;;  %8475 = vmatprep.subr.bf16.mxu0 %v10044_v5  ;;  %v900_v4 = vld [vmem:[%s15076_s1 + $0x1ad8] sm:$0xff]  ;;  %v14418_v25 = vpop.f32.mrf.mxu1 }
 0x426   :  { %8518 = vmatprep.subr.bf16.mxu1 %v10172_v9  ;;  %v904_v5 = vld [vmem:[%s15076_s1 + $0x1af8] sm:$0xff]  ;;  %v14404_v9 = vpop.f32.mrf.mxu0 }
 0x427   :  { %15089 = vst [vmem:[#allocation7_spill] sm:$0xff] %v14404_v9 }
 0x428   :  { %8476 = vmatpush1.bf16.msra.mxu0 %v10043_v18  ;;  %v764_v18 = vld [vmem:[%s15076_s1 + $0x1698] sm:$0xff]  ;;  %v14420_v27 = vpop.f32.mrf.mxu0 }
 0x429   :  { %8519 = vmatpush1.bf16.msra.mxu1 %v10171_v21  ;;  %8477 = vmatprep.subr.bf16.mxu0 %v10164_v22  ;;  %v10267_v21 = vcombine.low %v908_v53, %v912_v54  ;;  %v10132_v22 = vcombine.high %v772_v55, %v776_v62  ;;  %v10124_v39 = vcombine.high %v764_v18, %v768_v20  ;;  %v752_v53 = vld [vmem:[%s15076_s1 + $0x1638] sm:$0xff] }
 0x42a   :  { %8520 = vmatprep.subr.bf16.mxu1 %v10292_v24  ;;  %v896_v24 = vld [vmem:[%s15076_s1 + $0x1ab8] sm:$0xff]  ;;  %v14436_v46 = vpop.f32.mrf.mxu0 }
 0x42b   :  { %15091 = vst [vmem:[#allocation9_spill] sm:$0xff] %v14436_v46  ;;  %v10252_v12 = vcombine.high %v892_v23, %v896_v24  ;;  %v10251_v54 = vcombine.low %v892_v23, %v896_v24  ;;  %v880_v55 = vld [vmem:[%s15076_s1 + $0x1a38] sm:$0xff] }
 0x42c   :  { %8478 = vmatpush2.bf16.msra.mxu0 %v10163_v30  ;;  %v10260_v30 = vcombine.high %v900_v4, %v904_v5  ;;  %v1128_v23 = vld [vmem:[%s15076_s1 + $0x21f8] sm:$0xff] }
 0x42d   :  { %8521 = vmatpush2.bf16.msra.mxu1 %v10291_v49  ;;  %8479 = vmatprep.subr.bf16.mxu0 %v10156_v38  ;;  %v760_v49 = vld [vmem:[%s15076_s1 + $0x1678] sm:$0xff]  ;;  %v10259_v38 = vcombine.low %v900_v4, %v904_v5 }
 0x42e   :  { %8522 = vmatprep.subr.bf16.mxu1 %v10284_v36  ;;  %v884_v36 = vld [vmem:[%s15076_s1 + $0x1a58] sm:$0xff] }
 0x42f   :  { %v1052_v46 = vld [vmem:[%s15076_s1 + $0x1f98] sm:$0xff] }
 0x430   :  { %8480 = vmatpush2.bf16.msra.mxu0 %v10155_v45  ;;  %v14434_v45 = vpop.f32.mrf.mxu1 }
 0x431   :  { %8523 = vmatpush2.bf16.msra.mxu1 %v10283_v51  ;;  %8481 = vmatprep.subr.bf16.mxu0 %v10148_v52  ;;  %15090 = vst [vmem:[#allocation8_spill] sm:$0xff] %v14434_v45  ;;  %v10123_v51 = vcombine.low %v764_v18, %v768_v20  ;;  %v748_v52 = vld [vmem:[%s15076_s1 + $0x1618] sm:$0xff]  ;;  %v10243_v20 = vcombine.low %v884_v36, %v888_v40 }
 0x432   :  { %8524 = vmatprep.subr.bf16.mxu1 %v10276_v57  ;;  %v10116_v57 = vcombine.high %v756_v35, %v760_v49  ;;  %v14450_v62 = vpop.f32.mrf.mxu1  ;;  %v1000_v18 = vld [vmem:[%s15076_s1 + $0x1df8] sm:$0xff] }
 0x434   :  { %8482 = vmatpush2.bf16.msra.mxu0 %v10147_v3  ;;  %v876_v3 = vld [vmem:[%s15076_s1 + $0x1a18] sm:$0xff]  ;;  %v14454_v4 = vpop.f32.mrf.mxu1 }
 0x435   :  { %8525 = vmatpush2.bf16.msra.mxu1 %v10275_v0  ;;  %8483 = vmatprep.subr.bf16.mxu0 %v10140_v2  ;;  %v14452_v0 = vpop.f32.mrf.mxu0  ;;  %v10244_v2 = vcombine.high %v884_v36, %v888_v40  ;;  %15092 = vst [vmem:[#allocation10_spill] sm:$0xff] %v14454_v4  ;;  %v10236_v24 = vcombine.high %v876_v3, %v880_v55  ;;  %v988_v36 = vld [vmem:[%s15076_s1 + $0x1d98] sm:$0xff] }
 0x436   :  { %8526 = vmatprep.subr.bf16.mxu1 %v10268_v11  ;;  %v10115_v11 = vcombine.low %v756_v35, %v760_v49  ;;  %v10107_v35 = vcombine.low %v748_v52, %v752_v53  ;;  %v10235_v49 = vcombine.low %v876_v3, %v880_v55  ;;  %v992_v40 = vld [vmem:[%s15076_s1 + $0x1db8] sm:$0xff] }
 0x437   :  { %v14456_v5 = vpop.f32.mrf.mxu0  ;;  %v10348_v3 = vcombine.high %v988_v36, %v992_v40  ;;  %v944_v4 = vld [vmem:[%s15076_s1 + $0x1c38] sm:$0xff] }
 0x438   :  { %8484 = vmatpush2.bf16.msra.mxu0 %v10139_v47  ;;  %15093 = vst [vmem:[#allocation11_spill] sm:$0xff] %v14456_v5  ;;  %v996_v47 = vld [vmem:[%s15076_s1 + $0x1dd8] sm:$0xff] }
 0x439   :  { %8527 = vmatpush2.bf16.msra.mxu1 %v10267_v21  ;;  %8485 = vmatprep.subr.bf16.mxu0 %v10132_v22  ;;  %v10108_v21 = vcombine.high %v748_v52, %v752_v53  ;;  %v1124_v22 = vld [vmem:[%s15076_s1 + $0x21d8] sm:$0xff] }
 0x43a   :  { %8528 = vmatprep.subr.bf16.mxu1 %v10260_v30  ;;  %v14470_v30 = vpop.f32.mrf.mxu1  ;;  %v960_v5 = vld [vmem:[%s15076_s1 + $0x1cb8] sm:$0xff] }
 0x43c   :  { %8486 = vmatpush2.bf16.msra.mxu0 %v10131_v32  ;;  %v14472_v32 = vpop.f32.mrf.mxu0  ;;  %v14486_v52 = vpop.f32.mrf.mxu1 }
 0x43d   :  { %8529 = vmatpush2.bf16.msra.mxu1 %v10259_v38  ;;  %8487 = vmatprep.subr.bf16.mxu0 %v10124_v39  ;;  %v10356_v38 = vcombine.high %v996_v47, %v1000_v18  ;;  %v10484_v39 = vcombine.high %v1124_v22, %v1128_v23  ;;  %15094 = vst [vmem:[#allocation12_spill] sm:$0xff] %v14486_v52  ;;  %v1188_v52 = vld [vmem:[%s15076_s1 + $0x23d8] sm:$0xff] }
 0x43e   :  { %8530 = vmatprep.subr.bf16.mxu1 %v10252_v12  ;;  %v1116_v12 = vld [vmem:[%s15076_s1 + $0x2198] sm:$0xff]  ;;  %v14488_v53 = vpop.f32.mrf.mxu0 }
 0x43f   :  { %15095 = vst [vmem:[#allocation13_spill] sm:$0xff] %v14488_v53  ;;  %v940_v53 = vld [vmem:[%s15076_s1 + $0x1c18] sm:$0xff] }
 0x440   :  { %8488 = vmatpush2.bf16.msra.mxu0 %v10123_v51  ;;  %v1120_v51 = vld [vmem:[%s15076_s1 + $0x21b8] sm:$0xff] }
 0x441   :  { %8531 = vmatpush2.bf16.msra.mxu1 %v10251_v54  ;;  %8489 = vmatprep.subr.bf16.mxu0 %v10116_v57  ;;  %v10355_v54 = vcombine.low %v996_v47, %v1000_v18  ;;  %v10483_v57 = vcombine.low %v1124_v22, %v1128_v23  ;;  %v10476_v55 = vcombine.high %v1116_v12, %v1120_v51  ;;  %v1108_v47 = vld [vmem:[%s15076_s1 + $0x2158] sm:$0xff]  ;;  %v14507_v22 = vpop.f32.mrf.mxu0 }
 0x442   :  { %8532 = vmatprep.subr.bf16.mxu1 %v10244_v2  ;;  %v980_v2 = vld [vmem:[%s15076_s1 + $0x1d58] sm:$0xff] }
 0x443   :  { %v1112_v18 = vld [vmem:[%s15076_s1 + $0x2178] sm:$0xff] }
 0x444   :  { %8490 = vmatpush2.bf16.msra.mxu0 %v10115_v11  ;;  %v984_v11 = vld [vmem:[%s15076_s1 + $0x1d78] sm:$0xff] }
 0x445   :  { %8533 = vmatpush2.bf16.msra.mxu1 %v10243_v20  ;;  %8491 = vmatprep.subr.bf16.mxu0 %v10108_v21  ;;  %v10849_v20 = vld [vmem:[%s15077_s0 + $0x28] ss:$72 sps:$4 sm:$0xff]   ;;  %v14505_v21 = vpop.f32.mrf.mxu1 }
 0x446   :  { %8534 = vmatprep.subr.bf16.mxu1 %v10236_v24  ;;  %v10850_v23 = vld [vmem:[%s15077_s0 + $0x30] ss:$72 sps:$4 sm:$0xff]   ;;  %v10347_v24 = vcombine.low %v988_v36, %v992_v40  ;;  %v10851_v36 = vld [vmem:[%s15077_s0 + $0x3c] ss:$72 sps:$4 sm:$0xff]  }
 0x447   :  { %v1100_v40 = vld [vmem:[%s15076_s1 + $0x2118] sm:$0xff] }
 0x448   :  { %8492 = vmatpush2.bf16.msra.mxu0 %v10107_v35  ;;  %v10475_v35 = vcombine.low %v1116_v12, %v1120_v51  ;;  %v1104_v12 = vld [vmem:[%s15076_s1 + $0x2138] sm:$0xff]  ;;  %v10852_v51 = vld [vmem:[%s15077_s0 + $0x44] ss:$72 sps:$4 sm:$0xff]  }
 0x449   :  { %8535 = vmatpush2.bf16.msra.mxu1 %v10235_v49  ;;  %8547 = vmatprep.subr.bf16.mxu0 %v10356_v38  ;;  %v10340_v49 = vcombine.high %v980_v2, %v984_v11  ;;  %v14512_v38 = vpop.f32.mrf.mxu1  ;;  %v10460_v63 = vcombine.high %v1100_v40, %v1104_v12 }
 0x44a   :  { %8590 = vmatprep.subr.bf16.mxu1 %v10484_v39  ;;  %15096 = vst [vmem:[#allocation14_spill] sm:$0xff] %v14512_v38  ;;  %v14514_v39 = vpop.f32.mrf.mxu0  ;;  %v956_v38 = vld [vmem:[%s15076_s1 + $0x1c98] sm:$0xff] }
 0x44b   :  { %8494 = vmatmul.mubr.bf16.vlgmr.msra.gmra.mxu0 %v10849_v20  ;;  %15097 = vst [vmem:[#allocation15_spill] sm:$0xff] %v14514_v39  ;;  %v10468_v20 = vcombine.high %v1108_v47, %v1112_v18  ;;  %v964_v39 = vld [vmem:[%s15076_s1 + $0x1cd8] sm:$0xff] }
 0x44c   :  { %8537 = vmatmul.mubr.bf16.vlgmr.msra.gmra.mxu1 %v10850_v23  ;;  %8548 = vmatpush1.bf16.msra.mxu0 %v10355_v54  ;;  %v976_v23 = vld [vmem:[%s15076_s1 + $0x1d38] sm:$0xff]  ;;  %v10339_v54 = vcombine.low %v980_v2, %v984_v11 }
 0x44d   :  { %8591 = vmatpush1.bf16.msra.mxu1 %v10483_v57  ;;  %8549 = vmatprep.subr.bf16.mxu0 %v10348_v3  ;;  %v10467_v57 = vcombine.low %v1108_v47, %v1112_v18  ;;  %v10332_v3 = vcombine.high %v972_v1, %v976_v23  ;;  %v1092_v2 = vld [vmem:[%s15076_s1 + $0x20d8] sm:$0xff]  ;;  %v10331_v47 = vcombine.low %v972_v1, %v976_v23 }
 0x44e   :  { %8592 = vmatprep.subr.bf16.mxu1 %v10476_v55  ;;  %8579 = vmatprep.mubr.bf16.mxu0 %v10851_v36  ;;  %v14534_v55 = vpop.f32.mrf.mxu1  ;;  %v14536_v36 = vpop.f32.mrf.mxu0  ;;  %v1096_v11 = vld [vmem:[%s15076_s1 + $0x20f8] sm:$0xff]  ;;  %v10459_v18 = vcombine.low %v1100_v40, %v1104_v12  ;;  %v10316_v12 = vcombine.high %v956_v38, %v960_v5 }
 0x44f   :  { %8622 = vmatprep.mubr.bf16.mxu1 %v10852_v51  ;;  %v968_v51 = vld [vmem:[%s15076_s1 + $0x1cf8] sm:$0xff] }
 0x450   :  { %8550 = vmatpush1.bf16.msra.mxu0 %v10347_v24  ;;  %v10324_v24 = vcombine.high %v964_v39, %v968_v51  ;;  %v1084_v1 = vld [vmem:[%s15076_s1 + $0x2098] sm:$0xff]  ;;  %v10323_v40 = vcombine.low %v964_v39, %v968_v51 }
 0x451   :  { %8593 = vmatpush1.bf16.msra.mxu1 %v10475_v35  ;;  %8551 = vmatprep.subr.bf16.mxu0 %v10340_v49  ;;  %v14550_v35 = vpop.f32.mrf.mxu1  ;;  %v14552_v49 = vpop.f32.mrf.mxu0  ;;  %v1088_v23 = vld [vmem:[%s15076_s1 + $0x20b8] sm:$0xff] }
 0x452   :  { %8594 = vmatprep.subr.bf16.mxu1 %v10468_v20  ;;  %15098 = vst [vmem:[#allocation16_spill] sm:$0xff] %v14550_v35  ;;  %15099 = vst [vmem:[#allocation17_spill] sm:$0xff] %v14552_v49  ;;  %v10452_v20 = vcombine.high %v1092_v2, %v1096_v11  ;;  %v948_v49 = vld [vmem:[%s15076_s1 + $0x1c58] sm:$0xff] }
 0x453   :  { %v952_v35 = vld [vmem:[%s15076_s1 + $0x1c78] sm:$0xff] }
 0x454   :  { %8552 = vmatpush1.bf16.msra.mxu0 %v10339_v54  ;;  %v14566_v54 = vpop.f32.mrf.mxu1  ;;  %v1076_v39 = vld [vmem:[%s15076_s1 + $0x2058] sm:$0xff] }
 0x455   :  { %8595 = vmatpush1.bf16.msra.mxu1 %v10467_v57  ;;  %8553 = vmatprep.subr.bf16.mxu0 %v10332_v3  ;;  %v14568_v57 = vpop.f32.mrf.mxu0  ;;  %v10444_v3 = vcombine.high %v1084_v1, %v1088_v23  ;;  %v1080_v51 = vld [vmem:[%s15076_s1 + $0x2078] sm:$0xff] }
 0x456   :  { %8596 = vmatprep.subr.bf16.mxu1 %v10460_v63  ;;  %v10451_v63 = vcombine.low %v1092_v2, %v1096_v11  ;;  %v14582_v2 = vpop.f32.mrf.mxu1 }
 0x457   :  { %15100 = vst [vmem:[#allocation18_spill] sm:$0xff] %v14582_v2  ;;  %v14584_v11 = vpop.f32.mrf.mxu0  ;;  %v1064_v2 = vld [vmem:[%s15076_s1 + $0x1ff8] sm:$0xff] }
 0x458   :  { %8554 = vmatpush1.bf16.msra.mxu0 %v10331_v47  ;;  %15101 = vst [vmem:[#allocation19_spill] sm:$0xff] %v14584_v11  ;;  %v10315_v47 = vcombine.low %v956_v38, %v960_v5  ;;  %v1068_v11 = vld [vmem:[%s15076_s1 + $0x2018] sm:$0xff]  ;;  %v14598_v38 = vpop.f32.mrf.mxu1 }
 0x459   :  { %8597 = vmatpush1.bf16.msra.mxu1 %v10459_v18  ;;  %8555 = vmatprep.subr.bf16.mxu0 %v10324_v24  ;;  %v10443_v18 = vcombine.low %v1084_v1, %v1088_v23  ;;  %v10308_v24 = vcombine.high %v948_v49, %v952_v35  ;;  %v1072_v5 = vld [vmem:[%s15076_s1 + $0x2038] sm:$0xff]  ;;  %v14600_v1 = vpop.f32.mrf.mxu0  ;;  %v10307_v23 = vcombine.low %v948_v49, %v952_v35  ;;  %v1201_v49 = vsub.s32 1, %v11702_v10 }
 0x45a   :  { %8598 = vmatprep.subr.bf16.mxu1 %v10452_v20  ;;  %v10436_v20 = vcombine.high %v1076_v39, %v1080_v51  ;;  %15102 = vst [vmem:[#allocation20_spill] sm:$0xff] %v14600_v1  ;;  %v1192_v35 = vld [vmem:[%s15076_s1 + $0x23f8] sm:$0xff] }
 0x45b   :  { %v10548_v9 = vcombine.high %v1188_v52, %v1192_v35 }
 0x45c   :  { %8556 = vmatpush1.bf16.msra.mxu0 %v10323_v40  ;;  %v10435_v40 = vcombine.low %v1076_v39, %v1080_v51  ;;  %v14615_v39 = vpop.f32.mrf.mxu1  ;;  %v14617_v51 = vpop.f32.mrf.mxu0 }
 0x45d   :  { %8599 = vmatpush1.bf16.msra.mxu1 %v10451_v63  ;;  %8557 = vmatprep.subr.bf16.mxu0 %v10316_v12  ;;  %v10300_v63 = vcombine.high %v940_v53, %v944_v4  ;;  %v10428_v12 = vcombine.high %v1068_v11, %v1072_v5  ;;  %15103 = vst [vmem:[#allocation21_spill] sm:$0xff] %v14615_v39  ;;  %15104 = vst [vmem:[#allocation22_spill] sm:$0xff] %v14617_v51  ;;  %v1056_v39 = vld [vmem:[%s15076_s1 + $0x1fb8] sm:$0xff] }
 0x45e   :  { %8600 = vmatprep.subr.bf16.mxu1 %v10444_v3  ;;  %v1060_v3 = vld [vmem:[%s15076_s1 + $0x1fd8] sm:$0xff]  ;;  %v10412_v51 = vcombine.high %v1052_v46, %v1056_v39 }
 0x460   :  { %8558 = vmatpush1.bf16.msra.mxu0 %v10315_v47  ;;  %v10299_v47 = vcombine.low %v940_v53, %v944_v4  ;;  %v1180_v4 = vld [vmem:[%s15076_s1 + $0x2398] sm:$0xff] }
 0x461   :  { %8601 = vmatpush1.bf16.msra.mxu1 %v10443_v18  ;;  %8559 = vmatprep.subr.bf16.mxu0 %v10308_v24  ;;  %v10427_v18 = vcombine.low %v1068_v11, %v1072_v5  ;;  %v10420_v24 = vcombine.high %v1060_v3, %v1064_v2  ;;  %v1184_v53 = vld [vmem:[%s15076_s1 + $0x23b8] sm:$0xff]  ;;  %v14635_v11 = vld [vmem:[%s15078_s2] sm:$0xff] }
 0x462   :  { %8602 = vmatprep.subr.bf16.mxu1 %v10436_v20  ;;  %v1209_v20 = vsub.s32 3, %v11702_v10  ;;  %v1202_v5 = vrot.slane %v14635_v11, %v1201_v49  ;;  %v10540_v1 = vcombine.high %v1180_v4, %v1184_v53  ;;  %v1044_v49 = vld [vmem:[%s15076_s1 + $0x1f58] sm:$0xff] }
 0x464   :  { %8560 = vmatpush1.bf16.msra.mxu0 %v10307_v23  ;;  %v14638_v23 = vpop.f32.mrf.mxu1  ;;  %v1210_v6 = vrot.slane %v14635_v11, %v1209_v20 }
 0x465   :  { %8603 = vmatpush1.bf16.msra.mxu1 %v10435_v40  ;;  %8561 = vmatprep.subr.bf16.mxu0 %v10300_v63  ;;  %v14640_v40 = vpop.f32.mrf.mxu0  ;;  %v10419_v63 = vcombine.low %v1060_v3, %v1064_v2  ;;  %v1048_v2 = vld [vmem:[%s15076_s1 + $0x1f78] sm:$0xff]  ;;  %v7126_v3 = vadd.f32 %v11947_v56, %v1202_v5 }
 0x466   :  { %8604 = vmatprep.subr.bf16.mxu1 %v10428_v12  ;;  %v10547_v12 = vcombine.low %v1188_v52, %v1192_v35  ;;  %v14643_v45 = vpop.f32.mrf.mxu1  ;;  %v1172_v52 = vld [vmem:[%s15076_s1 + $0x2358] sm:$0xff]  ;;  %v10404_v20 = vcombine.high %v1044_v49, %v1048_v2  ;;  %v7509_v56 = vadd.f32 %v14354_v28, %v1210_v6 }
 0x467   :  { %15105 = vst [vmem:[#allocation23_spill] sm:$0xff] %v14643_v45  ;;  %v14645_v15 = vpop.f32.mrf.mxu0  ;;  %v1176_v35 = vld [vmem:[%s15076_s1 + $0x2378] sm:$0xff] }
 0x468   :  { %8562 = vmatpush1.bf16.msra.mxu0 %v10299_v47  ;;  %15106 = vst [vmem:[#allocation24_spill] sm:$0xff] %v14645_v15  ;;  %v7513_v47 = vadd.f32 %v14386_v58, %v1210_v6  ;;  %v14664_v45 = vpop.f32.mrf.mxu1  ;;  %v10532_v14 = vcombine.high %v1172_v52, %v1176_v35  ;;  %v1040_v58 = vld [vmem:[%s15076_s1 + $0x1f38] sm:$0xff] }
 0x469   :  { %8605 = vmatpush1.bf16.msra.mxu1 %v10427_v18  ;;  %8563 = vmatprep.subr.bf16.mxu0 %v10420_v24  ;;  %v10411_v18 = vcombine.low %v1052_v46, %v1056_v39  ;;  %v10539_v24 = vcombine.low %v1180_v4, %v1184_v53  ;;  %v14666_v42 = vpop.f32.mrf.mxu0  ;;  %v7169_v46 = vadd.f32 %v11949_v59, %v7126_v3  ;;  %v1164_v28 = vld [vmem:[%s15076_s1 + $0x2318] sm:$0xff] }
 0x46a   :  { %8606 = vmatprep.subr.bf16.mxu1 %v10548_v9  ;;  %v7122_v9 = vadd.f32 %v11753_v44, %v1202_v5  ;;  %v7556_v15 = vadd.f32 %v14388_v60, %v7513_v47  ;;  %v1036_v44 = vld [vmem:[%s15076_s1 + $0x1f18] sm:$0xff]  ;;  %v10403_v39 = vcombine.low %v1044_v49, %v1048_v2  ;;  %v10531_v4 = vcombine.low %v1172_v52, %v1176_v35 }
 0x46b   :  { %v1168_v60 = vld [vmem:[%s15076_s1 + $0x2338] sm:$0xff]  ;;  %v10396_v59 = vcombine.high %v1036_v44, %v1040_v58  ;;  %v10395_v49 = vcombine.low %v1036_v44, %v1040_v58 }
 0x46c   :  { %8564 = vmatpush2.bf16.msra.mxu0 %v10419_v63  ;;  %v7165_v6 = vadd.f32 %v11757_v48, %v7122_v9  ;;  %v7599_v5 = vadd.f32 %v14450_v62, %v7556_v15  ;;  %v14686_v63 = vpop.f32.mrf.mxu1  ;;  %v10524_v48 = vcombine.high %v1164_v28, %v1168_v60  ;;  %v1160_v15 = vld [vmem:[%s15076_s1 + $0x22f8] sm:$0xff]  ;;  %v10523_v3 = vcombine.low %v1164_v28, %v1168_v60 }
 0x46d   :  { %8607 = vmatpush2.bf16.msra.mxu1 %v10547_v12  ;;  %8565 = vmatprep.subr.bf16.mxu0 %v10412_v51  ;;  %v7212_v51 = vadd.f32 %v12162_v29, %v7169_v46  ;;  %v14688_v12 = vpop.f32.mrf.mxu0  ;;  %v1032_v29 = vld [vmem:[%s15076_s1 + $0x1ef8] sm:$0xff] }
 0x46e   :  { %8608 = vmatprep.subr.bf16.mxu1 %v10540_v1  ;;  %v7552_v1 = vadd.f32 %v14356_v61, %v7509_v56  ;;  %v7208_v53 = vadd.f32 %v11967_v8, %v7165_v6  ;;  %v1028_v61 = vld [vmem:[%s15076_s1 + $0x1ed8] sm:$0xff]  ;;  %v14707_v47 = vpop.f32.mrf.mxu1 }
 0x46f   :  { %v1156_v8 = vld [vmem:[%s15076_s1 + $0x22d8] sm:$0xff]  ;;  %v7255_v2 = vadd.f32 %v12164_v31, %v7212_v51  ;;  %v10388_v52 = vcombine.high %v1028_v61, %v1032_v29  ;;  %v10387_v46 = vcombine.low %v1028_v61, %v1032_v29 }
 0x470   :  { %8566 = vmatpush2.bf16.msra.mxu0 %v10411_v18  ;;  %v7595_v62 = vadd.f32 %v14418_v25, %v7552_v1  ;;  %v7251_v35 = vadd.f32 %v11971_v13, %v7208_v53  ;;  %v14709_v18 = vpop.f32.mrf.mxu0  ;;  %v10516_v25 = vcombine.high %v1156_v8, %v1160_v15  ;;  %v1024_v31 = vld [vmem:[%s15076_s1 + $0x1eb8] sm:$0xff]  ;;  %v14726_v44 = vpop.f32.mrf.mxu1 }
 0x471   :  { %8609 = vmatpush2.bf16.msra.mxu1 %v10539_v24  ;;  %8567 = vmatprep.subr.bf16.mxu0 %v10404_v20  ;;  %v7298_v24 = vadd.f32 %v12380_v16, %v7255_v2  ;;  %v1148_v13 = vld [vmem:[%s15076_s1 + $0x2298] sm:$0xff]  ;;  %v10515_v16 = vcombine.low %v1156_v8, %v1160_v15 }
 0x472   :  { %8610 = vmatprep.subr.bf16.mxu1 %v10532_v14  ;;  %v7642_v14 = vadd.f32 %v14452_v0, %v7599_v5  ;;  %v7638_v9 = vadd.f32 %v14420_v27, %v7595_v62  ;;  %v1020_v0 = vld [vmem:[%s15076_s1 + $0x1e98] sm:$0xff]  ;;  %v7294_v20 = vadd.f32 %v12185_v43, %v7251_v35  ;;  %v14728_v58 = vpop.f32.mrf.mxu0 }
 0x473   :  { %v1152_v27 = vld [vmem:[%s15076_s1 + $0x22b8] sm:$0xff]  ;;  %v10380_v28 = vcombine.high %v1020_v0, %v1024_v31  ;;  %v10379_v5 = vcombine.low %v1020_v0, %v1024_v31 }
 0x474   :  { %8568 = vmatpush2.bf16.msra.mxu0 %v10403_v39  ;;  %v7685_v56 = vadd.f32 %v14505_v21, %v7642_v14  ;;  %v7681_v60 = vadd.f32 %v14470_v30, %v7638_v9  ;;  %v10508_v1 = vcombine.high %v1148_v13, %v1152_v27  ;;  %v1012_v43 = vld [vmem:[%s15076_s1 + $0x1e58] sm:$0xff]  ;;  %v7341_v39 = vadd.f32 %v12382_v19, %v7298_v24  ;;  %v14749_v53 = vpop.f32.mrf.mxu0 }
 0x475   :  { %8611 = vmatpush2.bf16.msra.mxu1 %v10531_v4  ;;  %8569 = vmatprep.subr.bf16.mxu0 %v10396_v59  ;;  %v1016_v21 = vld [vmem:[%s15076_s1 + $0x1e78] sm:$0xff]  ;;  %v14747_v59 = vpop.f32.mrf.mxu1  ;;  %v1205_v9 = vsub.s32 2, %v11702_v10 }
 0x476   :  { %8612 = vmatprep.subr.bf16.mxu1 %v10524_v48  ;;  %v7728_v6 = vadd.f32 %v14507_v22, %v7685_v56  ;;  %v1140_v51 = vld [vmem:[%s15076_s1 + $0x2258] sm:$0xff]  ;;  %v7337_v22 = vadd.f32 %v12189_v50, %v7294_v20  ;;  %v7724_v4 = vadd.f32 %v14472_v32, %v7681_v60  ;;  %v7384_v19 = vadd.f32 %v12598_v17, %v7341_v39  ;;  %v14770_v2 = vpop.f32.mrf.mxu0 }
 0x477   :  { %v1144_v30 = vld [vmem:[%s15076_s1 + $0x2278] sm:$0xff]  ;;  %v10507_v48 = vcombine.low %v1148_v13, %v1152_v27  ;;  %v10372_v61 = vcombine.high %v1012_v43, %v1016_v21  ;;  %v1217_v20 = vsub.s32 5, %v11702_v10 }
 0x478   :  { %8570 = vmatpush2.bf16.msra.mxu0 %v10395_v49  ;;  %v7771_v29 = vadd.f32 %v14566_v54, %v7728_v6  ;;  %v10500_v8 = vcombine.high %v1140_v51, %v1144_v30  ;;  %v1004_v50 = vld [vmem:[%s15076_s1 + $0x1e18] sm:$0xff]  ;;  %v7380_v15 = vadd.f32 %v12403_v33, %v7337_v22  ;;  %v7767_v62 = vadd.f32 %v14534_v55, %v7724_v4  ;;  %v14768_v49 = vpop.f32.mrf.mxu1  ;;  %v14780_v13 = vpop.f32.mrf.mxu0 }
 0x479   :  { %8613 = vmatpush2.bf16.msra.mxu1 %v10523_v3  ;;  %8571 = vmatprep.subr.bf16.mxu0 %v10388_v52  ;;  %v1008_v32 = vld [vmem:[%s15076_s1 + $0x1e38] sm:$0xff]  ;;  %v10371_v3 = vcombine.low %v1012_v43, %v1016_v21  ;;  %v7427_v33 = vadd.f32 %v14328_v26, %v7384_v19  ;;  %v10499_v52 = vcombine.low %v1140_v51, %v1144_v30  ;;  %v10733_v30 = vld [vmem:[%s15079_s3 + $0x70] sm:$0xff]   ;;  %v15107_v19 = vld [vmem:[#allocation3_spill] sm:$0xff] }
 0x47a   :  { %8614 = vmatprep.subr.bf16.mxu1 %v10516_v25  ;;  %v1132_v17 = vld [vmem:[%s15076_s1 + $0x2218] sm:$0xff]  ;;  %v7814_v14 = vadd.f32 %v14568_v57, %v7771_v29  ;;  %v10364_v35 = vcombine.high %v1004_v50, %v1008_v32  ;;  %v7810_v25 = vadd.f32 %v14536_v36, %v7767_v62  ;;  %v7423_v57 = vadd.f32 %v12407_v37, %v7380_v15  ;;  %v14778_v24 = vpop.f32.mrf.mxu1  ;;  %v15110_v62 = vld [vmem:[#allocation4_spill] sm:$0xff] }
 0x47b   :  { %v1136_v54 = vld [vmem:[%s15076_s1 + $0x2238] sm:$0xff]  ;;  %v7470_v0 = vadd.f32 %v14330_v7, %v7427_v33  ;;  %v10363_v26 = vcombine.low %v1004_v50, %v1008_v32  ;;  %v1206_v7 = vrot.slane %v14635_v11, %v1205_v9  ;;  %v10855_v50 = vld [vmem:[%s15077_s0 + $0x40] ss:$72 sps:$4 sm:$0xff]   ;;  %v15109_v32 = vld [vmem:[#allocation20_spill] sm:$0xff] }
 0x47c   :  { %8572 = vmatpush2.bf16.msra.mxu0 %v10387_v46  ;;  %v10492_v55 = vcombine.high %v1132_v17, %v1136_v54  ;;  %v7857_v31 = vadd.f32 %v14638_v23, %v7814_v14  ;;  %v7466_v27 = vadd.f32 %v12619_v34, %v7423_v57  ;;  %v10491_v36 = vcombine.low %v1132_v17, %v1136_v54  ;;  %v10729_v37 = vld [vmem:[%s15079_s3 + $0x78] sm:$0xff]   ;;  %v14789_v56 = vpop.f32.mrf.mxu1  ;;  %v14791_v46 = vpop.f32.mrf.mxu0  ;;  %v10736_v17 = vld [vmem:[%s15079_s3 + $0xb0] sm:$0xff]   ;;  %v10737_v54 = vld [vmem:[%s15079_s3 + $0x68] sm:$0xff]  }
 0x47d   :  { %8615 = vmatpush2.bf16.msra.mxu1 %v10515_v16  ;;  %8573 = vmatprep.subr.bf16.mxu0 %v10380_v28  ;;  %v7853_v23 = vadd.f32 %v14598_v38, %v7810_v25  ;;  %v10730_v34 = vld [vmem:[%s15079_s3 + $0xf8] sm:$0xff]   ;;  %v8642_v16 = vmax.f32 %v7470_v0, 0.0  ;;  %v7511_v43 = vadd.f32 %v14370_v41, %v1206_v7  ;;  %v10734_v41 = vld [vmem:[%s15079_s3 + $0xf0] sm:$0xff]  }
 0x47e   :  { %8616 = vmatprep.subr.bf16.mxu1 %v10508_v1  ;;  %v8644_v28 = vmax.f32 %v7857_v31, 0.0  ;;  %v10731_v60 = vld [vmem:[%s15079_s3 + $0x38] sm:$0xff]   ;;  %v8634_v6 = vmax.f32 %v7466_v27, 0.0  ;;  %v1218_v1 = vrot.slane %v14635_v11, %v1217_v20  ;;  %v14804_v39 = vpop.f32.mrf.mxu1  ;;  %v14806_v51 = vpop.f32.mrf.mxu0  ;;  %v15111_v9 = vld [vmem:[#allocation8_spill] sm:$0xff]  ;;  %v10740_v31 = vld [vmem:[%s15079_s3 + $0xa8] sm:$0xff]  }
 0x47f   :  { %v10732_v38 = vld [vmem:[%s15079_s3 + $0xb8] sm:$0xff]   ;;  %v8636_v21 = vmax.f32 %v7853_v23, 0.0  ;;  %v15114_v23 = vld [vmem:[#allocation7_spill] sm:$0xff] }
 0x480   :  { %8574 = vmatpush2.bf16.msra.mxu0 %v10379_v5  ;;  %v8650_v22 = vpack.c.bf16 %v8642_v16, %v8634_v6  ;;  %v7900_v4 = vadd.f32 %v14640_v40, %v1218_v1  ;;  %v10854_v5 = vld [vmem:[%s15077_s0 + $0x38] ss:$72 sps:$4 sm:$0xff]   ;;  %v10735_v40 = vld [vmem:[%s15079_s3 + $0x30] sm:$0xff]   ;;  %v7896_v15 = vadd.f32 %v15109_v32, %v1218_v1  ;;  %v14836_v33 = vpop.f32.mrf.mxu0 }
 0x481   :  { %8617 = vmatpush2.bf16.msra.mxu1 %v10507_v48  ;;  %8575 = vmatprep.subr.bf16.mxu0 %v10372_v61  ;;  %v7507_v48 = vadd.f32 %v15107_v19, %v1206_v7  ;;  %v15108_v61 = vld [vmem:[#allocation5_spill] sm:$0xff]  ;;  %v10744_v1 = vld [vmem:[%s15079_s3 + $0xa0] sm:$0xff]  }
 0x482   :  { %8618 = vmatprep.subr.bf16.mxu1 %v10500_v8  ;;  %v7554_v29 = vadd.f32 %v15108_v61, %v7511_v43  ;;  %v8652_v8 = vpack.c.bf16 %v8644_v28, %v8636_v21  ;;  %v7939_v57 = vadd.f32 %v14664_v45, %v7896_v15  ;;  %v15113_v20 = vld [vmem:[#allocation9_spill] sm:$0xff]  ;;  %v8157_v7 = vpop.f32.mrf.mxu0  ;;  %v10742_v45 = vld [vmem:[%s15079_s3 + $0xe0] sm:$0xff]   ;;  %v15119_v15 = vld [vmem:[#allocation16_spill] sm:$0xff] }
 0x483   :  { %v7550_v14 = vadd.f32 %v15110_v62, %v7507_v48  ;;  %v10746_v21 = vld [vmem:[%s15079_s3 + $0xd8] sm:$0xff]   ;;  %v10751_v62 = vld [vmem:[%s15079_s3 + $0x10] sm:$0xff]  }
 0x484   :  { %8576 = vmatpush2.bf16.msra.mxu0 %v10371_v3  ;;  %v14834_v3 = vpop.f32.mrf.mxu1  ;;  %v7597_v25 = vadd.f32 %v15111_v9, %v7554_v29  ;;  %v14863_v28 = vpop.f32.mrf.mxu0  ;;  %v10747_v61 = vld [vmem:[%s15079_s3 + $0x18] sm:$0xff]   ;;  %v10753_v9 = vld [vmem:[%s15079_s3 + $0x48] sm:$0xff]  }
 0x485   :  { %8619 = vmatpush2.bf16.msra.mxu1 %v10499_v52  ;;  %8577 = vmatprep.subr.bf16.mxu0 %v10364_v35  ;;  %v10738_v52 = vld [vmem:[%s15079_s3 + $0xe8] sm:$0xff]   ;;  %v7943_v35 = vadd.f32 %v14707_v47, %v7900_v4  ;;  %v10741_v47 = vld [vmem:[%s15079_s3 + $0x60] sm:$0xff]  }
 0x486   :  { %8620 = vmatprep.subr.bf16.mxu1 %v10492_v55  ;;  %v10739_v55 = vld [vmem:[%s15079_s3 + $0x28] sm:$0xff]   ;;  %v8239_v48 = vpop.f32.mrf.mxu0 }
 0x487   :  { %v7986_v0 = vadd.f32 %v14709_v18, %v7943_v35  ;;  %v7982_v18 = vadd.f32 %v14666_v42, %v7939_v57  ;;  %v10745_v42 = vld [vmem:[%s15079_s3 + $0x58] sm:$0xff]   ;;  %v10752_v35 = vld [vmem:[%s15079_s3 + $0x90] sm:$0xff]  }
 0x488   :  { %8578 = vmatpush2.bf16.msra.mxu0 %v10363_v26  ;;  %v15112_v26 = vld [vmem:[#allocation6_spill] sm:$0xff]  ;;  %v15121_v57 = vld [vmem:[#allocation17_spill] sm:$0xff] }
 0x489   :  { %8621 = vmatpush2.bf16.msra.mxu1 %v10491_v36  ;;  %10614 = vmatprep.subr.bf16.mxu0 %v10729_v37  ;;  %v7593_v27 = vadd.f32 %v15112_v26, %v7550_v14  ;;  %v7640_v36 = vadd.f32 %v15113_v20, %v7597_v25  ;;  %v8114_v37 = vpop.f32.mrf.mxu1  ;;  %v8029_v6 = vadd.f32 %v14778_v24, %v7986_v0  ;;  %v15120_v25 = vld [vmem:[#allocation14_spill] sm:$0xff] }
 0x48a   :  { %10636 = vmatprep.subr.bf16.mxu1 %v10730_v34 }
 0x48b   :  { %8580 = vmatmul.mubr.bf16.vlgmr.msra.gmra.mxu0 %v10854_v5  ;;  %v7636_v34 = vadd.f32 %v15114_v23, %v7593_v27  ;;  %v14861_v16 = vpop.f32.mrf.mxu1  ;;  %v8072_v24 = vadd.f32 %v14780_v13, %v8029_v6  ;;  %v15117_v5 = vld [vmem:[#allocation13_spill] sm:$0xff]  ;;  %v10749_v13 = vld [vmem:[%s15079_s3 + $0x50] sm:$0xff]   ;;  %v10758_v23 = vld [vmem:[%s15079_s3 + $0xc0] sm:$0xff]  }
 0x48c   :  { %8623 = vmatmul.mubr.bf16.vlgmr.msra.gmra.mxu1 %v10855_v50  ;;  %10615 = vmatpush3.bf16.msra.mxu0 %v10731_v60  ;;  %v10743_v60 = vld [vmem:[%s15079_s3 + $0x20] sm:$0xff]  }
 0x48d   :  { %9208 = vmatprep.mubr.bf16.mxu0 %v8650_v22  ;;  %10637 = vmatpush3.bf16.msra.mxu1 %v10732_v38  ;;  %v15115_v38 = vld [vmem:[#allocation12_spill] sm:$0xff]  ;;  %v15116_v22 = vld [vmem:[#allocation10_spill] sm:$0xff]  ;;  %v8196_v19 = vpop.f32.mrf.mxu1  ;;  %v8115_v32 = vadd.f32 %v8114_v37, %v8072_v24 }
 0x48e   :  { %9249 = vmatprep.mubr.bf16.mxu1 %v8652_v8  ;;  %10616 = vmatprep.subr.bf16.mxu0 %v10733_v30  ;;  %v7683_v43 = vadd.f32 %v15115_v38, %v7640_v36  ;;  %v8025_v30 = vadd.f32 %v14747_v59, %v7982_v18  ;;  %v7679_v4 = vadd.f32 %v15116_v22, %v7636_v34  ;;  %v10748_v59 = vld [vmem:[%s15079_s3 + $0x98] sm:$0xff]   ;;  %v15118_v8 = vld [vmem:[#allocation11_spill] sm:$0xff]  ;;  %v1213_v34 = vsub.s32 4, %v11702_v10  ;;  %v10759_v38 = vld [vmem:[%s15079_s3] sm:$0xff]  }
 0x48f   :  { %10638 = vmatprep.subr.bf16.mxu1 %v10734_v41  ;;  %v10755_v36 = vld [vmem:[%s15079_s3 + $0x8] sm:$0xff]   ;;  %v10777_v22 = vld [vmem:[%s15079_s3 + $0x1f8] sm:$0xff]  }
 0x490   :  { %10617 = vmatpush3.bf16.msra.mxu0 %v10735_v40  ;;  %v7726_v41 = vadd.f32 %v15117_v5, %v7683_v43  ;;  %v8068_v29 = vadd.f32 %v14749_v53, %v8025_v30  ;;  %v7722_v50 = vadd.f32 %v15118_v8, %v7679_v4  ;;  %v10750_v40 = vld [vmem:[%s15079_s3 + $0xd0] sm:$0xff]   ;;  %v10761_v30 = vld [vmem:[%s15079_s3 + $0x178] sm:$0xff]   ;;  %v1214_v4 = vrot.slane %v14635_v11, %v1213_v34 }
 0x491   :  { %10639 = vmatpush3.bf16.msra.mxu1 %v10736_v17  ;;  %10618 = vmatprep.subr.bf16.mxu0 %v10737_v54  ;;  %v14898_v17 = vpop.f32.mrf.mxu1  ;;  %v14900_v54 = vpop.f32.mrf.mxu0  ;;  %v10778_v8 = vld [vmem:[%s15079_s3 + $0x1b8] sm:$0xff]  }
 0x492   :  { %10640 = vmatprep.subr.bf16.mxu1 %v10738_v52  ;;  %v7769_v53 = vadd.f32 %v15119_v15, %v7726_v41  ;;  %v8111_v14 = vadd.f32 %v14804_v39, %v8068_v29  ;;  %v8158_v52 = vadd.f32 %v8157_v7, %v8115_v32  ;;  %v10754_v39 = vld [vmem:[%s15079_s3 + $0xc8] sm:$0xff]   ;;  %v15127_v15 = vld [vmem:[#allocation2_spill] sm:$0xff] }
 0x493   :  { %v8200_v27 = vpop.f32.mrf.mxu1  ;;  %v8243_v20 = vpop.f32.mrf.mxu0  ;;  %v10756_v7 = vld [vmem:[%s15079_s3 + $0x88] sm:$0xff]  }
 0x494   :  { %10619 = vmatpush3.bf16.msra.mxu0 %v10739_v55  ;;  %v7765_v55 = vadd.f32 %v15120_v25, %v7722_v50  ;;  %v7812_v0 = vadd.f32 %v15121_v57, %v7769_v53  ;;  %v8201_v37 = vadd.f32 %v8200_v27, %v8158_v52  ;;  %v15126_v50 = vld [vmem:[#allocation19_spill] sm:$0xff]  ;;  %v10779_v53 = vld [vmem:[%s15079_s3 + $0x1f0] sm:$0xff]   ;;  %v10768_v27 = vld [vmem:[%s15079_s3 + $0x120] sm:$0xff]  }
 0x495   :  { %10641 = vmatpush3.bf16.msra.mxu1 %v10740_v31  ;;  %10620 = vmatprep.subr.bf16.mxu0 %v10741_v47  ;;  %v8154_v31 = vadd.f32 %v14806_v51, %v8111_v14  ;;  %v15122_v47 = vld [vmem:[#allocation15_spill] sm:$0xff]  ;;  %v10757_v51 = vld [vmem:[%s15079_s3 + $0x40] sm:$0xff]  }
 0x496   :  { %10642 = vmatprep.subr.bf16.mxu1 %v10742_v45  ;;  %v7808_v26 = vadd.f32 %v15122_v47, %v7765_v55  ;;  %v15123_v45 = vld [vmem:[#allocation21_spill] sm:$0xff]  ;;  %v8244_v6 = vadd.f32 %v8243_v20, %v8201_v37  ;;  %v10765_v52 = vld [vmem:[%s15079_s3 + $0x168] sm:$0xff]  }
 0x497   :  { %v7855_v18 = vadd.f32 %v15123_v45, %v7812_v0  ;;  %v10766_v57 = vld [vmem:[%s15079_s3 + $0x128] sm:$0xff]   ;;  %v15129_v0 = vld [vmem:[#allocation24_spill] sm:$0xff]  ;;  %v10769_v37 = vld [vmem:[%s15079_s3 + $0x158] sm:$0xff]  }
 0x498   :  { %10621 = vmatpush3.bf16.msra.mxu0 %v10743_v60  ;;  %v8197_v60 = vadd.f32 %v8196_v19, %v8154_v31  ;;  %v8646_v5 = vmax.f32 %v8244_v6, 0.0  ;;  %v10762_v19 = vld [vmem:[%s15079_s3 + $0x138] sm:$0xff]   ;;  %v10767_v31 = vld [vmem:[%s15079_s3 + $0x160] sm:$0xff]  }
 0x499   :  { %10643 = vmatpush3.bf16.msra.mxu1 %v10744_v1  ;;  %10622 = vmatprep.subr.bf16.mxu0 %v10745_v42  ;;  %v15124_v1 = vld [vmem:[#allocation18_spill] sm:$0xff]  ;;  %v8643_v24 = vmax.f32 %v7855_v18, 0.0 }
 0x49a   :  { %10644 = vmatprep.subr.bf16.mxu1 %v10746_v21  ;;  %v7851_v42 = vadd.f32 %v15124_v1, %v7808_v26  ;;  %v8240_v43 = vadd.f32 %v8239_v48, %v8197_v60  ;;  %v10760_v21 = vld [vmem:[%s15079_s3 + $0x80] sm:$0xff]  }
 0x49b   :  { %v15125_v48 = vld [vmem:[#allocation22_spill] sm:$0xff] }
 0x49c   :  { %10623 = vmatpush3.bf16.msra.mxu0 %v10747_v61  ;;  %v8635_v41 = vmax.f32 %v7851_v42, 0.0  ;;  %v7898_v61 = vadd.f32 %v15125_v48, %v1214_v4  ;;  %v8638_v29 = vmax.f32 %v8240_v43, 0.0  ;;  %v10783_v26 = vld [vmem:[%s15079_s3 + $0x1e0] sm:$0xff]   ;;  %v10788_v43 = vld [vmem:[%s15079_s3 + $0x190] sm:$0xff]   ;;  %v8323_v48 = vpop.f32.mrf.mxu0 }
 0x49d   :  { %10645 = vmatpush3.bf16.msra.mxu1 %v10748_v59  ;;  %10624 = vmatprep.subr.bf16.mxu0 %v10749_v13  ;;  %v10763_v59 = vld [vmem:[%s15079_s3 + $0x170] sm:$0xff]  }
 0x49e   :  { %10646 = vmatprep.subr.bf16.mxu1 %v10750_v40  ;;  %v8651_v13 = vpack.c.bf16 %v8643_v24, %v8635_v41  ;;  %v7894_v40 = vadd.f32 %v15126_v50, %v1214_v4  ;;  %v8654_v32 = vpack.c.bf16 %v8646_v5, %v8638_v29  ;;  %v7941_v14 = vadd.f32 %v14686_v63, %v7898_v61  ;;  %v10781_v63 = vld [vmem:[%s15079_s3 + $0x1e8] sm:$0xff]   ;;  %v10791_v24 = vld [vmem:[%s15079_s3 + $0x1c0] sm:$0xff]   ;;  %v8280_v4 = vpop.f32.mrf.mxu1  ;;  %v8325_v29 = vpop.f32.mrf.mxu0 }
 0x4a0   :  { %10625 = vmatpush3.bf16.msra.mxu0 %v10751_v62  ;;  %v10764_v62 = vld [vmem:[%s15079_s3 + $0x130] sm:$0xff]   ;;  %v7984_v55 = vadd.f32 %v14688_v12, %v7941_v14  ;;  %v10782_v12 = vld [vmem:[%s15079_s3 + $0x1a8] sm:$0xff]   ;;  %v8282_v5 = vpop.f32.mrf.mxu1 }
 0x4a1   :  { %10647 = vmatpush3.bf16.msra.mxu1 %v10752_v35  ;;  %10626 = vmatprep.subr.bf16.mxu0 %v10753_v9  ;;  %v10780_v35 = vld [vmem:[%s15079_s3 + $0x1b0] sm:$0xff]   ;;  %v15128_v9 = vld [vmem:[#allocation23_spill] sm:$0xff] }
 0x4a2   :  { %10648 = vmatprep.subr.bf16.mxu1 %v10754_v39  ;;  %v7937_v25 = vadd.f32 %v15128_v9, %v7894_v40  ;;  %v8027_v47 = vadd.f32 %v14768_v49, %v7984_v55  ;;  %v10784_v49 = vld [vmem:[%s15079_s3 + $0x1a0] sm:$0xff]   ;;  %v8284_v41 = vpop.f32.mrf.mxu1 }
 0x4a4   :  { %10627 = vmatpush3.bf16.msra.mxu0 %v10755_v36  ;;  %v7980_v39 = vadd.f32 %v15129_v0, %v7937_v25  ;;  %v8070_v36 = vadd.f32 %v14770_v2, %v8027_v47 }
 0x4a5   :  { %10649 = vmatpush3.bf16.msra.mxu1 %v10756_v7  ;;  %10628 = vmatprep.subr.bf16.mxu0 %v10757_v51  ;;  %v10771_v51 = vld [vmem:[%s15079_s3 + $0x150] sm:$0xff]  }
 0x4a6   :  { %10650 = vmatprep.subr.bf16.mxu1 %v10758_v23  ;;  %v8023_v20 = vadd.f32 %v14726_v44, %v7980_v39  ;;  %v10770_v44 = vld [vmem:[%s15079_s3 + $0x118] sm:$0xff]   ;;  %v8113_v2 = vadd.f32 %v14834_v3, %v8070_v36  ;;  %v10773_v3 = vld [vmem:[%s15079_s3 + $0x148] sm:$0xff]  }
 0x4a8   :  { %10629 = vmatpush3.bf16.msra.mxu0 %v10759_v38  ;;  %v8066_v7 = vadd.f32 %v14728_v58, %v8023_v20  ;;  %v8156_v18 = vadd.f32 %v14836_v33, %v8113_v2  ;;  %v10772_v58 = vld [vmem:[%s15079_s3 + $0x110] sm:$0xff]  }
 0x4a9   :  { %10651 = vmatpush3.bf16.msra.mxu1 %v10760_v21  ;;  %10658 = vmatprep.subr.bf16.mxu0 %v10761_v30  ;;  %v10789_v21 = vld [vmem:[%s15079_s3 + $0x1c8] sm:$0xff]  }
 0x4aa   :  { %10680 = vmatprep.subr.bf16.mxu1 %v10777_v22  ;;  %v8109_v45 = vadd.f32 %v14789_v56, %v8066_v7  ;;  %v8199_v34 = vadd.f32 %v14898_v17, %v8156_v18  ;;  %v10774_v56 = vld [vmem:[%s15079_s3 + $0x108] sm:$0xff]   ;;  %v10776_v17 = vld [vmem:[%s15079_s3 + $0x100] sm:$0xff]  }
 0x4ab   :  { %9209 = vmatmul.mubr.bf16.vlgmr.msra.gmra.mxu0 %v15127_v15  ;;  %v10790_v30 = vld [vmem:[%s15079_s3 + $0x188] sm:$0xff]   ;;  %v10792_v22 = vld [vmem:[%s15079_s3 + $0x180] sm:$0xff]  }
 0x4ac   :  { %9250 = vmatmul.mubr.bf16.vlgmr.msra.gmra.mxu1 %v8651_v13  ;;  %10659 = vmatpush3.bf16.msra.mxu0 %v10762_v19  ;;  %v8152_v23 = vadd.f32 %v14791_v46, %v8109_v45  ;;  %v8242_v60 = vadd.f32 %v14900_v54, %v8199_v34  ;;  %v10775_v46 = vld [vmem:[%s15079_s3 + $0x140] sm:$0xff]   ;;  %v10786_v54 = vld [vmem:[%s15079_s3 + $0x198] sm:$0xff]   ;;  %v8286_v19 = vpop.f32.mrf.mxu1  ;;  %v8327_v13 = vpop.f32.mrf.mxu0 }
 0x4ad   :  { %9290 = vmatprep.mubr.bf16.mxu0 %v8654_v32  ;;  %10660 = vmatprep.subr.bf16.mxu0 %v10763_v59 }
 0x4ae   :  { %10681 = vmatpush3.bf16.msra.mxu1 %v10778_v8  ;;  %v8195_v33 = vadd.f32 %v14861_v16, %v8152_v23  ;;  %v8645_v1 = vmax.f32 %v8242_v60, 0.0  ;;  %v10785_v16 = vld [vmem:[%s15079_s3 + $0x1d8] sm:$0xff]   ;;  %v8366_v61 = vpop.f32.mrf.mxu1  ;;  %v8329_v50 = vpop.f32.mrf.mxu0 }
 0x4af   :  { %10682 = vmatprep.subr.bf16.mxu1 %v10779_v53  ;;  %v1225_v53 = vsub.s32 7, %v11702_v10 }
 0x4b0   :  { %10661 = vmatpush3.bf16.msra.mxu0 %v10764_v62  ;;  %v8238_v6 = vadd.f32 %v14863_v28, %v8195_v33  ;;  %v10787_v28 = vld [vmem:[%s15079_s3 + $0x1d0] sm:$0xff]   ;;  %v8368_v59 = vpop.f32.mrf.mxu1  ;;  %v1221_v62 = vsub.s32 6, %v11702_v10 }
 0x4b1   :  { %10662 = vmatprep.subr.bf16.mxu0 %v10765_v52 }
 0x4b2   :  { %10683 = vmatpush3.bf16.msra.mxu1 %v10780_v35  ;;  %v8637_v42 = vmax.f32 %v8238_v6, 0.0  ;;  %v8370_v8 = vpop.f32.mrf.mxu1  ;;  %v1226_v35 = vrot.slane %v14635_v11, %v1225_v53  ;;  %v1222_v9 = vrot.slane %v14635_v11, %v1221_v62 }
 0x4b3   :  { %10684 = vmatprep.subr.bf16.mxu1 %v10781_v63 }
 0x4b4   :  { %10663 = vmatpush3.bf16.msra.mxu0 %v10766_v57  ;;  %v8653_v38 = vpack.c.bf16 %v8645_v1, %v8637_v42  ;;  %v8372_v40 = vpop.f32.mrf.mxu1  ;;  %v8283_v63 = vadd.f32 %v8282_v5, %v1226_v35  ;;  %v8281_v57 = vadd.f32 %v8280_v4, %v1222_v9  ;;  %v8285_v39 = vadd.f32 %v8284_v41, %v1222_v9 }
 0x4b5   :  { %10664 = vmatprep.subr.bf16.mxu0 %v10767_v31 }
 0x4b6   :  { %10685 = vmatpush3.bf16.msra.mxu1 %v10782_v12  ;;  %v8326_v31 = vadd.f32 %v8325_v29, %v8283_v63  ;;  %v8324_v47 = vadd.f32 %v8323_v48, %v8281_v57  ;;  %v8328_v20 = vadd.f32 %v8327_v13, %v8285_v39 }
 0x4b7   :  { %10686 = vmatprep.subr.bf16.mxu1 %v10783_v26 }
 0x4b8   :  { %10665 = vmatpush3.bf16.msra.mxu0 %v10768_v27  ;;  %v8287_v27 = vadd.f32 %v8286_v19, %v1226_v35  ;;  %v8369_v10 = vadd.f32 %v8368_v59, %v8326_v31 }
 0x4b9   :  { %10666 = vmatprep.subr.bf16.mxu0 %v10769_v37 }
 0x4ba   :  { %10687 = vmatpush3.bf16.msra.mxu1 %v10784_v49  ;;  %v8330_v37 = vadd.f32 %v8329_v50, %v8287_v27  ;;  %v8367_v49 = vadd.f32 %v8366_v61, %v8324_v47 }
 0x4bb   :  { %10688 = vmatprep.subr.bf16.mxu1 %v10785_v16 }
 0x4bc   :  { %10667 = vmatpush3.bf16.msra.mxu0 %v10770_v44  ;;  %v8371_v44 = vadd.f32 %v8370_v8, %v8328_v20  ;;  %v8373_v45 = vadd.f32 %v8372_v40, %v8330_v37 }
 0x4bd   :  { %10668 = vmatprep.subr.bf16.mxu0 %v10771_v51 }
 0x4be   :  { %10689 = vmatpush3.bf16.msra.mxu1 %v10786_v54 }
 0x4bf   :  { %10690 = vmatprep.subr.bf16.mxu1 %v10787_v28 }
 0x4c0   :  { %10669 = vmatpush3.bf16.msra.mxu0 %v10772_v58 }
 0x4c1   :  { %10670 = vmatprep.subr.bf16.mxu0 %v10773_v3 }
 0x4c2   :  { %10691 = vmatpush3.bf16.msra.mxu1 %v10788_v43 }
 0x4c3   :  { %10692 = vmatprep.subr.bf16.mxu1 %v10789_v21 }
 0x4c4   :  { %10671 = vmatpush3.bf16.msra.mxu0 %v10774_v56 }
 0x4c5   :  { %10672 = vmatprep.subr.bf16.mxu0 %v10775_v46 }
 0x4c6   :  { %10693 = vmatpush3.bf16.msra.mxu1 %v10790_v30 }
 0x4c7   :  { %10694 = vmatprep.subr.bf16.mxu1 %v10791_v24 }
 0x4c8   :  { %10673 = vmatpush3.bf16.msra.mxu0 %v10776_v17 }
 0x4ca   :  { %10695 = vmatpush3.bf16.msra.mxu1 %v10792_v22 }
 0x4cb   :  { %9291 = vmatmul.mubr.bf16.vlgmr.msra.gmra.mxu0 %v8653_v38  ;;  %v8409_v32 = vpop.f32.mrf.mxu0 }
 0x4cc   :  { %v8452_v15 = vpop.f32.mrf.mxu1  ;;  %v8410_v51 = vadd.f32 %v8409_v32, %v8367_v49 }
 0x4cd   :  { %v8411_v14 = vpop.f32.mrf.mxu0 }
 0x4ce   :  { %v8454_v52 = vpop.f32.mrf.mxu1  ;;  %v8412_v2 = vadd.f32 %v8411_v14, %v8369_v10  ;;  %v8453_v56 = vadd.f32 %v8452_v15, %v8410_v51 }
 0x4cf   :  { %v8413_v25 = vpop.f32.mrf.mxu0 }
 0x4d0   :  { %v8456_v55 = vpop.f32.mrf.mxu1  ;;  %v8414_v18 = vadd.f32 %v8413_v25, %v8371_v44  ;;  %v8455_v23 = vadd.f32 %v8454_v52, %v8412_v2  ;;  %v15130_v44 = vlaneseq }
 0x4d1   :  { %v8415_v0 = vpop.f32.mrf.mxu0 }
 0x4d2   :  { %v8458_v12 = vpop.f32.mrf.mxu1  ;;  %v8416_v3 = vadd.f32 %v8415_v0, %v8373_v45  ;;  %v8457_v33 = vadd.f32 %v8456_v55, %v8414_v18  ;;  %v9341_v2 = vand.u32 127, %v15130_v44 }
 0x4d4   :  { %v8459_v17 = vadd.f32 %v8458_v12, %v8416_v3  ;;  %v10549_v12 = vld [vmem:[%s15080_s4] ss:$0 sm:$0xff]  ;;  %vm9342_vm0 = vcmp.lt.s32.totalorder %v9341_v2, 10 }
 0x50b   :  { %v8495_v26 = vpop.f32.mrf.mxu0 }
 0x50c   :  { %v8538_v36 = vpop.f32.mrf.mxu1  ;;  %v8496_v46 = vadd.f32 %v8495_v26, %v8453_v56 }
 0x50d   :  { %v8497_v7 = vpop.f32.mrf.mxu0 }
 0x50e   :  { %v8540_v11 = vpop.f32.mrf.mxu1  ;;  %v8498_v60 = vadd.f32 %v8497_v7, %v8455_v23  ;;  %v8539_v43 = vadd.f32 %v8538_v36, %v8496_v46 }
 0x50f   :  { %v8499_v58 = vpop.f32.mrf.mxu0 }
 0x510   :  { %v8542_v34 = vpop.f32.mrf.mxu1  ;;  %v8500_v1 = vadd.f32 %v8499_v58, %v8457_v33  ;;  %v8541_v16 = vadd.f32 %v8540_v11, %v8498_v60 }
 0x511   :  { %v8501_v6 = vpop.f32.mrf.mxu0 }
 0x512   :  { %v8544_v42 = vpop.f32.mrf.mxu1  ;;  %v8502_v54 = vadd.f32 %v8501_v6, %v8459_v17  ;;  %v8543_v30 = vadd.f32 %v8542_v34, %v8500_v1 }
 0x514   :  { %v8545_v41 = vadd.f32 %v8544_v42, %v8502_v54 }
 0x54b   :  { %v8581_v38 = vpop.f32.mrf.mxu0 }
 0x54c   :  { %v8624_v28 = vpop.f32.mrf.mxu1  ;;  %v8582_v4 = vadd.f32 %v8581_v38, %v8539_v43 }
 0x54d   :  { %v8583_v21 = vpop.f32.mrf.mxu0 }
 0x54e   :  { %v8584_v24 = vadd.f32 %v8583_v21, %v8541_v16  ;;  %v8626_v22 = vpop.f32.mrf.mxu1  ;;  %v8625_v8 = vadd.f32 %v8624_v28, %v8582_v4 }
 0x54f   :  { %v8585_v5 = vpop.f32.mrf.mxu0 }
 0x550   :  { %v8586_v19 = vadd.f32 %v8585_v5, %v8543_v30  ;;  %v8628_v48 = vpop.f32.mrf.mxu1  ;;  %v8627_v29 = vadd.f32 %v8626_v22, %v8584_v24  ;;  %v8639_v62 = vmax.f32 %v8625_v8, 0.0 }
 0x551   :  { %v8587_v61 = vpop.f32.mrf.mxu0 }
 0x552   :  { %v8629_v59 = vadd.f32 %v8628_v48, %v8586_v19  ;;  %v8588_v13 = vadd.f32 %v8587_v61, %v8545_v41  ;;  %v8630_v50 = vpop.f32.mrf.mxu1  ;;  %v8640_v15 = vmax.f32 %v8627_v29, 0.0 }
 0x554   :  { %v8631_v40 = vadd.f32 %v8630_v50, %v8588_v13  ;;  %v8647_v32 = vmax.f32 %v8629_v59, 0.0 }
 0x556   :  { %v8648_v53 = vmax.f32 %v8631_v40, 0.0  ;;  %v8655_v52 = vpack.c.bf16 %v8647_v32, %v8639_v62 }
 0x558   :  { %v8656_v14 = vpack.c.bf16 %v8648_v53, %v8640_v15 }
 0x55a   :  { %9331 = vmatprep.mubr.bf16.mxu1 %v8656_v14 }
 0x55b   :  { %9332 = vmatmul.mubr.bf16.vlgmr.msra.gmra.mxu1 %v8655_v52 }
 0x56b   :  { %v10630_v35 = vpop.f32.mrf.mxu0 }
 0x56c   :  { %v10652_v55 = vpop.f32.mrf.mxu1 }
 0x56d   :  { %v10631_v9 = vpop.f32.mrf.mxu0 }
 0x56e   :  { %v10653_v0 = vpop.f32.mrf.mxu1  ;;  %v10632_v31 = vadd.f32 %v10631_v9, %v10630_v35 }
 0x56f   :  { %v10633_v25 = vpop.f32.mrf.mxu0  ;;  %v10654_v10 = vadd.f32 %v10653_v0, %v10652_v55 }
 0x570   :  { %v10655_v47 = vpop.f32.mrf.mxu1  ;;  %v9211_v27 = vadd.f32 %v10632_v31, %v10549_v12 }
 0x571   :  { %v10634_v63 = vpop.f32.mrf.mxu0 }
 0x572   :  { %v10635_v20 = vadd.f32 %v10634_v63, %v10633_v25  ;;  %v10656_v36 = vpop.f32.mrf.mxu1  ;;  %v9252_v11 = vadd.f32 %v10654_v10, %v9211_v27 }
 0x573   :  { %v10657_v18 = vadd.f32 %v10656_v36, %v10655_v47 }
 0x574   :  { %v9214_v51 = vadd.f32 %v10635_v20, %v10549_v12 }
 0x576   :  { %v9255_v56 = vadd.f32 %v10657_v18, %v9214_v51 }
 0x58b   :  { %v10674_v57 = vpop.f32.mrf.mxu0 }
 0x58d   :  { %v10675_v39 = vpop.f32.mrf.mxu0 }
 0x58e   :  { %v10676_v37 = vadd.f32 %v10675_v39, %v10674_v57 }
 0x58f   :  { %v10677_v26 = vpop.f32.mrf.mxu0 }
 0x590   :  { %v9293_v58 = vadd.f32 %v10676_v37, %v9252_v11 }
 0x591   :  { %v10678_v49 = vpop.f32.mrf.mxu0 }
 0x592   :  { %v10679_v23 = vadd.f32 %v10678_v49, %v10677_v26 }
 0x594   :  { %v9296_v46 = vadd.f32 %v10679_v23, %v9255_v56 }
 0x61b   :  { %v10696_v7 = vpop.f32.mrf.mxu1 }
 0x61d   :  { %v10697_v45 = vpop.f32.mrf.mxu1 }
 0x61e   :  { %v10698_v3 = vadd.f32 %v10697_v45, %v10696_v7 }
 0x61f   :  { %v10699_v34 = vpop.f32.mrf.mxu1 }
 0x620   :  { %v9334_v33 = vadd.f32 %v10698_v3, %v9293_v58 }
 0x621   :  { %v10700_v60 = vpop.f32.mrf.mxu1 }
 0x622   :  { %9365 = vst [vmem:[%s15081_s5] sm:$0xff] %v9334_v33  ;;  %v10701_v6 = vadd.f32 %v10700_v60, %v10699_v34  ;;  %v9343_v17 = vsel %vm9342_vm0, %v9334_v33, -inf }
 0x623   :  { %9345 = vmax.xlane.f32.xlu0 %v9343_v17 }
 0x624   :  { %v9337_v1 = vadd.f32 %v10701_v6, %v9296_v46 }
 0x626   :  { %9366 = vst [vmem:[%s15081_s5 + $0x8] sm:$0xff] %v9337_v1  ;;  %v9344_v42 = vsel %vm9342_vm0, %v9337_v1, -inf }
 0x627   :  { %9347 = vmax.xlane.f32.xlu0 %v9344_v42 }
 0x6ac   :  { %v9346_v38 = vpop.xlane.xlu0 %9345 }
 0x6ad   :  { %v9349_v16 = vsub.f32 %v9343_v17, %v9346_v38 }
 0x6af   :  { %v9351_v54 = vmul.f32 1.442695, %v9349_v16 }
 0x6b0   :  { %v9348_v28 = vpop.xlane.xlu0 %9347 }
 0x6b1   :  { %10793 = vpow2.f32 %v9351_v54  ;;  %v9350_v43 = vsub.f32 %v9344_v42, %v9348_v28 }
 0x6b3   :  { %v9353_v21 = vmul.f32 1.442695, %v9350_v43 }
 0x6b5   :  { %10795 = vpow2.f32 %v9353_v21 }
 0x6be   :  { %v10794_v30 = vpop.eup %10793 }
 0x6bf   :  { %9355 = vadd.xlane.f32.xlu1 %v10794_v30 }
 0x6c2   :  { %v10796_v24 = vpop.eup %10795 }
 0x6c3   :  { %9357 = vadd.xlane.f32.xlu1 %v10796_v24 }
 0x748   :  { %v9356_v22 = vpop.xlane.xlu1 %9355 }
 0x749   :  { %10797 = vlog2.f32 %v9356_v22 }
 0x74c   :  { %v9358_v4 = vpop.xlane.xlu1 %9357 }
 0x74d   :  { %10799 = vlog2.f32 %v9358_v4 }
 0x756   :  { %v10798_v5 = vpop.eup %10797 }
 0x757   :  { %v9360_v41 = vmul.f32 0.6931472, %v10798_v5 }
 0x759   :  { %v9363_v19 = vadd.f32 %v9360_v41, %v9346_v38 }
 0x75a   :  { %v10800_v48 = vpop.eup %10799 }
 0x75b   :  { %v9367_v61 = vsub.f32 %v9334_v33, %v9363_v19  ;;  %v9362_v29 = vmul.f32 0.6931472, %v10800_v48 }
 0x75d   :  { %9369 = vst [vmem:[%s15082_s6] sm:$0xff] %v9367_v61  ;;  %v9364_v59 = vadd.f32 %v9362_v29, %v9348_v28 }
 0x75f   :  { %v9368_v13 = vsub.f32 %v9337_v1, %v9364_v59 }
 0x761   :  { %9370 = vst [vmem:[%s15082_s6 + $0x8] sm:$0xff] %v9368_v13 }

</bundles_post_ra>
